<compile_context>
chip_gen: v7x
topology: tpu7x:2x2x1
jax: 0.10.0
libtpu: 0.0.40
codegen_flags: <defaults>
</compile_context>

<pallas_src>
import functools
import math

import jax
import jax.numpy as jnp
import numpy as np
from jax.experimental import pallas as pl
from jax.experimental.pallas import tpu as pltpu

# Plain Python float (NOT a jnp array) so the kernel does not capture a constant.
NEG_PAD = -(2.0 ** 32) + 1.0

# Operand dtype fed to the MXU.  Set to jnp.bfloat16 on v6e/v7x at real sizes
# (accumulation stays f32 via preferred_element_type; softmax/LayerNorm stay f32).
MATMUL_DTYPE = jnp.float32


# ---------------------------------------------------------------------------
# math helpers (pure jnp — used both inside the kernel and in the reference)
# ---------------------------------------------------------------------------
def _dot(a, b):
    return jnp.dot(a.astype(MATMUL_DTYPE), b.astype(MATMUL_DTYPE),
                   preferred_element_type=jnp.float32)


def _bmm(eq, a, b):
    return jnp.einsum(eq, a.astype(MATMUL_DTYPE), b.astype(MATMUL_DTYPE),
                      preferred_element_type=jnp.float32)


def _layer_norm(x, gamma, beta, eps):
    mu = jnp.mean(x, axis=-1, keepdims=True)
    var = jnp.mean((x - mu) * (x - mu), axis=-1, keepdims=True)
    return (x - mu) * jax.lax.rsqrt(var + eps) * gamma + beta


def _attn_core(Q, K, V, Wo, bo, *, B, Lq, Lk, num_heads, causal, recip):
    """Scaled dot-product attention over `num_heads` heads.

    Q: (B*Lq, H); K, V: (B*Lk, H).  Heads are a short static loop of
    single-batch-dim 3D einsums so every contraction / score tile keeps Lk on
    the lane axis (no 4D transposes, no multi-batch-dim dot_generals).
    Mirrors the PyTorch module: ReLU'd projections (done by caller), per-head
    key-padding mask (keys whose ReLU'd per-head features sum to 0), optional
    causal mask, softmax, value aggregation, output projection.
    """
    H = Q.shape[-1]
    dh = H // num_heads
    scale = 1.0 / math.sqrt(dh)

    Q3 = Q.reshape(B, Lq, H)
    K3 = K.reshape(B, Lk, H)
    V3 = V.reshape(B, Lk, H)

    causal_mask = None
    if causal:
        row = jax.lax.broadcasted_iota(jnp.int32, (Lq, Lk), 0)
        col = jax.lax.broadcasted_iota(jnp.int32, (Lq, Lk), 1)
        causal_mask = (col > row)[None, :, :]               # (1, Lq, Lk)

    outs = []
    for h in range(num_heads):                               # static unrolled
        sl = slice(h * dh, (h + 1) * dh)
        Qh, Kh, Vh = Q3[:, :, sl], K3[:, :, sl], V3[:, :, sl]

        s = _bmm("bqd,bkd->bqk", Qh, Kh) * scale             # (B, Lq, Lk)

        # key padding: key whose ReLU'd per-head features sum to exactly 0
        pad = (jnp.sum(Kh, axis=-1) == 0.0)[:, None, :]      # (B, 1, Lk)
        mask = jnp.logical_or(pad, causal_mask) if causal else pad
        s = jnp.where(mask, NEG_PAD, s)

        m = jnp.max(s, axis=-1, keepdims=True)
        e = jnp.exp(s - m)
        p = e * recip(jnp.sum(e, axis=-1, keepdims=True))
        # dropout: identity (eval mode)

        outs.append(_bmm("bqk,bkd->bqd", p, Vh))             # (B, Lq, dh)

    o = jnp.concatenate(outs, axis=-1).reshape(B * Lq, H)
    return _dot(o, Wo) + bo


# packed (num_vec, d_model) row indices:
#  0 b_so | 1 b_co | 2 fb2 | 3 fg | 4 fb | 5 g1 | 6 b1 | 7 g2 | 8 b2 | 9 g3 | 10 b3
def _encoder_layer_math(x, mem, w_qkv, b_qkv, w_o, fw1, fb1, fw2, vecs,
                        *, B, T, S, num_heads, recip):
    """One full encoder layer over the whole batch.  x: (B*T, D), mem: (B*S, D).

    w_qkv: (2, D, 3H) — row 0 = self [Wq|Wk|Wv], row 1 = cross [Wq|Wk|Wv]
    b_qkv: (2, 3H); w_o: (2, H, D); fw1: (D, F); fb1: (1, F); fw2: (F, D)
    vecs : (11, D) packed bias / LayerNorm vectors (see index table above).
    """
    H3 = w_qkv.shape[-1]
    H = H3 // 3

    def vec(i):
        return vecs[i:i + 1, :]                              # (1, D) static slice

    # --- self attention (fused QKV, causal) + residual + norm1 ---
    sqkv = jnp.maximum(_dot(x, w_qkv[0]) + b_qkv[0:1, :], 0.0)   # (B*T, 3H)
    Qs, Ks, Vs = sqkv[:, :H], sqkv[:, H:2 * H], sqkv[:, 2 * H:]
    sa = _attn_core(Qs, Ks, Vs, w_o[0], vec(0),
                    B=B, Lq=T, Lk=T, num_heads=num_heads, causal=True,
                    recip=recip)
    x = _layer_norm(x + sa, vec(5), vec(6), 1e-5)

    # --- cross attention (Q from x, fused K|V from memory) + residual + norm2 ---
    wc = w_qkv[1]
    bc = b_qkv[1:2, :]
    Qc = jnp.maximum(_dot(x, wc[:, :H]) + bc[:, :H], 0.0)        # (B*T, H)
    kvc = jnp.maximum(_dot(mem, wc[:, H:]) + bc[:, H:], 0.0)     # (B*S, 2H)
    Kc, Vc = kvc[:, :H], kvc[:, H:]
    ca = _attn_core(Qc, Kc, Vc, w_o[1], vec(1),
                    B=B, Lq=T, Lk=S, num_heads=num_heads, causal=False,
                    recip=recip)
    x = _layer_norm(x + ca, vec(7), vec(8), 1e-5)

    # --- feedforward (dense1 -> relu -> dense2 -> +input -> LN(eps=1e-6)) ---
    h = jnp.maximum(_dot(x, fw1) + fb1, 0.0)
    y = _dot(h, fw2) + vec(2)
    y = y + x
    y = _layer_norm(y, vec(3), vec(4), 1e-6)

    # --- residual + norm3 ---
    x = _layer_norm(x + y, vec(9), vec(10), 1e-5)
    return x


# ---------------------------------------------------------------------------
# Pallas kernel: whole layer stack fused, grid axis = layer index
# ---------------------------------------------------------------------------
def _encoder_stack_kernel(src_ref, mem_ref, w_qkv_ref, b_qkv_ref, w_o_ref,
                          fw1_ref, fb1_ref, fw2_ref, vec_ref, out_ref, x_scr,
                          *, B, T, S, num_heads):
    layer = pl.program_id(0)

    # Load the input slab into the VMEM-resident activation scratch once.
    @pl.when(layer == 0)
    def _():
        x_scr[...] = src_ref[...]

    y = _encoder_layer_math(
        x_scr[...], mem_ref[...],
        w_qkv_ref[0], b_qkv_ref[0], w_o_ref[0],
        fw1_ref[0], fb1_ref[0], fw2_ref[0], vec_ref[0],
        B=B, T=T, S=S, num_heads=num_heads,
        recip=lambda v: pl.reciprocal(v, approx=True))

    x_scr[...] = y                                            # carry to next layer

    @pl.when(layer == pl.num_programs(0) - 1)
    def _():
        out_ref[...] = y


def transformer_encoder(src, memory, stacked, *, num_heads):
    """src: (B, T, D), memory: (B, S, D) -> (B, T, D).

    `stacked` = (w_qkv, b_qkv, w_o, fw1, fb1, fw2, vecs), each with a leading
    num_layers axis.  All layers run inside ONE pallas_call; the activation slab
    stays resident in VMEM across layers.
    """
    B, T, D = src.shape
    S = memory.shape[1]
    num_layers = stacked[0].shape[0]
    src2 = src.reshape(B * T, D)                              # lane-dense 2D slabs
    mem2 = memory.reshape(B * S, D)
    w_qkv, b_qkv, w_o, fw1, fb1, fw2, vecs = stacked

    def const_spec(arr):                                      # resident across layers
        return pl.BlockSpec(arr.shape, lambda l, _z=(0,) * arr.ndim: _z)

    def per_layer_spec(arr):                                  # pipelined per-layer block
        return pl.BlockSpec((1,) + arr.shape[1:],
                            lambda l, _t=(0,) * (arr.ndim - 1): (l,) + _t)

    kernel = functools.partial(_encoder_stack_kernel,
                               B=B, T=T, S=S, num_heads=num_heads)

    out2 = pl.pallas_call(
        kernel,
        out_shape=jax.ShapeDtypeStruct((B * T, D), jnp.float32),
        grid_spec=pltpu.PrefetchScalarGridSpec(
            num_scalar_prefetch=0,
            grid=(num_layers,),
            in_specs=[const_spec(src2), const_spec(mem2),
                      per_layer_spec(w_qkv), per_layer_spec(b_qkv),
                      per_layer_spec(w_o), per_layer_spec(fw1),
                      per_layer_spec(fb1), per_layer_spec(fw2),
                      per_layer_spec(vecs)],
            out_specs=pl.BlockSpec((B * T, D), lambda l: (0, 0)),
            scratch_shapes=[pltpu.VMEM((B * T, D), jnp.float32)],
        ),
        # Layer axis carries the activation -> must be sequential ("arbitrary").
        compiler_params=pltpu.CompilerParams(
            dimension_semantics=("arbitrary",)),
    )(src2, mem2, w_qkv, b_qkv, w_o, fw1, fb1, fw2, vecs)

    return out2.reshape(B, T, D)


# ---------------------------------------------------------------------------
# deterministic parameter init (mimics nn.Linear default uniform init) + packing
# ---------------------------------------------------------------------------
def _linear(key, fan_in, fan_out):
    k1, k2 = jax.random.split(key)
    bound = 1.0 / math.sqrt(fan_in)
    W = jax.random.uniform(k1, (fan_in, fan_out), jnp.float32, -bound, bound)
    b = jax.random.uniform(k2, (1, fan_out), jnp.float32, -bound, bound)
    return W, b


def init_layer_params(key, d_model, num_hiddens, hidden_channel):
    keys = jax.random.split(key, 10)
    p = {}
    # self attention
    p["sWq"], p["sbq"] = _linear(keys[0], d_model, num_hiddens)
    p["sWk"], p["sbk"] = _linear(keys[1], d_model, num_hiddens)
    p["sWv"], p["sbv"] = _linear(keys[2], d_model, num_hiddens)
    p["sWo"], p["sbo"] = _linear(keys[3], num_hiddens, d_model)
    # cross attention
    p["cWq"], p["cbq"] = _linear(keys[4], d_model, num_hiddens)
    p["cWk"], p["cbk"] = _linear(keys[5], d_model, num_hiddens)
    p["cWv"], p["cbv"] = _linear(keys[6], d_model, num_hiddens)
    p["cWo"], p["cbo"] = _linear(keys[7], num_hiddens, d_model)
    # feedforward
    p["fW1"], p["fb1"] = _linear(keys[8], d_model, hidden_channel)
    p["fW2"], p["fb2"] = _linear(keys[9], hidden_channel, d_model)
    p["fg"] = jnp.ones((1, d_model), jnp.float32)
    p["fb"] = jnp.zeros((1, d_model), jnp.float32)
    # outer layer norms
    for name_g, name_b in (("g1", "b1"), ("g2", "b2"), ("g3", "b3")):
        p[name_g] = jnp.ones((1, d_model), jnp.float32)
        p[name_b] = jnp.zeros((1, d_model), jnp.float32)
    return p


def pack_layer_params(p):
    """Pack one layer's tensors: fused QKV weights + grouped small vectors."""
    w_qkv = jnp.stack([
        jnp.concatenate([p["sWq"], p["sWk"], p["sWv"]], axis=1),
        jnp.concatenate([p["cWq"], p["cWk"], p["cWv"]], axis=1)], axis=0)
    b_qkv = jnp.stack([
        jnp.concatenate([p["sbq"], p["sbk"], p["sbv"]], axis=1)[0],
        jnp.concatenate([p["cbq"], p["cbk"], p["cbv"]], axis=1)[0]], axis=0)
    w_o = jnp.stack([p["sWo"], p["cWo"]], axis=0)
    vecs = jnp.concatenate([p["sbo"], p["cbo"], p["fb2"], p["fg"], p["fb"],
                            p["g1"], p["b1"], p["g2"], p["b2"],
                            p["g3"], p["b3"]], axis=0)
    return (w_qkv, b_qkv, w_o, p["fW1"], p["fb1"], p["fW2"], vecs)


def stack_layers(per_layer_packed):
    """Stack per-layer packed tuples along a new leading num_layers axis."""
    return tuple(jnp.stack(arrs, axis=0) for arrs in zip(*per_layer_packed))


if __name__ == "__main__":
    # small shapes implied by the module:
    # query_size = key_size = value_size = output_channel = D (needed for residuals)
    B, T, S = 2, 8, 8
    D = 32               # d_model
    NUM_HIDDENS = 32     # attention inner width (divisible by num_heads)
    NUM_HEADS = 4
    HIDDEN_CHANNEL = 64  # feedforward hidden width
    NUM_LAYERS = 2       # TransformerEncoder stacks deep-copied layers

    root = jax.random.PRNGKey(0)
    k_src, k_mem, k_par = jax.random.split(root, 3)

    src = jax.random.normal(k_src, (B, T, D), jnp.float32)
    memory = jax.random.normal(k_mem, (B, S, D), jnp.float32)

    layer_params = init_layer_params(k_par, D, NUM_HIDDENS, HIDDEN_CHANNEL)
    packed_one = pack_layer_params(layer_params)
    # nn.TransformerEncoder deep-copies the layer, so every layer starts with
    # identical parameters; the kernel API nevertheless takes a per-layer stack.
    stacked = stack_layers([packed_one] * NUM_LAYERS)

    out = transformer_encoder(src, memory, stacked, num_heads=NUM_HEADS)
    out = jax.block_until_ready(out)

    # pure-JAX reference (same math; exact reciprocal instead of the kernel's
    # EUP approximate reciprocal, hence the slightly loosened tolerance).
    ref = src.reshape(B * T, D)
    mem2 = memory.reshape(B * S, D)
    for l in range(NUM_LAYERS):
        ref = _encoder_layer_math(
            ref, mem2, stacked[0][l], stacked[1][l], stacked[2][l],
            stacked[3][l], stacked[4][l], stacked[5][l], stacked[6][l],
            B=B, T=T, S=S, num_heads=NUM_HEADS, recip=lambda v: 1.0 / v)
    ref = jax.block_until_ready(ref.reshape(B, T, D))

    assert out.shape == (B, T, D)
    assert np.all(np.isfinite(np.asarray(out)))
    np.testing.assert_allclose(np.asarray(out), np.asarray(ref),
                               rtol=1e-2, atol=1e-2)

    print("KERNEL_OK")
</pallas_src>

<mosaic_0001>
module attributes {stable_mosaic.version = 11 : i64} {
  func.func @_encoder_stack_kernel(%arg0: i32, %arg1: memref<16x32xf32, #tpu.memory_space<vmem>>, %arg2: memref<16x32xf32, #tpu.memory_space<vmem>>, %arg3: memref<1x2x32x96xf32, #tpu.memory_space<vmem>>, %arg4: memref<1x2x96xf32, #tpu.memory_space<vmem>>, %arg5: memref<1x2x32x32xf32, #tpu.memory_space<vmem>>, %arg6: memref<1x32x64xf32, #tpu.memory_space<vmem>>, %arg7: memref<1x1x64xf32, #tpu.memory_space<vmem>>, %arg8: memref<1x64x32xf32, #tpu.memory_space<vmem>>, %arg9: memref<1x11x32xf32, #tpu.memory_space<vmem>>, %arg10: memref<16x32xf32, #tpu.memory_space<vmem>>, %arg11: memref<16x32xf32, #tpu.memory_space<vmem>>) attributes {dimension_semantics = [#tpu.dimension_semantics<arbitrary>], iteration_bounds = array<i64: 2>, scalar_prefetch = 0 : i64, scratch_operands = 1 : i64, tpu.core_type = #tpu.core_type<tc>, window_params = [{pipeline_mode = #tpu.pipeline_mode<synchronous>, transform_indices = @transform_0, window_bounds = array<i64: 16, 32>}, {pipeline_mode = #tpu.pipeline_mode<synchronous>, transform_indices = @transform_1, window_bounds = array<i64: 16, 32>}, {transform_indices = @transform_2, window_bounds = array<i64: 1, 2, 32, 96>}, {transform_indices = @transform_3, window_bounds = array<i64: 1, 2, 96>}, {transform_indices = @transform_4, window_bounds = array<i64: 1, 2, 32, 32>}, {transform_indices = @transform_5, window_bounds = array<i64: 1, 32, 64>}, {transform_indices = @transform_6, window_bounds = array<i64: 1, 1, 64>}, {transform_indices = @transform_7, window_bounds = array<i64: 1, 64, 32>}, {transform_indices = @transform_8, window_bounds = array<i64: 1, 11, 32>}, {pipeline_mode = #tpu.pipeline_mode<synchronous>, transform_indices = @transform_9, window_bounds = array<i64: 16, 32>}]} {
    %c0_i32 = arith.constant 0 : i32
    %0 = arith.cmpi eq, %arg0, %c0_i32 : i32
    %1 = arith.extui %0 : i1 to i32
    %c0_i32_0 = arith.constant 0 : i32
    %2 = arith.cmpi ne, %1, %c0_i32_0 : i32
    scf.if %2 {
      %c0_124 = arith.constant 0 : index
      %c0_125 = arith.constant 0 : index
      %400 = vector.load %arg1[%c0_124, %c0_125] : memref<16x32xf32, #tpu.memory_space<vmem>>, vector<16x32xf32>
      %c0_126 = arith.constant 0 : index
      %c0_127 = arith.constant 0 : index
      %401 = vector.load %arg11[%c0_126, %c0_127] : memref<16x32xf32, #tpu.memory_space<vmem>>, vector<16x32xf32>
      tpu.vector_store %arg11[%c0_126, %c0_127], %400 {strides = array<i32>} : memref<16x32xf32, #tpu.memory_space<vmem>>, vector<16x32xf32>,
    } else {
    }
    %c0 = arith.constant 0 : index
    %c0_1 = arith.constant 0 : index
    %3 = vector.load %arg11[%c0, %c0_1] : memref<16x32xf32, #tpu.memory_space<vmem>>, vector<16x32xf32>
    %c0_2 = arith.constant 0 : index
    %c0_3 = arith.constant 0 : index
    %4 = vector.load %arg2[%c0_2, %c0_3] : memref<16x32xf32, #tpu.memory_space<vmem>>, vector<16x32xf32>
    %c0_4 = arith.constant 0 : index
    %c0_5 = arith.constant 0 : index
    %c0_6 = arith.constant 0 : index
    %c0_7 = arith.constant 0 : index
    %5 = vector.load %arg3[%c0_4, %c0_5, %c0_6, %c0_7] : memref<1x2x32x96xf32, #tpu.memory_space<vmem>>, vector<1x2x32x96xf32>
    %6 = vector.shape_cast %5 : vector<1x2x32x96xf32> to vector<2x32x96xf32>
    %c0_8 = arith.constant 0 : index
    %c0_9 = arith.constant 0 : index
    %c0_10 = arith.constant 0 : index
    %7 = vector.load %arg4[%c0_8, %c0_9, %c0_10] : memref<1x2x96xf32, #tpu.memory_space<vmem>>, vector<1x2x96xf32>
    %8 = vector.shape_cast %7 : vector<1x2x96xf32> to vector<2x96xf32>
    %c0_11 = arith.constant 0 : index
    %c0_12 = arith.constant 0 : index
    %c0_13 = arith.constant 0 : index
    %c0_14 = arith.constant 0 : index
    %9 = vector.load %arg5[%c0_11, %c0_12, %c0_13, %c0_14] : memref<1x2x32x32xf32, #tpu.memory_space<vmem>>, vector<1x2x32x32xf32>
    %10 = vector.shape_cast %9 : vector<1x2x32x32xf32> to vector<2x32x32xf32>
    %c0_15 = arith.constant 0 : index
    %c0_16 = arith.constant 0 : index
    %c0_17 = arith.constant 0 : index
    %11 = vector.load %arg6[%c0_15, %c0_16, %c0_17] : memref<1x32x64xf32, #tpu.memory_space<vmem>>, vector<1x32x64xf32>
    %12 = vector.shape_cast %11 : vector<1x32x64xf32> to vector<32x64xf32>
    %c0_18 = arith.constant 0 : index
    %c0_19 = arith.constant 0 : index
    %c0_20 = arith.constant 0 : index
    %13 = vector.load %arg7[%c0_18, %c0_19, %c0_20] : memref<1x1x64xf32, #tpu.memory_space<vmem>>, vector<1x1x64xf32>
    %14 = vector.shape_cast %13 : vector<1x1x64xf32> to vector<1x64xf32>
    %c0_21 = arith.constant 0 : index
    %c0_22 = arith.constant 0 : index
    %c0_23 = arith.constant 0 : index
    %15 = vector.load %arg8[%c0_21, %c0_22, %c0_23] : memref<1x64x32xf32, #tpu.memory_space<vmem>>, vector<1x64x32xf32>
    %16 = vector.shape_cast %15 : vector<1x64x32xf32> to vector<64x32xf32>
    %c0_24 = arith.constant 0 : index
    %c0_25 = arith.constant 0 : index
    %c0_26 = arith.constant 0 : index
    %17 = vector.load %arg9[%c0_24, %c0_25, %c0_26] : memref<1x11x32xf32, #tpu.memory_space<vmem>>, vector<1x11x32xf32>
    %18 = vector.shape_cast %17 : vector<1x11x32xf32> to vector<11x32xf32>
    %19 = vector.extract_strided_slice %6 {offsets = [0, 0, 0], sizes = [1, 32, 96], strides = [1, 1, 1]} : vector<2x32x96xf32> to vector<1x32x96xf32>
    %20 = vector.shape_cast %19 : vector<1x32x96xf32> to vector<32x96xf32>
    %cst = arith.constant dense<0.000000e+00> : vector<16x96xf32>
    %21 = tpu.matmul %3, %20, %cst {dimension_numbers = #tpu.dot_dimension_numbers<[1], [0], [0], [1], [0, 0, 1, 1], [], []>} : vector<16x32xf32>, vector<32x96xf32>, vector<16x96xf32> -> vector<16x96xf32>
    %22 = vector.extract_strided_slice %8 {offsets = [0, 0], sizes = [1, 96], strides = [1, 1]} : vector<2x96xf32> to vector<1x96xf32>
    %23 = vector.broadcast %22 : vector<1x96xf32> to vector<16x96xf32>
    %24 = arith.addf %21, %23 : vector<16x96xf32>
    %cst_27 = arith.constant 0.000000e+00 : f32
    %25 = vector.broadcast %cst_27 : f32 to vector<16x96xf32>
    %26 = arith.maximumf %24, %25 : vector<16x96xf32>
    %27 = vector.extract_strided_slice %26 {offsets = [0, 0], sizes = [16, 32], strides = [1, 1]} : vector<16x96xf32> to vector<16x32xf32>
    %28 = vector.extract_strided_slice %26 {offsets = [0, 32], sizes = [16, 32], strides = [1, 1]} : vector<16x96xf32> to vector<16x32xf32>
    %29 = vector.extract_strided_slice %26 {offsets = [0, 64], sizes = [16, 32], strides = [1, 1]} : vector<16x96xf32> to vector<16x32xf32>
    %30 = vector.extract_strided_slice %10 {offsets = [0, 0, 0], sizes = [1, 32, 32], strides = [1, 1, 1]} : vector<2x32x32xf32> to vector<1x32x32xf32>
    %31 = vector.shape_cast %30 : vector<1x32x32xf32> to vector<32x32xf32>
    %32 = vector.extract_strided_slice %18 {offsets = [0, 0], sizes = [1, 32], strides = [1, 1]} : vector<11x32xf32> to vector<1x32xf32>
    %33 = vector.shape_cast %27 : vector<16x32xf32> to vector<2x8x32xf32>
    %34 = vector.shape_cast %28 : vector<16x32xf32> to vector<2x8x32xf32>
    %35 = vector.shape_cast %29 : vector<16x32xf32> to vector<2x8x32xf32>
    %36 = tpu.iota {dimensions = array<i32: 0>} : vector<8x8xi32>
    %37 = tpu.iota {dimensions = array<i32: 1>} : vector<8x8xi32>
    %38 = arith.cmpi sgt, %37, %36 : vector<8x8xi32>
    %39 = vector.shape_cast %38 : vector<8x8xi1> to vector<1x8x8xi1>
    %40 = vector.extract_strided_slice %33 {offsets = [0, 0, 0], sizes = [2, 8, 8], strides = [1, 1, 1]} : vector<2x8x32xf32> to vector<2x8x8xf32>
    %41 = vector.extract_strided_slice %34 {offsets = [0, 0, 0], sizes = [2, 8, 8], strides = [1, 1, 1]} : vector<2x8x32xf32> to vector<2x8x8xf32>
    %42 = vector.extract_strided_slice %35 {offsets = [0, 0, 0], sizes = [2, 8, 8], strides = [1, 1, 1]} : vector<2x8x32xf32> to vector<2x8x8xf32>
    "tpu.trace_start"() <{level = 10 : i32, message = "bqd,bkd->bqk"}> : () -> ()
    %cst_28 = arith.constant dense<0.000000e+00> : vector<2x8x8xf32>
    %43 = tpu.matmul %40, %41, %cst_28 {dimension_numbers = #tpu.dot_dimension_numbers<[2], [2], [1], [1], [0, 0, 0, 1, 1, 1], [0], [0]>} : vector<2x8x8xf32>, vector<2x8x8xf32>, vector<2x8x8xf32> -> vector<2x8x8xf32>
    "tpu.trace_stop"() : () -> ()
    %cst_29 = arith.constant 0.353553385 : f32
    %44 = vector.broadcast %cst_29 : f32 to vector<2x8x8xf32>
    %45 = arith.mulf %43, %44 : vector<2x8x8xf32>
    %cst_30 = arith.constant dense<0.000000e+00> : vector<2x8xf32>
    %46 = vector.multi_reduction <add>, %41, %cst_30 [2] : vector<2x8x8xf32> to vector<2x8xf32>
    %cst_31 = arith.constant 0.000000e+00 : f32
    %47 = vector.broadcast %cst_31 : f32 to vector<2x8xf32>
    %48 = arith.cmpf oeq, %46, %47 : vector<2x8xf32>
    %49 = vector.shape_cast %48 : vector<2x8xi1> to vector<2x1x8xi1>
    %50 = vector.broadcast %49 : vector<2x1x8xi1> to vector<2x8x8xi1>
    %51 = vector.broadcast %39 : vector<1x8x8xi1> to vector<2x8x8xi1>
    %52 = arith.ori %50, %51 : vector<2x8x8xi1>
    %cst_32 = arith.constant -4.2949673E+9 : f32
    %53 = vector.broadcast %cst_32 : f32 to vector<2x8x8xf32>
    %54 = arith.select %52, %53, %45 : vector<2x8x8xi1>, vector<2x8x8xf32>
    %cst_33 = arith.constant dense<0xFF800000> : vector<2x8xf32>
    %55 = vector.multi_reduction <maximumf>, %54, %cst_33 [2] : vector<2x8x8xf32> to vector<2x8xf32>
    %56 = vector.shape_cast %55 : vector<2x8xf32> to vector<2x8x1xf32>
    %57 = vector.broadcast %56 : vector<2x8x1xf32> to vector<2x8x8xf32>
    %58 = arith.subf %54, %57 : vector<2x8x8xf32>
    %59 = math.exp %58 : vector<2x8x8xf32>
    %cst_34 = arith.constant dense<0.000000e+00> : vector<2x8xf32>
    %60 = vector.multi_reduction <add>, %59, %cst_34 [2] : vector<2x8x8xf32> to vector<2x8xf32>
    %61 = vector.shape_cast %60 : vector<2x8xf32> to vector<2x8x1xf32>
    %62 = tpu.reciprocal %61 {approx = true} : vector<2x8x1xf32> -> vector<2x8x1xf32>
    %63 = vector.broadcast %62 : vector<2x8x1xf32> to vector<2x8x8xf32>
    %64 = arith.mulf %59, %63 : vector<2x8x8xf32>
    "tpu.trace_start"() <{level = 10 : i32, message = "bqk,bkd->bqd"}> : () -> ()
    %cst_35 = arith.constant dense<0.000000e+00> : vector<2x8x8xf32>
    %65 = tpu.matmul %64, %42, %cst_35 {dimension_numbers = #tpu.dot_dimension_numbers<[2], [1], [1], [2], [0, 0, 0, 1, 1, 2], [0], [0]>} : vector<2x8x8xf32>, vector<2x8x8xf32>, vector<2x8x8xf32> -> vector<2x8x8xf32>
    "tpu.trace_stop"() : () -> ()
    %66 = vector.extract_strided_slice %33 {offsets = [0, 0, 8], sizes = [2, 8, 8], strides = [1, 1, 1]} : vector<2x8x32xf32> to vector<2x8x8xf32>
    %67 = vector.extract_strided_slice %34 {offsets = [0, 0, 8], sizes = [2, 8, 8], strides = [1, 1, 1]} : vector<2x8x32xf32> to vector<2x8x8xf32>
    %68 = vector.extract_strided_slice %35 {offsets = [0, 0, 8], sizes = [2, 8, 8], strides = [1, 1, 1]} : vector<2x8x32xf32> to vector<2x8x8xf32>
    "tpu.trace_start"() <{level = 10 : i32, message = "bqd,bkd->bqk"}> : () -> ()
    %cst_36 = arith.constant dense<0.000000e+00> : vector<2x8x8xf32>
    %69 = tpu.matmul %66, %67, %cst_36 {dimension_numbers = #tpu.dot_dimension_numbers<[2], [2], [1], [1], [0, 0, 0, 1, 1, 1], [0], [0]>} : vector<2x8x8xf32>, vector<2x8x8xf32>, vector<2x8x8xf32> -> vector<2x8x8xf32>
    "tpu.trace_stop"() : () -> ()
    %cst_37 = arith.constant 0.353553385 : f32
    %70 = vector.broadcast %cst_37 : f32 to vector<2x8x8xf32>
    %71 = arith.mulf %69, %70 : vector<2x8x8xf32>
    %cst_38 = arith.constant dense<0.000000e+00> : vector<2x8xf32>
    %72 = vector.multi_reduction <add>, %67, %cst_38 [2] : vector<2x8x8xf32> to vector<2x8xf32>
    %cst_39 = arith.constant 0.000000e+00 : f32
    %73 = vector.broadcast %cst_39 : f32 to vector<2x8xf32>
    %74 = arith.cmpf oeq, %72, %73 : vector<2x8xf32>
    %75 = vector.shape_cast %74 : vector<2x8xi1> to vector<2x1x8xi1>
    %76 = vector.broadcast %75 : vector<2x1x8xi1> to vector<2x8x8xi1>
    %77 = vector.broadcast %39 : vector<1x8x8xi1> to vector<2x8x8xi1>
    %78 = arith.ori %76, %77 : vector<2x8x8xi1>
    %cst_40 = arith.constant -4.2949673E+9 : f32
    %79 = vector.broadcast %cst_40 : f32 to vector<2x8x8xf32>
    %80 = arith.select %78, %79, %71 : vector<2x8x8xi1>, vector<2x8x8xf32>
    %cst_41 = arith.constant dense<0xFF800000> : vector<2x8xf32>
    %81 = vector.multi_reduction <maximumf>, %80, %cst_41 [2] : vector<2x8x8xf32> to vector<2x8xf32>
    %82 = vector.shape_cast %81 : vector<2x8xf32> to vector<2x8x1xf32>
    %83 = vector.broadcast %82 : vector<2x8x1xf32> to vector<2x8x8xf32>
    %84 = arith.subf %80, %83 : vector<2x8x8xf32>
    %85 = math.exp %84 : vector<2x8x8xf32>
    %cst_42 = arith.constant dense<0.000000e+00> : vector<2x8xf32>
    %86 = vector.multi_reduction <add>, %85, %cst_42 [2] : vector<2x8x8xf32> to vector<2x8xf32>
    %87 = vector.shape_cast %86 : vector<2x8xf32> to vector<2x8x1xf32>
    %88 = tpu.reciprocal %87 {approx = true} : vector<2x8x1xf32> -> vector<2x8x1xf32>
    %89 = vector.broadcast %88 : vector<2x8x1xf32> to vector<2x8x8xf32>
    %90 = arith.mulf %85, %89 : vector<2x8x8xf32>
    "tpu.trace_start"() <{level = 10 : i32, message = "bqk,bkd->bqd"}> : () -> ()
    %cst_43 = arith.constant dense<0.000000e+00> : vector<2x8x8xf32>
    %91 = tpu.matmul %90, %68, %cst_43 {dimension_numbers = #tpu.dot_dimension_numbers<[2], [1], [1], [2], [0, 0, 0, 1, 1, 2], [0], [0]>} : vector<2x8x8xf32>, vector<2x8x8xf32>, vector<2x8x8xf32> -> vector<2x8x8xf32>
    "tpu.trace_stop"() : () -> ()
    %92 = vector.extract_strided_slice %33 {offsets = [0, 0, 16], sizes = [2, 8, 8], strides = [1, 1, 1]} : vector<2x8x32xf32> to vector<2x8x8xf32>
    %93 = vector.extract_strided_slice %34 {offsets = [0, 0, 16], sizes = [2, 8, 8], strides = [1, 1, 1]} : vector<2x8x32xf32> to vector<2x8x8xf32>
    %94 = vector.extract_strided_slice %35 {offsets = [0, 0, 16], sizes = [2, 8, 8], strides = [1, 1, 1]} : vector<2x8x32xf32> to vector<2x8x8xf32>
    "tpu.trace_start"() <{level = 10 : i32, message = "bqd,bkd->bqk"}> : () -> ()
    %cst_44 = arith.constant dense<0.000000e+00> : vector<2x8x8xf32>
    %95 = tpu.matmul %92, %93, %cst_44 {dimension_numbers = #tpu.dot_dimension_numbers<[2], [2], [1], [1], [0, 0, 0, 1, 1, 1], [0], [0]>} : vector<2x8x8xf32>, vector<2x8x8xf32>, vector<2x8x8xf32> -> vector<2x8x8xf32>
    "tpu.trace_stop"() : () -> ()
    %cst_45 = arith.constant 0.353553385 : f32
    %96 = vector.broadcast %cst_45 : f32 to vector<2x8x8xf32>
    %97 = arith.mulf %95, %96 : vector<2x8x8xf32>
    %cst_46 = arith.constant dense<0.000000e+00> : vector<2x8xf32>
    %98 = vector.multi_reduction <add>, %93, %cst_46 [2] : vector<2x8x8xf32> to vector<2x8xf32>
    %cst_47 = arith.constant 0.000000e+00 : f32
    %99 = vector.broadcast %cst_47 : f32 to vector<2x8xf32>
    %100 = arith.cmpf oeq, %98, %99 : vector<2x8xf32>
    %101 = vector.shape_cast %100 : vector<2x8xi1> to vector<2x1x8xi1>
    %102 = vector.broadcast %101 : vector<2x1x8xi1> to vector<2x8x8xi1>
    %103 = vector.broadcast %39 : vector<1x8x8xi1> to vector<2x8x8xi1>
    %104 = arith.ori %102, %103 : vector<2x8x8xi1>
    %cst_48 = arith.constant -4.2949673E+9 : f32
    %105 = vector.broadcast %cst_48 : f32 to vector<2x8x8xf32>
    %106 = arith.select %104, %105, %97 : vector<2x8x8xi1>, vector<2x8x8xf32>
    %cst_49 = arith.constant dense<0xFF800000> : vector<2x8xf32>
    %107 = vector.multi_reduction <maximumf>, %106, %cst_49 [2] : vector<2x8x8xf32> to vector<2x8xf32>
    %108 = vector.shape_cast %107 : vector<2x8xf32> to vector<2x8x1xf32>
    %109 = vector.broadcast %108 : vector<2x8x1xf32> to vector<2x8x8xf32>
    %110 = arith.subf %106, %109 : vector<2x8x8xf32>
    %111 = math.exp %110 : vector<2x8x8xf32>
    %cst_50 = arith.constant dense<0.000000e+00> : vector<2x8xf32>
    %112 = vector.multi_reduction <add>, %111, %cst_50 [2] : vector<2x8x8xf32> to vector<2x8xf32>
    %113 = vector.shape_cast %112 : vector<2x8xf32> to vector<2x8x1xf32>
    %114 = tpu.reciprocal %113 {approx = true} : vector<2x8x1xf32> -> vector<2x8x1xf32>
    %115 = vector.broadcast %114 : vector<2x8x1xf32> to vector<2x8x8xf32>
    %116 = arith.mulf %111, %115 : vector<2x8x8xf32>
    "tpu.trace_start"() <{level = 10 : i32, message = "bqk,bkd->bqd"}> : () -> ()
    %cst_51 = arith.constant dense<0.000000e+00> : vector<2x8x8xf32>
    %117 = tpu.matmul %116, %94, %cst_51 {dimension_numbers = #tpu.dot_dimension_numbers<[2], [1], [1], [2], [0, 0, 0, 1, 1, 2], [0], [0]>} : vector<2x8x8xf32>, vector<2x8x8xf32>, vector<2x8x8xf32> -> vector<2x8x8xf32>
    "tpu.trace_stop"() : () -> ()
    %118 = vector.extract_strided_slice %33 {offsets = [0, 0, 24], sizes = [2, 8, 8], strides = [1, 1, 1]} : vector<2x8x32xf32> to vector<2x8x8xf32>
    %119 = vector.extract_strided_slice %34 {offsets = [0, 0, 24], sizes = [2, 8, 8], strides = [1, 1, 1]} : vector<2x8x32xf32> to vector<2x8x8xf32>
    %120 = vector.extract_strided_slice %35 {offsets = [0, 0, 24], sizes = [2, 8, 8], strides = [1, 1, 1]} : vector<2x8x32xf32> to vector<2x8x8xf32>
    "tpu.trace_start"() <{level = 10 : i32, message = "bqd,bkd->bqk"}> : () -> ()
    %cst_52 = arith.constant dense<0.000000e+00> : vector<2x8x8xf32>
    %121 = tpu.matmul %118, %119, %cst_52 {dimension_numbers = #tpu.dot_dimension_numbers<[2], [2], [1], [1], [0, 0, 0, 1, 1, 1], [0], [0]>} : vector<2x8x8xf32>, vector<2x8x8xf32>, vector<2x8x8xf32> -> vector<2x8x8xf32>
    "tpu.trace_stop"() : () -> ()
    %cst_53 = arith.constant 0.353553385 : f32
    %122 = vector.broadcast %cst_53 : f32 to vector<2x8x8xf32>
    %123 = arith.mulf %121, %122 : vector<2x8x8xf32>
    %cst_54 = arith.constant dense<0.000000e+00> : vector<2x8xf32>
    %124 = vector.multi_reduction <add>, %119, %cst_54 [2] : vector<2x8x8xf32> to vector<2x8xf32>
    %cst_55 = arith.constant 0.000000e+00 : f32
    %125 = vector.broadcast %cst_55 : f32 to vector<2x8xf32>
    %126 = arith.cmpf oeq, %124, %125 : vector<2x8xf32>
    %127 = vector.shape_cast %126 : vector<2x8xi1> to vector<2x1x8xi1>
    %128 = vector.broadcast %127 : vector<2x1x8xi1> to vector<2x8x8xi1>
    %129 = vector.broadcast %39 : vector<1x8x8xi1> to vector<2x8x8xi1>
    %130 = arith.ori %128, %129 : vector<2x8x8xi1>
    %cst_56 = arith.constant -4.2949673E+9 : f32
    %131 = vector.broadcast %cst_56 : f32 to vector<2x8x8xf32>
    %132 = arith.select %130, %131, %123 : vector<2x8x8xi1>, vector<2x8x8xf32>
    %cst_57 = arith.constant dense<0xFF800000> : vector<2x8xf32>
    %133 = vector.multi_reduction <maximumf>, %132, %cst_57 [2] : vector<2x8x8xf32> to vector<2x8xf32>
    %134 = vector.shape_cast %133 : vector<2x8xf32> to vector<2x8x1xf32>
    %135 = vector.broadcast %134 : vector<2x8x1xf32> to vector<2x8x8xf32>
    %136 = arith.subf %132, %135 : vector<2x8x8xf32>
    %137 = math.exp %136 : vector<2x8x8xf32>
    %cst_58 = arith.constant dense<0.000000e+00> : vector<2x8xf32>
    %138 = vector.multi_reduction <add>, %137, %cst_58 [2] : vector<2x8x8xf32> to vector<2x8xf32>
    %139 = vector.shape_cast %138 : vector<2x8xf32> to vector<2x8x1xf32>
    %140 = tpu.reciprocal %139 {approx = true} : vector<2x8x1xf32> -> vector<2x8x1xf32>
    %141 = vector.broadcast %140 : vector<2x8x1xf32> to vector<2x8x8xf32>
    %142 = arith.mulf %137, %141 : vector<2x8x8xf32>
    "tpu.trace_start"() <{level = 10 : i32, message = "bqk,bkd->bqd"}> : () -> ()
    %cst_59 = arith.constant dense<0.000000e+00> : vector<2x8x8xf32>
    %143 = tpu.matmul %142, %120, %cst_59 {dimension_numbers = #tpu.dot_dimension_numbers<[2], [1], [1], [2], [0, 0, 0, 1, 1, 2], [0], [0]>} : vector<2x8x8xf32>, vector<2x8x8xf32>, vector<2x8x8xf32> -> vector<2x8x8xf32>
    "tpu.trace_stop"() : () -> ()
    %144 = tpu.concatenate %65, %91, %117, %143 in 2 : vector<2x8x8xf32>, vector<2x8x8xf32>, vector<2x8x8xf32>, vector<2x8x8xf32> -> vector<2x8x32xf32>
    %145 = vector.shape_cast %144 : vector<2x8x32xf32> to vector<16x32xf32>
    %cst_60 = arith.constant dense<0.000000e+00> : vector<16x32xf32>
    %146 = tpu.matmul %145, %31, %cst_60 {dimension_numbers = #tpu.dot_dimension_numbers<[1], [0], [0], [1], [0, 0, 1, 1], [], []>} : vector<16x32xf32>, vector<32x32xf32>, vector<16x32xf32> -> vector<16x32xf32>
    %147 = vector.broadcast %32 : vector<1x32xf32> to vector<16x32xf32>
    %148 = arith.addf %146, %147 : vector<16x32xf32>
    %149 = arith.addf %3, %148 : vector<16x32xf32>
    %150 = vector.extract_strided_slice %18 {offsets = [5, 0], sizes = [1, 32], strides = [1, 1]} : vector<11x32xf32> to vector<1x32xf32>
    %151 = vector.extract_strided_slice %18 {offsets = [6, 0], sizes = [1, 32], strides = [1, 1]} : vector<11x32xf32> to vector<1x32xf32>
    %cst_61 = arith.constant dense<0.000000e+00> : vector<16xf32>
    %152 = vector.multi_reduction <add>, %149, %cst_61 [1] : vector<16x32xf32> to vector<16xf32>
    %153 = vector.shape_cast %152 : vector<16xf32> to vector<16x1xf32>
    %cst_62 = arith.constant 3.200000e+01 : f32
    %154 = vector.broadcast %cst_62 : f32 to vector<16x1xf32>
    %155 = arith.divf %153, %154 : vector<16x1xf32>
    %156 = vector.broadcast %155 : vector<16x1xf32> to vector<16x32xf32>
    %157 = arith.subf %149, %156 : vector<16x32xf32>
    %158 = vector.broadcast %155 : vector<16x1xf32> to vector<16x32xf32>
    %159 = arith.subf %149, %158 : vector<16x32xf32>
    %160 = arith.mulf %157, %159 : vector<16x32xf32>
    %cst_63 = arith.constant dense<0.000000e+00> : vector<16xf32>
    %161 = vector.multi_reduction <add>, %160, %cst_63 [1] : vector<16x32xf32> to vector<16xf32>
    %162 = vector.shape_cast %161 : vector<16xf32> to vector<16x1xf32>
    %cst_64 = arith.constant 3.200000e+01 : f32
    %163 = vector.broadcast %cst_64 : f32 to vector<16x1xf32>
    %164 = arith.divf %162, %163 : vector<16x1xf32>
    %165 = vector.broadcast %155 : vector<16x1xf32> to vector<16x32xf32>
    %166 = arith.subf %149, %165 : vector<16x32xf32>
    %cst_65 = arith.constant 9.99999974E-6 : f32
    %167 = vector.broadcast %cst_65 : f32 to vector<16x1xf32>
    %168 = arith.addf %164, %167 : vector<16x1xf32>
    %169 = math.rsqrt %168 : vector<16x1xf32>
    %170 = vector.broadcast %169 : vector<16x1xf32> to vector<16x32xf32>
    %171 = arith.mulf %166, %170 : vector<16x32xf32>
    %172 = vector.broadcast %150 : vector<1x32xf32> to vector<16x32xf32>
    %173 = arith.mulf %171, %172 : vector<16x32xf32>
    %174 = vector.broadcast %151 : vector<1x32xf32> to vector<16x32xf32>
    %175 = arith.addf %173, %174 : vector<16x32xf32>
    %176 = vector.extract_strided_slice %6 {offsets = [1, 0, 0], sizes = [1, 32, 96], strides = [1, 1, 1]} : vector<2x32x96xf32> to vector<1x32x96xf32>
    %177 = vector.shape_cast %176 : vector<1x32x96xf32> to vector<32x96xf32>
    %178 = vector.extract_strided_slice %8 {offsets = [1, 0], sizes = [1, 96], strides = [1, 1]} : vector<2x96xf32> to vector<1x96xf32>
    %179 = vector.extract_strided_slice %177 {offsets = [0, 0], sizes = [32, 32], strides = [1, 1]} : vector<32x96xf32> to vector<32x32xf32>
    %cst_66 = arith.constant dense<0.000000e+00> : vector<16x32xf32>
    %180 = tpu.matmul %175, %179, %cst_66 {dimension_numbers = #tpu.dot_dimension_numbers<[1], [0], [0], [1], [0, 0, 1, 1], [], []>} : vector<16x32xf32>, vector<32x32xf32>, vector<16x32xf32> -> vector<16x32xf32>
    %181 = vector.extract_strided_slice %178 {offsets = [0, 0], sizes = [1, 32], strides = [1, 1]} : vector<1x96xf32> to vector<1x32xf32>
    %182 = vector.broadcast %181 : vector<1x32xf32> to vector<16x32xf32>
    %183 = arith.addf %180, %182 : vector<16x32xf32>
    %cst_67 = arith.constant 0.000000e+00 : f32
    %184 = vector.broadcast %cst_67 : f32 to vector<16x32xf32>
    %185 = arith.maximumf %183, %184 : vector<16x32xf32>
    %186 = vector.extract_strided_slice %177 {offsets = [0, 32], sizes = [32, 64], strides = [1, 1]} : vector<32x96xf32> to vector<32x64xf32>
    %cst_68 = arith.constant dense<0.000000e+00> : vector<16x64xf32>
    %187 = tpu.matmul %4, %186, %cst_68 {dimension_numbers = #tpu.dot_dimension_numbers<[1], [0], [0], [1], [0, 0, 1, 1], [], []>} : vector<16x32xf32>, vector<32x64xf32>, vector<16x64xf32> -> vector<16x64xf32>
    %188 = vector.extract_strided_slice %178 {offsets = [0, 32], sizes = [1, 64], strides = [1, 1]} : vector<1x96xf32> to vector<1x64xf32>
    %189 = vector.broadcast %188 : vector<1x64xf32> to vector<16x64xf32>
    %190 = arith.addf %187, %189 : vector<16x64xf32>
    %cst_69 = arith.constant 0.000000e+00 : f32
    %191 = vector.broadcast %cst_69 : f32 to vector<16x64xf32>
    %192 = arith.maximumf %190, %191 : vector<16x64xf32>
    %193 = vector.extract_strided_slice %192 {offsets = [0, 0], sizes = [16, 32], strides = [1, 1]} : vector<16x64xf32> to vector<16x32xf32>
    %194 = vector.extract_strided_slice %192 {offsets = [0, 32], sizes = [16, 32], strides = [1, 1]} : vector<16x64xf32> to vector<16x32xf32>
    %195 = vector.extract_strided_slice %10 {offsets = [1, 0, 0], sizes = [1, 32, 32], strides = [1, 1, 1]} : vector<2x32x32xf32> to vector<1x32x32xf32>
    %196 = vector.shape_cast %195 : vector<1x32x32xf32> to vector<32x32xf32>
    %197 = vector.extract_strided_slice %18 {offsets = [1, 0], sizes = [1, 32], strides = [1, 1]} : vector<11x32xf32> to vector<1x32xf32>
    %198 = vector.shape_cast %185 : vector<16x32xf32> to vector<2x8x32xf32>
    %199 = vector.shape_cast %193 : vector<16x32xf32> to vector<2x8x32xf32>
    %200 = vector.shape_cast %194 : vector<16x32xf32> to vector<2x8x32xf32>
    %201 = vector.extract_strided_slice %198 {offsets = [0, 0, 0], sizes = [2, 8, 8], strides = [1, 1, 1]} : vector<2x8x32xf32> to vector<2x8x8xf32>
    %202 = vector.extract_strided_slice %199 {offsets = [0, 0, 0], sizes = [2, 8, 8], strides = [1, 1, 1]} : vector<2x8x32xf32> to vector<2x8x8xf32>
    %203 = vector.extract_strided_slice %200 {offsets = [0, 0, 0], sizes = [2, 8, 8], strides = [1, 1, 1]} : vector<2x8x32xf32> to vector<2x8x8xf32>
    "tpu.trace_start"() <{level = 10 : i32, message = "bqd,bkd->bqk"}> : () -> ()
    %cst_70 = arith.constant dense<0.000000e+00> : vector<2x8x8xf32>
    %204 = tpu.matmul %201, %202, %cst_70 {dimension_numbers = #tpu.dot_dimension_numbers<[2], [2], [1], [1], [0, 0, 0, 1, 1, 1], [0], [0]>} : vector<2x8x8xf32>, vector<2x8x8xf32>, vector<2x8x8xf32> -> vector<2x8x8xf32>
    "tpu.trace_stop"() : () -> ()
    %cst_71 = arith.constant 0.353553385 : f32
    %205 = vector.broadcast %cst_71 : f32 to vector<2x8x8xf32>
    %206 = arith.mulf %204, %205 : vector<2x8x8xf32>
    %cst_72 = arith.constant dense<0.000000e+00> : vector<2x8xf32>
    %207 = vector.multi_reduction <add>, %202, %cst_72 [2] : vector<2x8x8xf32> to vector<2x8xf32>
    %cst_73 = arith.constant 0.000000e+00 : f32
    %208 = vector.broadcast %cst_73 : f32 to vector<2x8xf32>
    %209 = arith.cmpf oeq, %207, %208 : vector<2x8xf32>
    %210 = vector.shape_cast %209 : vector<2x8xi1> to vector<2x1x8xi1>
    %cst_74 = arith.constant -4.2949673E+9 : f32
    %211 = vector.shape_cast %210 : vector<2x1x8xi1> to vector<2x1x8xi1>
    %212 = vector.broadcast %211 : vector<2x1x8xi1> to vector<2x8x8xi1>
    %213 = vector.broadcast %cst_74 : f32 to vector<2x8x8xf32>
    %214 = arith.select %212, %213, %206 : vector<2x8x8xi1>, vector<2x8x8xf32>
    %cst_75 = arith.constant dense<0xFF800000> : vector<2x8xf32>
    %215 = vector.multi_reduction <maximumf>, %214, %cst_75 [2] : vector<2x8x8xf32> to vector<2x8xf32>
    %216 = vector.shape_cast %215 : vector<2x8xf32> to vector<2x8x1xf32>
    %217 = vector.broadcast %216 : vector<2x8x1xf32> to vector<2x8x8xf32>
    %218 = arith.subf %214, %217 : vector<2x8x8xf32>
    %219 = math.exp %218 : vector<2x8x8xf32>
    %cst_76 = arith.constant dense<0.000000e+00> : vector<2x8xf32>
    %220 = vector.multi_reduction <add>, %219, %cst_76 [2] : vector<2x8x8xf32> to vector<2x8xf32>
    %221 = vector.shape_cast %220 : vector<2x8xf32> to vector<2x8x1xf32>
    %222 = tpu.reciprocal %221 {approx = true} : vector<2x8x1xf32> -> vector<2x8x1xf32>
    %223 = vector.broadcast %222 : vector<2x8x1xf32> to vector<2x8x8xf32>
    %224 = arith.mulf %219, %223 : vector<2x8x8xf32>
    "tpu.trace_start"() <{level = 10 : i32, message = "bqk,bkd->bqd"}> : () -> ()
    %cst_77 = arith.constant dense<0.000000e+00> : vector<2x8x8xf32>
    %225 = tpu.matmul %224, %203, %cst_77 {dimension_numbers = #tpu.dot_dimension_numbers<[2], [1], [1], [2], [0, 0, 0, 1, 1, 2], [0], [0]>} : vector<2x8x8xf32>, vector<2x8x8xf32>, vector<2x8x8xf32> -> vector<2x8x8xf32>
    "tpu.trace_stop"() : () -> ()
    %226 = vector.extract_strided_slice %198 {offsets = [0, 0, 8], sizes = [2, 8, 8], strides = [1, 1, 1]} : vector<2x8x32xf32> to vector<2x8x8xf32>
    %227 = vector.extract_strided_slice %199 {offsets = [0, 0, 8], sizes = [2, 8, 8], strides = [1, 1, 1]} : vector<2x8x32xf32> to vector<2x8x8xf32>
    %228 = vector.extract_strided_slice %200 {offsets = [0, 0, 8], sizes = [2, 8, 8], strides = [1, 1, 1]} : vector<2x8x32xf32> to vector<2x8x8xf32>
    "tpu.trace_start"() <{level = 10 : i32, message = "bqd,bkd->bqk"}> : () -> ()
    %cst_78 = arith.constant dense<0.000000e+00> : vector<2x8x8xf32>
    %229 = tpu.matmul %226, %227, %cst_78 {dimension_numbers = #tpu.dot_dimension_numbers<[2], [2], [1], [1], [0, 0, 0, 1, 1, 1], [0], [0]>} : vector<2x8x8xf32>, vector<2x8x8xf32>, vector<2x8x8xf32> -> vector<2x8x8xf32>
    "tpu.trace_stop"() : () -> ()
    %cst_79 = arith.constant 0.353553385 : f32
    %230 = vector.broadcast %cst_79 : f32 to vector<2x8x8xf32>
    %231 = arith.mulf %229, %230 : vector<2x8x8xf32>
    %cst_80 = arith.constant dense<0.000000e+00> : vector<2x8xf32>
    %232 = vector.multi_reduction <add>, %227, %cst_80 [2] : vector<2x8x8xf32> to vector<2x8xf32>
    %cst_81 = arith.constant 0.000000e+00 : f32
    %233 = vector.broadcast %cst_81 : f32 to vector<2x8xf32>
    %234 = arith.cmpf oeq, %232, %233 : vector<2x8xf32>
    %235 = vector.shape_cast %234 : vector<2x8xi1> to vector<2x1x8xi1>
    %cst_82 = arith.constant -4.2949673E+9 : f32
    %236 = vector.shape_cast %235 : vector<2x1x8xi1> to vector<2x1x8xi1>
    %237 = vector.broadcast %236 : vector<2x1x8xi1> to vector<2x8x8xi1>
    %238 = vector.broadcast %cst_82 : f32 to vector<2x8x8xf32>
    %239 = arith.select %237, %238, %231 : vector<2x8x8xi1>, vector<2x8x8xf32>
    %cst_83 = arith.constant dense<0xFF800000> : vector<2x8xf32>
    %240 = vector.multi_reduction <maximumf>, %239, %cst_83 [2] : vector<2x8x8xf32> to vector<2x8xf32>
    %241 = vector.shape_cast %240 : vector<2x8xf32> to vector<2x8x1xf32>
    %242 = vector.broadcast %241 : vector<2x8x1xf32> to vector<2x8x8xf32>
    %243 = arith.subf %239, %242 : vector<2x8x8xf32>
    %244 = math.exp %243 : vector<2x8x8xf32>
    %cst_84 = arith.constant dense<0.000000e+00> : vector<2x8xf32>
    %245 = vector.multi_reduction <add>, %244, %cst_84 [2] : vector<2x8x8xf32> to vector<2x8xf32>
    %246 = vector.shape_cast %245 : vector<2x8xf32> to vector<2x8x1xf32>
    %247 = tpu.reciprocal %246 {approx = true} : vector<2x8x1xf32> -> vector<2x8x1xf32>
    %248 = vector.broadcast %247 : vector<2x8x1xf32> to vector<2x8x8xf32>
    %249 = arith.mulf %244, %248 : vector<2x8x8xf32>
    "tpu.trace_start"() <{level = 10 : i32, message = "bqk,bkd->bqd"}> : () -> ()
    %cst_85 = arith.constant dense<0.000000e+00> : vector<2x8x8xf32>
    %250 = tpu.matmul %249, %228, %cst_85 {dimension_numbers = #tpu.dot_dimension_numbers<[2], [1], [1], [2], [0, 0, 0, 1, 1, 2], [0], [0]>} : vector<2x8x8xf32>, vector<2x8x8xf32>, vector<2x8x8xf32> -> vector<2x8x8xf32>
    "tpu.trace_stop"() : () -> ()
    %251 = vector.extract_strided_slice %198 {offsets = [0, 0, 16], sizes = [2, 8, 8], strides = [1, 1, 1]} : vector<2x8x32xf32> to vector<2x8x8xf32>
    %252 = vector.extract_strided_slice %199 {offsets = [0, 0, 16], sizes = [2, 8, 8], strides = [1, 1, 1]} : vector<2x8x32xf32> to vector<2x8x8xf32>
    %253 = vector.extract_strided_slice %200 {offsets = [0, 0, 16], sizes = [2, 8, 8], strides = [1, 1, 1]} : vector<2x8x32xf32> to vector<2x8x8xf32>
    "tpu.trace_start"() <{level = 10 : i32, message = "bqd,bkd->bqk"}> : () -> ()
    %cst_86 = arith.constant dense<0.000000e+00> : vector<2x8x8xf32>
    %254 = tpu.matmul %251, %252, %cst_86 {dimension_numbers = #tpu.dot_dimension_numbers<[2], [2], [1], [1], [0, 0, 0, 1, 1, 1], [0], [0]>} : vector<2x8x8xf32>, vector<2x8x8xf32>, vector<2x8x8xf32> -> vector<2x8x8xf32>
    "tpu.trace_stop"() : () -> ()
    %cst_87 = arith.constant 0.353553385 : f32
    %255 = vector.broadcast %cst_87 : f32 to vector<2x8x8xf32>
    %256 = arith.mulf %254, %255 : vector<2x8x8xf32>
    %cst_88 = arith.constant dense<0.000000e+00> : vector<2x8xf32>
    %257 = vector.multi_reduction <add>, %252, %cst_88 [2] : vector<2x8x8xf32> to vector<2x8xf32>
    %cst_89 = arith.constant 0.000000e+00 : f32
    %258 = vector.broadcast %cst_89 : f32 to vector<2x8xf32>
    %259 = arith.cmpf oeq, %257, %258 : vector<2x8xf32>
    %260 = vector.shape_cast %259 : vector<2x8xi1> to vector<2x1x8xi1>
    %cst_90 = arith.constant -4.2949673E+9 : f32
    %261 = vector.shape_cast %260 : vector<2x1x8xi1> to vector<2x1x8xi1>
    %262 = vector.broadcast %261 : vector<2x1x8xi1> to vector<2x8x8xi1>
    %263 = vector.broadcast %cst_90 : f32 to vector<2x8x8xf32>
    %264 = arith.select %262, %263, %256 : vector<2x8x8xi1>, vector<2x8x8xf32>
    %cst_91 = arith.constant dense<0xFF800000> : vector<2x8xf32>
    %265 = vector.multi_reduction <maximumf>, %264, %cst_91 [2] : vector<2x8x8xf32> to vector<2x8xf32>
    %266 = vector.shape_cast %265 : vector<2x8xf32> to vector<2x8x1xf32>
    %267 = vector.broadcast %266 : vector<2x8x1xf32> to vector<2x8x8xf32>
    %268 = arith.subf %264, %267 : vector<2x8x8xf32>
    %269 = math.exp %268 : vector<2x8x8xf32>
    %cst_92 = arith.constant dense<0.000000e+00> : vector<2x8xf32>
    %270 = vector.multi_reduction <add>, %269, %cst_92 [2] : vector<2x8x8xf32> to vector<2x8xf32>
    %271 = vector.shape_cast %270 : vector<2x8xf32> to vector<2x8x1xf32>
    %272 = tpu.reciprocal %271 {approx = true} : vector<2x8x1xf32> -> vector<2x8x1xf32>
    %273 = vector.broadcast %272 : vector<2x8x1xf32> to vector<2x8x8xf32>
    %274 = arith.mulf %269, %273 : vector<2x8x8xf32>
    "tpu.trace_start"() <{level = 10 : i32, message = "bqk,bkd->bqd"}> : () -> ()
    %cst_93 = arith.constant dense<0.000000e+00> : vector<2x8x8xf32>
    %275 = tpu.matmul %274, %253, %cst_93 {dimension_numbers = #tpu.dot_dimension_numbers<[2], [1], [1], [2], [0, 0, 0, 1, 1, 2], [0], [0]>} : vector<2x8x8xf32>, vector<2x8x8xf32>, vector<2x8x8xf32> -> vector<2x8x8xf32>
    "tpu.trace_stop"() : () -> ()
    %276 = vector.extract_strided_slice %198 {offsets = [0, 0, 24], sizes = [2, 8, 8], strides = [1, 1, 1]} : vector<2x8x32xf32> to vector<2x8x8xf32>
    %277 = vector.extract_strided_slice %199 {offsets = [0, 0, 24], sizes = [2, 8, 8], strides = [1, 1, 1]} : vector<2x8x32xf32> to vector<2x8x8xf32>
    %278 = vector.extract_strided_slice %200 {offsets = [0, 0, 24], sizes = [2, 8, 8], strides = [1, 1, 1]} : vector<2x8x32xf32> to vector<2x8x8xf32>
    "tpu.trace_start"() <{level = 10 : i32, message = "bqd,bkd->bqk"}> : () -> ()
    %cst_94 = arith.constant dense<0.000000e+00> : vector<2x8x8xf32>
    %279 = tpu.matmul %276, %277, %cst_94 {dimension_numbers = #tpu.dot_dimension_numbers<[2], [2], [1], [1], [0, 0, 0, 1, 1, 1], [0], [0]>} : vector<2x8x8xf32>, vector<2x8x8xf32>, vector<2x8x8xf32> -> vector<2x8x8xf32>
    "tpu.trace_stop"() : () -> ()
    %cst_95 = arith.constant 0.353553385 : f32
    %280 = vector.broadcast %cst_95 : f32 to vector<2x8x8xf32>
    %281 = arith.mulf %279, %280 : vector<2x8x8xf32>
    %cst_96 = arith.constant dense<0.000000e+00> : vector<2x8xf32>
    %282 = vector.multi_reduction <add>, %277, %cst_96 [2] : vector<2x8x8xf32> to vector<2x8xf32>
    %cst_97 = arith.constant 0.000000e+00 : f32
    %283 = vector.broadcast %cst_97 : f32 to vector<2x8xf32>
    %284 = arith.cmpf oeq, %282, %283 : vector<2x8xf32>
    %285 = vector.shape_cast %284 : vector<2x8xi1> to vector<2x1x8xi1>
    %cst_98 = arith.constant -4.2949673E+9 : f32
    %286 = vector.shape_cast %285 : vector<2x1x8xi1> to vector<2x1x8xi1>
    %287 = vector.broadcast %286 : vector<2x1x8xi1> to vector<2x8x8xi1>
    %288 = vector.broadcast %cst_98 : f32 to vector<2x8x8xf32>
    %289 = arith.select %287, %288, %281 : vector<2x8x8xi1>, vector<2x8x8xf32>
    %cst_99 = arith.constant dense<0xFF800000> : vector<2x8xf32>
    %290 = vector.multi_reduction <maximumf>, %289, %cst_99 [2] : vector<2x8x8xf32> to vector<2x8xf32>
    %291 = vector.shape_cast %290 : vector<2x8xf32> to vector<2x8x1xf32>
    %292 = vector.broadcast %291 : vector<2x8x1xf32> to vector<2x8x8xf32>
    %293 = arith.subf %289, %292 : vector<2x8x8xf32>
    %294 = math.exp %293 : vector<2x8x8xf32>
    %cst_100 = arith.constant dense<0.000000e+00> : vector<2x8xf32>
    %295 = vector.multi_reduction <add>, %294, %cst_100 [2] : vector<2x8x8xf32> to vector<2x8xf32>
    %296 = vector.shape_cast %295 : vector<2x8xf32> to vector<2x8x1xf32>
    %297 = tpu.reciprocal %296 {approx = true} : vector<2x8x1xf32> -> vector<2x8x1xf32>
    %298 = vector.broadcast %297 : vector<2x8x1xf32> to vector<2x8x8xf32>
    %299 = arith.mulf %294, %298 : vector<2x8x8xf32>
    "tpu.trace_start"() <{level = 10 : i32, message = "bqk,bkd->bqd"}> : () -> ()
    %cst_101 = arith.constant dense<0.000000e+00> : vector<2x8x8xf32>
    %300 = tpu.matmul %299, %278, %cst_101 {dimension_numbers = #tpu.dot_dimension_numbers<[2], [1], [1], [2], [0, 0, 0, 1, 1, 2], [0], [0]>} : vector<2x8x8xf32>, vector<2x8x8xf32>, vector<2x8x8xf32> -> vector<2x8x8xf32>
    "tpu.trace_stop"() : () -> ()
    %301 = tpu.concatenate %225, %250, %275, %300 in 2 : vector<2x8x8xf32>, vector<2x8x8xf32>, vector<2x8x8xf32>, vector<2x8x8xf32> -> vector<2x8x32xf32>
    %302 = vector.shape_cast %301 : vector<2x8x32xf32> to vector<16x32xf32>
    %cst_102 = arith.constant dense<0.000000e+00> : vector<16x32xf32>
    %303 = tpu.matmul %302, %196, %cst_102 {dimension_numbers = #tpu.dot_dimension_numbers<[1], [0], [0], [1], [0, 0, 1, 1], [], []>} : vector<16x32xf32>, vector<32x32xf32>, vector<16x32xf32> -> vector<16x32xf32>
    %304 = vector.broadcast %197 : vector<1x32xf32> to vector<16x32xf32>
    %305 = arith.addf %303, %304 : vector<16x32xf32>
    %306 = arith.addf %175, %305 : vector<16x32xf32>
    %307 = vector.extract_strided_slice %18 {offsets = [7, 0], sizes = [1, 32], strides = [1, 1]} : vector<11x32xf32> to vector<1x32xf32>
    %308 = vector.extract_strided_slice %18 {offsets = [8, 0], sizes = [1, 32], strides = [1, 1]} : vector<11x32xf32> to vector<1x32xf32>
    %cst_103 = arith.constant dense<0.000000e+00> : vector<16xf32>
    %309 = vector.multi_reduction <add>, %306, %cst_103 [1] : vector<16x32xf32> to vector<16xf32>
    %310 = vector.shape_cast %309 : vector<16xf32> to vector<16x1xf32>
    %cst_104 = arith.constant 3.200000e+01 : f32
    %311 = vector.broadcast %cst_104 : f32 to vector<16x1xf32>
    %312 = arith.divf %310, %311 : vector<16x1xf32>
    %313 = vector.broadcast %312 : vector<16x1xf32> to vector<16x32xf32>
    %314 = arith.subf %306, %313 : vector<16x32xf32>
    %315 = vector.broadcast %312 : vector<16x1xf32> to vector<16x32xf32>
    %316 = arith.subf %306, %315 : vector<16x32xf32>
    %317 = arith.mulf %314, %316 : vector<16x32xf32>
    %cst_105 = arith.constant dense<0.000000e+00> : vector<16xf32>
    %318 = vector.multi_reduction <add>, %317, %cst_105 [1] : vector<16x32xf32> to vector<16xf32>
    %319 = vector.shape_cast %318 : vector<16xf32> to vector<16x1xf32>
    %cst_106 = arith.constant 3.200000e+01 : f32
    %320 = vector.broadcast %cst_106 : f32 to vector<16x1xf32>
    %321 = arith.divf %319, %320 : vector<16x1xf32>
    %322 = vector.broadcast %312 : vector<16x1xf32> to vector<16x32xf32>
    %323 = arith.subf %306, %322 : vector<16x32xf32>
    %cst_107 = arith.constant 9.99999974E-6 : f32
    %324 = vector.broadcast %cst_107 : f32 to vector<16x1xf32>
    %325 = arith.addf %321, %324 : vector<16x1xf32>
    %326 = math.rsqrt %325 : vector<16x1xf32>
    %327 = vector.broadcast %326 : vector<16x1xf32> to vector<16x32xf32>
    %328 = arith.mulf %323, %327 : vector<16x32xf32>
    %329 = vector.broadcast %307 : vector<1x32xf32> to vector<16x32xf32>
    %330 = arith.mulf %328, %329 : vector<16x32xf32>
    %331 = vector.broadcast %308 : vector<1x32xf32> to vector<16x32xf32>
    %332 = arith.addf %330, %331 : vector<16x32xf32>
    %cst_108 = arith.constant dense<0.000000e+00> : vector<16x64xf32>
    %333 = tpu.matmul %332, %12, %cst_108 {dimension_numbers = #tpu.dot_dimension_numbers<[1], [0], [0], [1], [0, 0, 1, 1], [], []>} : vector<16x32xf32>, vector<32x64xf32>, vector<16x64xf32> -> vector<16x64xf32>
    %334 = vector.broadcast %14 : vector<1x64xf32> to vector<16x64xf32>
    %335 = arith.addf %333, %334 : vector<16x64xf32>
    %cst_109 = arith.constant 0.000000e+00 : f32
    %336 = vector.broadcast %cst_109 : f32 to vector<16x64xf32>
    %337 = arith.maximumf %335, %336 : vector<16x64xf32>
    %cst_110 = arith.constant dense<0.000000e+00> : vector<16x32xf32>
    %338 = tpu.matmul %337, %16, %cst_110 {dimension_numbers = #tpu.dot_dimension_numbers<[1], [0], [0], [1], [0, 0, 1, 1], [], []>} : vector<16x64xf32>, vector<64x32xf32>, vector<16x32xf32> -> vector<16x32xf32>
    %339 = vector.extract_strided_slice %18 {offsets = [2, 0], sizes = [1, 32], strides = [1, 1]} : vector<11x32xf32> to vector<1x32xf32>
    %340 = vector.broadcast %339 : vector<1x32xf32> to vector<16x32xf32>
    %341 = arith.addf %338, %340 : vector<16x32xf32>
    %342 = arith.addf %341, %332 : vector<16x32xf32>
    %343 = vector.extract_strided_slice %18 {offsets = [3, 0], sizes = [1, 32], strides = [1, 1]} : vector<11x32xf32> to vector<1x32xf32>
    %344 = vector.extract_strided_slice %18 {offsets = [4, 0], sizes = [1, 32], strides = [1, 1]} : vector<11x32xf32> to vector<1x32xf32>
    %cst_111 = arith.constant dense<0.000000e+00> : vector<16xf32>
    %345 = vector.multi_reduction <add>, %342, %cst_111 [1] : vector<16x32xf32> to vector<16xf32>
    %346 = vector.shape_cast %345 : vector<16xf32> to vector<16x1xf32>
    %cst_112 = arith.constant 3.200000e+01 : f32
    %347 = vector.broadcast %cst_112 : f32 to vector<16x1xf32>
    %348 = arith.divf %346, %347 : vector<16x1xf32>
    %349 = vector.broadcast %348 : vector<16x1xf32> to vector<16x32xf32>
    %350 = arith.subf %342, %349 : vector<16x32xf32>
    %351 = vector.broadcast %348 : vector<16x1xf32> to vector<16x32xf32>
    %352 = arith.subf %342, %351 : vector<16x32xf32>
    %353 = arith.mulf %350, %352 : vector<16x32xf32>
    %cst_113 = arith.constant dense<0.000000e+00> : vector<16xf32>
    %354 = vector.multi_reduction <add>, %353, %cst_113 [1] : vector<16x32xf32> to vector<16xf32>
    %355 = vector.shape_cast %354 : vector<16xf32> to vector<16x1xf32>
    %cst_114 = arith.constant 3.200000e+01 : f32
    %356 = vector.broadcast %cst_114 : f32 to vector<16x1xf32>
    %357 = arith.divf %355, %356 : vector<16x1xf32>
    %358 = vector.broadcast %348 : vector<16x1xf32> to vector<16x32xf32>
    %359 = arith.subf %342, %358 : vector<16x32xf32>
    %cst_115 = arith.constant 9.99999997E-7 : f32
    %360 = vector.broadcast %cst_115 : f32 to vector<16x1xf32>
    %361 = arith.addf %357, %360 : vector<16x1xf32>
    %362 = math.rsqrt %361 : vector<16x1xf32>
    %363 = vector.broadcast %362 : vector<16x1xf32> to vector<16x32xf32>
    %364 = arith.mulf %359, %363 : vector<16x32xf32>
    %365 = vector.broadcast %343 : vector<1x32xf32> to vector<16x32xf32>
    %366 = arith.mulf %364, %365 : vector<16x32xf32>
    %367 = vector.broadcast %344 : vector<1x32xf32> to vector<16x32xf32>
    %368 = arith.addf %366, %367 : vector<16x32xf32>
    %369 = arith.addf %332, %368 : vector<16x32xf32>
    %370 = vector.extract_strided_slice %18 {offsets = [9, 0], sizes = [1, 32], strides = [1, 1]} : vector<11x32xf32> to vector<1x32xf32>
    %371 = vector.extract_strided_slice %18 {offsets = [10, 0], sizes = [1, 32], strides = [1, 1]} : vector<11x32xf32> to vector<1x32xf32>
    %cst_116 = arith.constant dense<0.000000e+00> : vector<16xf32>
    %372 = vector.multi_reduction <add>, %369, %cst_116 [1] : vector<16x32xf32> to vector<16xf32>
    %373 = vector.shape_cast %372 : vector<16xf32> to vector<16x1xf32>
    %cst_117 = arith.constant 3.200000e+01 : f32
    %374 = vector.broadcast %cst_117 : f32 to vector<16x1xf32>
    %375 = arith.divf %373, %374 : vector<16x1xf32>
    %376 = vector.broadcast %375 : vector<16x1xf32> to vector<16x32xf32>
    %377 = arith.subf %369, %376 : vector<16x32xf32>
    %378 = vector.broadcast %375 : vector<16x1xf32> to vector<16x32xf32>
    %379 = arith.subf %369, %378 : vector<16x32xf32>
    %380 = arith.mulf %377, %379 : vector<16x32xf32>
    %cst_118 = arith.constant dense<0.000000e+00> : vector<16xf32>
    %381 = vector.multi_reduction <add>, %380, %cst_118 [1] : vector<16x32xf32> to vector<16xf32>
    %382 = vector.shape_cast %381 : vector<16xf32> to vector<16x1xf32>
    %cst_119 = arith.constant 3.200000e+01 : f32
    %383 = vector.broadcast %cst_119 : f32 to vector<16x1xf32>
    %384 = arith.divf %382, %383 : vector<16x1xf32>
    %385 = vector.broadcast %375 : vector<16x1xf32> to vector<16x32xf32>
    %386 = arith.subf %369, %385 : vector<16x32xf32>
    %cst_120 = arith.constant 9.99999974E-6 : f32
    %387 = vector.broadcast %cst_120 : f32 to vector<16x1xf32>
    %388 = arith.addf %384, %387 : vector<16x1xf32>
    %389 = math.rsqrt %388 : vector<16x1xf32>
    %390 = vector.broadcast %389 : vector<16x1xf32> to vector<16x32xf32>
    %391 = arith.mulf %386, %390 : vector<16x32xf32>
    %392 = vector.broadcast %370 : vector<1x32xf32> to vector<16x32xf32>
    %393 = arith.mulf %391, %392 : vector<16x32xf32>
    %394 = vector.broadcast %371 : vector<1x32xf32> to vector<16x32xf32>
    %395 = arith.addf %393, %394 : vector<16x32xf32>
    %c0_121 = arith.constant 0 : index
    %c0_122 = arith.constant 0 : index
    %396 = vector.load %arg11[%c0_121, %c0_122] : memref<16x32xf32, #tpu.memory_space<vmem>>, vector<16x32xf32>
    tpu.vector_store %arg11[%c0_121, %c0_122], %395 {strides = array<i32>} : memref<16x32xf32, #tpu.memory_space<vmem>>, vector<16x32xf32>,
    %c1_i32 = arith.constant 1 : i32
    %397 = arith.cmpi eq, %arg0, %c1_i32 : i32
    %398 = arith.extui %397 : i1 to i32
    %c0_i32_123 = arith.constant 0 : i32
    %399 = arith.cmpi ne, %398, %c0_i32_123 : i32
    scf.if %399 {
      %c0_124 = arith.constant 0 : index
      %c0_125 = arith.constant 0 : index
      %400 = vector.load %arg10[%c0_124, %c0_125] : memref<16x32xf32, #tpu.memory_space<vmem>>, vector<16x32xf32>
      tpu.vector_store %arg10[%c0_124, %c0_125], %395 {strides = array<i32>} : memref<16x32xf32, #tpu.memory_space<vmem>>, vector<16x32xf32>,
    } else {
    }
    return
  }
  func.func @transform_0(%arg0: i32) -> (i32, i32) {
    %c0_i32 = arith.constant 0 : i32
    %c0_i32_0 = arith.constant 0 : i32
    %c0_i32_1 = arith.constant 0 : i32
    return %c0_i32, %c0_i32_0 : i32, i32
  }
  func.func @transform_1(%arg0: i32) -> (i32, i32) {
    %c0_i32 = arith.constant 0 : i32
    %c0_i32_0 = arith.constant 0 : i32
    %c0_i32_1 = arith.constant 0 : i32
    return %c0_i32, %c0_i32_0 : i32, i32
  }
  func.func @transform_2(%arg0: i32) -> (i32, i32, i32, i32) {
    %c0_i32 = arith.constant 0 : i32
    %c0_i32_0 = arith.constant 0 : i32
    %c0_i32_1 = arith.constant 0 : i32
    %c0_i32_2 = arith.constant 0 : i32
    return %arg0, %c0_i32, %c0_i32_0, %c0_i32_1 : i32, i32, i32, i32
  }
  func.func @transform_3(%arg0: i32) -> (i32, i32, i32) {
    %c0_i32 = arith.constant 0 : i32
    %c0_i32_0 = arith.constant 0 : i32
    %c0_i32_1 = arith.constant 0 : i32
    return %arg0, %c0_i32, %c0_i32_0 : i32, i32, i32
  }
  func.func @transform_4(%arg0: i32) -> (i32, i32, i32, i32) {
    %c0_i32 = arith.constant 0 : i32
    %c0_i32_0 = arith.constant 0 : i32
    %c0_i32_1 = arith.constant 0 : i32
    %c0_i32_2 = arith.constant 0 : i32
    return %arg0, %c0_i32, %c0_i32_0, %c0_i32_1 : i32, i32, i32, i32
  }
  func.func @transform_5(%arg0: i32) -> (i32, i32, i32) {
    %c0_i32 = arith.constant 0 : i32
    %c0_i32_0 = arith.constant 0 : i32
    %c0_i32_1 = arith.constant 0 : i32
    return %arg0, %c0_i32, %c0_i32_0 : i32, i32, i32
  }
  func.func @transform_6(%arg0: i32) -> (i32, i32, i32) {
    %c0_i32 = arith.constant 0 : i32
    %c0_i32_0 = arith.constant 0 : i32
    %c0_i32_1 = arith.constant 0 : i32
    return %arg0, %c0_i32, %c0_i32_0 : i32, i32, i32
  }
  func.func @transform_7(%arg0: i32) -> (i32, i32, i32) {
    %c0_i32 = arith.constant 0 : i32
    %c0_i32_0 = arith.constant 0 : i32
    %c0_i32_1 = arith.constant 0 : i32
    return %arg0, %c0_i32, %c0_i32_0 : i32, i32, i32
  }
  func.func @transform_8(%arg0: i32) -> (i32, i32, i32) {
    %c0_i32 = arith.constant 0 : i32
    %c0_i32_0 = arith.constant 0 : i32
    %c0_i32_1 = arith.constant 0 : i32
    return %arg0, %c0_i32, %c0_i32_0 : i32, i32, i32
  }
  func.func @transform_9(%arg0: i32) -> (i32, i32) {
    %c0_i32 = arith.constant 0 : i32
    %c0_i32_0 = arith.constant 0 : i32
    %c0_i32_1 = arith.constant 0 : i32
    return %c0_i32, %c0_i32_0 : i32, i32
  }
}

</mosaic_0001>

<bundles_post_ra>
// kernel: tpu_custom_call.1
= control target key start
LH: loop header
LB: loop body
LE: loop exit
PB: predicated region body
PF: predicated region fallthrough
CT: control target
= control target key end

     0   :  { %s15200_s0 = inlined_call_operand.hbm [shape: f32[16,32], index: 0, kind: input, shape index: {}]   ;;  %s15201_s1 = inlined_call_operand.hbm [shape: f32[16,32], index: 1, kind: input, shape index: {}]   ;;  %s15202_s2 = inlined_call_operand.vmem [shape: f32[2,2,32,96], index: 2, kind: input, shape index: {}]   ;;  %s15203_s3 = inlined_call_operand.hbm [shape: f32[2,2,96], index: 3, kind: input, shape index: {}]   ;;  %s15204_s4 = inlined_call_operand.vmem [shape: f32[2,2,32,32], index: 4, kind: input, shape index: {}]   ;;  %s15205_s5 = inlined_call_operand.hbm [shape: f32[2,32,64], index: 5, kind: input, shape index: {}]   ;;  %s15206_s6 = inlined_call_operand.vmem [shape: f32[2,1,64], index: 6, kind: input, shape index: {}]   ;;  %s15207_s7 = inlined_call_operand.vmem [shape: f32[2,64,32], index: 7, kind: input, shape index: {}]   ;;  %s15208_s8 = inlined_call_operand.vmem [shape: f32[2,11,32], index: 8, kind: input, shape index: {}]   ;;  %s15209_s9 = inlined_call_operand.hbm [shape: f32[16,32], index: 9, kind: output, shape index: {}]  }
   0x1   :  { %15237 = sst [smem:[#allocation16_spill]] %s15200_s0 }
   0x2   :  { %15238 = sst [smem:[#allocation17_spill]] %s15209_s9 }
   0x3   :  { %14 = vsyncpa [#allocation4], 0 }
   0x4   :  { %15 = vsyncpa [#allocation7], 0 }
   0x5   :  { %16 = vsyncpa [#allocation5], 0  ;;  %s11997_s30 = smov 0   ;;  %s11999_s10 = smov 0  }
   0x6   :  { %s12001_s11 = smov 0   ;;  %s12003_s12 = smov 0  }
   0x7 LB: > { %s12016_s13 = sadd.s32 4294967295, %s11920_s12   ;;  %p110_p0 = scmp.ne.s32.totalorder %s11912_s10, %s11908_s30  ;;  %s11920_s12 = sphi %s12003_s12, %s15597_s12   ;;  %s11916_s11 = sphi %s12001_s11, %s15600_s11   ;;  %s11912_s10 = sphi %s11999_s10, %s15599_s10   ;;  %s11908_s30 = sphi %s11997_s30, %s15598_s30  }
   0x8   : > { %p15210_p1 = scmp.eq.s32.totalorder %s12016_s13, 0  ;;  %p10805_p2 = scmp.ge.s32.totalorder %s11920_s12, 1 }
   0x9   : > { %p272_p3 = scmp.lt.s32.totalorder %s11920_s12, 3  ;;  %s11922_s16 = smov [#allocation3]  }
   0xa   : > { %p12025_p5 = por %p15210_p1, %p110_p0  ;;  %s284_s17 = sshll.u32 %s11922_s16, 4  ;;  %s285_s17 = int_to_ptr.vmem [resolvable:$true] %s284_s17 }
   0xb   : > { %p12029_p6 = pnand %p10805_p2, %p272_p3  ;;  %s12042_s19 = sadd.s32 1, %s11920_s12  }
   0xc   : > { %s15239_s14 = scalar_select %p12025_p5, 1, 0 }
   0xd   : > { %s15240_s15 = scalar_select %p12029_p6, 1, 0 }
   0xe   : > { %p11336_p7 = pneg %p12029_p6  ;;  %15242 = sst [smem:[#allocation15_spill]] %s12042_s19 }
   0xf   : > { %s97_s20 = sadd.s32 1, %s11916_s11  ;;  %s94_s21 = ssub.s32 %s11920_s12, %s12042_s19 }
  0x10   : > { %p12037_p8 = pnand %p11336_p7, %p15210_p1  ;;  %s15243_s0 = sld [smem:[#allocation16_spill]] }
  0x12   : > { %p15218_p10 = pneg %p12037_p8 }
  0x16   : > { %s11732_s24 = scalar_lea.hbm %s15243_s0, 256 }
  0x17   : > { %p11733_p9 = scmp.ne.s32.totalorder %s15243_s0, %s11732_s24  ;;  %p11739_p13 = scmp.lt.u32.totalorder %s11732_s24, %s15243_s0 }
  0x19   : > { %p11735_p11 = pnand %p15218_p10, %p11733_p9 }
  0x1b   : > { %p11736_p12 = pneg %p11735_p11 }
  0x1d   : > { %p11741_p0 = pnand %p11739_p13, %p11736_p12 }
  0x1f   : > { %11744 = shalt.err (!%p11741_p0)
}
  0x20   : > { %s11745_s29 = scalar_lea.vmem %s285_s17, 256  ;;  %p11753_p4 = scmp.lt.s32.totalorder %s285_s17, %s285_s17 }
  0x21   : > { %p11746_p2 = scmp.ne.s32.totalorder %s285_s17, %s11745_s29  ;;  %p11754_p1 = scmp.lt.s32.totalorder %s11745_s29, %s11745_s29 }
  0x23   : > { %p11748_p3 = pnand %p11746_p2, %p15218_p10  ;;  %p11755_p5 = por %p11754_p1, %p11753_p4 }
  0x25   : > { %p11749_p7 = pneg %p11748_p3 }
  0x27   : > { %p11756_p6 = pnand %p11755_p5, %p11749_p7 }
  0x29   : > { %11759 = shalt.err (!%p11756_p6)
}
  0x2a   : > { %s15216_s30 = smov 128   ;;  %s15219_s16 = smov 8  }
  0x2b   : > { %11339 = dma.hbm_to_vmem [thread:$0]  (!%p12037_p8), %s15243_s0, 256, %s285_s17, [#allocation4], %s15216_s30, %s15216_s30, %s15219_s16  }
  0x2c   : > { %p95_p1 = scmp.eq.s32.totalorder %s94_s21, 0  ;;  %p104_p4 = scmp.ne.s32.totalorder %s11916_s11, %s11912_s10 }
  0x2d   : > { %p105_p5 = scmp.eq.s32.totalorder %s11920_s12, 0  ;;  %p11352_p6 = scmp.lt.s32.totalorder %s11920_s12, 2 }
  0x2e   : > { %s12077_s24 = scalar_select %p95_p1, %s11916_s11, %s97_s20  }
  0x2f   : > { %p106_p9 = por %p105_p5, %p104_p4  ;;  %s319_s25 = sand.u32 1, %s11920_s12  }
  0x30   : > { %s321_s26 = sand.u32 1, %s11916_s11   ;;  %s10810_s28 = sshll.u32 %s11920_s12, 5 }
  0x31   : > { %s10809_s27 = sshll.u32 %s321_s26, 1  ;;  %s12085_s9 = scalar_lea.hbm %s15203_s3, %s10810_s28 }
  0x32   : > { %s323_s17 = scalar_lea.vmem [#allocation8], %s10809_s27  ;;  %p12087_p11 = pnand %p11352_p6, %p106_p9 }
  0x33   : > { %s330_s21 = sshll.u32 %s323_s17, 4  ;;  %s12093_s20 = sshll.u32 %s321_s26, 5  ;;  %s12091_s21 = int_to_ptr.vmem [resolvable:$true] %s330_s21 }
  0x34   : > { %s15244_s22 = scalar_select %p12087_p11, 1, 0 }
  0x35   : > { %s12095_s23 = scalar_lea.sflag [#allocation4], %s319_s25  ;;  %s11760_s19 = scalar_lea.hbm %s12085_s9, 32 }
  0x36   : > { %p11761_p12 = scmp.ne.s32.totalorder %s12085_s9, %s11760_s19  ;;  %p15221_p13 = pneg %p12087_p11 }
  0x37   : > { %s11765_s29 = scalar_lea.hbm %s15203_s3, 64  ;;  %p11766_p3 = scmp.lt.u32.totalorder %s12085_s9, %s15203_s3 }
  0x38   : > { %p11763_p0 = pnand %p15221_p13, %p11761_p12  ;;  %p11767_p7 = scmp.lt.u32.totalorder %s11765_s29, %s11760_s19 }
  0x39   : > { %p11769_p4 = scmp.lt.u32.totalorder %s11760_s19, %s12085_s9 }
  0x3a   : > { %p11764_p2 = pneg %p11763_p0  ;;  %p11768_p1 = por %p11767_p7, %p11766_p3 }
  0x3c   : > { %p11770_p5 = por %p11769_p4, %p11768_p1 }
  0x3e   : > { %p11771_p6 = pnand %p11770_p5, %p11764_p2 }
  0x40   : > { %11774 = shalt.err (!%p11771_p6)
}
  0x41   : > { %s11775_s25 = scalar_lea.vmem %s12091_s21, 32  ;;  %s11925_s26 = smov [#allocation8]  }
  0x42   : > { %p11776_p9 = scmp.ne.s32.totalorder %s12091_s21, %s11775_s25  ;;  %s11780_s27 = sshll.u32 %s11925_s26, 4  ;;  %s11781_s27 = int_to_ptr.vmem [resolvable:$false] %s11780_s27 }
  0x43   : > { %s11782_s30 = scalar_lea.vmem %s11781_s27, 64  ;;  %p11783_p10 = scmp.lt.s32.totalorder %s12091_s21, %s11781_s27 }
  0x44   : > { %p11778_p12 = pnand %p11776_p9, %p15221_p13  ;;  %p11784_p3 = scmp.lt.s32.totalorder %s11782_s30, %s11775_s25 }
  0x46   : > { %p11779_p0 = pneg %p11778_p12  ;;  %p11785_p7 = por %p11784_p3, %p11783_p10 }
  0x48   : > { %p11786_p1 = pnand %p11785_p7, %p11779_p0 }
  0x4a   : > { %11789 = shalt.err (!%p11786_p1)
}
  0x4b   : > { %11346 = dma.hbm_to_vmem [thread:$0]  (!%p12087_p11), %s12085_s9, 32, %s12091_s21, %s12095_s23  }
  0x4c   : > { %s349_s19 = scalar_lea.vmem [#allocation9], %s12093_s20  ;;  %s11926_s29 = smov [#allocation6]  }
  0x4d   : > { %s356_s28 = sshll.u32 %s349_s19, 4  ;;  %s297_s17 = sshll.u32 %s11926_s29, 4  ;;  %s12124_s28 = int_to_ptr.vmem [resolvable:$true] %s356_s28  ;;  %s298_s17 = int_to_ptr.vmem [resolvable:$true] %s297_s17 }
  0x4e   : > { %s10896_s25 = sshll.u32 %s11920_s12, 9  ;;  %s11790_s30 = scalar_lea.hbm %s15201_s1, 256 }
  0x4f   : > { %p11791_p10 = scmp.ne.s32.totalorder %s15201_s1, %s11790_s30  ;;  %p15245_p2 = pneg %p12037_p8 }
  0x50   : > { %p11797_p6 = scmp.lt.u32.totalorder %s11790_s30, %s15201_s1 }
  0x51   : > { %p11793_p4 = pnand %p11791_p10, %p15245_p2 }
  0x53   : > { %p11794_p5 = pneg %p11793_p4 }
  0x55   : > { %p11799_p9 = pnand %p11797_p6, %p11794_p5 }
  0x57   : > { %11802 = shalt.err (!%p11799_p9)
}
  0x58   : > { %s11803_s20 = scalar_lea.vmem %s298_s17, 256  ;;  %p15246_p0 = pmov %p15245_p2 }
  0x59   : > { %p11804_p12 = scmp.ne.s32.totalorder %s298_s17, %s11803_s20  ;;  %p11811_p1 = scmp.lt.s32.totalorder %s298_s17, %s298_s17 }
  0x5a   : > { %p11812_p13 = scmp.lt.s32.totalorder %s11803_s20, %s11803_s20 }
  0x5b   : > { %p11806_p3 = pnand %p11804_p12, %p15246_p0 }
  0x5c   : > { %p11813_p11 = por %p11812_p13, %p11811_p1 }
  0x5d   : > { %p11807_p7 = pneg %p11806_p3 }
  0x5f   : > { %p11814_p2 = pnand %p11813_p11, %p11807_p7 }
  0x61   : > { %11817 = shalt.err (!%p11814_p2)
}
  0x62   : > { %s15247_s0 = smov 8   ;;  %s15248_s12 = smov 128  }
  0x63   : > { %11342 = dma.hbm_to_vmem [thread:$0]  (!%p12037_p8), %s15201_s1, 256, %s298_s17, [#allocation7], %s15248_s12, %s15248_s12, %s15247_s0  }
  0x64   : > { %s12153_s27 = scalar_lea.hbm %s15205_s5, %s10896_s25  ;;  %p15249_p13 = scmp.ne.s32.totalorder %s15244_s22, 0 }
  0x65   : > { %s11818_s30 = scalar_lea.hbm %s12153_s27, 512  ;;  %s11823_s21 = scalar_lea.hbm %s15205_s5, 1024 }
  0x66   : > { %p11819_p11 = scmp.ne.s32.totalorder %s12153_s27, %s11818_s30  ;;  %p15250_p10 = pneg %p15249_p13 }
  0x67   : > { %p11824_p8 = scmp.lt.u32.totalorder %s12153_s27, %s15205_s5  ;;  %p11825_p6 = scmp.lt.u32.totalorder %s11823_s21, %s11818_s30 }
  0x68   : > { %p11821_p4 = pnand %p11819_p11, %p15250_p10  ;;  %p11827_p12 = scmp.lt.u32.totalorder %s11818_s30, %s12153_s27 }
  0x69   : > { %p11826_p9 = por %p11825_p6, %p11824_p8 }
  0x6a   : > { %p11822_p5 = pneg %p11821_p4 }
  0x6b   : > { %p11828_p0 = por %p11827_p12, %p11826_p9 }
  0x6d   : > { %p11829_p3 = pnand %p11828_p0, %p11822_p5 }
  0x6f   : > { %11832 = shalt.err (!%p11829_p3)
}
  0x70   : > { %s11833_s25 = scalar_lea.vmem %s12124_s28, 512  ;;  %p15251_p1 = pmov %p15250_p10 }
  0x71   : > { %p11834_p7 = scmp.ne.s32.totalorder %s12124_s28, %s11833_s25  ;;  %s11927_s16 = smov [#allocation9]  }
  0x72   : > { %s11838_s19 = sshll.u32 %s11927_s16, 4  ;;  %s11839_s19 = int_to_ptr.vmem [resolvable:$false] %s11838_s19 }
  0x73   : > { %p11836_p2 = pnand %p11834_p7, %p15251_p1  ;;  %s11840_s29 = scalar_lea.vmem %s11839_s19, 1024 }
  0x74   : > { %p11841_p10 = scmp.lt.s32.totalorder %s12124_s28, %s11839_s19  ;;  %p11842_p4 = scmp.lt.s32.totalorder %s11840_s29, %s11833_s25 }
  0x75   : > { %p11837_p11 = pneg %p11836_p2 }
  0x76   : > { %p11843_p8 = por %p11842_p4, %p11841_p10 }
  0x78   : > { %p11844_p6 = pnand %p11843_p8, %p11837_p11 }
  0x7a   : > { %11847 = shalt.err (!%p11844_p6)
}
  0x7b   : > { %11349 = dma.hbm_to_vmem [thread:$0]  (!%p15249_p13), %s12153_s27, 512, %s12124_s28, %s12095_s23, %s15248_s12, %s15248_s12, %s15247_s0  }
  0x7c   : > { %p15252_p5 = scmp.ne.s32.totalorder %s15240_s15, 0 }
  0x7d   : > { %p15253_p9 = scmp.eq.s32.totalorder (!%p15252_p5), %s12016_s13, 0 }
  0x7e   : > { %390 = sbr.rel (%p15252_p5) target bundleno = 12575 (0x311f), region = 56 }
  0x85   : > { %11891 = dma.done.wait (%p15253_p9), [#allocation4], 256   ;;  %p15254_p12 = pmov %p15253_p9 }
  0x86   : > { %p15255_p0 = pmov %p15253_p9 }
  0x87   : > { %11893 = vsyncadd (%p15254_p12), [#allocation4], 4294967040 }
  0x88   : > { %11895 = dma.done.wait (%p15255_p0), [#allocation7], 256   ;;  %p15256_p3 = pmov %p15255_p0 }
  0x89   : > { %s400_s22 = sand.u32 1, %s12016_s13   ;;  %s402_s23 = sand.u32 1, %s11912_s10  }
  0x8a   : > { %11897 = vsyncadd (%p15256_p3), [#allocation7], 4294967040  ;;  %s12194_s28 = sshll.u32 %s402_s23, 1  ;;  %s401_s15 = scalar_lea.sflag [#allocation4], %s400_s22 }
  0x8b   : > { %p15257_p13 = scmp.ne.s32.totalorder %s15239_s14, 0 }
  0x8d   : > { %11899 = dma.done.wait (%p15257_p13), %s401_s15, 544  }
  0x8e   : > { %11901 = vsyncadd (%p15257_p13), %s401_s15, 4294966752  ;;  %s10818_s12 = sshll.u32 %s402_s23, 5  ;;  %p471_p7 = scmp.lt.s32.totalorder %s12016_s13, 1 }
  0x8f   : > { %s12231_s18 = scalar_lea.vmem [#allocation9], %s10818_s12  ;;  %p15258_p1 = scmp.ne.s32.totalorder %s12016_s13, 0 }
  0x90   : > { %s12203_s26 = scalar_select %p471_p7, %s12016_s13, 1 }
  0x91   : > { %497 = sbr.rel (%p15258_p1) target bundleno = 152 (0x98), region = 76  ;;  %v498_v0 = vld [vmem:[#allocation3] sm:$0xff] (!%p15258_p1)  ;;  %vm500_vm0 = vcmask (!%p15258_p1), 261120   ;;  %v499_v1 = vld [vmem:[#allocation3 + $0x8] sm:$0xff] (!%p15258_p1) }
  0x92   : > { %s10897_s27 = sshll.u32 %s12203_s26, 6  ;;  %s483_s9 = scalar_lea.vmem %s15206_s6, %s12203_s26  ;;  %501 = vst.msk [vmem:[#allocation2] sm:$0xff] (!%p15258_p1), %vm500_vm0, %v498_v0  ;;  %502 = vst.msk [vmem:[#allocation2 + $0x8] sm:$0xff] (!%p15258_p1), %vm500_vm0, %v499_v1 }
  0x93   : > { %s12213_s20 = scalar_lea.vmem %s15202_s2, %s10897_s27  ;;  %s12218_s16 = scalar_lea.vmem %s15204_s4, %s10897_s27 }
  0x94   : > { %s12223_s22 = scalar_lea.vmem %s15207_s7, %s10897_s27  ;;  %s10900_s23 = sshll.u32 %s12203_s26, 4 }
  0x95   : > { %s12229_s30 = scalar_lea.vmem %s15208_s8, %s10900_s23 }
  0x98 PF: > { %v507_v2 = vld [vmem:[%s12213_s20] sm:$0xff]  ;;  %v508_v3 = vld [vmem:[%s12213_s20 + $0x8] sm:$0xff]  ;;  %v509_v4 = vld [vmem:[%s12213_s20 + $0x10] sm:$0xff]  ;;  %vm15224_vm1 = vcmask 261120   ;;  %v539_v10 = vlaneseq  ;;  %v11928_v14 = vmov 0   ;;  %v11929_v16 = vmov 0.0  }
  0x99   : > { %v11256_v5 = vpack.c.bf16 %v508_v3, %v507_v2  ;;  %v510_v6 = vld [vmem:[%s12213_s20 + $0x18] sm:$0xff]  ;;  %v503_v7 = vld [vmem:[#allocation2] sm:$0xff]  ;;  %v504_v9 = vld [vmem:[#allocation2 + $0x8] sm:$0xff]  ;;  %11412 = vset.pattern.permute.xlu1 %v11928_v14  ;;  %11413 = vset.pattern.permute.xlu0 %v11928_v14  ;;  %vm15226_vm3 = vmmov 0   ;;  %s15259_s0 = scalar_lea.vmem [#allocation8], %s12194_s28  ;;  %s11931_s12 = smov 96  }
  0x9a   : > { %v11260_v8 = vpack.c.bf16 %v510_v6, %v509_v4  ;;  %11019 = vmatprep.mubr.msk.f32.mxu1 %vm15224_vm1, %v503_v7  ;;  %v12241_v11 = vshrl.u32 %v539_v10, 7  ;;  %v12246_v13 = vand.u32 127, %v539_v10  ;;  %11032 = vmatprep.subr.mxu0 %v11929_v16  ;;  %v515_v25 = vld [vmem:[%s15259_s0] sm:$0x3]  ;;  %vm15228_vm4 = vcmask 64512   ;;  %s11932_s27 = smov 64  }
  0x9b   : > { %11257 = vmatprep.subr.bf16.mxu1 %v11256_v5  ;;  %11034 = vmatprep.mubr.msk.f32.mxu0 %vm15226_vm3, %v11929_v16  ;;  %s11933_s21 = smov 88   ;;  %s11934_s17 = smov 120  }
  0x9c   : > { %11259 = vmatpush3.bf16.msra.mxu1 %v11256_v5  ;;  %v12244_v12 = vsub.s32 1, %v12241_v11  ;;  %vm631_vm2 = vcmp.gt.s32.totalorder %v12246_v13, %v12241_v11  ;;  %v12251_v15 = vsub.s32 4, %v12241_v11  ;;  %v12258_v20 = vsub.s32 5, %v12241_v11  ;;  %s11935_s14 = smov 56   ;;  %s11936_s25 = smov 80  }
  0x9d   : > { %11261 = vmatprep.subr.bf16.mxu1 %v11260_v8  ;;  %v805_v17 = vsel %vm631_vm2, 1, %v11928_v14  ;;  %v12262_v22 = vsub.s32 7, %v12241_v11  ;;  %v12266_v24 = vsub.s32 0, %v12241_v11  ;;  %v12285_v34 = vsub.s32 2, %v12241_v11  ;;  %s11937_s19 = smov 112   ;;  %s11938_s29 = smov 48  }
  0x9e   : > { %v816_v18 = vrot.slane %v805_v17, %v12244_v12  ;;  %v837_v19 = vrot.slane %v805_v17, %v12251_v15  ;;  %v844_v21 = vrot.slane %v805_v17, %v12258_v20  ;;  %v12289_v36 = vsub.s32 3, %v12241_v11  ;;  %s11939_s23 = smov 72   ;;  %s11940_s15 = smov 104  }
  0x9f   : > { %v858_v23 = vrot.slane %v805_v17, %v12262_v22  ;;  %v542_v26 = vrot.slane %v515_v25, %v12266_v24  ;;  %v809_v33 = vrot.slane %v805_v17, %v12266_v24  ;;  %v823_v35 = vrot.slane %v805_v17, %v12285_v34  ;;  %s11941_s0 = smov 40   ;;  %p10891_p2 = scmp.ne.s32.totalorder %s12016_s13, 1 }
  0xa0   : > { %11263 = vmatpush3.bf16.msra.mxu1 %v11260_v8  ;;  %818 = vbcast.lane.b32.xlu1 %v816_v18, 256  ;;  %v830_v37 = vrot.slane %v805_v17, %v12289_v36  ;;  %v12293_v38 = vsub.s32 6, %v12241_v11 }
  0xa1   : > { %11022 = vmatprep.subr.mxu1 %v11929_v16 }
  0xa2   : > { %v851_v39 = vrot.slane %v805_v17, %v12293_v38 }
  0xa3   : > { %11020 = vmatmul.mubr.msk.f32.vlgmr.msra.gmra.mrb[0].mxu1 %vm15224_vm1, %v504_v9 }
  0xa4   : > { %839 = vbcast.lane.b32.xlu1 %v837_v19, 256  ;;  %11024 = vmatprep.mubr.msk.f32.mxu1 %vm15226_vm3, %v11929_v16 }
  0xa8   : > { %846 = vbcast.lane.b32.xlu1 %v844_v21, 256 }
  0xac   : > { %860 = vbcast.lane.b32.xlu1 %v858_v23, 256 }
 0x112   : > { %v12326_v2 = vpop.permute.xlu1 %818 }
 0x113   : > { %vm863_vm8 = vcmp.ne.s32.totalorder %v12326_v2, 0 }
 0x116   : > { %v12328_v3 = vpop.permute.xlu1 %839 }
 0x117   : > { %vm866_vm14 = vcmp.ne.s32.totalorder %v12328_v3, 0 }
 0x11a   : > { %v12330_v4 = vpop.permute.xlu1 %846 }
 0x11b   : > { %vm15234_vm0 = vcmp.ne.s32.totalorder %v12330_v4, 0 }
 0x11e   : > { %v12334_v6 = vpop.permute.xlu1 %860 }
 0x176   : > { %v11021_v27 = vpop.f32.mrb[0].mxu1 }
 0x177   : > { %v616_v28 = vpop.f32.mrb[1].mxu1  ;;  %v622_v30 = vadd.f32 %v11021_v27, %v542_v26 }
 0x178   : > { %v617_v29 = vadd.f32 %v616_v28, %v542_v26 }
 0x179   : > { %v12279_v32 = vmax.f32 %v622_v30, 0.0 }
 0x17a   : > { %v12275_v31 = vmax.f32 %v617_v29, 0.0 }
 0x17c   : > { %633 = vrot.lane.b32.xlu0 %v12275_v31, %s11931_s12 }
 0x180   : > { %711 = vrot.lane.b32.xlu0 %v12279_v32, %s11931_s12 }
 0x184   : > { %811 = vbcast.lane.b32.xlu0 %v809_v33, 256 }
 0x188   : > { %825 = vbcast.lane.b32.xlu0 %v823_v35, 256 }
 0x18c   : > { %832 = vbcast.lane.b32.xlu0 %v830_v37, 256 }
 0x190   : > { %853 = vbcast.lane.b32.xlu0 %v851_v39, 256 }
 0x1ee   : > { %v634_v40 = vpop.permute.xlu0 %633 }
 0x1ef   : > { %11023 = vmatpush3.xpose.msk.msra.mxu1 %vm15228_vm4, %v634_v40  ;;  %v791_v43 = vsel %vm15228_vm4, %v634_v40, 0.0 }
 0x1f0   : > { %11027 = vmatprep.subr.mxu1 %v11929_v16 }
 0x1f2   : > { %11025 = vmatmul.mubr.msk.f32.vlgmr.msra.gmra.mrb[2].mxu1 %vm15228_vm4, %v12275_v31  ;;  %v712_v41 = vpop.permute.xlu0 %711 }
 0x1f3   : > { %11028 = vmatpush3.xpose.msk.msra.mxu1 %vm15228_vm4, %v712_v41  ;;  %v794_v42 = vsel %vm15228_vm4, %v712_v41, 0.0  ;;  %11029 = vmatprep.mubr.msk.f32.mxu1 %vm15226_vm3, %v11929_v16 }
 0x1f4   : > { %795 = vadd.xlane.f32.xlu1 %v794_v42  ;;  %11037 = vmatprep.subr.mxu1 %v11929_v16 }
 0x1f6   : > { %11030 = vmatmul.mubr.msk.f32.vlgmr.msra.gmra.mrb[4].mxu1 %vm15228_vm4, %v12279_v32  ;;  %v12332_v5 = vpop.permute.xlu0 %811 }
 0x1f7   : > { %11039 = vmatprep.mubr.msk.f32.mxu1 %vm15226_vm3, %v11929_v16  ;;  %vm862_vm6 = vcmp.ne.s32.totalorder %v12332_v5, 0 }
 0x1f8   : > { %792 = vadd.xlane.f32.xlu1 %v791_v43 }
 0x1fa   : > { %v12336_v7 = vpop.permute.xlu0 %825 }
 0x1fb   : > { %vm15233_vm10 = vcmp.ne.s32.totalorder %v12336_v7, 0 }
 0x1fe   : > { %v12340_v9 = vpop.permute.xlu0 %832 }
 0x1ff   : > { %vm865_vm12 = vcmp.ne.s32.totalorder %v12340_v9, 0 }
 0x202   : > { %v12342_v14 = vpop.permute.xlu0 %853 }
 0x281   : > { %v12338_v8 = vpop.xlane.xlu1 %795 }
 0x285   : > { %v793_v10 = vpop.xlane.xlu1 %792 }
 0x286   : > { %vm797_vm5 = vcmp.eq.f32.partialorder %v793_v10, 0.0 }
 0x287   : > { %vm870_vm7 = vmor %vm797_vm5, %vm862_vm6 }
 0x288   : > { %vm871_vm9 = vmor %vm797_vm5, %vm863_vm8 }
 0x289   : > { %vm872_vm11 = vmor %vm797_vm5, %vm15233_vm10 }
 0x28a   : > { %vm873_vm13 = vmor %vm797_vm5, %vm865_vm12 }
 0x28b   : > { %vm874_vm15 = vmor %vm797_vm5, %vm866_vm14 }
 0x28c   : > { %vm875_vm2 = vmor %vm797_vm5, %vm15234_vm0 }
 0x2c5   : > { %v706_v44 = vpop.f32.mrb[2].mxu1 }
 0x2c6   : > { %v787_v45 = vmul.f32 0.35355338, %v706_v44  ;;  %v11026_v46 = vpop.f32.mrb[3].mxu1 }
 0x2c8   : > { %v891_v47 = vrot.slane %v787_v45, %v12266_v24  ;;  %v919_v48 = vrot.slane %v787_v45, %v12251_v15  ;;  %v898_v52 = vrot.slane %v787_v45, %v12244_v12  ;;  %v905_v54 = vrot.slane %v787_v45, %v12285_v34 }
 0x2c9   : > { %v783_v49 = vpop.f32.mrb[4].mxu1  ;;  %v912_v56 = vrot.slane %v787_v45, %v12289_v36  ;;  %v926_v58 = vrot.slane %v787_v45, %v12258_v20  ;;  %v933_v60 = vrot.slane %v787_v45, %v12293_v38  ;;  %v940_v62 = vrot.slane %v787_v45, %v12262_v22 }
 0x2ca   : > { %v788_v50 = vmul.f32 0.35355338, %v783_v49  ;;  %893 = vbcast.lane.b32.xlu0 %v891_v47, 256  ;;  %v11031_v51 = vpop.f32.mrb[5].mxu1  ;;  %921 = vbcast.lane.b32.xlu1 %v919_v48, 256 }
 0x2cc   : > { %v947_v53 = vrot.slane %v788_v50, %v12266_v24  ;;  %v961_v55 = vrot.slane %v788_v50, %v12285_v34  ;;  %v975_v57 = vrot.slane %v788_v50, %v12251_v15  ;;  %v982_v59 = vrot.slane %v788_v50, %v12258_v20 }
 0x2cd   : > { %v989_v61 = vrot.slane %v788_v50, %v12293_v38  ;;  %v954_v63 = vrot.slane %v788_v50, %v12244_v12  ;;  %v968_v0 = vrot.slane %v788_v50, %v12289_v36  ;;  %v996_v1 = vrot.slane %v788_v50, %v12262_v22 }
 0x2ce   : > { %900 = vbcast.lane.b32.xlu0 %v898_v52, 256  ;;  %949 = vbcast.lane.b32.xlu1 %v947_v53, 256 }
 0x2d2   : > { %907 = vbcast.lane.b32.xlu0 %v905_v54, 256  ;;  %963 = vbcast.lane.b32.xlu1 %v961_v55, 256 }
 0x2d6   : > { %914 = vbcast.lane.b32.xlu0 %v912_v56, 256  ;;  %977 = vbcast.lane.b32.xlu1 %v975_v57, 256 }
 0x2da   : > { %928 = vbcast.lane.b32.xlu0 %v926_v58, 256  ;;  %984 = vbcast.lane.b32.xlu1 %v982_v59, 256 }
 0x2de   : > { %935 = vbcast.lane.b32.xlu0 %v933_v60, 256  ;;  %991 = vbcast.lane.b32.xlu1 %v989_v61, 256 }
 0x2e2   : > { %942 = vbcast.lane.b32.xlu0 %v940_v62, 256 }
 0x2e6   : > { %956 = vbcast.lane.b32.xlu0 %v954_v63, 256  ;;  %v12459_v63 = vsub.s32 %v12246_v13, %v12241_v11 }
 0x2ea   : > { %970 = vbcast.lane.b32.xlu0 %v968_v0, 256 }
 0x2ee   : > { %998 = vbcast.lane.b32.xlu0 %v996_v1, 256 }
 0x33c   : > { %v894_v17 = vpop.permute.xlu0 %893  ;;  %v922_v28 = vpop.permute.xlu1 %921 }
 0x33d   : > { %v12348_v18 = vsel %vm870_vm7, -4.2949673e+09, %v894_v17  ;;  %v12376_v30 = vsel %vm874_vm15, -4.2949673e+09, %v922_v28  ;;  %vm868_vm7 = vcmp.ne.s32.totalorder %v12342_v14, 0 }
 0x33e   : > { %1049 = vperm.xlu1 %11412, %v12348_v18  }
 0x340   : > { %v901_v19 = vpop.permute.xlu0 %900  ;;  %v950_v37 = vpop.permute.xlu1 %949 }
 0x341   : > { %v12355_v21 = vsel %vm871_vm9, -4.2949673e+09, %v901_v19  ;;  %vm798_vm9 = vcmp.eq.f32.partialorder %v12338_v8, 0.0 }
 0x342   : > { %1052 = vperm.xlu0 %11413, %v12355_v21   ;;  %vm879_vm15 = vmor %vm798_vm9, %vm863_vm8 }
 0x344   : > { %v908_v23 = vpop.permute.xlu0 %907  ;;  %v964_v41 = vpop.permute.xlu1 %963 }
 0x345   : > { %v12362_v25 = vsel %vm872_vm11, -4.2949673e+09, %v908_v23  ;;  %vm876_vm11 = vmor %vm797_vm5, %vm868_vm7 }
 0x346   : > { %1055 = vperm.xlu1 %11412, %v12362_v25  }
 0x348   : > { %v915_v26 = vpop.permute.xlu0 %914  ;;  %v978_v48 = vpop.permute.xlu1 %977 }
 0x349   : > { %v12369_v27 = vsel %vm873_vm13, -4.2949673e+09, %v915_v26  ;;  %vm878_vm13 = vmor %vm798_vm9, %vm862_vm6 }
 0x34a   : > { %1058 = vperm.xlu1 %11412, %v12369_v27   ;;  %v12402_v43 = vsel %vm878_vm13, -4.2949673e+09, %v950_v37  ;;  %vm881_vm13 = vmor %vm798_vm9, %vm865_vm12 }
 0x34c   : > { %v929_v29 = vpop.permute.xlu0 %928  ;;  %v985_v52 = vpop.permute.xlu1 %984 }
 0x34d   : > { %v12383_v35 = vsel %vm875_vm2, -4.2949673e+09, %v929_v29  ;;  %vm15225_vm2 = vcmp.ne.s32.totalorder %v12334_v6, 0 }
 0x34e   : > { %1061 = vperm.xlu1 %11412, %v12376_v30   ;;  %vm877_vm1 = vmor %vm797_vm5, %vm15225_vm2 }
 0x34f   : > { %vm885_vm5 = vmor %vm798_vm9, %vm15225_vm2  ;;  %vm15229_vm2 = vcmask 1047559  }
 0x350   : > { %v936_v33 = vpop.permute.xlu0 %935  ;;  %v992_v55 = vpop.permute.xlu1 %991 }
 0x351   : > { %v12391_v40 = vsel %vm876_vm11, -4.2949673e+09, %v936_v33  ;;  %vm880_vm11 = vmor %vm798_vm9, %vm15233_vm10 }
 0x352   : > { %1064 = vperm.xlu1 %11412, %v12383_v35   ;;  %v12418_v47 = vsel %vm880_vm11, -4.2949673e+09, %v964_v41  ;;  %vm884_vm11 = vmor %vm798_vm9, %vm868_vm7 }
 0x353   : > { %v12454_v56 = vsel %vm884_vm11, -4.2949673e+09, %v992_v55  ;;  %vm15230_vm11 = vcmask 1046534  }
 0x354   : > { %v943_v39 = vpop.permute.xlu0 %942 }
 0x355   : > { %v12416_v46 = vsel %vm877_vm1, -4.2949673e+09, %v943_v39  ;;  %vm882_vm1 = vmor %vm798_vm9, %vm866_vm14 }
 0x356   : > { %1067 = vperm.xlu1 %11412, %v12391_v40   ;;  %v12440_v53 = vsel %vm882_vm1, -4.2949673e+09, %v978_v48  ;;  %vm15232_vm1 = vcmask 1044484  }
 0x358   : > { %v957_v42 = vpop.permute.xlu0 %956 }
 0x359   : > { %v12404_v44 = vsel %vm879_vm15, -4.2949673e+09, %v957_v42  ;;  %vm883_vm15 = vmor %vm798_vm9, %vm15234_vm0  ;;  %vm15236_vm9 = vcmask 1042434  }
 0x35a   : > { %1073 = vperm.xlu1 %11412, %v12402_v43   ;;  %1076 = vperm.xlu0 %11413, %v12404_v44   ;;  %v12447_v54 = vsel %vm883_vm15, -4.2949673e+09, %v985_v52  ;;  %vm15231_vm15 = vcmask 1045509  }
 0x35c   : > { %v971_v45 = vpop.permute.xlu0 %970 }
 0x35d   : > { %v12430_v50 = vsel %vm881_vm13, -4.2949673e+09, %v971_v45  ;;  %vm1160_vm13 = vcmask 1041409  }
 0x35e   : > { %1070 = vperm.xlu1 %11412, %v12416_v46   ;;  %1079 = vperm.xlu0 %11413, %v12418_v47  }
 0x360   : > { %v999_v49 = vpop.permute.xlu0 %998 }
 0x361   : > { %v12432_v51 = vsel %vm885_vm5, -4.2949673e+09, %v999_v49  ;;  %vm15235_vm5 = vcmask 1043459  }
 0x362   : > { %1082 = vperm.xlu0 %11413, %v12430_v50   ;;  %1094 = vperm.xlu1 %11412, %v12432_v51  }
 0x366   : > { %1085 = vperm.xlu0 %11413, %v12440_v53  }
 0x36a   : > { %1088 = vperm.xlu0 %11413, %v12447_v54  }
 0x36e   : > { %1091 = vperm.xlu0 %11413, %v12454_v56  }
 0x3bd   : > { %v1050_v57 = vpop.permute.xlu1 %1049 }
 0x3be   : > { %v1099_v10 = vrot.slane %v1050_v57, %v12459_v63 }
 0x3c1   : > { %v1053_v62 = vpop.permute.xlu0 %1052 }
 0x3c2   : > { %v1103_v1 = vrot.slane %v1053_v62, %v12459_v63 }
 0x3c4   : > { %v1161_v28 = vsel %vm1160_vm13, %v1103_v1, %v1099_v10 }
 0x3c5   : > { %v1056_v58 = vpop.permute.xlu1 %1055 }
 0x3c6   : > { %v1107_v8 = vrot.slane %v1056_v58, %v12459_v63 }
 0x3c8   : > { %v1163_v13 = vsel %vm15236_vm9, %v1107_v8, %v1161_v28 }
 0x3c9   : > { %v1059_v59 = vpop.permute.xlu1 %1058 }
 0x3ca   : > { %v1111_v17 = vrot.slane %v1059_v59, %v12459_v63 }
 0x3cc   : > { %v1165_v33 = vsel %vm15235_vm5, %v1111_v17, %v1163_v13 }
 0x3cd   : > { %v1062_v60 = vpop.permute.xlu1 %1061 }
 0x3ce   : > { %v1115_v19 = vrot.slane %v1062_v60, %v12459_v63 }
 0x3d0   : > { %v1167_v37 = vsel %vm15232_vm1, %v1115_v19, %v1165_v33 }
 0x3d1   : > { %v1065_v61 = vpop.permute.xlu1 %1064 }
 0x3d2   : > { %v1119_v11 = vrot.slane %v1065_v61, %v12459_v63 }
 0x3d4   : > { %v1169_v45 = vsel %vm15231_vm15, %v1119_v11, %v1167_v37 }
 0x3d5   : > { %v1068_v0 = vpop.permute.xlu1 %1067 }
 0x3d6   : > { %v1123_v29 = vrot.slane %v1068_v0, %v12459_v63 }
 0x3d8   : > { %v1171_v48 = vsel %vm15230_vm11, %v1123_v29, %v1169_v45 }
 0x3d9   : > { %v1074_v23 = vpop.permute.xlu1 %1073  ;;  %v1077_v26 = vpop.permute.xlu0 %1076 }
 0x3da   : > { %v1131_v58 = vrot.slane %v1074_v23, %v12459_v63  ;;  %v1135_v59 = vrot.slane %v1077_v26, %v12459_v63 }
 0x3dc   : > { %v1174_v1 = vsel %vm1160_vm13, %v1135_v59, %v1131_v58 }
 0x3dd   : > { %v1071_v39 = vpop.permute.xlu1 %1070  ;;  %v1080_v41 = vpop.permute.xlu0 %1079 }
 0x3de   : > { %v1127_v42 = vrot.slane %v1071_v39, %v12459_v63  ;;  %v1139_v60 = vrot.slane %v1080_v41, %v12459_v63 }
 0x3e0   : > { %v1173_v49 = vsel %vm15229_vm2, %v1127_v42, %v1171_v48  ;;  %v1175_v10 = vsel %vm15236_vm9, %v1139_v60, %v1174_v1 }
 0x3e1   : > { %v1083_v52 = vpop.permute.xlu0 %1082  ;;  %v1183_v55 = vsel %vm15228_vm4, %v1173_v49, -inf  ;;  %v1095_v17 = vpop.permute.xlu1 %1094 }
 0x3e2   : > { %1184 = vmax.xlane.f32.xlu0 %v1183_v55  ;;  %v1143_v61 = vrot.slane %v1083_v52, %v12459_v63  ;;  %v1159_v11 = vrot.slane %v1095_v17, %v12459_v63 }
 0x3e4   : > { %v1176_v19 = vsel %vm15235_vm5, %v1143_v61, %v1175_v10 }
 0x3e5   : > { %v1086_v57 = vpop.permute.xlu0 %1085 }
 0x3e6   : > { %v1147_v0 = vrot.slane %v1086_v57, %v12459_v63 }
 0x3e8   : > { %v1177_v23 = vsel %vm15232_vm1, %v1147_v0, %v1176_v19 }
 0x3e9   : > { %v1089_v62 = vpop.permute.xlu0 %1088 }
 0x3ea   : > { %v1151_v8 = vrot.slane %v1089_v62, %v12459_v63 }
 0x3ec   : > { %v1178_v13 = vsel %vm15231_vm15, %v1151_v8, %v1177_v23 }
 0x3ed   : > { %v1092_v28 = vpop.permute.xlu0 %1091 }
 0x3ee   : > { %v1155_v26 = vrot.slane %v1092_v28, %v12459_v63 }
 0x3f0   : > { %v1179_v29 = vsel %vm15230_vm11, %v1155_v26, %v1178_v13 }
 0x3f1   : > { %v1180_v33 = vsel %vm15229_vm2, %v1159_v11, %v1179_v29 }
 0x3f2   : > { %v1186_v37 = vsel %vm15228_vm4, %v1180_v33, -inf }
 0x3f3   : > { %1187 = vmax.xlane.f32.xlu1 %v1186_v37 }
 0x46f   : > { %v1185_v39 = vpop.xlane.xlu0 %1184 }
 0x470   : > { %v1194_v41 = vrot.slane %v1185_v39, %v12266_v24  ;;  %v1198_v42 = vrot.slane %v1185_v39, %v12244_v12  ;;  %v1202_v45 = vrot.slane %v1185_v39, %v12285_v34  ;;  %v1206_v48 = vrot.slane %v1185_v39, %v12289_v36 }
 0x471   : > { %v1210_v49 = vrot.slane %v1185_v39, %v12251_v15  ;;  %v1214_v61 = vrot.slane %v1185_v39, %v12258_v20  ;;  %v1218_v8 = vrot.slane %v1185_v39, %v12293_v38 }
 0x472   : > { %v1272_v52 = vsub.f32 %v12355_v21, %v1198_v42  ;;  %v1271_v55 = vsub.f32 %v12348_v18, %v1194_v41  ;;  %v1274_v57 = vsub.f32 %v12369_v27, %v1206_v48  ;;  %v1273_v58 = vsub.f32 %v12362_v25, %v1202_v45 }
 0x473   : > { %v1275_v0 = vsub.f32 %v12376_v30, %v1210_v49  ;;  %v1276_v18 = vsub.f32 %v12383_v35, %v1214_v61  ;;  %v1277_v25 = vsub.f32 %v12391_v40, %v1218_v8  ;;  %v1222_v35 = vrot.slane %v1185_v39, %v12262_v22 }
 0x474   : > { %v1289_v59 = vmul.f32 1.442695, %v1272_v52  ;;  %v1287_v60 = vmul.f32 1.442695, %v1271_v55  ;;  %v1293_v62 = vmul.f32 1.442695, %v1274_v57 }
 0x475   : > { %v1291_v1 = vmul.f32 1.442695, %v1273_v58  ;;  %v1295_v21 = vmul.f32 1.442695, %v1275_v0  ;;  %v1297_v27 = vmul.f32 1.442695, %v1276_v18  ;;  %v1278_v45 = vsub.f32 %v12416_v46, %v1222_v35 }
 0x476   : > { %11424 = vpow2.f32 %v1289_v59  ;;  %v1299_v26 = vmul.f32 1.442695, %v1277_v25 }
 0x477   : > { %11426 = vpow2.f32 %v1287_v60  ;;  %v1301_v49 = vmul.f32 1.442695, %v1278_v45 }
 0x478   : > { %11428 = vpow2.f32 %v1293_v62 }
 0x479   : > { %11430 = vpow2.f32 %v1291_v1 }
 0x47a   : > { %11432 = vpow2.f32 %v1295_v21 }
 0x47b   : > { %11434 = vpow2.f32 %v1297_v27 }
 0x47c   : > { %11436 = vpow2.f32 %v1299_v26 }
 0x480   : > { %v12507_v10 = vpop.eup %11424  ;;  %v1188_v17 = vpop.xlane.xlu1 %1187 }
 0x481   : > { %v12509_v19 = vpop.eup %11426  ;;  %v1226_v30 = vrot.slane %v1188_v17, %v12266_v24  ;;  %v1230_v28 = vrot.slane %v1188_v17, %v12244_v12  ;;  %v1234_v23 = vrot.slane %v1188_v17, %v12285_v34  ;;  %1339 = vperm.xlu1 %11412, %v12507_v10   ;;  %v1238_v40 = vrot.slane %v1188_v17, %v12289_v36 }
 0x482   : > { %1336 = vperm.xlu0 %11413, %v12509_v19   ;;  %v12521_v33 = vpop.eup %11428  ;;  %v1254_v39 = vrot.slane %v1188_v17, %v12262_v22  ;;  %v1246_v55 = vrot.slane %v1188_v17, %v12258_v20  ;;  %v1250_v59 = vrot.slane %v1188_v17, %v12293_v38 }
 0x483   : > { %v1280_v11 = vsub.f32 %v12404_v44, %v1230_v28  ;;  %v1279_v13 = vsub.f32 %v12402_v43, %v1226_v30  ;;  %v1281_v29 = vsub.f32 %v12418_v47, %v1234_v23  ;;  %v12523_v37 = vpop.eup %11430  ;;  %v1242_v44 = vrot.slane %v1188_v17, %v12251_v15 }
 0x484   : > { %v1282_v47 = vsub.f32 %v12430_v50, %v1238_v40  ;;  %v12531_v48 = vpop.eup %11432  ;;  %v1286_v52 = vsub.f32 %v12432_v51, %v1254_v39  ;;  %v1284_v61 = vsub.f32 %v12447_v54, %v1246_v55  ;;  %v1285_v0 = vsub.f32 %v12454_v56, %v1250_v59 }
 0x485   : > { %1345 = vperm.xlu1 %11412, %v12521_v33   ;;  %v1305_v41 = vmul.f32 1.442695, %v1280_v11  ;;  %v1303_v42 = vmul.f32 1.442695, %v1279_v13  ;;  %v1307_v43 = vmul.f32 1.442695, %v1281_v29  ;;  %v1283_v46 = vsub.f32 %v12440_v53, %v1242_v44  ;;  %v12537_v58 = vpop.eup %11434 }
 0x486   : > { %1342 = vperm.xlu0 %11413, %v12523_v37   ;;  %v1309_v57 = vmul.f32 1.442695, %v1282_v47  ;;  %v1317_v50 = vmul.f32 1.442695, %v1286_v52  ;;  %v12542_v62 = vpop.eup %11436  ;;  %v1313_v53 = vmul.f32 1.442695, %v1284_v61 }
 0x487   : > { %11438 = vpow2.f32 %v1305_v41  ;;  %v1311_v60 = vmul.f32 1.442695, %v1283_v46  ;;  %v1315_v54 = vmul.f32 1.442695, %v1285_v0 }
 0x488   : > { %11440 = vpow2.f32 %v1303_v42 }
 0x489   : > { %1348 = vperm.xlu1 %11412, %v12531_v48   ;;  %11442 = vpow2.f32 %v1307_v43 }
 0x48a   : > { %11444 = vpow2.f32 %v1301_v49 }
 0x48b   : > { %11446 = vpow2.f32 %v1309_v57 }
 0x48c   : > { %11448 = vpow2.f32 %v1317_v50 }
 0x48d   : > { %1351 = vperm.xlu1 %11412, %v12537_v58   ;;  %11450 = vpow2.f32 %v1311_v60 }
 0x48e   : > { %11452 = vpow2.f32 %v1313_v53 }
 0x48f   : > { %11454 = vpow2.f32 %v1315_v54 }
 0x491   : > { %v12544_v51 = vpop.eup %11438  ;;  %1354 = vperm.xlu1 %11412, %v12542_v62  }
 0x492   : > { %1363 = vperm.xlu0 %11413, %v12544_v51   ;;  %v12549_v1 = vpop.eup %11440 }
 0x493   : > { %v12551_v8 = vpop.eup %11442 }
 0x494   : > { %v12555_v21 = vpop.eup %11444 }
 0x495   : > { %1360 = vperm.xlu1 %11412, %v12549_v1   ;;  %v12557_v18 = vpop.eup %11446 }
 0x496   : > { %1366 = vperm.xlu0 %11413, %v12551_v8   ;;  %v12561_v56 = vpop.eup %11448 }
 0x497   : > { %v12563_v27 = vpop.eup %11450 }
 0x498   : > { %v12567_v25 = vpop.eup %11452 }
 0x499   : > { %1357 = vperm.xlu1 %11412, %v12555_v21   ;;  %v12570_v17 = vpop.eup %11454 }
 0x49a   : > { %1369 = vperm.xlu0 %11413, %v12557_v18  }
 0x49d   : > { %1381 = vperm.xlu1 %11412, %v12561_v56  }
 0x49e   : > { %1372 = vperm.xlu0 %11413, %v12563_v27  }
 0x4a2   : > { %1375 = vperm.xlu0 %11413, %v12567_v25  }
 0x4a6   : > { %1378 = vperm.xlu0 %11413, %v12570_v17  }
 0x500   : > { %v1340_v30 = vpop.permute.xlu1 %1339 }
 0x501   : > { %v1337_v23 = vpop.permute.xlu0 %1336  ;;  %v1390_v11 = vrot.slane %v1340_v30, %v12459_v63 }
 0x502   : > { %v1386_v13 = vrot.slane %v1337_v23, %v12459_v63 }
 0x504   : > { %v1346_v28 = vpop.permute.xlu1 %1345  ;;  %v1447_v42 = vsel %vm1160_vm13, %v1390_v11, %v1386_v13 }
 0x505   : > { %v1343_v40 = vpop.permute.xlu0 %1342  ;;  %v1398_v45 = vrot.slane %v1346_v28, %v12459_v63 }
 0x506   : > { %v1394_v29 = vrot.slane %v1343_v40, %v12459_v63 }
 0x508   : > { %v1349_v35 = vpop.permute.xlu1 %1348  ;;  %v1448_v44 = vsel %vm15236_vm9, %v1394_v29, %v1447_v42 }
 0x509   : > { %v1402_v43 = vrot.slane %v1349_v35, %v12459_v63  ;;  %v1449_v57 = vsel %vm15235_vm5, %v1398_v45, %v1448_v44 }
 0x50b   : > { %v1450_v46 = vsel %vm15232_vm1, %v1402_v43, %v1449_v57 }
 0x50c   : > { %v1352_v26 = vpop.permute.xlu1 %1351 }
 0x50d   : > { %v1406_v49 = vrot.slane %v1352_v26, %v12459_v63 }
 0x50f   : > { %v1451_v61 = vsel %vm15231_vm15, %v1406_v49, %v1450_v46 }
 0x510   : > { %v1355_v41 = vpop.permute.xlu1 %1354 }
 0x511   : > { %v1364_v39 = vpop.permute.xlu0 %1363  ;;  %v1410_v55 = vrot.slane %v1355_v41, %v12459_v63 }
 0x512   : > { %v1422_v23 = vrot.slane %v1364_v39, %v12459_v63 }
 0x513   : > { %v1452_v53 = vsel %vm15230_vm11, %v1410_v55, %v1451_v61 }
 0x514   : > { %v1361_v47 = vpop.permute.xlu1 %1360 }
 0x515   : > { %v1367_v52 = vpop.permute.xlu0 %1366  ;;  %v1418_v30 = vrot.slane %v1361_v47, %v12459_v63 }
 0x516   : > { %v1426_v35 = vrot.slane %v1367_v52, %v12459_v63 }
 0x517   : > { %v1454_v26 = vsel %vm1160_vm13, %v1422_v23, %v1418_v30 }
 0x518   : > { %v1358_v50 = vpop.permute.xlu1 %1357  ;;  %v1455_v41 = vsel %vm15236_vm9, %v1426_v35, %v1454_v26 }
 0x519   : > { %v1414_v59 = vrot.slane %v1358_v50, %v12459_v63  ;;  %v1370_v60 = vpop.permute.xlu0 %1369 }
 0x51a   : > { %v1430_v40 = vrot.slane %v1370_v60, %v12459_v63 }
 0x51b   : > { %v1453_v0 = vsel %vm15229_vm2, %v1414_v59, %v1452_v53 }
 0x51c   : > { %v1463_v54 = vsel %vm15228_vm4, %v1453_v0, 0.0  ;;  %v1382_v42 = vpop.permute.xlu1 %1381  ;;  %v1456_v45 = vsel %vm15235_vm5, %v1430_v40, %v1455_v41 }
 0x51d   : > { %1464 = vadd.xlane.f32.xlu0 %v1463_v54  ;;  %v1373_v28 = vpop.permute.xlu0 %1372  ;;  %v1446_v47 = vrot.slane %v1382_v42, %v12459_v63 }
 0x51e   : > { %v1434_v13 = vrot.slane %v1373_v28, %v12459_v63 }
 0x520   : > { %v1457_v43 = vsel %vm15232_vm1, %v1434_v13, %v1456_v45 }
 0x521   : > { %v1376_v11 = vpop.permute.xlu0 %1375 }
 0x522   : > { %v1438_v29 = vrot.slane %v1376_v11, %v12459_v63 }
 0x524   : > { %v1458_v49 = vsel %vm15231_vm15, %v1438_v29, %v1457_v43 }
 0x525   : > { %v1379_v44 = vpop.permute.xlu0 %1378 }
 0x526   : > { %v1442_v39 = vrot.slane %v1379_v44, %v12459_v63 }
 0x528   : > { %v1459_v52 = vsel %vm15230_vm11, %v1442_v39, %v1458_v49 }
 0x529   : > { %v1460_v55 = vsel %vm15229_vm2, %v1446_v47, %v1459_v52 }
 0x52a   : > { %v1466_v57 = vsel %vm15228_vm4, %v1460_v55, 0.0 }
 0x52b   : > { %1467 = vadd.xlane.f32.xlu1 %v1466_v57 }
 0x5aa   : > { %v1465_v46 = vpop.xlane.xlu0 %1464 }
 0x5ab   : > { %11456 = vrcp.f32 %v1465_v46 }
 0x5b5   : > { %v11457_v50 = vpop.eup %11456 }
 0x5b6   : > { %v1480_v59 = vrot.slane %v11457_v50, %v12244_v12  ;;  %v1476_v60 = vrot.slane %v11457_v50, %v12266_v24  ;;  %v1488_v54 = vrot.slane %v11457_v50, %v12289_v36  ;;  %v1484_v30 = vrot.slane %v11457_v50, %v12285_v34 }
 0x5b7   : > { %v1492_v35 = vrot.slane %v11457_v50, %v12251_v15  ;;  %v1500_v13 = vrot.slane %v11457_v50, %v12293_v38  ;;  %v1504_v45 = vrot.slane %v11457_v50, %v12262_v22 }
 0x5b8   : > { %v1468_v61 = vpop.xlane.xlu1 %1467  ;;  %v1554_v53 = vmul.f32 %v12507_v10, %v1480_v59  ;;  %v1553_v0 = vmul.f32 %v12509_v19, %v1476_v60  ;;  %v1556_v28 = vmul.f32 %v12521_v33, %v1488_v54  ;;  %v1555_v23 = vmul.f32 %v12523_v37, %v1484_v30 }
 0x5b9   : > { %11458 = vrcp.f32 %v1468_v61  ;;  %v1557_v26 = vmul.f32 %v12531_v48, %v1492_v35  ;;  %v1496_v10 = vrot.slane %v11457_v50, %v12258_v20  ;;  %v1559_v29 = vmul.f32 %v12542_v62, %v1500_v13 }
 0x5ba   : > { %1581 = vperm.xlu1 %11412, %v1554_v53   ;;  %1578 = vperm.xlu0 %11413, %v1553_v0   ;;  %v1560_v62 = vmul.f32 %v12555_v21, %v1504_v45 }
 0x5bb   : > { %v1558_v40 = vmul.f32 %v12537_v58, %v1496_v10 }
 0x5be   : > { %1587 = vperm.xlu1 %11412, %v1556_v28   ;;  %1584 = vperm.xlu0 %11413, %v1555_v23  }
 0x5c2   : > { %1590 = vperm.xlu1 %11412, %v1557_v26  }
 0x5c3   : > { %v11459_v19 = vpop.eup %11458 }
 0x5c4   : > { %v1512_v11 = vrot.slane %v11459_v19, %v12244_v12  ;;  %v1516_v37 = vrot.slane %v11459_v19, %v12285_v34  ;;  %v1508_v48 = vrot.slane %v11459_v19, %v12266_v24  ;;  %v1520_v42 = vrot.slane %v11459_v19, %v12289_v36 }
 0x5c5   : > { %v1524_v44 = vrot.slane %v11459_v19, %v12251_v15  ;;  %v1536_v43 = vrot.slane %v11459_v19, %v12262_v22  ;;  %v1528_v39 = vrot.slane %v11459_v19, %v12258_v20 }
 0x5c6   : > { %1593 = vperm.xlu1 %11412, %v1558_v40   ;;  %v1562_v33 = vmul.f32 %v12544_v51, %v1512_v11  ;;  %v1563_v41 = vmul.f32 %v12551_v8, %v1516_v37  ;;  %v1561_v58 = vmul.f32 %v12549_v1, %v1508_v48  ;;  %v1564_v51 = vmul.f32 %v12557_v18, %v1520_v42 }
 0x5c7   : > { %v1565_v8 = vmul.f32 %v12563_v27, %v1524_v44  ;;  %v1568_v1 = vmul.f32 %v12561_v56, %v1536_v43  ;;  %v1566_v47 = vmul.f32 %v12567_v25, %v1528_v39  ;;  %v1532_v18 = vrot.slane %v11459_v19, %v12293_v38 }
 0x5c8   : > { %1727 = vperm.xlu0 %11413, %v1562_v33  }
 0x5c9   : > { %v1567_v21 = vmul.f32 %v12570_v17, %v1532_v18 }
 0x5ca   : > { %1596 = vperm.xlu1 %11412, %v1559_v29  }
 0x5cc   : > { %1730 = vperm.xlu0 %11413, %v1563_v41  }
 0x5ce   : > { %1724 = vperm.xlu1 %11412, %v1561_v58  }
 0x5d0   : > { %1733 = vperm.xlu0 %11413, %v1564_v51  }
 0x5d2   : > { %1599 = vperm.xlu1 %11412, %v1560_v62  }
 0x5d4   : > { %1736 = vperm.xlu0 %11413, %v1565_v8  }
 0x5d6   : > { %1745 = vperm.xlu1 %11412, %v1568_v1  }
 0x5d8   : > { %1739 = vperm.xlu0 %11413, %v1566_v47  }
 0x5da   : > { %1786 = vrot.lane.b32.xlu1 %v12279_v32, %s11932_s27 }
 0x5dc   : > { %1742 = vperm.xlu0 %11413, %v1567_v21  }
 0x5de   : > { %1941 = vrot.lane.b32.xlu1 %v12279_v32, %s11933_s21 }
 0x5e0   : > { %1640 = vrot.lane.b32.xlu0 %v12275_v31, %s11932_s27  ;;  %s11942_s27 = smov 8  }
 0x5e2   : > { %1939 = vrot.lane.b32.xlu1 %v12279_v32, %s11934_s17 }
 0x5e4   : > { %1863 = vrot.lane.b32.xlu0 %v12275_v31, %s11933_s21 }
 0x5e8   : > { %1861 = vrot.lane.b32.xlu0 %v12275_v31, %s11934_s17 }
 0x639   : > { %v1582_v56 = vpop.permute.xlu1 %1581  ;;  %v1579_v27 = vpop.permute.xlu0 %1578 }
 0x63a   : > { %v1608_v54 = vrot.slane %v1582_v56, %v12459_v63  ;;  %v1604_v30 = vrot.slane %v1579_v27, %v12459_v63 }
 0x63c   : > { %v1633_v40 = vsel %vm1160_vm13, %v1608_v54, %v1604_v30 }
 0x63d   : > { %v1588_v25 = vpop.permute.xlu1 %1587  ;;  %v1585_v49 = vpop.permute.xlu0 %1584 }
 0x63e   : > { %v1612_v28 = vrot.slane %v1585_v49, %v12459_v63  ;;  %v1616_v11 = vrot.slane %v1588_v25, %v12459_v63 }
 0x640   : > { %v1634_v37 = vsel %vm15236_vm9, %v1612_v28, %v1633_v40 }
 0x641   : > { %v1591_v17 = vpop.permute.xlu1 %1590  ;;  %v1635_v44 = vsel %vm15235_vm5, %v1616_v11, %v1634_v37 }
 0x642   : > { %v1620_v29 = vrot.slane %v1591_v17, %v12459_v63 }
 0x644   : > { %v1636_v39 = vsel %vm15232_vm1, %v1620_v29, %v1635_v44 }
 0x645   : > { %v1594_v52 = vpop.permute.xlu1 %1593 }
 0x646   : > { %v1624_v42 = vrot.slane %v1594_v52, %v12459_v63 }
 0x647   : > { %v1728_v55 = vpop.permute.xlu0 %1727 }
 0x648   : > { %v1754_v53 = vrot.slane %v1728_v55, %v12459_v63  ;;  %v1637_v21 = vsel %vm15231_vm15, %v1624_v42, %v1636_v39 }
 0x649   : > { %v1597_v57 = vpop.permute.xlu1 %1596 }
 0x64a   : > { %v1628_v58 = vrot.slane %v1597_v57, %v12459_v63 }
 0x64b   : > { %v1731_v46 = vpop.permute.xlu0 %1730 }
 0x64c   : > { %v1758_v26 = vrot.slane %v1731_v46, %v12459_v63  ;;  %v1638_v49 = vsel %vm15230_vm11, %v1628_v58, %v1637_v21 }
 0x64d   : > { %v1725_v50 = vpop.permute.xlu1 %1724 }
 0x64e   : > { %v1750_v60 = vrot.slane %v1725_v50, %v12459_v63 }
 0x64f   : > { %v1734_v59 = vpop.permute.xlu0 %1733 }
 0x650   : > { %v1779_v23 = vsel %vm1160_vm13, %v1754_v53, %v1750_v60  ;;  %v1762_v10 = vrot.slane %v1734_v59, %v12459_v63 }
 0x651   : > { %v1600_v61 = vpop.permute.xlu1 %1599  ;;  %v1780_v13 = vsel %vm15236_vm9, %v1758_v26, %v1779_v23 }
 0x652   : > { %v1781_v45 = vsel %vm15235_vm5, %v1762_v10, %v1780_v13  ;;  %v1632_v62 = vrot.slane %v1600_v61, %v12459_v63 }
 0x653   : > { %v1737_v0 = vpop.permute.xlu0 %1736 }
 0x654   : > { %v1766_v33 = vrot.slane %v1737_v0, %v12459_v63  ;;  %v1639_v52 = vsel %vm15229_vm2, %v1632_v62, %v1638_v49 }
 0x655   : > { %v1746_v35 = vpop.permute.xlu1 %1745 }
 0x656   : > { %v1782_v43 = vsel %vm15232_vm1, %v1766_v33, %v1781_v45  ;;  %v1778_v1 = vrot.slane %v1746_v35, %v12459_v63 }
 0x657   : > { %v1740_v19 = vpop.permute.xlu0 %1739 }
 0x658   : > { %v1770_v48 = vrot.slane %v1740_v19, %v12459_v63 }
 0x659   : > { %v1787_v41 = vpop.permute.xlu1 %1786 }
 0x65a   : > { %11038 = vmatpush3.msra.mxu1 %v1787_v41  ;;  %v1783_v47 = vsel %vm15231_vm15, %v1770_v48, %v1782_v43 }
 0x65b   : > { %v1743_v51 = vpop.permute.xlu0 %1742  ;;  %11047 = vmatprep.subr.mxu1 %v11929_v16 }
 0x65c   : > { %v1774_v8 = vrot.slane %v1743_v51, %v12459_v63 }
 0x65d   : > { %v1942_v18 = vpop.permute.xlu1 %1941 }
 0x65e   : > { %v1784_v56 = vsel %vm15230_vm11, %v1774_v8, %v1783_v47  ;;  %v2024_v27 = vsel %vm15228_vm4, %v1942_v18, 0.0 }
 0x65f   : > { %2025 = vadd.xlane.f32.xlu1 %v2024_v27  ;;  %v1641_v25 = vpop.permute.xlu0 %1640  ;;  %v1785_v17 = vsel %vm15229_vm2, %v1778_v1, %v1784_v56 }
 0x660   : > { %11033 = vmatpush3.msra.mxu0 %v1641_v25  ;;  %11040 = vmatmul.mubr.msk.f32.vlgmr.msra.gmra.mrb[6].mxu1 %vm15228_vm4, %v1785_v17 }
 0x661   : > { %11035 = vmatmul.mubr.msk.f32.vlgmr.msra.gmra.mrb[0].mxu0 %vm15228_vm4, %v1639_v52  ;;  %11048 = vmatpush3.xpose.msk.msra.mxu1 %vm15228_vm4, %v1942_v18  ;;  %v1940_v55 = vpop.permute.xlu1 %1939 }
 0x662   : > { %11049 = vmatprep.mubr.msk.f32.mxu1 %vm15226_vm3, %v11929_v16  ;;  %11042 = vmatprep.subr.mxu0 %v11929_v16 }
 0x663   : > { %v1864_v57 = vpop.permute.xlu0 %1863  ;;  %11044 = vmatprep.mubr.msk.f32.mxu0 %vm15226_vm3, %v11929_v16  ;;  %11057 = vmatprep.subr.mxu1 %v11929_v16 }
 0x664   : > { %11050 = vmatmul.mubr.msk.f32.vlgmr.msra.gmra.mrb[8].mxu1 %vm15228_vm4, %v1940_v55  ;;  %v2021_v46 = vsel %vm15228_vm4, %v1864_v57, 0.0 }
 0x665   : > { %2022 = vadd.xlane.f32.xlu0 %v2021_v46  ;;  %11059 = vmatprep.mubr.msk.f32.mxu1 %vm15226_vm3, %v11929_v16 }
 0x667   : > { %11043 = vmatpush3.xpose.msk.msra.mxu0 %vm15228_vm4, %v1864_v57  ;;  %v1862_v50 = vpop.permute.xlu0 %1861 }
 0x668   : > { %11052 = vmatprep.subr.mxu0 %v11929_v16 }
 0x66a   : > { %11045 = vmatmul.mubr.msk.f32.vlgmr.msra.gmra.mrb[2].mxu0 %vm15228_vm4, %v1862_v50 }
 0x66b   : > { %11054 = vmatprep.mubr.msk.f32.mxu0 %vm15226_vm3, %v11929_v16 }
 0x6ec   : > { %v2026_v43 = vpop.xlane.xlu1 %2025 }
 0x6ed   : > { %vm2028_vm15 = vcmp.eq.f32.partialorder %v2026_v43, 0.0 }
 0x6f2   : > { %v2023_v62 = vpop.xlane.xlu0 %2022 }
 0x6f3   : > { %vm2027_vm3 = vcmp.eq.f32.partialorder %v2023_v62, 0.0 }
 0x6f4   : > { %vm2034_vm4 = vmor %vm2027_vm3, %vm863_vm8 }
 0x6f5   : > { %vm2033_vm2 = vmor %vm2027_vm3, %vm862_vm6 }
 0x6f6   : > { %vm2036_vm11 = vmor %vm2027_vm3, %vm865_vm12 }
 0x6f7   : > { %vm2035_vm1 = vmor %vm2027_vm3, %vm15233_vm10 }
 0x733   : > { %v12697_v59 = vpop.f32.mrb[6].mxu1 }
 0x734   : > { %v12699_v60 = vpop.f32.mrb[0].mxu0  ;;  %v11041_v61 = vpop.f32.mrb[7].mxu1 }
 0x735   : > { %v11036_v53 = vpop.f32.mrb[1].mxu0 }
 0x737   : > { %v2013_v0 = vpop.f32.mrb[8].mxu1 }
 0x738   : > { %v11051_v54 = vpop.f32.mrb[9].mxu1  ;;  %v2018_v10 = vmul.f32 0.35355338, %v2013_v0 }
 0x73a   : > { %v2117_v13 = vrot.slane %v2018_v10, %v12244_v12  ;;  %v2124_v37 = vrot.slane %v2018_v10, %v12285_v34  ;;  %v2131_v48 = vrot.slane %v2018_v10, %v12289_v36  ;;  %v2110_v41 = vrot.slane %v2018_v10, %v12266_v24 }
 0x73b   : > { %v2138_v42 = vrot.slane %v2018_v10, %v12251_v15  ;;  %v2145_v45 = vrot.slane %v2018_v10, %v12258_v20  ;;  %v2159_v51 = vrot.slane %v2018_v10, %v12262_v22  ;;  %v2152_v44 = vrot.slane %v2018_v10, %v12293_v38 }
 0x73d   : > { %v1935_v30 = vpop.f32.mrb[2].mxu0 }
 0x73e   : > { %v2017_v28 = vmul.f32 0.35355338, %v1935_v30  ;;  %v11046_v23 = vpop.f32.mrb[3].mxu0 }
 0x740   : > { %v2061_v35 = vrot.slane %v2017_v28, %v12244_v12  ;;  %v2054_v26 = vrot.slane %v2017_v28, %v12266_v24  ;;  %v2075_v19 = vrot.slane %v2017_v28, %v12289_v36  ;;  %v2068_v40 = vrot.slane %v2017_v28, %v12285_v34 }
 0x741   : > { %v2082_v11 = vrot.slane %v2017_v28, %v12251_v15  ;;  %v2089_v33 = vrot.slane %v2017_v28, %v12258_v20  ;;  %v2096_v29 = vrot.slane %v2017_v28, %v12293_v38  ;;  %v2103_v58 = vrot.slane %v2017_v28, %v12262_v22 }
 0x742   : > { %2063 = vbcast.lane.b32.xlu1 %v2061_v35, 256  ;;  %2056 = vbcast.lane.b32.xlu0 %v2054_v26, 256 }
 0x746   : > { %2077 = vbcast.lane.b32.xlu1 %v2075_v19, 256  ;;  %2070 = vbcast.lane.b32.xlu0 %v2068_v40, 256 }
 0x74a   : > { %2084 = vbcast.lane.b32.xlu1 %v2082_v11, 256  ;;  %2119 = vbcast.lane.b32.xlu0 %v2117_v13, 256 }
 0x74e   : > { %2091 = vbcast.lane.b32.xlu1 %v2089_v33, 256  ;;  %2126 = vbcast.lane.b32.xlu0 %v2124_v37, 256 }
 0x752   : > { %2098 = vbcast.lane.b32.xlu1 %v2096_v29, 256  ;;  %2133 = vbcast.lane.b32.xlu0 %v2131_v48, 256 }
 0x756   : > { %2112 = vbcast.lane.b32.xlu1 %v2110_v41, 256  ;;  %2140 = vbcast.lane.b32.xlu0 %v2138_v42, 256 }
 0x75a   : > { %2105 = vbcast.lane.b32.xlu1 %v2103_v58, 256  ;;  %2147 = vbcast.lane.b32.xlu0 %v2145_v45, 256 }
 0x75e   : > { %2161 = vbcast.lane.b32.xlu1 %v2159_v51, 256  ;;  %2154 = vbcast.lane.b32.xlu0 %v2152_v44, 256 }
 0x7b4   : > { %v2064_v8 = vpop.permute.xlu1 %2063  ;;  %v2057_v39 = vpop.permute.xlu0 %2056 }
 0x7b5   : > { %v12723_v1 = vsel %vm2034_vm4, -4.2949673e+09, %v2064_v8  ;;  %v12725_v47 = vsel %vm2033_vm2, -4.2949673e+09, %v2057_v39  ;;  %vm2042_vm4 = vmor %vm2028_vm15, %vm863_vm8 }
 0x7b6   : > { %2215 = vperm.xlu1 %11412, %v12723_v1   ;;  %2212 = vperm.xlu0 %11413, %v12725_v47   ;;  %vm2037_vm2 = vmor %vm2027_vm3, %vm866_vm14 }
 0x7b8   : > { %v2078_v18 = vpop.permute.xlu1 %2077  ;;  %v2071_v21 = vpop.permute.xlu0 %2070 }
 0x7b9   : > { %v12735_v56 = vsel %vm2036_vm11, -4.2949673e+09, %v2078_v18  ;;  %v12737_v27 = vsel %vm2035_vm1, -4.2949673e+09, %v2071_v21  ;;  %vm2043_vm1 = vmor %vm2028_vm15, %vm15233_vm10 }
 0x7ba   : > { %2221 = vperm.xlu1 %11412, %v12735_v56   ;;  %2218 = vperm.xlu0 %11413, %v12737_v27   ;;  %vm2038_vm11 = vmor %vm2027_vm3, %vm15234_vm0 }
 0x7bc   : > { %v2085_v25 = vpop.permute.xlu1 %2084  ;;  %v2120_v17 = vpop.permute.xlu0 %2119 }
 0x7bd   : > { %v12747_v49 = vsel %vm2037_vm2, -4.2949673e+09, %v2085_v25  ;;  %v12749_v52 = vsel %vm2042_vm4, -4.2949673e+09, %v2120_v17  ;;  %vm2044_vm4 = vmor %vm2028_vm15, %vm865_vm12 }
 0x7be   : > { %2224 = vperm.xlu1 %11412, %v12747_v49   ;;  %2239 = vperm.xlu0 %11413, %v12749_v52   ;;  %vm2039_vm2 = vmor %vm2027_vm3, %vm868_vm7 }
 0x7c0   : > { %v2092_v55 = vpop.permute.xlu1 %2091  ;;  %v2127_v57 = vpop.permute.xlu0 %2126 }
 0x7c1   : > { %v12759_v46 = vsel %vm2038_vm11, -4.2949673e+09, %v2092_v55  ;;  %v12761_v50 = vsel %vm2043_vm1, -4.2949673e+09, %v2127_v57  ;;  %vm2041_vm1 = vmor %vm2028_vm15, %vm862_vm6 }
 0x7c2   : > { %2227 = vperm.xlu1 %11412, %v12759_v46   ;;  %2242 = vperm.xlu0 %11413, %v12761_v50   ;;  %vm2045_vm11 = vmor %vm2028_vm15, %vm866_vm14 }
 0x7c4   : > { %v2099_v61 = vpop.permute.xlu1 %2098  ;;  %v2134_v53 = vpop.permute.xlu0 %2133 }
 0x7c5   : > { %v12771_v0 = vsel %vm2039_vm2, -4.2949673e+09, %v2099_v61  ;;  %v12773_v54 = vsel %vm2044_vm4, -4.2949673e+09, %v2134_v53  ;;  %vm2046_vm4 = vmor %vm2028_vm15, %vm15234_vm0  ;;  %vm15260_vm2 = vcmp.ne.s32.totalorder %v12334_v6, 0 }
 0x7c6   : > { %2230 = vperm.xlu1 %11412, %v12771_v0   ;;  %2245 = vperm.xlu0 %11413, %v12773_v54   ;;  %vm2040_vm10 = vmor %vm2027_vm3, %vm15260_vm2  ;;  %vm15262_vm3 = vcmask 1044484  }
 0x7c7   : > { %vm2047_vm0 = vmor %vm2028_vm15, %vm868_vm7 }
 0x7c8   : > { %v2113_v30 = vpop.permute.xlu1 %2112  ;;  %v2141_v28 = vpop.permute.xlu0 %2140 }
 0x7c9   : > { %v12783_v23 = vsel %vm2041_vm1, -4.2949673e+09, %v2113_v30  ;;  %v12785_v35 = vsel %vm2045_vm11, -4.2949673e+09, %v2141_v28  ;;  %vm15261_vm1 = vmmov %vm15260_vm2  ;;  %vm15267_vm2 = vcmask 64512  }
 0x7ca   : > { %2236 = vperm.xlu1 %11412, %v12783_v23   ;;  %2248 = vperm.xlu0 %11413, %v12785_v35   ;;  %vm2048_vm11 = vmor %vm2028_vm15, %vm15261_vm1 }
 0x7cb   : > { %vm15265_vm15 = vmmov %vm15262_vm3 }
 0x7cc   : > { %v2106_v26 = vpop.permute.xlu1 %2105  ;;  %v2148_v10 = vpop.permute.xlu0 %2147 }
 0x7cd   : > { %v12795_v19 = vsel %vm2040_vm10, -4.2949673e+09, %v2106_v26  ;;  %v12797_v40 = vsel %vm2046_vm4, -4.2949673e+09, %v2148_v10  ;;  %vm15263_vm10 = vcmask 1045509   ;;  %vm15266_vm4 = vcmask 1047559  }
 0x7ce   : > { %2233 = vperm.xlu1 %11412, %v12795_v19   ;;  %2251 = vperm.xlu0 %11413, %v12797_v40   ;;  %vm15268_vm1 = vmmov %vm15263_vm10 }
 0x7d0   : > { %v2162_v11 = vpop.permute.xlu1 %2161  ;;  %v2155_v13 = vpop.permute.xlu0 %2154 }
 0x7d1   : > { %v12807_v33 = vsel %vm2048_vm11, -4.2949673e+09, %v2162_v11  ;;  %v12809_v37 = vsel %vm2047_vm0, -4.2949673e+09, %v2155_v13  ;;  %vm15264_vm0 = vcmask 1046534  }
 0x7d2   : > { %2257 = vperm.xlu1 %11412, %v12807_v33   ;;  %2254 = vperm.xlu0 %11413, %v12809_v37   ;;  %vm15269_vm11 = vmmov %vm15264_vm0 }
 0x835   : > { %v2216_v29 = vpop.permute.xlu1 %2215  ;;  %v2213_v48 = vpop.permute.xlu0 %2212 }
 0x836   : > { %v2266_v62 = vrot.slane %v2216_v29, %v12459_v63  ;;  %v2262_v43 = vrot.slane %v2213_v48, %v12459_v63 }
 0x838   : > { %v2323_v21 = vsel %vm1160_vm13, %v2266_v62, %v2262_v43 }
 0x839   : > { %v2222_v41 = vpop.permute.xlu1 %2221  ;;  %v2219_v42 = vpop.permute.xlu0 %2218 }
 0x83a   : > { %v2270_v8 = vrot.slane %v2219_v42, %v12459_v63  ;;  %v2274_v25 = vrot.slane %v2222_v41, %v12459_v63 }
 0x83c   : > { %v2324_v17 = vsel %vm15236_vm9, %v2270_v8, %v2323_v21 }
 0x83d   : > { %v2225_v58 = vpop.permute.xlu1 %2224  ;;  %v2240_v45 = vpop.permute.xlu0 %2239  ;;  %v2325_v11 = vsel %vm15235_vm5, %v2274_v25, %v2324_v17 }
 0x83e   : > { %v2278_v55 = vrot.slane %v2225_v58, %v12459_v63  ;;  %v2298_v53 = vrot.slane %v2240_v45, %v12459_v63 }
 0x840   : > { %v2326_v48 = vsel %vm15262_vm3, %v2278_v55, %v2325_v11  ;;  %vm15270_vm3 = vmmov %vm15266_vm4 }
 0x841   : > { %v2228_v51 = vpop.permute.xlu1 %2227  ;;  %v2243_v44 = vpop.permute.xlu0 %2242 }
 0x842   : > { %v2282_v30 = vrot.slane %v2228_v51, %v12459_v63  ;;  %v2302_v26 = vrot.slane %v2243_v44, %v12459_v63 }
 0x844   : > { %v2327_v45 = vsel %vm15263_vm10, %v2282_v30, %v2326_v48  ;;  %vm15271_vm10 = vmmov %vm15267_vm2 }
 0x845   : > { %v2231_v39 = vpop.permute.xlu1 %2230  ;;  %v2246_v18 = vpop.permute.xlu0 %2245 }
 0x846   : > { %v2286_v10 = vrot.slane %v2231_v39, %v12459_v63  ;;  %v2306_v13 = vrot.slane %v2246_v18, %v12459_v63 }
 0x848   : > { %v2328_v8 = vsel %vm15264_vm0, %v2286_v10, %v2327_v45  ;;  %vm15272_vm0 = vmmov %vm15265_vm15 }
 0x849   : > { %v2237_v57 = vpop.permute.xlu1 %2236  ;;  %v2249_v61 = vpop.permute.xlu0 %2248 }
 0x84a   : > { %v2294_v28 = vrot.slane %v2237_v57, %v12459_v63  ;;  %v2310_v44 = vrot.slane %v2249_v61, %v12459_v63 }
 0x84c   : > { %v2330_v29 = vsel %vm1160_vm13, %v2298_v53, %v2294_v28 }
 0x84d   : > { %v2331_v41 = vsel %vm15236_vm9, %v2302_v26, %v2330_v29  ;;  %v2234_v42 = vpop.permute.xlu1 %2233  ;;  %v2252_v58 = vpop.permute.xlu0 %2251 }
 0x84e   : > { %v2332_v51 = vsel %vm15235_vm5, %v2306_v13, %v2331_v41  ;;  %v2290_v62 = vrot.slane %v2234_v42, %v12459_v63  ;;  %v2314_v43 = vrot.slane %v2252_v58, %v12459_v63 }
 0x84f   : > { %v2333_v39 = vsel %vm15265_vm15, %v2310_v44, %v2332_v51  ;;  %vm15273_vm15 = vmmov %vm15268_vm1 }
 0x850   : > { %v2329_v18 = vsel %vm15266_vm4, %v2290_v62, %v2328_v8  ;;  %v2334_v61 = vsel %vm15268_vm1, %v2314_v43, %v2333_v39  ;;  %vm15274_vm4 = vmmov %vm15269_vm11 }
 0x851   : > { %v2258_v21 = vpop.permute.xlu1 %2257  ;;  %v2255_v25 = vpop.permute.xlu0 %2254  ;;  %v2339_v17 = vsel %vm15267_vm2, %v2329_v18, -inf  ;;  %vm15275_vm2 = vmmov %vm15272_vm0 }
 0x852   : > { %v2322_v55 = vrot.slane %v2258_v21, %v12459_v63  ;;  %v2318_v57 = vrot.slane %v2255_v25, %v12459_v63  ;;  %2340 = vmax.xlane.f32.xlu0 %v2339_v17  ;;  %vm15276_vm1 = vmmov %vm15270_vm3 }
 0x854   : > { %v2335_v53 = vsel %vm15269_vm11, %v2318_v57, %v2334_v61  ;;  %vm15277_vm11 = vmmov %vm15271_vm10 }
 0x855   : > { %v2336_v30 = vsel %vm15270_vm3, %v2322_v55, %v2335_v53  ;;  %vm15278_vm3 = vmmov %vm15273_vm15 }
 0x856   : > { %v2342_v28 = vsel %vm15271_vm10, %v2336_v30, -inf  ;;  %vm15279_vm10 = vmmov %vm15274_vm4 }
 0x857   : > { %2343 = vmax.xlane.f32.xlu1 %v2342_v28 }
 0x8df   : > { %v2341_v26 = vpop.xlane.xlu0 %2340 }
 0x8e0   : > { %v2350_v10 = vrot.slane %v2341_v26, %v12266_v24  ;;  %v2354_v11 = vrot.slane %v2341_v26, %v12244_v12  ;;  %v2358_v13 = vrot.slane %v2341_v26, %v12285_v34  ;;  %v2362_v29 = vrot.slane %v2341_v26, %v12289_v36 }
 0x8e1   : > { %v2366_v48 = vrot.slane %v2341_v26, %v12251_v15  ;;  %v2370_v43 = vrot.slane %v2341_v26, %v12258_v20 }
 0x8e2   : > { %v2427_v41 = vsub.f32 %v12725_v47, %v2350_v10  ;;  %v2428_v42 = vsub.f32 %v12723_v1, %v2354_v11  ;;  %v2429_v58 = vsub.f32 %v12737_v27, %v2358_v13  ;;  %v2430_v45 = vsub.f32 %v12735_v56, %v2362_v29 }
 0x8e3   : > { %v2431_v8 = vsub.f32 %v12747_v49, %v2366_v48  ;;  %v2374_v27 = vrot.slane %v2341_v26, %v12293_v38  ;;  %v2432_v56 = vsub.f32 %v12759_v46, %v2370_v43 }
 0x8e4   : > { %v2443_v51 = vmul.f32 1.442695, %v2427_v41  ;;  %v2445_v44 = vmul.f32 1.442695, %v2428_v42  ;;  %v2344_v62 = vpop.xlane.xlu1 %2343  ;;  %v2447_v39 = vmul.f32 1.442695, %v2429_v58 }
 0x8e5   : > { %v2386_v18 = vrot.slane %v2344_v62, %v12244_v12  ;;  %v2449_v21 = vmul.f32 1.442695, %v2430_v45  ;;  %v2390_v47 = vrot.slane %v2344_v62, %v12285_v34  ;;  %v2451_v25 = vmul.f32 1.442695, %v2431_v8 }
 0x8e6   : > { %11460 = vpow2.f32 %v2443_v51  ;;  %v2394_v17 = vrot.slane %v2344_v62, %v12289_v36  ;;  %v2433_v57 = vsub.f32 %v12771_v0, %v2374_v27  ;;  %v2453_v61 = vmul.f32 1.442695, %v2432_v56 }
 0x8e7   : > { %11462 = vpow2.f32 %v2445_v44  ;;  %v2436_v1 = vsub.f32 %v12749_v52, %v2386_v18  ;;  %v2437_v49 = vsub.f32 %v12761_v50, %v2390_v47  ;;  %v2382_v53 = vrot.slane %v2344_v62, %v12266_v24 }
 0x8e8   : > { %11464 = vpow2.f32 %v2447_v39  ;;  %v2398_v52 = vrot.slane %v2344_v62, %v12251_v15  ;;  %v2438_v30 = vsub.f32 %v12773_v54, %v2394_v17  ;;  %v2378_v50 = vrot.slane %v2341_v26, %v12262_v22 }
 0x8e9   : > { %11466 = vpow2.f32 %v2449_v21  ;;  %v2461_v55 = vmul.f32 1.442695, %v2436_v1  ;;  %v2463_v46 = vmul.f32 1.442695, %v2437_v49  ;;  %v2455_v0 = vmul.f32 1.442695, %v2433_v57 }
 0x8ea   : > { %11468 = vpow2.f32 %v2451_v25  ;;  %v2435_v11 = vsub.f32 %v12783_v23, %v2382_v53  ;;  %v2402_v13 = vrot.slane %v2344_v62, %v12258_v20  ;;  %v2439_v54 = vsub.f32 %v12785_v35, %v2398_v52 }
 0x8eb   : > { %11470 = vpow2.f32 %v2461_v55  ;;  %v2465_v29 = vmul.f32 1.442695, %v2438_v30  ;;  %v2434_v26 = vsub.f32 %v12795_v19, %v2378_v50  ;;  %v2406_v42 = vrot.slane %v2344_v62, %v12293_v38 }
 0x8ec   : > { %11472 = vpow2.f32 %v2453_v61  ;;  %v2459_v23 = vmul.f32 1.442695, %v2435_v11  ;;  %v2410_v58 = vrot.slane %v2344_v62, %v12262_v22  ;;  %v2440_v35 = vsub.f32 %v12797_v40, %v2402_v13 }
 0x8ed   : > { %11474 = vpow2.f32 %v2463_v46  ;;  %v2467_v45 = vmul.f32 1.442695, %v2439_v54  ;;  %v2457_v43 = vmul.f32 1.442695, %v2434_v26  ;;  %v2441_v8 = vsub.f32 %v12809_v37, %v2406_v42 }
 0x8ee   : > { %11476 = vpow2.f32 %v2455_v0  ;;  %v2442_v19 = vsub.f32 %v12807_v33, %v2410_v58  ;;  %v2469_v62 = vmul.f32 1.442695, %v2440_v35 }
 0x8ef   : > { %11478 = vpow2.f32 %v2465_v29  ;;  %v2471_v18 = vmul.f32 1.442695, %v2441_v8 }
 0x8f0   : > { %v12867_v28 = vpop.eup %11460  ;;  %11480 = vpow2.f32 %v2459_v23  ;;  %v2473_v37 = vmul.f32 1.442695, %v2442_v19 }
 0x8f1   : > { %v12869_v10 = vpop.eup %11462  ;;  %2492 = vperm.xlu0 %11413, %v12867_v28   ;;  %11482 = vpow2.f32 %v2467_v45 }
 0x8f2   : > { %2495 = vperm.xlu1 %11412, %v12869_v10   ;;  %v12877_v48 = vpop.eup %11464  ;;  %11484 = vpow2.f32 %v2457_v43 }
 0x8f3   : > { %v12879_v41 = vpop.eup %11466  ;;  %11486 = vpow2.f32 %v2469_v62 }
 0x8f4   : > { %v12887_v51 = vpop.eup %11468  ;;  %11488 = vpow2.f32 %v2471_v18 }
 0x8f5   : > { %2498 = vperm.xlu0 %11413, %v12877_v48   ;;  %v12889_v44 = vpop.eup %11470  ;;  %11490 = vpow2.f32 %v2473_v37 }
 0x8f6   : > { %2501 = vperm.xlu1 %11412, %v12879_v41   ;;  %v12895_v39 = vpop.eup %11472 }
 0x8f7   : > { %v12897_v40 = vpop.eup %11474 }
 0x8f8   : > { %v12901_v21 = vpop.eup %11476 }
 0x8f9   : > { %2519 = vperm.xlu0 %11413, %v12889_v44   ;;  %v12903_v47 = vpop.eup %11478 }
 0x8fa   : > { %2504 = vperm.xlu1 %11412, %v12887_v51   ;;  %v12907_v33 = vpop.eup %11480 }
 0x8fb   : > { %v12909_v1 = vpop.eup %11482 }
 0x8fc   : > { %v12913_v27 = vpop.eup %11484 }
 0x8fd   : > { %2522 = vperm.xlu0 %11413, %v12897_v40   ;;  %v12915_v56 = vpop.eup %11486 }
 0x8fe   : > { %2507 = vperm.xlu1 %11412, %v12895_v39   ;;  %v12919_v25 = vpop.eup %11488 }
 0x8ff   : > { %v12921_v17 = vpop.eup %11490 }
 0x901   : > { %2525 = vperm.xlu0 %11413, %v12903_v47  }
 0x902   : > { %2510 = vperm.xlu1 %11412, %v12901_v21  }
 0x905   : > { %2528 = vperm.xlu0 %11413, %v12909_v1  }
 0x906   : > { %2516 = vperm.xlu1 %11412, %v12907_v33  }
 0x909   : > { %2531 = vperm.xlu0 %11413, %v12915_v56  }
 0x90a   : > { %2513 = vperm.xlu1 %11412, %v12913_v27  }
 0x90d   : > { %2534 = vperm.xlu0 %11413, %v12919_v25  }
 0x90e   : > { %2537 = vperm.xlu1 %11412, %v12921_v17  }
 0x970   : > { %v2493_v49 = vpop.permute.xlu0 %2492 }
 0x971   : > { %v2496_v55 = vpop.permute.xlu1 %2495  ;;  %v2542_v0 = vrot.slane %v2493_v49, %v12459_v63 }
 0x972   : > { %v2546_v50 = vrot.slane %v2496_v55, %v12459_v63 }
 0x974   : > { %v2499_v57 = vpop.permute.xlu0 %2498  ;;  %v2603_v29 = vsel %vm1160_vm13, %v2546_v50, %v2542_v0 }
 0x975   : > { %v2502_v61 = vpop.permute.xlu1 %2501  ;;  %v2550_v11 = vrot.slane %v2499_v57, %v12459_v63 }
 0x976   : > { %v2554_v26 = vrot.slane %v2502_v61, %v12459_v63 }
 0x977   : > { %v2604_v42 = vsel %vm15236_vm9, %v2550_v11, %v2603_v29 }
 0x978   : > { %v2520_v52 = vpop.permute.xlu0 %2519  ;;  %v2605_v18 = vsel %vm15235_vm5, %v2554_v26, %v2604_v42 }
 0x979   : > { %v2505_v53 = vpop.permute.xlu1 %2504  ;;  %v2578_v45 = vrot.slane %v2520_v52, %v12459_v63 }
 0x97a   : > { %v2558_v23 = vrot.slane %v2505_v53, %v12459_v63 }
 0x97c   : > { %v2523_v46 = vpop.permute.xlu0 %2522  ;;  %v2606_v55 = vsel %vm15272_vm0, %v2558_v23, %v2605_v18  ;;  %vm15280_vm0 = vmmov %vm15276_vm1 }
 0x97d   : > { %v2508_v30 = vpop.permute.xlu1 %2507  ;;  %v2582_v19 = vrot.slane %v2523_v46, %v12459_v63 }
 0x97e   : > { %v2562_v43 = vrot.slane %v2508_v30, %v12459_v63 }
 0x980   : > { %v2526_v54 = vpop.permute.xlu0 %2525  ;;  %v2607_v52 = vsel %vm15273_vm15, %v2562_v43, %v2606_v55  ;;  %vm15281_vm15 = vmmov %vm15277_vm11 }
 0x981   : > { %v2511_v13 = vpop.permute.xlu1 %2510  ;;  %v2586_v37 = vrot.slane %v2526_v54, %v12459_v63 }
 0x982   : > { %v2566_v62 = vrot.slane %v2511_v13, %v12459_v63 }
 0x984   : > { %v2529_v35 = vpop.permute.xlu0 %2528  ;;  %v2608_v11 = vsel %vm15274_vm4, %v2566_v62, %v2607_v52  ;;  %vm15282_vm4 = vmmov %vm15275_vm2 }
 0x985   : > { %v2517_v58 = vpop.permute.xlu1 %2516  ;;  %v2590_v46 = vrot.slane %v2529_v35, %v12459_v63 }
 0x986   : > { %v2574_v8 = vrot.slane %v2517_v58, %v12459_v63 }
 0x988   : > { %v2610_v49 = vsel %vm1160_vm13, %v2578_v45, %v2574_v8  ;;  %v2532_v53 = vpop.permute.xlu0 %2531 }
 0x989   : > { %v2611_v57 = vsel %vm15236_vm9, %v2582_v19, %v2610_v49  ;;  %v2514_v61 = vpop.permute.xlu1 %2513  ;;  %v2594_v0 = vrot.slane %v2532_v53, %v12459_v63 }
 0x98a   : > { %v2612_v30 = vsel %vm15235_vm5, %v2586_v37, %v2611_v57  ;;  %v2570_v50 = vrot.slane %v2514_v61, %v12459_v63 }
 0x98b   : > { %v2613_v13 = vsel %vm15275_vm2, %v2590_v46, %v2612_v30 }
 0x98c   : > { %v2609_v54 = vsel %vm15276_vm1, %v2570_v50, %v2608_v11  ;;  %v2535_v26 = vpop.permute.xlu0 %2534  ;;  %v2614_v35 = vsel %vm15278_vm3, %v2594_v0, %v2613_v13  ;;  %vm15283_vm1 = vmmov %vm15278_vm3 }
 0x98d   : > { %v2538_v29 = vpop.permute.xlu1 %2537  ;;  %v2619_v42 = vsel %vm15277_vm11, %v2609_v54, 0.0  ;;  %v2598_v58 = vrot.slane %v2535_v26, %v12459_v63  ;;  %vm15284_vm11 = vmmov %vm15283_vm1 }
 0x98e   : > { %v2602_v23 = vrot.slane %v2538_v29, %v12459_v63  ;;  %2620 = vadd.xlane.f32.xlu0 %v2619_v42  ;;  %vm15285_vm3 = vmmov %vm15279_vm10 }
 0x98f   : > { %v2615_v45 = vsel %vm15279_vm10, %v2598_v58, %v2614_v35  ;;  %vm15286_vm10 = vmmov %vm15285_vm3 }
 0x990   : > { %v2616_v43 = vsel %vm15280_vm0, %v2602_v23, %v2615_v45 }
 0x991   : > { %v2622_v8 = vsel %vm15281_vm15, %v2616_v43, 0.0  ;;  %vm15287_vm15 = vmmov %vm15280_vm0 }
 0x992   : > { %2623 = vadd.xlane.f32.xlu1 %v2622_v8 }
 0xa1b   : > { %v2621_v19 = vpop.xlane.xlu0 %2620 }
 0xa1c   : > { %11492 = vrcp.f32 %v2621_v19 }
 0xa1f   : > { %v2624_v62 = vpop.xlane.xlu1 %2623 }
 0xa20   : > { %11494 = vrcp.f32 %v2624_v62 }
 0xa26   : > { %v11493_v18 = vpop.eup %11492 }
 0xa27   : > { %v2636_v37 = vrot.slane %v11493_v18, %v12244_v12  ;;  %v2632_v49 = vrot.slane %v11493_v18, %v12266_v24  ;;  %v2644_v61 = vrot.slane %v11493_v18, %v12289_v36  ;;  %v2640_v53 = vrot.slane %v11493_v18, %v12285_v34 }
 0xa28   : > { %v2648_v50 = vrot.slane %v11493_v18, %v12251_v15  ;;  %v2652_v11 = vrot.slane %v11493_v18, %v12258_v20  ;;  %v2656_v54 = vrot.slane %v11493_v18, %v12293_v38  ;;  %v2660_v23 = vrot.slane %v11493_v18, %v12262_v22 }
 0xa29   : > { %v2710_v55 = vmul.f32 %v12869_v10, %v2636_v37  ;;  %v2709_v57 = vmul.f32 %v12867_v28, %v2632_v49  ;;  %v2712_v30 = vmul.f32 %v12879_v41, %v2644_v61  ;;  %v2711_v46 = vmul.f32 %v12877_v48, %v2640_v53 }
 0xa2a   : > { %v11495_v52 = vpop.eup %11494  ;;  %v2713_v10 = vmul.f32 %v12887_v51, %v2648_v50  ;;  %v2714_v41 = vmul.f32 %v12895_v39, %v2652_v11  ;;  %v2715_v51 = vmul.f32 %v12901_v21, %v2656_v54  ;;  %v2716_v21 = vmul.f32 %v12913_v27, %v2660_v23 }
 0xa2b   : > { %2737 = vperm.xlu1 %11412, %v2710_v55   ;;  %2734 = vperm.xlu0 %11413, %v2709_v57   ;;  %v2668_v0 = vrot.slane %v11495_v52, %v12244_v12  ;;  %v2672_v13 = vrot.slane %v11495_v52, %v12285_v34  ;;  %v2676_v29 = vrot.slane %v11495_v52, %v12289_v36 }
 0xa2c   : > { %v2664_v26 = vrot.slane %v11495_v52, %v12266_v24  ;;  %v2680_v42 = vrot.slane %v11495_v52, %v12251_v15  ;;  %v2684_v58 = vrot.slane %v11495_v52, %v12258_v20  ;;  %v2692_v35 = vrot.slane %v11495_v52, %v12262_v22 }
 0xa2d   : > { %v2718_v28 = vmul.f32 %v12889_v44, %v2668_v0  ;;  %v2719_v48 = vmul.f32 %v12897_v40, %v2672_v13  ;;  %v2720_v44 = vmul.f32 %v12903_v47, %v2676_v29  ;;  %v2688_v45 = vrot.slane %v11495_v52, %v12293_v38 }
 0xa2e   : > { %v2717_v39 = vmul.f32 %v12907_v33, %v2664_v26  ;;  %v2721_v40 = vmul.f32 %v12909_v1, %v2680_v42  ;;  %v2722_v47 = vmul.f32 %v12915_v56, %v2684_v58  ;;  %v2724_v33 = vmul.f32 %v12921_v17, %v2692_v35 }
 0xa2f   : > { %2743 = vperm.xlu1 %11412, %v2712_v30   ;;  %2740 = vperm.xlu0 %11413, %v2711_v46   ;;  %v2723_v1 = vmul.f32 %v12919_v25, %v2688_v45 }
 0xa33   : > { %2746 = vperm.xlu1 %11412, %v2713_v10   ;;  %2883 = vperm.xlu0 %11413, %v2718_v28  }
 0xa37   : > { %2749 = vperm.xlu1 %11412, %v2714_v41   ;;  %2886 = vperm.xlu0 %11413, %v2719_v48  }
 0xa3b   : > { %2752 = vperm.xlu1 %11412, %v2715_v51   ;;  %2889 = vperm.xlu0 %11413, %v2720_v44  }
 0xa3f   : > { %2880 = vperm.xlu1 %11412, %v2717_v39   ;;  %2892 = vperm.xlu0 %11413, %v2721_v40  }
 0xa43   : > { %2755 = vperm.xlu1 %11412, %v2716_v21   ;;  %2895 = vperm.xlu0 %11413, %v2722_v47  }
 0xa47   : > { %2901 = vperm.xlu1 %11412, %v2724_v33   ;;  %2898 = vperm.xlu0 %11413, %v2723_v1  }
 0xa4b   : > { %2942 = vrot.lane.b32.xlu1 %v12279_v32, %s11935_s14  ;;  %2796 = vrot.lane.b32.xlu0 %v12275_v31, %s11935_s14  ;;  %s11943_s14 = smov 16  }
 0xa4f   : > { %3097 = vrot.lane.b32.xlu1 %v12279_v32, %s11936_s25  ;;  %3019 = vrot.lane.b32.xlu0 %v12275_v31, %s11936_s25 }
 0xa53   : > { %3095 = vrot.lane.b32.xlu1 %v12279_v32, %s11937_s19  ;;  %3017 = vrot.lane.b32.xlu0 %v12275_v31, %s11937_s19 }
 0xaaa   : > { %v2738_v27 = vpop.permute.xlu1 %2737  ;;  %v2735_v56 = vpop.permute.xlu0 %2734 }
 0xaab   : > { %v2764_v57 = vrot.slane %v2738_v27, %v12459_v63  ;;  %v2760_v61 = vrot.slane %v2735_v56, %v12459_v63 }
 0xaad   : > { %v2789_v13 = vsel %vm1160_vm13, %v2764_v57, %v2760_v61 }
 0xaae   : > { %v2744_v25 = vpop.permute.xlu1 %2743  ;;  %v2741_v17 = vpop.permute.xlu0 %2740 }
 0xaaf   : > { %v2768_v30 = vrot.slane %v2741_v17, %v12459_v63  ;;  %v2772_v41 = vrot.slane %v2744_v25, %v12459_v63 }
 0xab1   : > { %v2790_v29 = vsel %vm15236_vm9, %v2768_v30, %v2789_v13 }
 0xab2   : > { %v2747_v43 = vpop.permute.xlu1 %2746  ;;  %v2884_v8 = vpop.permute.xlu0 %2883  ;;  %v2791_v58 = vsel %vm15235_vm5, %v2772_v41, %v2790_v29 }
 0xab3   : > { %v2910_v53 = vrot.slane %v2884_v8, %v12459_v63  ;;  %v2776_v51 = vrot.slane %v2747_v43, %v12459_v63 }
 0xab5   : > { %v2792_v45 = vsel %vm15275_vm2, %v2776_v51, %v2791_v58  ;;  %vm15290_vm2 = vmmov 0  }
 0xab6   : > { %v2750_v19 = vpop.permute.xlu1 %2749  ;;  %v2887_v62 = vpop.permute.xlu0 %2886 }
 0xab7   : > { %v2914_v46 = vrot.slane %v2887_v62, %v12459_v63  ;;  %v2780_v26 = vrot.slane %v2750_v19, %v12459_v63 }
 0xab9   : > { %v2793_v1 = vsel %vm15284_vm11, %v2780_v26, %v2792_v45 }
 0xaba   : > { %v2753_v18 = vpop.permute.xlu1 %2752  ;;  %v2890_v37 = vpop.permute.xlu0 %2889 }
 0xabb   : > { %v2918_v50 = vrot.slane %v2890_v37, %v12459_v63  ;;  %v2784_v39 = vrot.slane %v2753_v18, %v12459_v63 }
 0xabd   : > { %v2794_v56 = vsel %vm15286_vm10, %v2784_v39, %v2793_v1 }
 0xabe   : > { %v2881_v49 = vpop.permute.xlu1 %2880  ;;  %v2893_v55 = vpop.permute.xlu0 %2892 }
 0xabf   : > { %v2906_v52 = vrot.slane %v2881_v49, %v12459_v63  ;;  %v2922_v54 = vrot.slane %v2893_v55, %v12459_v63 }
 0xac1   : > { %v2935_v0 = vsel %vm1160_vm13, %v2910_v53, %v2906_v52 }
 0xac2   : > { %v2936_v10 = vsel %vm15236_vm9, %v2914_v46, %v2935_v0  ;;  %v2756_v28 = vpop.permute.xlu1 %2755  ;;  %v2896_v11 = vpop.permute.xlu0 %2895 }
 0xac3   : > { %v2937_v48 = vsel %vm15235_vm5, %v2918_v50, %v2936_v10  ;;  %v2926_v44 = vrot.slane %v2896_v11, %v12459_v63  ;;  %v2788_v21 = vrot.slane %v2756_v28, %v12459_v63 }
 0xac4   : > { %v2938_v42 = vsel %vm15282_vm4, %v2922_v54, %v2937_v48  ;;  %vm15288_vm4 = vcmask 64512  }
 0xac5   : > { %v2939_v33 = vsel %vm15283_vm1, %v2926_v44, %v2938_v42  ;;  %v2795_v8 = vsel %vm15287_vm15, %v2788_v21, %v2794_v56  ;;  %vm15289_vm5 = vmmov %vm15288_vm4 }
 0xac6   : > { %v2902_v40 = vpop.permute.xlu1 %2901  ;;  %v2899_v23 = vpop.permute.xlu0 %2898  ;;  %vm15291_vm1 = vmmov %vm15288_vm4 }
 0xac7   : > { %v2934_v47 = vrot.slane %v2902_v40, %v12459_v63  ;;  %v2930_v35 = vrot.slane %v2899_v23, %v12459_v63  ;;  %vm15292_vm11 = vmmov %vm15291_vm1 }
 0xac8   : > { %vm15295_vm10 = vmmov %vm15291_vm1 }
 0xac9   : > { %v2940_v27 = vsel %vm15285_vm3, %v2930_v35, %v2939_v33  ;;  %vm15293_vm3 = vmmov %vm15291_vm1 }
 0xaca   : > { %v2943_v25 = vpop.permute.xlu1 %2942  ;;  %v2797_v17 = vpop.permute.xlu0 %2796  ;;  %v2941_v43 = vsel %vm15280_vm0, %v2934_v47, %v2940_v27  ;;  %vm15296_vm0 = vmmov %vm15291_vm1 }
 0xacb   : > { %11053 = vmatpush3.msra.mxu0 %v2797_v17  ;;  %11058 = vmatpush3.msra.mxu1 %v2943_v25 }
 0xacc   : > { %11055 = vmatmul.mubr.msk.f32.vlgmr.msra.gmra.mrb[4].mxu0 %vm15288_vm4, %v2795_v8  ;;  %11060 = vmatmul.mubr.msk.f32.vlgmr.msra.gmra.mrb[10].mxu1 %vm15289_vm5, %v2941_v43  ;;  %vm15294_vm5 = vmmov %vm15291_vm1 }
 0xacd   : > { %11062 = vmatprep.subr.mxu0 %v11929_v16  ;;  %11067 = vmatprep.subr.mxu1 %v11929_v16 }
 0xace   : > { %v3098_v19 = vpop.permute.xlu1 %3097  ;;  %v3020_v62 = vpop.permute.xlu0 %3019  ;;  %11064 = vmatprep.mubr.msk.f32.mxu0 %vm15290_vm2, %v11929_v16  ;;  %11069 = vmatprep.mubr.msk.f32.mxu1 %vm15290_vm2, %v11929_v16 }
 0xacf   : > { %v3180_v18 = vsel %vm15291_vm1, %v3098_v19, 0.0  ;;  %v3177_v37 = vsel %vm15292_vm11, %v3020_v62, 0.0 }
 0xad0   : > { %3181 = vadd.xlane.f32.xlu1 %v3180_v18  ;;  %3178 = vadd.xlane.f32.xlu0 %v3177_v37 }
 0xad2   : > { %11063 = vmatpush3.xpose.msk.msra.mxu0 %vm15293_vm3, %v3020_v62  ;;  %11068 = vmatpush3.xpose.msk.msra.mxu1 %vm15294_vm5, %v3098_v19  ;;  %v3096_v49 = vpop.permute.xlu1 %3095  ;;  %v3018_v55 = vpop.permute.xlu0 %3017  ;;  %vm15297_vm3 = vcmp.ne.s32.totalorder %v12336_v7, 0 }
 0xad3   : > { %11072 = vmatprep.subr.mxu0 %v11929_v16  ;;  %11077 = vmatprep.subr.mxu1 %v11929_v16 }
 0xad5   : > { %11065 = vmatmul.mubr.msk.f32.vlgmr.msra.gmra.mrb[6].mxu0 %vm15295_vm10, %v3018_v55  ;;  %11070 = vmatmul.mubr.msk.f32.vlgmr.msra.gmra.mrb[12].mxu1 %vm15296_vm0, %v3096_v49 }
 0xad6   : > { %11074 = vmatprep.mubr.msk.f32.mxu0 %vm15290_vm2, %v11929_v16  ;;  %11079 = vmatprep.mubr.msk.f32.mxu1 %vm15290_vm2, %v11929_v16 }
 0xb5d   : > { %v3179_v35 = vpop.xlane.xlu0 %3178  ;;  %v3182_v45 = vpop.xlane.xlu1 %3181 }
 0xb5e   : > { %vm3183_vm15 = vcmp.eq.f32.partialorder %v3179_v35, 0.0  ;;  %vm3184_vm10 = vcmp.eq.f32.partialorder %v3182_v45, 0.0 }
 0xb5f   : > { %vm3190_vm4 = vmor %vm3183_vm15, %vm863_vm8 }
 0xb60   : > { %vm3189_vm1 = vmor %vm3183_vm15, %vm862_vm6 }
 0xb61   : > { %vm3192_vm11 = vmor %vm3183_vm15, %vm865_vm12 }
 0xb62   : > { %vm3191_vm5 = vmor %vm3183_vm15, %vm15297_vm3 }
 0xb63   : > { %vm3193_vm0 = vmor %vm3183_vm15, %vm866_vm14 }
 0xb9f   : > { %v13049_v57 = vpop.f32.mrb[4].mxu0  ;;  %v13051_v61 = vpop.f32.mrb[10].mxu1 }
 0xba0   : > { %v11056_v53 = vpop.f32.mrb[5].mxu0  ;;  %v11061_v52 = vpop.f32.mrb[11].mxu1 }
 0xba8   : > { %v3091_v30 = vpop.f32.mrb[6].mxu0  ;;  %v3169_v46 = vpop.f32.mrb[12].mxu1 }
 0xba9   : > { %v3173_v50 = vmul.f32 0.35355338, %v3091_v30  ;;  %v11066_v0 = vpop.f32.mrb[7].mxu0  ;;  %v11071_v10 = vpop.f32.mrb[13].mxu1  ;;  %v3174_v13 = vmul.f32 0.35355338, %v3169_v46 }
 0xbab   : > { %v3217_v28 = vrot.slane %v3173_v50, %v12244_v12  ;;  %v3210_v11 = vrot.slane %v3173_v50, %v12266_v24  ;;  %v3231_v41 = vrot.slane %v3173_v50, %v12289_v36  ;;  %v3224_v48 = vrot.slane %v3173_v50, %v12285_v34 }
 0xbac   : > { %v3238_v54 = vrot.slane %v3173_v50, %v12251_v15  ;;  %v3273_v29 = vrot.slane %v3174_v13, %v12244_v12  ;;  %v3245_v51 = vrot.slane %v3173_v50, %v12258_v20  ;;  %v3280_v44 = vrot.slane %v3174_v13, %v12285_v34 }
 0xbad   : > { %3219 = vbcast.lane.b32.xlu1 %v3217_v28, 256  ;;  %3212 = vbcast.lane.b32.xlu0 %v3210_v11, 256  ;;  %v3252_v26 = vrot.slane %v3173_v50, %v12293_v38  ;;  %v3287_v42 = vrot.slane %v3174_v13, %v12289_v36  ;;  %v3266_v39 = vrot.slane %v3174_v13, %v12266_v24 }
 0xbae   : > { %v3294_v40 = vrot.slane %v3174_v13, %v12251_v15  ;;  %v3259_v23 = vrot.slane %v3173_v50, %v12262_v22  ;;  %v3301_v58 = vrot.slane %v3174_v13, %v12258_v20  ;;  %v3315_v21 = vrot.slane %v3174_v13, %v12262_v22 }
 0xbaf   : > { %v3308_v47 = vrot.slane %v3174_v13, %v12293_v38 }
 0xbb1   : > { %3233 = vbcast.lane.b32.xlu1 %v3231_v41, 256  ;;  %3226 = vbcast.lane.b32.xlu0 %v3224_v48, 256 }
 0xbb5   : > { %3240 = vbcast.lane.b32.xlu1 %v3238_v54, 256  ;;  %3275 = vbcast.lane.b32.xlu0 %v3273_v29, 256 }
 0xbb9   : > { %3247 = vbcast.lane.b32.xlu1 %v3245_v51, 256  ;;  %3282 = vbcast.lane.b32.xlu0 %v3280_v44, 256 }
 0xbbd   : > { %3254 = vbcast.lane.b32.xlu1 %v3252_v26, 256  ;;  %3289 = vbcast.lane.b32.xlu0 %v3287_v42, 256 }
 0xbc1   : > { %3268 = vbcast.lane.b32.xlu1 %v3266_v39, 256  ;;  %3296 = vbcast.lane.b32.xlu0 %v3294_v40, 256 }
 0xbc5   : > { %3261 = vbcast.lane.b32.xlu1 %v3259_v23, 256  ;;  %3303 = vbcast.lane.b32.xlu0 %v3301_v58, 256 }
 0xbc9   : > { %3317 = vbcast.lane.b32.xlu1 %v3315_v21, 256  ;;  %3310 = vbcast.lane.b32.xlu0 %v3308_v47, 256 }
 0xc1f   : > { %v3220_v33 = vpop.permute.xlu1 %3219  ;;  %v3213_v1 = vpop.permute.xlu0 %3212 }
 0xc20   : > { %v13075_v27 = vsel %vm3190_vm4, -4.2949673e+09, %v3220_v33  ;;  %v13077_v56 = vsel %vm3189_vm1, -4.2949673e+09, %v3213_v1  ;;  %vm3198_vm4 = vmor %vm3184_vm10, %vm863_vm8  ;;  %vm15298_vm1 = vcmp.ne.s32.totalorder %v12330_v4, 0 }
 0xc21   : > { %3371 = vperm.xlu1 %11412, %v13075_v27   ;;  %3368 = vperm.xlu0 %11413, %v13077_v56  }
 0xc23   : > { %v3234_v25 = vpop.permute.xlu1 %3233  ;;  %v3227_v17 = vpop.permute.xlu0 %3226 }
 0xc24   : > { %v13087_v43 = vsel %vm3192_vm11, -4.2949673e+09, %v3234_v25  ;;  %v13089_v8 = vsel %vm3191_vm5, -4.2949673e+09, %v3227_v17  ;;  %vm3194_vm11 = vmor %vm3183_vm15, %vm15298_vm1 }
 0xc25   : > { %3377 = vperm.xlu1 %11412, %v13087_v43   ;;  %3374 = vperm.xlu0 %11413, %v13089_v8   ;;  %vm3199_vm5 = vmor %vm3184_vm10, %vm15297_vm3  ;;  %vm15299_vm3 = vcmp.ne.s32.totalorder %v12334_v6, 0 }
 0xc26   : > { %vm3197_vm1 = vmor %vm3184_vm10, %vm862_vm6 }
 0xc27   : > { %v3241_v19 = vpop.permute.xlu1 %3240  ;;  %v3276_v62 = vpop.permute.xlu0 %3275 }
 0xc28   : > { %v13099_v18 = vsel %vm3193_vm0, -4.2949673e+09, %v3241_v19  ;;  %v13101_v37 = vsel %vm3198_vm4, -4.2949673e+09, %v3276_v62  ;;  %vm3195_vm0 = vmor %vm3183_vm15, %vm868_vm7 }
 0xc29   : > { %3380 = vperm.xlu1 %11412, %v13099_v18   ;;  %3395 = vperm.xlu0 %11413, %v13101_v37   ;;  %vm3200_vm4 = vmor %vm3184_vm10, %vm865_vm12 }
 0xc2b   : > { %v3248_v49 = vpop.permute.xlu1 %3247  ;;  %v3283_v55 = vpop.permute.xlu0 %3282 }
 0xc2c   : > { %v13111_v53 = vsel %vm3194_vm11, -4.2949673e+09, %v3248_v49  ;;  %v13113_v52 = vsel %vm3199_vm5, -4.2949673e+09, %v3283_v55  ;;  %vm3201_vm11 = vmor %vm3184_vm10, %vm866_vm14 }
 0xc2d   : > { %3383 = vperm.xlu1 %11412, %v13111_v53   ;;  %3398 = vperm.xlu0 %11413, %v13113_v52   ;;  %vm3196_vm5 = vmor %vm3183_vm15, %vm15299_vm3 }
 0xc2e   : > { %vm3203_vm15 = vmor %vm3184_vm10, %vm868_vm7 }
 0xc2f   : > { %v3255_v30 = vpop.permute.xlu1 %3254  ;;  %v3290_v46 = vpop.permute.xlu0 %3289 }
 0xc30   : > { %v13123_v50 = vsel %vm3195_vm0, -4.2949673e+09, %v3255_v30  ;;  %v13125_v0 = vsel %vm3200_vm4, -4.2949673e+09, %v3290_v46  ;;  %vm15300_vm0 = vcmp.ne.s32.totalorder %v12330_v4, 0 }
 0xc31   : > { %3386 = vperm.xlu1 %11412, %v13123_v50   ;;  %3401 = vperm.xlu0 %11413, %v13125_v0   ;;  %vm3202_vm4 = vmor %vm3184_vm10, %vm15300_vm0 }
 0xc33   : > { %v3269_v10 = vpop.permute.xlu1 %3268  ;;  %v3297_v28 = vpop.permute.xlu0 %3296 }
 0xc34   : > { %v13135_v11 = vsel %vm3197_vm1, -4.2949673e+09, %v3269_v10  ;;  %v13137_v13 = vsel %vm3201_vm11, -4.2949673e+09, %v3297_v28  ;;  %vm15301_vm1 = vmmov %vm15299_vm3  ;;  %vm15303_vm3 = vcmask 1044484  }
 0xc35   : > { %3392 = vperm.xlu1 %11412, %v13135_v11   ;;  %3404 = vperm.xlu0 %11413, %v13137_v13   ;;  %vm3204_vm11 = vmor %vm3184_vm10, %vm15301_vm1  ;;  %vm15302_vm10 = vcmask 1043459  }
 0xc36   : > { %vm15305_vm0 = vmmov %vm15302_vm10 }
 0xc37   : > { %v3262_v41 = vpop.permute.xlu1 %3261  ;;  %v3304_v48 = vpop.permute.xlu0 %3303  ;;  %vm15307_vm1 = vmmov %vm15303_vm3 }
 0xc38   : > { %v13147_v54 = vsel %vm3196_vm5, -4.2949673e+09, %v3262_v41  ;;  %v13149_v29 = vsel %vm3202_vm4, -4.2949673e+09, %v3304_v48  ;;  %vm15304_vm5 = vcmask 1045509   ;;  %vm15306_vm4 = vcmask 1046534  }
 0xc39   : > { %3389 = vperm.xlu1 %11412, %v13147_v54   ;;  %3407 = vperm.xlu0 %11413, %v13149_v29  }
 0xc3b   : > { %v3318_v51 = vpop.permute.xlu1 %3317  ;;  %v3311_v44 = vpop.permute.xlu0 %3310 }
 0xc3c   : > { %v13159_v26 = vsel %vm3204_vm11, -4.2949673e+09, %v3318_v51  ;;  %v13161_v42 = vsel %vm3203_vm15, -4.2949673e+09, %v3311_v44  ;;  %vm15308_vm11 = vcmask 1047559   ;;  %vm15309_vm15 = vcmask 64512  }
 0xc3d   : > { %3413 = vperm.xlu1 %11412, %v13159_v26   ;;  %3410 = vperm.xlu0 %11413, %v13161_v42  }
 0xca0   : > { %v3372_v39 = vpop.permute.xlu1 %3371  ;;  %v3369_v40 = vpop.permute.xlu0 %3368 }
 0xca1   : > { %v3422_v45 = vrot.slane %v3372_v39, %v12459_v63  ;;  %v3418_v1 = vrot.slane %v3369_v40, %v12459_v63 }
 0xca3   : > { %v3479_v62 = vsel %vm1160_vm13, %v3422_v45, %v3418_v1 }
 0xca4   : > { %v3378_v23 = vpop.permute.xlu1 %3377  ;;  %v3375_v58 = vpop.permute.xlu0 %3374 }
 0xca5   : > { %v3426_v25 = vrot.slane %v3375_v58, %v12459_v63  ;;  %v3430_v49 = vrot.slane %v3378_v23, %v12459_v63 }
 0xca7   : > { %v3480_v55 = vsel %vm15236_vm9, %v3426_v25, %v3479_v62 }
 0xca8   : > { %v3381_v21 = vpop.permute.xlu1 %3380  ;;  %v3396_v47 = vpop.permute.xlu0 %3395  ;;  %v3481_v39 = vsel %vm15302_vm10, %v3430_v49, %v3480_v55  ;;  %vm15310_vm10 = vmmov %vm15304_vm5 }
 0xca9   : > { %v3434_v30 = vrot.slane %v3381_v21, %v12459_v63  ;;  %v3454_v28 = vrot.slane %v3396_v47, %v12459_v63 }
 0xcab   : > { %v3482_v58 = vsel %vm15303_vm3, %v3434_v30, %v3481_v39  ;;  %vm15311_vm3 = vmmov %vm15306_vm4 }
 0xcac   : > { %v3384_v35 = vpop.permute.xlu1 %3383  ;;  %v3399_v33 = vpop.permute.xlu0 %3398 }
 0xcad   : > { %v3438_v41 = vrot.slane %v3384_v35, %v12459_v63  ;;  %v3458_v51 = vrot.slane %v3399_v33, %v12459_v63 }
 0xcaf   : > { %v3483_v35 = vsel %vm15304_vm5, %v3438_v41, %v3482_v58  ;;  %vm15312_vm5 = vmmov %vm15308_vm11 }
 0xcb0   : > { %v3387_v17 = vpop.permute.xlu1 %3386  ;;  %v3402_v19 = vpop.permute.xlu0 %3401 }
 0xcb1   : > { %v3442_v44 = vrot.slane %v3387_v17, %v12459_v63  ;;  %v3462_v40 = vrot.slane %v3402_v19, %v12459_v63 }
 0xcb3   : > { %v3484_v19 = vsel %vm15306_vm4, %v3442_v44, %v3483_v35  ;;  %vm15314_vm4 = vcmask 1043459  }
 0xcb4   : > { %v3393_v46 = vpop.permute.xlu1 %3392  ;;  %v3405_v10 = vpop.permute.xlu0 %3404 }
 0xcb5   : > { %v3450_v48 = vrot.slane %v3393_v46, %v12459_v63  ;;  %v3466_v33 = vrot.slane %v3405_v10, %v12459_v63 }
 0xcb7   : > { %v3486_v23 = vsel %vm1160_vm13, %v3454_v28, %v3450_v48 }
 0xcb8   : > { %v3487_v21 = vsel %vm15236_vm9, %v3458_v51, %v3486_v23  ;;  %v3390_v45 = vpop.permute.xlu1 %3389  ;;  %v3408_v47 = vpop.permute.xlu0 %3407 }
 0xcb9   : > { %v3488_v1 = vsel %vm15305_vm0, %v3462_v40, %v3487_v21  ;;  %v3446_v25 = vrot.slane %v3390_v45, %v12459_v63  ;;  %v3470_v17 = vrot.slane %v3408_v47, %v12459_v63  ;;  %vm15313_vm0 = vmmov %vm15309_vm15 }
 0xcba   : > { %v3489_v62 = vsel %vm15307_vm1, %v3466_v33, %v3488_v1 }
 0xcbb   : > { %v3485_v49 = vsel %vm15308_vm11, %v3446_v25, %v3484_v19  ;;  %v3490_v10 = vsel %vm15310_vm10, %v3470_v17, %v3489_v62  ;;  %vm15315_vm11 = vmmov %vm15310_vm10 }
 0xcbc   : > { %v3414_v55 = vpop.permute.xlu1 %3413  ;;  %v3411_v30 = vpop.permute.xlu0 %3410  ;;  %v3495_v46 = vsel %vm15309_vm15, %v3485_v49, -inf  ;;  %vm15316_vm15 = vmmov %vm15314_vm4 }
 0xcbd   : > { %v3478_v28 = vrot.slane %v3414_v55, %v12459_v63  ;;  %v3474_v41 = vrot.slane %v3411_v30, %v12459_v63  ;;  %3496 = vmax.xlane.f32.xlu0 %v3495_v46  ;;  %vm15317_vm10 = vmmov %vm15311_vm3 }
 0xcbf   : > { %v3491_v48 = vsel %vm15311_vm3, %v3474_v41, %v3490_v10  ;;  %vm15318_vm3 = vmmov %vm15307_vm1 }
 0xcc0   : > { %v3492_v51 = vsel %vm15312_vm5, %v3478_v28, %v3491_v48 }
 0xcc1   : > { %v3498_v44 = vsel %vm15313_vm0, %v3492_v51, -inf }
 0xcc2   : > { %3499 = vmax.xlane.f32.xlu1 %v3498_v44 }
 0xd4a   : > { %v3497_v39 = vpop.xlane.xlu0 %3496 }
 0xd4b   : > { %v3506_v40 = vrot.slane %v3497_v39, %v12266_v24  ;;  %v3510_v23 = vrot.slane %v3497_v39, %v12244_v12  ;;  %v3514_v58 = vrot.slane %v3497_v39, %v12285_v34  ;;  %v3518_v21 = vrot.slane %v3497_v39, %v12289_v36 }
 0xd4c   : > { %v3522_v45 = vrot.slane %v3497_v39, %v12251_v15  ;;  %v3526_v62 = vrot.slane %v3497_v39, %v12258_v20 }
 0xd4d   : > { %v3583_v47 = vsub.f32 %v13077_v56, %v3506_v40  ;;  %v3584_v35 = vsub.f32 %v13075_v27, %v3510_v23  ;;  %v3585_v1 = vsub.f32 %v13089_v8, %v3514_v58  ;;  %v3586_v33 = vsub.f32 %v13087_v43, %v3518_v21 }
 0xd4e   : > { %v3587_v49 = vsub.f32 %v13099_v18, %v3522_v45  ;;  %v3530_v8 = vrot.slane %v3497_v39, %v12293_v38  ;;  %v3588_v43 = vsub.f32 %v13111_v53, %v3526_v62 }
 0xd4f   : > { %v3599_v25 = vmul.f32 1.442695, %v3583_v47  ;;  %v3601_v17 = vmul.f32 1.442695, %v3584_v35  ;;  %v3500_v19 = vpop.xlane.xlu1 %3499  ;;  %v3603_v55 = vmul.f32 1.442695, %v3585_v1 }
 0xd50   : > { %v3542_v30 = vrot.slane %v3500_v19, %v12244_v12  ;;  %v3605_v46 = vmul.f32 1.442695, %v3586_v33  ;;  %v3546_v56 = vrot.slane %v3500_v19, %v12285_v34  ;;  %v3607_v28 = vmul.f32 1.442695, %v3587_v49 }
 0xd51   : > { %11496 = vpow2.f32 %v3599_v25  ;;  %v3550_v41 = vrot.slane %v3500_v19, %v12289_v36  ;;  %v3589_v48 = vsub.f32 %v13123_v50, %v3530_v8  ;;  %v3609_v51 = vmul.f32 1.442695, %v3588_v43 }
 0xd52   : > { %11498 = vpow2.f32 %v3601_v17  ;;  %v3592_v27 = vsub.f32 %v13101_v37, %v3542_v30  ;;  %v3593_v18 = vsub.f32 %v13113_v52, %v3546_v56  ;;  %v3538_v44 = vrot.slane %v3500_v19, %v12266_v24 }
 0xd53   : > { %11500 = vpow2.f32 %v3603_v55  ;;  %v3554_v37 = vrot.slane %v3500_v19, %v12251_v15  ;;  %v3594_v40 = vsub.f32 %v13125_v0, %v3550_v41  ;;  %v3534_v52 = vrot.slane %v3497_v39, %v12262_v22 }
 0xd54   : > { %11502 = vpow2.f32 %v3605_v46  ;;  %v3617_v10 = vmul.f32 1.442695, %v3592_v27  ;;  %v3619_v53 = vmul.f32 1.442695, %v3593_v18  ;;  %v3611_v50 = vmul.f32 1.442695, %v3589_v48 }
 0xd55   : > { %11504 = vpow2.f32 %v3607_v28  ;;  %v3591_v21 = vsub.f32 %v13135_v11, %v3538_v44  ;;  %v3558_v45 = vrot.slane %v3500_v19, %v12258_v20  ;;  %v3595_v0 = vsub.f32 %v13137_v13, %v3554_v37 }
 0xd56   : > { %11506 = vpow2.f32 %v3617_v10  ;;  %v3621_v47 = vmul.f32 1.442695, %v3594_v40  ;;  %v3590_v39 = vsub.f32 %v13147_v54, %v3534_v52  ;;  %v3562_v33 = vrot.slane %v3500_v19, %v12293_v38 }
 0xd57   : > { %11508 = vpow2.f32 %v3609_v51  ;;  %v3615_v11 = vmul.f32 1.442695, %v3591_v21  ;;  %v3566_v25 = vrot.slane %v3500_v19, %v12262_v22  ;;  %v3596_v13 = vsub.f32 %v13149_v29, %v3558_v45 }
 0xd58   : > { %11510 = vpow2.f32 %v3619_v53  ;;  %v3623_v17 = vmul.f32 1.442695, %v3595_v0  ;;  %v3613_v55 = vmul.f32 1.442695, %v3590_v39  ;;  %v3597_v30 = vsub.f32 %v13161_v42, %v3562_v33 }
 0xd59   : > { %11512 = vpow2.f32 %v3611_v50  ;;  %v3598_v54 = vsub.f32 %v13159_v26, %v3566_v25  ;;  %v3625_v19 = vmul.f32 1.442695, %v3596_v13 }
 0xd5a   : > { %11514 = vpow2.f32 %v3621_v47  ;;  %v3627_v56 = vmul.f32 1.442695, %v3597_v30 }
 0xd5b   : > { %v13219_v23 = vpop.eup %11496  ;;  %11516 = vpow2.f32 %v3615_v11  ;;  %v3629_v42 = vmul.f32 1.442695, %v3598_v54 }
 0xd5c   : > { %v13221_v58 = vpop.eup %11498  ;;  %3648 = vperm.xlu0 %11413, %v13219_v23   ;;  %11518 = vpow2.f32 %v3623_v17 }
 0xd5d   : > { %3651 = vperm.xlu1 %11412, %v13221_v58   ;;  %v13229_v35 = vpop.eup %11500  ;;  %11520 = vpow2.f32 %v3613_v55 }
 0xd5e   : > { %v13231_v1 = vpop.eup %11502  ;;  %11522 = vpow2.f32 %v3625_v19 }
 0xd5f   : > { %v13239_v62 = vpop.eup %11504  ;;  %11524 = vpow2.f32 %v3627_v56 }
 0xd60   : > { %3654 = vperm.xlu0 %11413, %v13229_v35   ;;  %v13241_v49 = vpop.eup %11506  ;;  %11526 = vpow2.f32 %v3629_v42 }
 0xd61   : > { %3657 = vperm.xlu1 %11412, %v13231_v1   ;;  %v13247_v46 = vpop.eup %11508 }
 0xd62   : > { %v13249_v29 = vpop.eup %11510 }
 0xd63   : > { %v13253_v27 = vpop.eup %11512 }
 0xd64   : > { %3675 = vperm.xlu0 %11413, %v13241_v49   ;;  %v13255_v8 = vpop.eup %11514 }
 0xd65   : > { %3660 = vperm.xlu1 %11412, %v13239_v62   ;;  %v13259_v26 = vpop.eup %11516 }
 0xd66   : > { %v13261_v43 = vpop.eup %11518 }
 0xd67   : > { %v13265_v28 = vpop.eup %11520 }
 0xd68   : > { %3678 = vperm.xlu0 %11413, %v13249_v29   ;;  %v13267_v41 = vpop.eup %11522 }
 0xd69   : > { %3663 = vperm.xlu1 %11412, %v13247_v46   ;;  %v13271_v18 = vpop.eup %11524 }
 0xd6a   : > { %v13273_v10 = vpop.eup %11526 }
 0xd6c   : > { %3681 = vperm.xlu0 %11413, %v13255_v8  }
 0xd6d   : > { %3666 = vperm.xlu1 %11412, %v13253_v27  }
 0xd70   : > { %3684 = vperm.xlu0 %11413, %v13261_v43  }
 0xd71   : > { %3672 = vperm.xlu1 %11412, %v13259_v26  }
 0xd74   : > { %3687 = vperm.xlu0 %11413, %v13267_v41  }
 0xd75   : > { %3669 = vperm.xlu1 %11412, %v13265_v28  }
 0xd78   : > { %3690 = vperm.xlu0 %11413, %v13271_v18  }
 0xd79   : > { %3693 = vperm.xlu1 %11412, %v13273_v10  }
 0xddb   : > { %v3649_v48 = vpop.permute.xlu0 %3648 }
 0xddc   : > { %v3652_v51 = vpop.permute.xlu1 %3651  ;;  %v3698_v45 = vrot.slane %v3649_v48, %v12459_v63 }
 0xddd   : > { %v3702_v21 = vrot.slane %v3652_v51, %v12459_v63 }
 0xddf   : > { %v3655_v44 = vpop.permute.xlu0 %3654  ;;  %v3759_v33 = vsel %vm1160_vm13, %v3702_v21, %v3698_v45 }
 0xde0   : > { %v3658_v37 = vpop.permute.xlu1 %3657  ;;  %v3706_v0 = vrot.slane %v3655_v44, %v12459_v63 }
 0xde1   : > { %v3710_v11 = vrot.slane %v3658_v37, %v12459_v63 }
 0xde2   : > { %v3760_v25 = vsel %vm15236_vm9, %v3706_v0, %v3759_v33 }
 0xde3   : > { %v3676_v53 = vpop.permute.xlu0 %3675  ;;  %v3761_v48 = vsel %vm15314_vm4, %v3710_v11, %v3760_v25  ;;  %vm15319_vm4 = vmmov %vm15315_vm11 }
 0xde4   : > { %v3661_v40 = vpop.permute.xlu1 %3660  ;;  %v3734_v30 = vrot.slane %v3676_v53, %v12459_v63 }
 0xde5   : > { %v3714_v13 = vrot.slane %v3661_v40, %v12459_v63 }
 0xde7   : > { %v3679_v50 = vpop.permute.xlu0 %3678  ;;  %v3762_v37 = vsel %vm15307_vm1, %v3714_v13, %v3761_v48  ;;  %vm15320_vm1 = vmmov %vm15317_vm10 }
 0xde8   : > { %v3664_v52 = vpop.permute.xlu1 %3663  ;;  %v3738_v56 = vrot.slane %v3679_v50, %v12459_v63 }
 0xde9   : > { %v3718_v54 = vrot.slane %v3664_v52, %v12459_v63 }
 0xdeb   : > { %v3682_v39 = vpop.permute.xlu0 %3681  ;;  %v3763_v52 = vsel %vm15315_vm11, %v3718_v54, %v3762_v37  ;;  %vm15321_vm11 = vmmov %vm15312_vm5 }
 0xdec   : > { %v3667_v47 = vpop.permute.xlu1 %3666  ;;  %v3742_v51 = vrot.slane %v3682_v39, %v12459_v63 }
 0xded   : > { %v3722_v42 = vrot.slane %v3667_v47, %v12459_v63 }
 0xdef   : > { %v3685_v55 = vpop.permute.xlu0 %3684  ;;  %v3764_v39 = vsel %vm15317_vm10, %v3722_v42, %v3763_v52  ;;  %vm15323_vm10 = vcmask 1043459  }
 0xdf0   : > { %v3673_v17 = vpop.permute.xlu1 %3672  ;;  %v3746_v50 = vrot.slane %v3685_v55, %v12459_v63 }
 0xdf1   : > { %v3730_v19 = vrot.slane %v3673_v17, %v12459_v63 }
 0xdf3   : > { %v3766_v44 = vsel %vm1160_vm13, %v3734_v30, %v3730_v19  ;;  %v3688_v53 = vpop.permute.xlu0 %3687 }
 0xdf4   : > { %v3767_v40 = vsel %vm15236_vm9, %v3738_v56, %v3766_v44  ;;  %v3670_v21 = vpop.permute.xlu1 %3669  ;;  %v3750_v47 = vrot.slane %v3688_v53, %v12459_v63 }
 0xdf5   : > { %v3768_v45 = vsel %vm15316_vm15, %v3742_v51, %v3767_v40  ;;  %v3726_v0 = vrot.slane %v3670_v21, %v12459_v63  ;;  %vm15322_vm15 = vmmov %vm15313_vm0 }
 0xdf6   : > { %v3769_v33 = vsel %vm15318_vm3, %v3746_v50, %v3768_v45 }
 0xdf7   : > { %v3765_v11 = vsel %vm15312_vm5, %v3726_v0, %v3764_v39  ;;  %v3691_v13 = vpop.permute.xlu0 %3690  ;;  %v3770_v55 = vsel %vm15319_vm4, %v3750_v47, %v3769_v33  ;;  %vm15324_vm5 = vmmov %vm15323_vm10 }
 0xdf8   : > { %v3694_v25 = vpop.permute.xlu1 %3693  ;;  %v3775_v17 = vsel %vm15313_vm0, %v3765_v11, 0.0  ;;  %v3754_v54 = vrot.slane %v3691_v13, %v12459_v63  ;;  %vm15325_vm0 = vmmov %vm15318_vm3 }
 0xdf9   : > { %v3758_v30 = vrot.slane %v3694_v25, %v12459_v63  ;;  %3776 = vadd.xlane.f32.xlu0 %v3775_v17 }
 0xdfa   : > { %v3771_v19 = vsel %vm15320_vm1, %v3754_v54, %v3770_v55  ;;  %vm15326_vm1 = vmmov %vm15319_vm4 }
 0xdfb   : > { %v3772_v56 = vsel %vm15321_vm11, %v3758_v30, %v3771_v19  ;;  %vm15327_vm11 = vcmask 1046534  }
 0xdfc   : > { %v3778_v42 = vsel %vm15322_vm15, %v3772_v56, 0.0  ;;  %vm15328_vm15 = vmmov %vm15327_vm11 }
 0xdfd   : > { %3779 = vadd.xlane.f32.xlu1 %v3778_v42 }
 0xe86   : > { %v3777_v48 = vpop.xlane.xlu0 %3776 }
 0xe87   : > { %11528 = vrcp.f32 %v3777_v48 }
 0xe8a   : > { %v3780_v51 = vpop.xlane.xlu1 %3779 }
 0xe8b   : > { %11530 = vrcp.f32 %v3780_v51 }
 0xe91   : > { %v11529_v44 = vpop.eup %11528 }
 0xe92   : > { %v3792_v37 = vrot.slane %v11529_v44, %v12244_v12  ;;  %v3788_v40 = vrot.slane %v11529_v44, %v12266_v24  ;;  %v3800_v52 = vrot.slane %v11529_v44, %v12289_v36  ;;  %v3796_v45 = vrot.slane %v11529_v44, %v12285_v34 }
 0xe93   : > { %v3804_v39 = vrot.slane %v11529_v44, %v12251_v15  ;;  %v3808_v11 = vrot.slane %v11529_v44, %v12258_v20  ;;  %v3812_v13 = vrot.slane %v11529_v44, %v12293_v38  ;;  %v3816_v55 = vrot.slane %v11529_v44, %v12262_v22 }
 0xe94   : > { %v3866_v21 = vmul.f32 %v13221_v58, %v3792_v37  ;;  %v3865_v53 = vmul.f32 %v13219_v23, %v3788_v40  ;;  %v3868_v0 = vmul.f32 %v13231_v1, %v3800_v52  ;;  %v3867_v47 = vmul.f32 %v13229_v35, %v3796_v45 }
 0xe95   : > { %v11531_v50 = vpop.eup %11530  ;;  %v3869_v58 = vmul.f32 %v13239_v62, %v3804_v39  ;;  %v3870_v1 = vmul.f32 %v13247_v46, %v3808_v11  ;;  %v3871_v62 = vmul.f32 %v13253_v27, %v3812_v13  ;;  %v3872_v27 = vmul.f32 %v13265_v28, %v3816_v55 }
 0xe96   : > { %3893 = vperm.xlu1 %11412, %v3866_v21   ;;  %3890 = vperm.xlu0 %11413, %v3865_v53   ;;  %v3824_v33 = vrot.slane %v11531_v50, %v12244_v12  ;;  %v3828_v25 = vrot.slane %v11531_v50, %v12285_v34  ;;  %v3832_v17 = vrot.slane %v11531_v50, %v12289_v36 }
 0xe97   : > { %v3820_v30 = vrot.slane %v11531_v50, %v12266_v24  ;;  %v3836_v54 = vrot.slane %v11531_v50, %v12251_v15  ;;  %v3840_v19 = vrot.slane %v11531_v50, %v12258_v20  ;;  %v3848_v56 = vrot.slane %v11531_v50, %v12262_v22 }
 0xe98   : > { %v3874_v23 = vmul.f32 %v13241_v49, %v3824_v33  ;;  %v3875_v35 = vmul.f32 %v13249_v29, %v3828_v25  ;;  %v3876_v49 = vmul.f32 %v13255_v8, %v3832_v17  ;;  %v3844_v42 = vrot.slane %v11531_v50, %v12293_v38 }
 0xe99   : > { %v3873_v46 = vmul.f32 %v13259_v26, %v3820_v30  ;;  %v3877_v29 = vmul.f32 %v13261_v43, %v3836_v54  ;;  %v3878_v8 = vmul.f32 %v13267_v41, %v3840_v19  ;;  %v3880_v26 = vmul.f32 %v13273_v10, %v3848_v56 }
 0xe9a   : > { %3899 = vperm.xlu1 %11412, %v3868_v0   ;;  %3896 = vperm.xlu0 %11413, %v3867_v47   ;;  %v3879_v43 = vmul.f32 %v13271_v18, %v3844_v42 }
 0xe9e   : > { %3902 = vperm.xlu1 %11412, %v3869_v58   ;;  %4039 = vperm.xlu0 %11413, %v3874_v23  }
 0xea2   : > { %3905 = vperm.xlu1 %11412, %v3870_v1   ;;  %4042 = vperm.xlu0 %11413, %v3875_v35  }
 0xea6   : > { %3908 = vperm.xlu1 %11412, %v3871_v62   ;;  %4045 = vperm.xlu0 %11413, %v3876_v49  }
 0xeaa   : > { %4036 = vperm.xlu1 %11412, %v3873_v46   ;;  %4048 = vperm.xlu0 %11413, %v3877_v29  }
 0xeae   : > { %3911 = vperm.xlu1 %11412, %v3872_v27   ;;  %4051 = vperm.xlu0 %11413, %v3878_v8  }
 0xeb2   : > { %4057 = vperm.xlu1 %11412, %v3880_v26   ;;  %4054 = vperm.xlu0 %11413, %v3879_v43  }
 0xeb6   : > { %4098 = vrot.lane.b32.xlu1 %v12279_v32, %s11938_s29  ;;  %3952 = vrot.lane.b32.xlu0 %v12275_v31, %s11938_s29  ;;  %s11944_s29 = smov 24  }
 0xeba   : > { %4253 = vrot.lane.b32.xlu1 %v12279_v32, %s11939_s23  ;;  %4175 = vrot.lane.b32.xlu0 %v12275_v31, %s11939_s23 }
 0xebe   : > { %4251 = vrot.lane.b32.xlu1 %v12279_v32, %s11940_s15  ;;  %4173 = vrot.lane.b32.xlu0 %v12275_v31, %s11940_s15 }
 0xf15   : > { %v3894_v28 = vpop.permute.xlu1 %3893  ;;  %v3891_v41 = vpop.permute.xlu0 %3890 }
 0xf16   : > { %v3920_v45 = vrot.slane %v3894_v28, %v12459_v63  ;;  %v3916_v50 = vrot.slane %v3891_v41, %v12459_v63 }
 0xf18   : > { %v3945_v35 = vsel %vm1160_vm13, %v3920_v45, %v3916_v50 }
 0xf19   : > { %v3900_v18 = vpop.permute.xlu1 %3899  ;;  %v3897_v10 = vpop.permute.xlu0 %3896 }
 0xf1a   : > { %v3924_v39 = vrot.slane %v3897_v10, %v12459_v63  ;;  %v3928_v13 = vrot.slane %v3900_v18, %v12459_v63 }
 0xf1c   : > { %v3946_v49 = vsel %vm15236_vm9, %v3924_v39, %v3945_v35 }
 0xf1d   : > { %v3903_v48 = vpop.permute.xlu1 %3902  ;;  %v4040_v51 = vpop.permute.xlu0 %4039  ;;  %v3947_v8 = vsel %vm15324_vm5, %v3928_v13, %v3946_v49  ;;  %vm15331_vm5 = vcmask 64512  }
 0xf1e   : > { %v4066_v0 = vrot.slane %v4040_v51, %v12459_v63  ;;  %v3932_v30 = vrot.slane %v3903_v48, %v12459_v63 }
 0xf20   : > { %v3948_v43 = vsel %vm15325_vm0, %v3932_v30, %v3947_v8  ;;  %vm15333_vm0 = vmmov %vm15331_vm5 }
 0xf21   : > { %v3906_v44 = vpop.permute.xlu1 %3905  ;;  %v4043_v37 = vpop.permute.xlu0 %4042 }
 0xf22   : > { %v4070_v33 = vrot.slane %v4043_v37, %v12459_v63  ;;  %v3936_v46 = vrot.slane %v3906_v44, %v12459_v63 }
 0xf24   : > { %v3949_v41 = vsel %vm15326_vm1, %v3936_v46, %v3948_v43  ;;  %vm15335_vm1 = vmmov %vm15333_vm0 }
 0xf25   : > { %v3909_v40 = vpop.permute.xlu1 %3908  ;;  %v4046_v21 = vpop.permute.xlu0 %4045 }
 0xf26   : > { %v4074_v58 = vrot.slane %v4046_v21, %v12459_v63  ;;  %v3940_v55 = vrot.slane %v3909_v40, %v12459_v63 }
 0xf28   : > { %v3950_v10 = vsel %vm15328_vm15, %v3940_v55, %v3949_v41  ;;  %vm15338_vm15 = vmmov %vm15333_vm0 }
 0xf29   : > { %v4037_v53 = vpop.permute.xlu1 %4036  ;;  %v4049_v52 = vpop.permute.xlu0 %4048 }
 0xf2a   : > { %v4062_v47 = vrot.slane %v4037_v53, %v12459_v63  ;;  %v4078_v62 = vrot.slane %v4049_v52, %v12459_v63 }
 0xf2c   : > { %v4091_v23 = vsel %vm1160_vm13, %v4066_v0, %v4062_v47 }
 0xf2d   : > { %v4092_v11 = vsel %vm15236_vm9, %v4070_v33, %v4091_v23  ;;  %v3912_v25 = vpop.permute.xlu1 %3911  ;;  %v4052_v1 = vpop.permute.xlu0 %4051  ;;  %vm15332_vm9 = vmmov %vm15331_vm5 }
 0xf2e   : > { %v4093_v17 = vsel %vm15323_vm10, %v4074_v58, %v4092_v11  ;;  %v4082_v54 = vrot.slane %v4052_v1, %v12459_v63  ;;  %v3944_v56 = vrot.slane %v3912_v25, %v12459_v63  ;;  %vm15329_vm10 = vcmask 1047559  }
 0xf2f   : > { %v4094_v29 = vsel %vm15318_vm3, %v4078_v62, %v4093_v17  ;;  %vm15330_vm3 = vmmov %vm15329_vm10 }
 0xf30   : > { %v4095_v28 = vsel %vm15319_vm4, %v4082_v54, %v4094_v29  ;;  %v3951_v37 = vsel %vm15330_vm3, %v3944_v56, %v3950_v10  ;;  %vm15334_vm4 = vmmov %vm15333_vm0 }
 0xf31   : > { %v4058_v19 = vpop.permute.xlu1 %4057  ;;  %v4055_v27 = vpop.permute.xlu0 %4054 }
 0xf32   : > { %v4090_v42 = vrot.slane %v4058_v19, %v12459_v63  ;;  %v4086_v26 = vrot.slane %v4055_v27, %v12459_v63 }
 0xf34   : > { %v4096_v18 = vsel %vm15327_vm11, %v4086_v26, %v4095_v28  ;;  %vm15337_vm11 = vmmov %vm15333_vm0 }
 0xf35   : > { %v4099_v48 = vpop.permute.xlu1 %4098  ;;  %v3953_v51 = vpop.permute.xlu0 %3952  ;;  %v4097_v44 = vsel %vm15329_vm10, %v4090_v42, %v4096_v18 }
 0xf36   : > { %11073 = vmatpush3.msra.mxu0 %v3953_v51  ;;  %11078 = vmatpush3.msra.mxu1 %v4099_v48 }
 0xf37   : > { %11075 = vmatmul.mubr.msk.f32.vlgmr.msra.gmra.mrb[8].mxu0 %vm15331_vm5, %v3951_v37  ;;  %11080 = vmatmul.mubr.msk.f32.vlgmr.msra.gmra.mrb[14].mxu1 %vm15332_vm9, %v4097_v44  ;;  %vm15336_vm9 = vmmov %vm15333_vm0 }
 0xf38   : > { %11082 = vmatprep.subr.mxu0 %v11929_v16  ;;  %11087 = vmatprep.subr.mxu1 %v11929_v16 }
 0xf39   : > { %v4254_v40 = vpop.permute.xlu1 %4253  ;;  %v4176_v21 = vpop.permute.xlu0 %4175  ;;  %11084 = vmatprep.mubr.msk.f32.mxu0 %vm15290_vm2, %v11929_v16  ;;  %11089 = vmatprep.mubr.msk.f32.mxu1 %vm15290_vm2, %v11929_v16 }
 0xf3a   : > { %v4336_v53 = vsel %vm15333_vm0, %v4254_v40, 0.0  ;;  %v4333_v52 = vsel %vm15334_vm4, %v4176_v21, 0.0  ;;  %vm15339_vm4 = vcmp.ne.s32.totalorder %v12336_v7, 0 }
 0xf3b   : > { %4337 = vadd.xlane.f32.xlu1 %v4336_v53  ;;  %4334 = vadd.xlane.f32.xlu0 %v4333_v52 }
 0xf3d   : > { %11083 = vmatpush3.xpose.msk.msra.mxu0 %vm15335_vm1, %v4176_v21  ;;  %11088 = vmatpush3.xpose.msk.msra.mxu1 %vm15336_vm9, %v4254_v40  ;;  %v4252_v45 = vpop.permute.xlu1 %4251  ;;  %v4174_v50 = vpop.permute.xlu0 %4173 }
 0xf3e   : > { %11092 = vmatprep.subr.mxu0 %v11929_v16  ;;  %11097 = vmatprep.subr.mxu1 %v11929_v16 }
 0xf40   : > { %11085 = vmatmul.mubr.msk.f32.vlgmr.msra.gmra.mrb[10].mxu0 %vm15337_vm11, %v4174_v50  ;;  %11090 = vmatmul.mubr.msk.f32.vlgmr.msra.gmra.mrb[16].mxu1 %vm15338_vm15, %v4252_v45 }
 0xf41   : > { %11094 = vmatprep.mubr.msk.f32.mxu0 %vm15290_vm2, %v11929_v16  ;;  %11099 = vmatprep.mubr.msk.f32.mxu1 %vm15290_vm2, %v11929_v16 }
 0xfc8   : > { %v4335_v28 = vpop.xlane.xlu0 %4334  ;;  %v4338_v41 = vpop.xlane.xlu1 %4337 }
 0xfc9   : > { %vm4339_vm10 = vcmp.eq.f32.partialorder %v4335_v28, 0.0  ;;  %vm4340_vm9 = vcmp.eq.f32.partialorder %v4338_v41, 0.0 }
 0xfca   : > { %vm4346_vm3 = vmor %vm4339_vm10, %vm863_vm8 }
 0xfcb   : > { %vm4345_vm5 = vmor %vm4339_vm10, %vm862_vm6 }
 0xfcc   : > { %vm4348_vm0 = vmor %vm4339_vm10, %vm865_vm12 }
 0xfcd   : > { %vm4347_vm1 = vmor %vm4339_vm10, %vm15339_vm4 }
 0xfce   : > { %vm4349_vm11 = vmor %vm4339_vm10, %vm866_vm14 }
 0xfcf   : > { %vm4354_vm15 = vmor %vm4340_vm9, %vm863_vm8 }
 0xfd0   : > { %vm4351_vm8 = vmor %vm4339_vm10, %vm868_vm7 }
0x100a   : > { %v13401_v0 = vpop.f32.mrb[8].mxu0  ;;  %v13403_v47 = vpop.f32.mrb[14].mxu1 }
0x100b   : > { %v11076_v39 = vpop.f32.mrb[9].mxu0  ;;  %v11081_v33 = vpop.f32.mrb[15].mxu1 }
0x1013   : > { %v4247_v58 = vpop.f32.mrb[10].mxu0  ;;  %v4325_v23 = vpop.f32.mrb[16].mxu1 }
0x1014   : > { %v4329_v11 = vmul.f32 0.35355338, %v4247_v58  ;;  %v11086_v25 = vpop.f32.mrb[11].mxu0  ;;  %v11091_v1 = vpop.f32.mrb[17].mxu1  ;;  %v4330_v17 = vmul.f32 0.35355338, %v4325_v23 }
0x1016   : > { %v4373_v35 = vrot.slane %v4329_v11, %v12244_v12  ;;  %v4366_v13 = vrot.slane %v4329_v11, %v12266_v24  ;;  %v4387_v62 = vrot.slane %v4329_v11, %v12289_v36  ;;  %v4380_v49 = vrot.slane %v4329_v11, %v12285_v34 }
0x1017   : > { %v4394_v30 = vrot.slane %v4329_v11, %v12251_v15  ;;  %v4429_v54 = vrot.slane %v4330_v17, %v12244_v12  ;;  %v4401_v46 = vrot.slane %v4329_v11, %v12258_v20  ;;  %v4436_v29 = vrot.slane %v4330_v17, %v12285_v34 }
0x1018   : > { %4375 = vbcast.lane.b32.xlu1 %v4373_v35, 256  ;;  %4368 = vbcast.lane.b32.xlu0 %v4366_v13, 256  ;;  %v4408_v55 = vrot.slane %v4329_v11, %v12293_v38  ;;  %v4443_v19 = vrot.slane %v4330_v17, %v12289_v36  ;;  %v4422_v27 = vrot.slane %v4330_v17, %v12266_v24 }
0x1019   : > { %v4450_v8 = vrot.slane %v4330_v17, %v12251_v15  ;;  %v4415_v56 = vrot.slane %v4329_v11, %v12262_v22  ;;  %v4457_v42 = vrot.slane %v4330_v17, %v12258_v20  ;;  %v4471_v26 = vrot.slane %v4330_v17, %v12262_v22 }
0x101a   : > { %v4464_v43 = vrot.slane %v4330_v17, %v12293_v38 }
0x101c   : > { %4389 = vbcast.lane.b32.xlu1 %v4387_v62, 256  ;;  %4382 = vbcast.lane.b32.xlu0 %v4380_v49, 256 }
0x1020   : > { %4396 = vbcast.lane.b32.xlu1 %v4394_v30, 256  ;;  %4431 = vbcast.lane.b32.xlu0 %v4429_v54, 256 }
0x1024   : > { %4403 = vbcast.lane.b32.xlu1 %v4401_v46, 256  ;;  %4438 = vbcast.lane.b32.xlu0 %v4436_v29, 256 }
0x1028   : > { %4410 = vbcast.lane.b32.xlu1 %v4408_v55, 256  ;;  %4445 = vbcast.lane.b32.xlu0 %v4443_v19, 256 }
0x102c   : > { %4424 = vbcast.lane.b32.xlu1 %v4422_v27, 256  ;;  %4452 = vbcast.lane.b32.xlu0 %v4450_v8, 256 }
0x1030   : > { %4417 = vbcast.lane.b32.xlu1 %v4415_v56, 256  ;;  %4459 = vbcast.lane.b32.xlu0 %v4457_v42, 256 }
0x1034   : > { %4473 = vbcast.lane.b32.xlu1 %v4471_v26, 256  ;;  %4466 = vbcast.lane.b32.xlu0 %v4464_v43, 256 }
0x108a   : > { %v4376_v18 = vpop.permute.xlu1 %4375  ;;  %v4369_v10 = vpop.permute.xlu0 %4368 }
0x108b   : > { %v13427_v48 = vsel %vm4346_vm3, -4.2949673e+09, %v4376_v18  ;;  %v13429_v51 = vsel %vm4345_vm5, -4.2949673e+09, %v4369_v10  ;;  %vm15340_vm3 = vcmp.ne.s32.totalorder %v12330_v4, 0 }
0x108c   : > { %4527 = vperm.xlu1 %11412, %v13427_v48   ;;  %4524 = vperm.xlu0 %11413, %v13429_v51   ;;  %vm4350_vm5 = vmor %vm4339_vm10, %vm15340_vm3 }
0x108e   : > { %v4390_v44 = vpop.permute.xlu1 %4389  ;;  %v4383_v37 = vpop.permute.xlu0 %4382 }
0x108f   : > { %v13439_v40 = vsel %vm4348_vm0, -4.2949673e+09, %v4390_v44  ;;  %v13441_v21 = vsel %vm4347_vm1, -4.2949673e+09, %v4383_v37  ;;  %vm15341_vm0 = vmmov %vm15339_vm4 }
0x1090   : > { %4533 = vperm.xlu1 %11412, %v13439_v40   ;;  %4530 = vperm.xlu0 %11413, %v13441_v21   ;;  %vm4355_vm4 = vmor %vm4340_vm9, %vm15341_vm0 }
0x1091   : > { %vm4356_vm1 = vmor %vm4340_vm9, %vm865_vm12  ;;  %vm15342_vm12 = vcmp.ne.s32.totalorder %v12334_v6, 0 }
0x1092   : > { %v4397_v53 = vpop.permute.xlu1 %4396  ;;  %v4432_v52 = vpop.permute.xlu0 %4431  ;;  %vm4352_vm3 = vmor %vm4339_vm10, %vm15342_vm12 }
0x1093   : > { %v13451_v45 = vsel %vm4349_vm11, -4.2949673e+09, %v4397_v53  ;;  %v13453_v50 = vsel %vm4354_vm15, -4.2949673e+09, %v4432_v52  ;;  %vm4353_vm11 = vmor %vm4340_vm9, %vm862_vm6  ;;  %vm15343_vm6 = vcmp.ne.s32.totalorder %v12330_v4, 0 }
0x1094   : > { %4536 = vperm.xlu1 %11412, %v13451_v45   ;;  %4551 = vperm.xlu0 %11413, %v13453_v50   ;;  %vm4357_vm15 = vmor %vm4340_vm9, %vm866_vm14 }
0x1095   : > { %vm15344_vm14 = vmmov %vm15342_vm12 }
0x1096   : > { %v4404_v39 = vpop.permute.xlu1 %4403  ;;  %v4439_v2 = vpop.permute.xlu0 %4438  ;;  %vm4360_vm0 = vmor %vm4340_vm9, %vm15344_vm14 }
0x1097   : > { %v13463_v33 = vsel %vm4350_vm5, -4.2949673e+09, %v4404_v39  ;;  %v13465_v58 = vsel %vm4355_vm4, -4.2949673e+09, %v4439_v2  ;;  %vm4358_vm5 = vmor %vm4340_vm9, %vm15343_vm6  ;;  %vm15347_vm4 = vcmask 1044484   ;;  %vm15354_vm6 = vcmask 64512  }
0x1098   : > { %4539 = vperm.xlu1 %11412, %v13463_v33   ;;  %4554 = vperm.xlu0 %11413, %v13465_v58   ;;  %vm4359_vm10 = vmor %vm4340_vm9, %vm868_vm7  ;;  %vm15345_vm7 = vcmask 1042434   ;;  %vm15346_vm9 = vcmask 1043459  }
0x1099   : > { %vm15352_vm12 = vmmov %vm15347_vm4 }
0x109a   : > { %v4411_v23 = vpop.permute.xlu1 %4410  ;;  %v4446_v7 = vpop.permute.xlu0 %4445 }
0x109b   : > { %v13475_v11 = vsel %vm4351_vm8, -4.2949673e+09, %v4411_v23  ;;  %v13477_v25 = vsel %vm4356_vm1, -4.2949673e+09, %v4446_v7  ;;  %vm15348_vm8 = vmmov %vm15345_vm7  ;;  %vm15349_vm1 = vcmask 1045509  }
0x109c   : > { %4542 = vperm.xlu1 %11412, %v13475_v11   ;;  %4557 = vperm.xlu0 %11413, %v13477_v25  }
0x109e   : > { %v4425_v1 = vpop.permute.xlu1 %4424  ;;  %v4453_v9 = vpop.permute.xlu0 %4452 }
0x109f   : > { %v13487_v35 = vsel %vm4353_vm11, -4.2949673e+09, %v4425_v1  ;;  %v13489_v13 = vsel %vm4357_vm15, -4.2949673e+09, %v4453_v9  ;;  %vm15350_vm11 = vmmov %vm15346_vm9  ;;  %vm15351_vm15 = vcmask 1046534  }
0x10a0   : > { %4548 = vperm.xlu1 %11412, %v13487_v35   ;;  %4560 = vperm.xlu0 %11413, %v13489_v13   ;;  %vm15356_vm14 = vmmov %vm15351_vm15 }
0x10a2   : > { %v4418_v5 = vpop.permute.xlu1 %4417  ;;  %v4460_v3 = vpop.permute.xlu0 %4459 }
0x10a3   : > { %v13499_v17 = vsel %vm4352_vm3, -4.2949673e+09, %v4418_v5  ;;  %v13501_v62 = vsel %vm4358_vm5, -4.2949673e+09, %v4460_v3  ;;  %vm15353_vm3 = vcmask 1047559   ;;  %vm15355_vm5 = vmmov %vm15349_vm1 }
0x10a4   : > { %4545 = vperm.xlu1 %11412, %v13499_v17   ;;  %4563 = vperm.xlu0 %11413, %v13501_v62  }
0x10a6   : > { %v4474_v49 = vpop.permute.xlu1 %4473  ;;  %v4467_v4 = vpop.permute.xlu0 %4466 }
0x10a7   : > { %v13511_v30 = vsel %vm4360_vm0, -4.2949673e+09, %v4474_v49  ;;  %v13513_v54 = vsel %vm4359_vm10, -4.2949673e+09, %v4467_v4  ;;  %vm15357_vm0 = vmmov %vm15353_vm3 }
0x10a8   : > { %4569 = vperm.xlu1 %11412, %v13511_v30   ;;  %4566 = vperm.xlu0 %11413, %v13513_v54   ;;  %vm15358_vm10 = vmmov %vm15354_vm6 }
0x110b   : > { %v4528_v46 = vpop.permute.xlu1 %4527  ;;  %v4525_v29 = vpop.permute.xlu0 %4524 }
0x110c   : > { %v4578_v14 = vrot.slane %v4528_v46, %v12459_v63  ;;  %v4574_v42 = vrot.slane %v4525_v29, %v12459_v63 }
0x110e   : > { %v4635_v41 = vsel %vm1160_vm13, %v4578_v14, %v4574_v42 }
0x110f   : > { %v4534_v55 = vpop.permute.xlu1 %4533  ;;  %v4531_v6 = vpop.permute.xlu0 %4530 }
0x1110   : > { %v4582_v26 = vrot.slane %v4531_v6, %v12459_v63  ;;  %v4586_v18 = vrot.slane %v4534_v55, %v12459_v63 }
0x1112   : > { %v4636_v10 = vsel %vm15345_vm7, %v4582_v26, %v4635_v41 }
0x1113   : > { %v4537_v19 = vpop.permute.xlu1 %4536  ;;  %v4552_v27 = vpop.permute.xlu0 %4551  ;;  %v4637_v1 = vsel %vm15346_vm9, %v4586_v18, %v4636_v10 }
0x1114   : > { %v4590_v44 = vrot.slane %v4537_v19, %v12459_v63  ;;  %v4610_v52 = vrot.slane %v4552_v27, %v12459_v63 }
0x1116   : > { %v4638_v3 = vsel %vm15347_vm4, %v4590_v44, %v4637_v1 }
0x1117   : > { %v4540_v8 = vpop.permute.xlu1 %4539  ;;  %v4555_v56 = vpop.permute.xlu0 %4554 }
0x1118   : > { %v4594_v39 = vrot.slane %v4540_v8, %v12459_v63  ;;  %v4614_v23 = vrot.slane %v4555_v56, %v12459_v63 }
0x111a   : > { %v4639_v29 = vsel %vm15349_vm1, %v4594_v39, %v4638_v3 }
0x111b   : > { %v4543_v43 = vpop.permute.xlu1 %4542  ;;  %v4558_v28 = vpop.permute.xlu0 %4557 }
0x111c   : > { %v4598_v7 = vrot.slane %v4543_v43, %v12459_v63  ;;  %v4618_v9 = vrot.slane %v4558_v28, %v12459_v63 }
0x111e   : > { %v4640_v8 = vsel %vm15351_vm15, %v4598_v7, %v4639_v29  ;;  %vm15361_vm15 = vmmov %vm15356_vm14 }
0x111f   : > { %v4549_v37 = vpop.permute.xlu1 %4548  ;;  %v4561_v53 = vpop.permute.xlu0 %4560 }
0x1120   : > { %v4606_v2 = vrot.slane %v4549_v37, %v12459_v63  ;;  %v4622_v6 = vrot.slane %v4561_v53, %v12459_v63 }
0x1122   : > { %v4642_v5 = vsel %vm1160_vm13, %v4610_v52, %v4606_v2 }
0x1123   : > { %v4643_v49 = vsel %vm15348_vm8, %v4614_v23, %v4642_v5  ;;  %v4546_v4 = vpop.permute.xlu1 %4545  ;;  %v4564_v46 = vpop.permute.xlu0 %4563  ;;  %vm15359_vm8 = vmmov %vm15345_vm7 }
0x1124   : > { %v4644_v55 = vsel %vm15350_vm11, %v4618_v9, %v4643_v49  ;;  %v4602_v19 = vrot.slane %v4546_v4, %v12459_v63  ;;  %v4626_v27 = vrot.slane %v4564_v46, %v12459_v63  ;;  %vm15360_vm11 = vmmov %vm15346_vm9 }
0x1125   : > { %v4645_v56 = vsel %vm15352_vm12, %v4622_v6, %v4644_v55  ;;  %vm15362_vm12 = vmmov %vm15347_vm4 }
0x1126   : > { %v4641_v14 = vsel %vm15353_vm3, %v4602_v19, %v4640_v8  ;;  %v4646_v18 = vsel %vm15355_vm5, %v4626_v27, %v4645_v56  ;;  %vm15363_vm3 = vmmov %vm15357_vm0 }
0x1127   : > { %v4570_v42 = vpop.permute.xlu1 %4569  ;;  %v4567_v26 = vpop.permute.xlu0 %4566  ;;  %v4651_v43 = vsel %vm15354_vm6, %v4641_v14, -inf  ;;  %vm15364_vm5 = vmmov %vm15349_vm1 }
0x1128   : > { %v4634_v28 = vrot.slane %v4570_v42, %v12459_v63  ;;  %v4630_v41 = vrot.slane %v4567_v26, %v12459_v63  ;;  %4652 = vmax.xlane.f32.xlu0 %v4651_v43 }
0x112a   : > { %v4647_v10 = vsel %vm15356_vm14, %v4630_v41, %v4646_v18 }
0x112b   : > { %v4648_v44 = vsel %vm15357_vm0, %v4634_v28, %v4647_v10 }
0x112c   : > { %v4654_v37 = vsel %vm15358_vm10, %v4648_v44, -inf  ;;  %vm15365_vm10 = vmmov %vm15354_vm6 }
0x112d   : > { %4655 = vmax.xlane.f32.xlu1 %v4654_v37 }
0x11b5   : > { %v4653_v53 = vpop.xlane.xlu0 %4652 }
0x11b6   : > { %v4662_v52 = vrot.slane %v4653_v53, %v12266_v24  ;;  %v4666_v39 = vrot.slane %v4653_v53, %v12244_v12  ;;  %v4670_v2 = vrot.slane %v4653_v53, %v12285_v34  ;;  %v4674_v23 = vrot.slane %v4653_v53, %v12289_v36 }
0x11b7   : > { %v4678_v7 = vrot.slane %v4653_v53, %v12251_v15  ;;  %v4682_v29 = vrot.slane %v4653_v53, %v12258_v20 }
0x11b8   : > { %v4739_v1 = vsub.f32 %v13429_v51, %v4662_v52  ;;  %v4740_v9 = vsub.f32 %v13427_v48, %v4666_v39  ;;  %v4741_v5 = vsub.f32 %v13441_v21, %v4670_v2  ;;  %v4742_v3 = vsub.f32 %v13439_v40, %v4674_v23 }
0x11b9   : > { %v4743_v55 = vsub.f32 %v13451_v45, %v4678_v7  ;;  %v4686_v21 = vrot.slane %v4653_v53, %v12293_v38  ;;  %v4744_v40 = vsub.f32 %v13463_v33, %v4682_v29 }
0x11ba   : > { %v4755_v49 = vmul.f32 1.442695, %v4739_v1  ;;  %v4757_v4 = vmul.f32 1.442695, %v4740_v9  ;;  %v4656_v46 = vpop.xlane.xlu1 %4655  ;;  %v4759_v6 = vmul.f32 1.442695, %v4741_v5 }
0x11bb   : > { %v4698_v19 = vrot.slane %v4656_v46, %v12244_v12  ;;  %v4761_v27 = vmul.f32 1.442695, %v4742_v3  ;;  %v4702_v51 = vrot.slane %v4656_v46, %v12285_v34  ;;  %v4763_v8 = vmul.f32 1.442695, %v4743_v55 }
0x11bc   : > { %11532 = vpow2.f32 %v4755_v49  ;;  %v4706_v56 = vrot.slane %v4656_v46, %v12289_v36  ;;  %v4745_v42 = vsub.f32 %v13475_v11, %v4686_v21  ;;  %v4765_v26 = vmul.f32 1.442695, %v4744_v40 }
0x11bd   : > { %11534 = vpow2.f32 %v4757_v4  ;;  %v4748_v48 = vsub.f32 %v13453_v50, %v4698_v19  ;;  %v4749_v45 = vsub.f32 %v13465_v58, %v4702_v51  ;;  %v4694_v43 = vrot.slane %v4656_v46, %v12266_v24 }
0x11be   : > { %11536 = vpow2.f32 %v4759_v6  ;;  %v4710_v50 = vrot.slane %v4656_v46, %v12251_v15  ;;  %v4750_v28 = vsub.f32 %v13477_v25, %v4706_v56  ;;  %v4690_v58 = vrot.slane %v4653_v53, %v12262_v22 }
0x11bf   : > { %11538 = vpow2.f32 %v4761_v27  ;;  %v4773_v14 = vmul.f32 1.442695, %v4748_v48  ;;  %v4775_v33 = vmul.f32 1.442695, %v4749_v45  ;;  %v4767_v11 = vmul.f32 1.442695, %v4745_v42 }
0x11c0   : > { %11540 = vpow2.f32 %v4763_v8  ;;  %v4747_v10 = vsub.f32 %v13487_v35, %v4694_v43  ;;  %v4714_v44 = vrot.slane %v4656_v46, %v12258_v20  ;;  %v4751_v25 = vsub.f32 %v13489_v13, %v4710_v50 }
0x11c1   : > { %11542 = vpow2.f32 %v4773_v14  ;;  %v4777_v37 = vmul.f32 1.442695, %v4750_v28  ;;  %v4746_v53 = vsub.f32 %v13499_v17, %v4690_v58  ;;  %v4718_v2 = vrot.slane %v4656_v46, %v12293_v38 }
0x11c2   : > { %11544 = vpow2.f32 %v4765_v26  ;;  %v4771_v35 = vmul.f32 1.442695, %v4747_v10  ;;  %v4722_v23 = vrot.slane %v4656_v46, %v12262_v22  ;;  %v4752_v13 = vsub.f32 %v13501_v62, %v4714_v44 }
0x11c3   : > { %11546 = vpow2.f32 %v4775_v33  ;;  %v4779_v7 = vmul.f32 1.442695, %v4751_v25  ;;  %v4769_v5 = vmul.f32 1.442695, %v4746_v53  ;;  %v4753_v3 = vsub.f32 %v13513_v54, %v4718_v2 }
0x11c4   : > { %11548 = vpow2.f32 %v4767_v11  ;;  %v4754_v17 = vsub.f32 %v13511_v30, %v4722_v23  ;;  %v4781_v49 = vmul.f32 1.442695, %v4752_v13 }
0x11c5   : > { %11550 = vpow2.f32 %v4777_v37  ;;  %v4783_v46 = vmul.f32 1.442695, %v4753_v3 }
0x11c6   : > { %v13571_v41 = vpop.eup %11532  ;;  %11552 = vpow2.f32 %v4771_v35  ;;  %v4785_v54 = vmul.f32 1.442695, %v4754_v17 }
0x11c7   : > { %v13573_v18 = vpop.eup %11534  ;;  %4804 = vperm.xlu0 %11413, %v13571_v41   ;;  %11554 = vpow2.f32 %v4779_v7 }
0x11c8   : > { %4807 = vperm.xlu1 %11412, %v13573_v18   ;;  %v13581_v52 = vpop.eup %11536  ;;  %11556 = vpow2.f32 %v4769_v5 }
0x11c9   : > { %v13583_v39 = vpop.eup %11538  ;;  %11558 = vpow2.f32 %v4781_v49 }
0x11ca   : > { %v13591_v1 = vpop.eup %11540  ;;  %11560 = vpow2.f32 %v4783_v46 }
0x11cb   : > { %4810 = vperm.xlu0 %11413, %v13581_v52   ;;  %v13593_v9 = vpop.eup %11542  ;;  %11562 = vpow2.f32 %v4785_v54 }
0x11cc   : > { %4813 = vperm.xlu1 %11412, %v13583_v39   ;;  %v13599_v4 = vpop.eup %11544 }
0x11cd   : > { %v13601_v62 = vpop.eup %11546 }
0x11ce   : > { %v13605_v29 = vpop.eup %11548 }
0x11cf   : > { %4831 = vperm.xlu0 %11413, %v13593_v9   ;;  %v13607_v55 = vpop.eup %11550 }
0x11d0   : > { %4816 = vperm.xlu1 %11412, %v13591_v1   ;;  %v13611_v30 = vpop.eup %11552 }
0x11d1   : > { %v13613_v6 = vpop.eup %11554 }
0x11d2   : > { %v13617_v19 = vpop.eup %11556 }
0x11d3   : > { %4834 = vperm.xlu0 %11413, %v13601_v62   ;;  %v13619_v27 = vpop.eup %11558 }
0x11d4   : > { %4819 = vperm.xlu1 %11412, %v13599_v4   ;;  %v13623_v51 = vpop.eup %11560 }
0x11d5   : > { %v13625_v48 = vpop.eup %11562 }
0x11d7   : > { %4837 = vperm.xlu0 %11413, %v13607_v55  }
0x11d8   : > { %4822 = vperm.xlu1 %11412, %v13605_v29  }
0x11db   : > { %4840 = vperm.xlu0 %11413, %v13613_v6  }
0x11dc   : > { %4828 = vperm.xlu1 %11412, %v13611_v30  }
0x11df   : > { %4843 = vperm.xlu0 %11413, %v13619_v27  }
0x11e0   : > { %4825 = vperm.xlu1 %11412, %v13617_v19  }
0x11e3   : > { %4846 = vperm.xlu0 %11413, %v13623_v51  }
0x11e4   : > { %4849 = vperm.xlu1 %11412, %v13625_v48  }
0x1246   : > { %v4805_v21 = vpop.permute.xlu0 %4804 }
0x1247   : > { %v4808_v40 = vpop.permute.xlu1 %4807  ;;  %v4854_v50 = vrot.slane %v4805_v21, %v12459_v63 }
0x1248   : > { %v4858_v43 = vrot.slane %v4808_v40, %v12459_v63 }
0x124a   : > { %v4811_v8 = vpop.permute.xlu0 %4810  ;;  %v4915_v11 = vsel %vm1160_vm13, %v4858_v43, %v4854_v50 }
0x124b   : > { %v4814_v56 = vpop.permute.xlu1 %4813  ;;  %v4862_v28 = vrot.slane %v4811_v8, %v12459_v63 }
0x124c   : > { %v4866_v10 = vrot.slane %v4814_v56, %v12459_v63 }
0x124d   : > { %v4916_v44 = vsel %vm15345_vm7, %v4862_v28, %v4915_v11 }
0x124e   : > { %v4832_v14 = vpop.permute.xlu0 %4831  ;;  %v4917_v5 = vsel %vm15346_vm9, %v4866_v10, %v4916_v44 }
0x124f   : > { %v4817_v45 = vpop.permute.xlu1 %4816  ;;  %v4890_v2 = vrot.slane %v4832_v14, %v12459_v63 }
0x1250   : > { %v4870_v25 = vrot.slane %v4817_v45, %v12459_v63 }
0x1252   : > { %v4835_v26 = vpop.permute.xlu0 %4834  ;;  %v4918_v49 = vsel %vm15347_vm4, %v4870_v25, %v4917_v5  ;;  %vm15366_vm4 = vmmov %vm15345_vm7 }
0x1253   : > { %v4820_v42 = vpop.permute.xlu1 %4819  ;;  %v4894_v13 = vrot.slane %v4835_v26, %v12459_v63 }
0x1254   : > { %v4874_v35 = vrot.slane %v4820_v42, %v12459_v63 }
0x1256   : > { %v4838_v58 = vpop.permute.xlu0 %4837  ;;  %v4919_v40 = vsel %vm15349_vm1, %v4874_v35, %v4918_v49  ;;  %vm15368_vm1 = vmmov %vm15346_vm9 }
0x1257   : > { %v4823_v33 = vpop.permute.xlu1 %4822  ;;  %v4898_v3 = vrot.slane %v4838_v58, %v12459_v63 }
0x1258   : > { %v4878_v7 = vrot.slane %v4823_v33, %v12459_v63 }
0x125a   : > { %v4841_v53 = vpop.permute.xlu0 %4840  ;;  %v4920_v42 = vsel %vm15361_vm15, %v4878_v7, %v4919_v40  ;;  %vm15370_vm15 = vmmov %vm15364_vm5 }
0x125b   : > { %v4829_v37 = vpop.permute.xlu1 %4828  ;;  %v4902_v56 = vrot.slane %v4841_v53, %v12459_v63 }
0x125c   : > { %v4886_v23 = vrot.slane %v4829_v37, %v12459_v63 }
0x125e   : > { %v4922_v17 = vsel %vm1160_vm13, %v4890_v2, %v4886_v23  ;;  %v4844_v21 = vpop.permute.xlu0 %4843 }
0x125f   : > { %v4923_v46 = vsel %vm15359_vm8, %v4894_v13, %v4922_v17  ;;  %v4826_v54 = vpop.permute.xlu1 %4825  ;;  %v4906_v14 = vrot.slane %v4844_v21, %v12459_v63  ;;  %vm15367_vm8 = vmmov %vm15362_vm12 }
0x1260   : > { %v4924_v8 = vsel %vm15360_vm11, %v4898_v3, %v4923_v46  ;;  %v4882_v45 = vrot.slane %v4826_v54, %v12459_v63  ;;  %vm15369_vm11 = vmmov %vm15367_vm8 }
0x1261   : > { %v4925_v26 = vsel %vm15362_vm12, %v4902_v56, %v4924_v8  ;;  %vm15371_vm12 = vmmov %vm15364_vm5 }
0x1262   : > { %v4921_v43 = vsel %vm15363_vm3, %v4882_v45, %v4920_v42  ;;  %v4847_v28 = vpop.permute.xlu0 %4846  ;;  %v4926_v10 = vsel %vm15364_vm5, %v4906_v14, %v4925_v26  ;;  %vm15372_vm3 = vmmov %vm15356_vm14 }
0x1263   : > { %v4850_v50 = vpop.permute.xlu1 %4849  ;;  %v4931_v33 = vsel %vm15354_vm6, %v4921_v43, 0.0  ;;  %v4910_v11 = vrot.slane %v4847_v28, %v12459_v63  ;;  %vm15373_vm6 = vmmov %vm15372_vm3 }
0x1264   : > { %v4914_v58 = vrot.slane %v4850_v50, %v12459_v63  ;;  %4932 = vadd.xlane.f32.xlu0 %v4931_v33  ;;  %vm15374_vm5 = vmmov %vm15357_vm0 }
0x1265   : > { %v4927_v44 = vsel %vm15356_vm14, %v4910_v11, %v4926_v10  ;;  %vm15375_vm14 = vmmov %vm15357_vm0 }
0x1266   : > { %v4928_v25 = vsel %vm15357_vm0, %v4914_v58, %v4927_v44  ;;  %vm15376_vm0 = vmmov %vm15365_vm10 }
0x1267   : > { %v4934_v37 = vsel %vm15365_vm10, %v4928_v25, 0.0  ;;  %vm15377_vm10 = vmmov %vm15376_vm0 }
0x1268   : > { %4935 = vadd.xlane.f32.xlu1 %v4934_v37 }
0x12f1   : > { %v4933_v53 = vpop.xlane.xlu0 %4932 }
0x12f2   : > { %11564 = vrcp.f32 %v4933_v53 }
0x12f5   : > { %v4936_v2 = vpop.xlane.xlu1 %4935 }
0x12f6   : > { %11566 = vrcp.f32 %v4936_v2 }
0x12fc   : > { %v11565_v35 = vpop.eup %11564 }
0x12fd   : > { %v4948_v23 = vrot.slane %v11565_v35, %v12244_v12  ;;  %v4944_v13 = vrot.slane %v11565_v35, %v12266_v24  ;;  %v4956_v3 = vrot.slane %v11565_v35, %v12289_v36  ;;  %v4952_v17 = vrot.slane %v11565_v35, %v12285_v34 }
0x12fe   : > { %v4960_v21 = vrot.slane %v11565_v35, %v12251_v15  ;;  %v4964_v8 = vrot.slane %v11565_v35, %v12258_v20  ;;  %v4968_v45 = vrot.slane %v11565_v35, %v12293_v38  ;;  %v4972_v43 = vrot.slane %v11565_v35, %v12262_v22 }
0x12ff   : > { %v5022_v7 = vmul.f32 %v13573_v18, %v4948_v23  ;;  %v5021_v5 = vmul.f32 %v13571_v41, %v4944_v13  ;;  %v5024_v46 = vmul.f32 %v13583_v39, %v4956_v3  ;;  %v5023_v54 = vmul.f32 %v13581_v52, %v4952_v17 }
0x1300   : > { %v11567_v49 = vpop.eup %11566  ;;  %v5025_v18 = vmul.f32 %v13591_v1, %v4960_v21  ;;  %v5026_v39 = vmul.f32 %v13599_v4, %v4964_v8  ;;  %v5027_v1 = vmul.f32 %v13605_v29, %v4968_v45  ;;  %v5028_v29 = vmul.f32 %v13617_v19, %v4972_v43 }
0x1301   : > { %5049 = vperm.xlu1 %11412, %v5022_v7   ;;  %5046 = vperm.xlu0 %11413, %v5021_v5   ;;  %v4980_v40 = vrot.slane %v11567_v49, %v12244_v12  ;;  %v4984_v56 = vrot.slane %v11567_v49, %v12285_v34  ;;  %v4988_v14 = vrot.slane %v11567_v49, %v12289_v36 }
0x1302   : > { %v4976_v42 = vrot.slane %v11567_v49, %v12266_v24  ;;  %v4992_v26 = vrot.slane %v11567_v49, %v12251_v15  ;;  %v4996_v50 = vrot.slane %v11567_v49, %v12258_v20  ;;  %v5004_v28 = vrot.slane %v11567_v49, %v12262_v22 }
0x1303   : > { %v5030_v41 = vmul.f32 %v13593_v9, %v4980_v40  ;;  %v5031_v52 = vmul.f32 %v13601_v62, %v4984_v56  ;;  %v5032_v9 = vmul.f32 %v13607_v55, %v4988_v14  ;;  %v5000_v33 = vrot.slane %v11567_v49, %v12293_v38 }
0x1304   : > { %v5029_v4 = vmul.f32 %v13611_v30, %v4976_v42  ;;  %v5033_v62 = vmul.f32 %v13613_v6, %v4992_v26  ;;  %v5034_v55 = vmul.f32 %v13619_v27, %v4996_v50  ;;  %v5036_v30 = vmul.f32 %v13625_v48, %v5004_v28  ;;  %v516_v28 = vld [vmem:[%s12218_s16] sm:$0xff] }
0x1305   : > { %5055 = vperm.xlu1 %11412, %v5024_v46   ;;  %5052 = vperm.xlu0 %11413, %v5023_v54   ;;  %v5035_v6 = vmul.f32 %v13623_v51, %v5000_v33  ;;  %v517_v33 = vld [vmem:[%s12218_s16 + $0x8] sm:$0xff] }
0x1309   : > { %5058 = vperm.xlu1 %11412, %v5025_v18   ;;  %5195 = vperm.xlu0 %11413, %v5030_v41  }
0x130d   : > { %5061 = vperm.xlu1 %11412, %v5026_v39   ;;  %5198 = vperm.xlu0 %11413, %v5031_v52  }
0x1311   : > { %5064 = vperm.xlu1 %11412, %v5027_v1   ;;  %5201 = vperm.xlu0 %11413, %v5032_v9  }
0x1315   : > { %5192 = vperm.xlu1 %11412, %v5029_v4   ;;  %5204 = vperm.xlu0 %11413, %v5033_v62  }
0x1319   : > { %5067 = vperm.xlu1 %11412, %v5028_v29   ;;  %5207 = vperm.xlu0 %11413, %v5034_v55  }
0x131d   : > { %5213 = vperm.xlu1 %11412, %v5036_v30   ;;  %5210 = vperm.xlu0 %11413, %v5035_v6   ;;  %v518_v30 = vld [vmem:[%s12218_s16 + $0x10] sm:$0xff]  ;;  %v11264_v6 = vpack.c.bf16 %v517_v33, %v516_v28  ;;  %v505_v28 = vld [vmem:[#allocation6] sm:$0xff] }
0x1321   : > { %5254 = vrot.lane.b32.xlu1 %v12279_v32, %s11941_s0  ;;  %5108 = vrot.lane.b32.xlu0 %v12275_v31, %s11941_s0  ;;  %s15384_s0 = scalar_lea.vmem [#allocation8], %s12194_s28 }
0x1325   : > { %5333 = vrot.lane.b32.xlu1 %v13051_v61, %s11942_s27  ;;  %5331 = vrot.lane.b32.xlu0 %v13049_v57, %s11942_s27 }
0x1329   : > { %5341 = vrot.lane.b32.xlu1 %v13403_v47, %s11943_s14  ;;  %5339 = vrot.lane.b32.xlu0 %v13401_v0, %s11943_s14 }
0x1380   : > { %v5050_v19 = vpop.permute.xlu1 %5049  ;;  %v5047_v27 = vpop.permute.xlu0 %5046 }
0x1381   : > { %v5076_v57 = vrot.slane %v5050_v19, %v12459_v63  ;;  %v5072_v37 = vrot.slane %v5047_v27, %v12459_v63  ;;  %v519_v19 = vld [vmem:[%s12218_s16 + $0x18] sm:$0xff] }
0x1382   : > { %v11268_v27 = vpack.c.bf16 %v519_v19, %v518_v30 }
0x1383   : > { %v5101_v3 = vsel %vm1160_vm13, %v5076_v57, %v5072_v37 }
0x1384   : > { %v5056_v51 = vpop.permute.xlu1 %5055  ;;  %v5053_v32 = vpop.permute.xlu0 %5052 }
0x1385   : > { %v5080_v53 = vrot.slane %v5053_v32, %v12459_v63  ;;  %v5084_v17 = vrot.slane %v5056_v51, %v12459_v63 }
0x1387   : > { %v5102_v54 = vsel %vm15366_vm4, %v5080_v53, %v5101_v3  ;;  %vm15378_vm4 = vmmov %vm15376_vm0 }
0x1388   : > { %v5059_v48 = vpop.permute.xlu1 %5058  ;;  %v5196_v31 = vpop.permute.xlu0 %5195  ;;  %v5103_v52 = vsel %vm15368_vm1, %v5084_v17, %v5102_v54  ;;  %vm15380_vm1 = vcmask 261120   ;;  %v11729_v17 = vld [vmem:[#allocation2] sm:$0xff] }
0x1389   : > { %v5222_v47 = vrot.slane %v5196_v31, %v12459_v63  ;;  %v5088_v21 = vrot.slane %v5059_v48, %v12459_v63 }
0x138b   : > { %v5104_v9 = vsel %vm15369_vm11, %v5088_v21, %v5103_v52  ;;  %vm15381_vm11 = vmmov %vm15380_vm1  ;;  %v511_v21 = vld [vmem:[%s12213_s20 + $0x20] sm:$0xff] }
0x138c   : > { %v5062_v58 = vpop.permute.xlu1 %5061  ;;  %v5199_v11 = vpop.permute.xlu0 %5198 }
0x138d   : > { %v5226_v2 = vrot.slane %v5199_v11, %v12459_v63  ;;  %v5092_v18 = vrot.slane %v5062_v58, %v12459_v63 }
0x138f   : > { %v5105_v26 = vsel %vm15371_vm12, %v5092_v18, %v5104_v9  ;;  %vm15383_vm12 = vmmov %vm15380_vm1 }
0x1390   : > { %v5065_v10 = vpop.permute.xlu1 %5064  ;;  %v5202_v61 = vpop.permute.xlu0 %5201 }
0x1391   : > { %v5230_v35 = vrot.slane %v5202_v61, %v12459_v63  ;;  %v5096_v8 = vrot.slane %v5065_v10, %v12459_v63 }
0x1393   : > { %v5106_v62 = vsel %vm15373_vm6, %v5096_v8, %v5105_v26  ;;  %vm15386_vm6 = vmmov %vm15380_vm1 }
0x1394   : > { %v5193_v44 = vpop.permute.xlu1 %5192  ;;  %v5205_v25 = vpop.permute.xlu0 %5204 }
0x1395   : > { %v5218_v0 = vrot.slane %v5193_v44, %v12459_v63  ;;  %v5234_v46 = vrot.slane %v5205_v25, %v12459_v63 }
0x1397   : > { %v5247_v23 = vsel %vm1160_vm13, %v5222_v47, %v5218_v0 }
0x1398   : > { %v5248_v13 = vsel %vm15345_vm7, %v5226_v2, %v5247_v23  ;;  %v5068_v7 = vpop.permute.xlu1 %5067  ;;  %v5208_v5 = vpop.permute.xlu0 %5207  ;;  %vm5355_vm7 = vcmask 130048  }
0x1399   : > { %v5249_v49 = vsel %vm15346_vm9, %v5230_v35, %v5248_v13  ;;  %v5238_v40 = vrot.slane %v5208_v5, %v12459_v63  ;;  %v5100_v45 = vrot.slane %v5068_v7, %v12459_v63  ;;  %vm5358_vm9 = vcmask 195584   ;;  %v11728_v5 = vld [vmem:[#allocation2 + $0x8] sm:$0xff] }
0x139a   : > { %v5250_v41 = vsel %vm15367_vm8, %v5234_v46, %v5249_v49  ;;  %vm15379_vm8 = vmmov %vm15376_vm0 }
0x139b   : > { %v5251_v42 = vsel %vm15370_vm15, %v5238_v40, %v5250_v41  ;;  %v5107_v55 = vsel %vm15375_vm14, %v5100_v45, %v5106_v62  ;;  %vm15382_vm15 = vmmov %vm15380_vm1  ;;  %v512_v40 = vld [vmem:[%s12213_s20 + $0x28] sm:$0xff]  ;;  %v11730_v41 = vld [vmem:[%s15384_s0] sm:$0x3] }
0x139c   : > { %v5214_v56 = vpop.permute.xlu1 %5213  ;;  %v5211_v39 = vpop.permute.xlu0 %5210  ;;  %v11414_v18 = vpack.i.bf16 %v512_v40, %v511_v21  ;;  %v13763_v8 = vrot.slane %v11730_v41, %v12244_v12  ;;  %v513_v62 = vld [vmem:[%s12213_s20 + $0x30] sm:$0xff]  ;;  %vm15388_vm14 = vmmov %vm15380_vm1 }
0x139d   : > { %v5246_v14 = vrot.slane %v5214_v56, %v12459_v63  ;;  %v5242_v1 = vrot.slane %v5211_v39, %v12459_v63 }
0x139f   : > { %v5252_v4 = vsel %vm15372_vm3, %v5242_v1, %v5251_v42  ;;  %vm15385_vm3 = vmmov %vm15380_vm1 }
0x13a0   : > { %v5255_v43 = vpop.permute.xlu1 %5254  ;;  %v5109_v50 = vpop.permute.xlu0 %5108  ;;  %v5253_v29 = vsel %vm15374_vm5, %v5246_v14, %v5252_v4  ;;  %vm15387_vm5 = vmmov %vm15380_vm1 }
0x13a1   : > { %11093 = vmatpush3.msra.mxu0 %v5109_v50  ;;  %11098 = vmatpush3.msra.mxu1 %v5255_v43  ;;  %v514_v43 = vld [vmem:[%s12213_s20 + $0x38] sm:$0xff] }
0x13a2   : > { %11095 = vmatmul.mubr.msk.f32.vlgmr.msra.gmra.mrb[12].mxu0 %vm15376_vm0, %v5107_v55  ;;  %11100 = vmatmul.mubr.msk.f32.vlgmr.msra.gmra.mrb[18].mxu1 %vm15377_vm10, %v5253_v29  ;;  %v11419_v50 = vpack.i.bf16 %v514_v43, %v513_v62  ;;  %v11272_v55 = vpack.c.bf16 %v512_v40, %v511_v21  ;;  %v11276_v33 = vpack.c.bf16 %v514_v43, %v513_v62  ;;  %vm15389_vm0 = vmmov %vm15380_vm1 }
0x13a3   : > { %11265 = vmatprep.subr.bf16.mxu0 %v11264_v6  ;;  %vm15390_vm10 = vmmov %vm15389_vm0 }
0x13a4   : > { %11267 = vmatpush3.bf16.msra.mxu0 %v11264_v6  ;;  %v5334_v58 = vpop.permute.xlu1 %5333  ;;  %v5332_v11 = vpop.permute.xlu0 %5331  ;;  %11273 = vmatprep.subr.bf16.mxu1 %v11272_v55 }
0x13a5   : > { %11269 = vmatprep.subr.bf16.mxu0 %v11268_v27  ;;  %v5354_v44 = vsel %vm15378_vm4, %v12697_v59, %v5334_v58  ;;  %v5353_v25 = vsel %vm15379_vm8, %v12699_v60, %v5332_v11  ;;  %v13752_v59 = vld [vmem:[%s12229_s30] sm:$0xff]  ;;  %11275 = vmatpush3.bf16.msra.mxu1 %v11272_v55  ;;  %vm15391_vm8 = vmmov %vm15378_vm4 }
0x13a6   : > { %v5364_v60 = vrot.slane %v13752_v59, %v12266_v24  ;;  %11277 = vmatprep.subr.bf16.mxu1 %v11276_v33 }
0x13a8   : > { %11271 = vmatpush3.bf16.msra.mxu0 %v11268_v27  ;;  %v5342_v10 = vpop.permute.xlu1 %5341  ;;  %v5340_v61 = vpop.permute.xlu0 %5339 }
0x13a9   : > { %v5357_v57 = vsel %vm5355_vm7, %v5354_v44, %v5342_v10  ;;  %v5356_v37 = vsel %vm5355_vm7, %v5353_v25, %v5340_v61  ;;  %11279 = vmatpush3.bf16.msra.mxu1 %v11276_v33  ;;  %v506_v25 = vld [vmem:[#allocation6 + $0x8] sm:$0xff] }
0x13aa   : > { %11135 = vmatprep.subr.mxu1 %v11929_v16 }
0x1475   : > { %v5179_v51 = vpop.f32.mrb[12].mxu0  ;;  %v5325_v32 = vpop.f32.mrb[18].mxu1 }
0x1476   : > { %5349 = vrot.lane.b32.xlu1 %v5325_v32, %s11944_s29  ;;  %v11101_v48 = vpop.f32.mrb[19].mxu1  ;;  %5347 = vrot.lane.b32.xlu0 %v5179_v51, %s11944_s29  ;;  %v11096_v31 = vpop.f32.mrb[13].mxu0 }
0x14e8   : > { %v5350_v47 = vpop.permute.xlu1 %5349  ;;  %v5348_v0 = vpop.permute.xlu0 %5347 }
0x14e9   : > { %v5360_v53 = vsel %vm5358_vm9, %v5357_v57, %v5350_v47  ;;  %v5359_v2 = vsel %vm5358_vm9, %v5356_v37, %v5348_v0  ;;  %v5478_v47 = vrot.slane %v13752_v59, %v12258_v20 }
0x14ea   : > { %11110 = vmatprep.mubr.msk.f32.mxu0 %vm15380_vm1, %v5359_v2  ;;  %vm15392_vm1 = vmmov %vm15378_vm4 }
0x14eb   : > { %11111 = vmatmul.mubr.msk.f32.vlgmr.msra.gmra.mrb[14].mxu0 %vm15381_vm11, %v5360_v53  ;;  %vm15393_vm11 = vmmov %vm15392_vm1 }
0x14ec   : > { %11132 = vmatprep.mubr.msk.f32.mxu0 %vm15387_vm5, %v505_v28  ;;  %vm15396_vm5 = vcmask 1042434  }
0x15be   : > { %v11112_v35 = vpop.f32.mrb[14].mxu0 }
0x15bf   : > { %v5443_v23 = vadd.f32 %v11112_v35, %v5364_v60  ;;  %v5437_v13 = vpop.f32.mrb[15].mxu0 }
0x15c0   : > { %v5438_v7 = vadd.f32 %v5437_v13, %v5364_v60  ;;  %v5484_v60 = vrot.slane %v13752_v59, %v12293_v38 }
0x15c1   : > { %v5447_v3 = vadd.f32 %v11728_v5, %v5443_v23 }
0x15c2   : > { %v5446_v49 = vadd.f32 %v11729_v17, %v5438_v7 }
0x15c3   : > { %v5451_v46 = vsel %vm15382_vm15, %v5447_v3, 0.0  ;;  %vm15394_vm15 = vmmov %vm15392_vm1 }
0x15c4   : > { %5452 = vadd.xlane.f32.xlu1 %v5451_v46  ;;  %v5448_v54 = vsel %vm15383_vm12, %v5446_v49, 0.0  ;;  %vm15395_vm12 = vmmov %vm15392_vm1 }
0x15c5   : > { %5449 = vadd.xlane.f32.xlu0 %v5448_v54 }
0x15d5   : > { %11415 = vrot.lane.b32.xlu1 %v11414_v18, %s11931_s12 }
0x15d9   : > { %5591 = vrot.lane.b32.xlu1 %v13763_v8, %s11931_s12 }
0x1651   : > { %v5453_v56 = vpop.xlane.xlu1 %5452 }
0x1652   : > { %v5456_v39 = vmul.f32 0.03125, %v5453_v56  ;;  %v5450_v52 = vpop.xlane.xlu0 %5449 }
0x1653   : > { %v5455_v45 = vmul.f32 0.03125, %v5450_v52 }
0x1654   : > { %v5458_v14 = vsub.f32 %v5447_v3, %v5456_v39 }
0x1655   : > { %v5457_v1 = vsub.f32 %v5446_v49, %v5455_v45  ;;  %v11416_v29 = vpop.permute.xlu1 %11415 }
0x1656   : > { %v5460_v9 = vmul.f32 %v5458_v14, %v5458_v14  ;;  %v11418_v30 = vunpack.i.h.bf16 %v11416_v29  ;;  %v11417_v6 = vunpack.i.l.bf16 %v11416_v29 }
0x1657   : > { %v5459_v26 = vmul.f32 %v5457_v1, %v5457_v1 }
0x1658   : > { %v5464_v42 = vsel %vm15385_vm3, %v5460_v9, 0.0  ;;  %v11280_v19 = vpack.c.bf16 %v11418_v30, %v11417_v6 }
0x1659   : > { %5465 = vadd.xlane.f32.xlu0 %v5464_v42  ;;  %v5461_v4 = vsel %vm15386_vm6, %v5459_v26, 0.0  ;;  %v5592_v7 = vpop.permute.xlu1 %5591 }
0x165a   : > { %11281 = vmatprep.subr.bf16.mxu0 %v11280_v19 }
0x165b   : > { %11283 = vmatpush3.bf16.msra.mxu0 %v11280_v19 }
0x165d   : > { %5462 = vadd.xlane.f32.xlu0 %v5461_v4 }
0x1673   : > { %11420 = vrot.lane.b32.xlu0 %v11419_v50, %s11931_s12 }
0x16e6   : > { %v5466_v27 = vpop.xlane.xlu0 %5465 }
0x16e7   : > { %v5468_v51 = vmul.f32 0.03125, %v5466_v27 }
0x16e9   : > { %v5470_v32 = vadd.f32 1e-05, %v5468_v51 }
0x16ea   : > { %v5463_v48 = vpop.xlane.xlu0 %5462 }
0x16eb   : > { %11568 = vrsqrt.f32 %v5470_v32  ;;  %v5467_v31 = vmul.f32 0.03125, %v5463_v48 }
0x16ed   : > { %v5469_v58 = vadd.f32 1e-05, %v5467_v31 }
0x16ee   : > { %v11421_v11 = vpop.permute.xlu0 %11420 }
0x16ef   : > { %11570 = vrsqrt.f32 %v5469_v58  ;;  %v11423_v10 = vunpack.i.h.bf16 %v11421_v11  ;;  %v11422_v61 = vunpack.i.l.bf16 %v11421_v11 }
0x16f1   : > { %v11284_v44 = vpack.c.bf16 %v11423_v10, %v11422_v61 }
0x16f3   : > { %11285 = vmatprep.subr.bf16.mxu0 %v11284_v44 }
0x16f4   : > { %11287 = vmatpush3.bf16.msra.mxu0 %v11284_v44 }
0x16f5   : > { %v11569_v57 = vpop.eup %11568  ;;  %11145 = vmatprep.subr.mxu0 %v11929_v16 }
0x16f6   : > { %v5474_v37 = vmul.f32 %v11569_v57, %v5458_v14 }
0x16f7   : > { %11133 = vmatmul.mubr.msk.f32.vlgmr.msra.gmra.mrb[16].mxu0 %vm15388_vm14, %v506_v25  ;;  %vm15397_vm14 = vcmask 1043459  }
0x16f8   : > { %11147 = vmatprep.mubr.msk.f32.mxu0 %vm15290_vm2, %v11929_v16  ;;  %v5480_v2 = vmul.f32 %v5478_v47, %v5474_v37 }
0x16f9   : > { %v11571_v0 = vpop.eup %11570 }
0x16fa   : > { %v5473_v53 = vmul.f32 %v11571_v0, %v5457_v1  ;;  %v13785_v13 = vadd.f32 %v5484_v60, %v5480_v2 }
0x16fc   : > { %v5479_v35 = vmul.f32 %v5478_v47, %v5473_v53 }
0x16fe   : > { %v13783_v23 = vadd.f32 %v5484_v60, %v5479_v35 }
0x1700   : > { %11121 = vmatprep.mubr.msk.f32.mxu1 %vm15389_vm0, %v13783_v23  ;;  %vm15398_vm0 = vcmask 1044484  }
0x1701   : > { %11122 = vmatmul.mubr.msk.f32.vlgmr.msra.gmra.mrb[20].mxu1 %vm15390_vm10, %v13785_v13  ;;  %vm15399_vm10 = vmmov %vm15396_vm5 }
0x1702   : > { %11137 = vmatprep.mubr.msk.f32.mxu1 %vm15290_vm2, %v11929_v16 }
0x17ca   : > { %v11134_v5 = vpop.f32.mrb[16].mxu0 }
0x17cb   : > { %v5672_v3 = vadd.f32 %v11134_v5, %v5592_v7  ;;  %v5666_v17 = vpop.f32.mrb[17].mxu0 }
0x17cc   : > { %v5667_v49 = vadd.f32 %v5666_v17, %v5592_v7 }
0x17cd   : > { %v13793_v59 = vmax.f32 %v5672_v3, 0.0 }
0x17ce   : > { %v13795_v46 = vmax.f32 %v5667_v49, 0.0 }
0x17cf   : > { %v5834_v54 = vsel %vm15378_vm4, %v13793_v59, 0.0  ;;  %vm15400_vm4 = vcmask 1045509  }
0x17d0   : > { %11136 = vmatpush3.xpose.msk.msra.mxu1 %vm15391_vm8, %v13795_v46  ;;  %5835 = vadd.xlane.f32.xlu0 %v5834_v54  ;;  %v5831_v21 = vsel %vm15392_vm1, %v13795_v46, 0.0  ;;  %vm15401_vm8 = vmmov %vm15397_vm14  ;;  %vm15402_vm1 = vcmask 1046534  }
0x17d1   : > { %5832 = vadd.xlane.f32.xlu1 %v5831_v21  ;;  %11140 = vmatprep.subr.mxu1 %v11929_v16 }
0x17d4   : > { %v11123_v40 = vpop.f32.mrb[20].mxu1 }
0x17d5   : > { %v5563_v18 = vpop.f32.mrb[21].mxu1  ;;  %v5569_v56 = vadd.f32 %v11123_v40, %v13763_v8 }
0x17d6   : > { %v5564_v41 = vadd.f32 %v5563_v18, %v13763_v8 }
0x17d7   : > { %v13814_v52 = vmax.f32 %v5569_v56, 0.0 }
0x17d8   : > { %v13806_v39 = vmax.f32 %v5564_v41, 0.0 }
0x17da   : > { %11138 = vmatmul.mubr.msk.f32.vlgmr.msra.gmra.mrb[22].mxu1 %vm15393_vm11, %v13806_v39  ;;  %vm15403_vm11 = vmmov %vm15398_vm0 }
0x17db   : > { %11141 = vmatpush3.xpose.msk.msra.mxu1 %vm15394_vm15, %v13793_v59  ;;  %11142 = vmatprep.mubr.msk.f32.mxu1 %vm15290_vm2, %v11929_v16  ;;  %vm15404_vm15 = vcmask 1047559  }
0x17dc   : > { %11150 = vmatprep.subr.mxu1 %v11929_v16 }
0x17de   : > { %11143 = vmatmul.mubr.msk.f32.vlgmr.msra.gmra.mrb[24].mxu1 %vm15395_vm12, %v13814_v52 }
0x17df   : > { %11152 = vmatprep.mubr.msk.f32.mxu1 %vm15290_vm2, %v11929_v16 }
0x185d   : > { %v5836_v31 = vpop.xlane.xlu0 %5835 }
0x185e   : > { %v5833_v58 = vpop.xlane.xlu1 %5832  ;;  %vm5838_vm6 = vcmp.eq.f32.partialorder %v5836_v31, 0.0 }
0x185f   : > { %vm5837_vm3 = vcmp.eq.f32.partialorder %v5833_v58, 0.0 }
0x18ad   : > { %v5749_v8 = vpop.f32.mrb[22].mxu1 }
0x18ae   : > { %v5829_v45 = vmul.f32 0.35355338, %v5749_v8  ;;  %v11139_v14 = vpop.f32.mrb[23].mxu1 }
0x18b0   : > { %v5855_v1 = vrot.slane %v5829_v45, %v12244_v12  ;;  %v5848_v9 = vrot.slane %v5829_v45, %v12266_v24  ;;  %v5862_v62 = vrot.slane %v5829_v45, %v12285_v34  ;;  %v5869_v43 = vrot.slane %v5829_v45, %v12289_v36 }
0x18b1   : > { %v5825_v42 = vpop.f32.mrb[24].mxu1  ;;  %v5876_v50 = vrot.slane %v5829_v45, %v12251_v15  ;;  %v5883_v55 = vrot.slane %v5829_v45, %v12258_v20  ;;  %v5890_v33 = vrot.slane %v5829_v45, %v12293_v38  ;;  %v5897_v51 = vrot.slane %v5829_v45, %v12262_v22 }
0x18b2   : > { %5857 = vbcast.lane.b32.xlu1 %v5855_v1, 256  ;;  %5850 = vbcast.lane.b32.xlu0 %v5848_v9, 256  ;;  %v11144_v26 = vpop.f32.mrb[25].mxu1  ;;  %v5830_v4 = vmul.f32 0.35355338, %v5825_v42 }
0x18b4   : > { %v5911_v29 = vrot.slane %v5830_v4, %v12244_v12  ;;  %v5918_v28 = vrot.slane %v5830_v4, %v12285_v34  ;;  %v5925_v30 = vrot.slane %v5830_v4, %v12289_v36  ;;  %v5932_v6 = vrot.slane %v5830_v4, %v12251_v15 }
0x18b5   : > { %v5904_v19 = vrot.slane %v5830_v4, %v12266_v24  ;;  %v5939_v27 = vrot.slane %v5830_v4, %v12258_v20  ;;  %v5946_v32 = vrot.slane %v5830_v4, %v12293_v38  ;;  %v5953_v48 = vrot.slane %v5830_v4, %v12262_v22 }
0x18b6   : > { %5864 = vbcast.lane.b32.xlu1 %v5862_v62, 256  ;;  %5871 = vbcast.lane.b32.xlu0 %v5869_v43, 256 }
0x18ba   : > { %5878 = vbcast.lane.b32.xlu0 %v5876_v50, 256  ;;  %5913 = vbcast.lane.b32.xlu1 %v5911_v29, 256 }
0x18be   : > { %5885 = vbcast.lane.b32.xlu0 %v5883_v55, 256  ;;  %5920 = vbcast.lane.b32.xlu1 %v5918_v28, 256 }
0x18c2   : > { %5892 = vbcast.lane.b32.xlu0 %v5890_v33, 256  ;;  %5927 = vbcast.lane.b32.xlu1 %v5925_v30, 256 }
0x18c6   : > { %5934 = vbcast.lane.b32.xlu1 %v5932_v6, 256  ;;  %5906 = vbcast.lane.b32.xlu0 %v5904_v19, 256 }
0x18ca   : > { %5941 = vbcast.lane.b32.xlu1 %v5939_v27, 256  ;;  %5899 = vbcast.lane.b32.xlu0 %v5897_v51, 256 }
0x18ce   : > { %5948 = vbcast.lane.b32.xlu1 %v5946_v32, 256  ;;  %5955 = vbcast.lane.b32.xlu0 %v5953_v48, 256 }
0x1924   : > { %v5858_v11 = vpop.permute.xlu1 %5857  ;;  %v5851_v10 = vpop.permute.xlu0 %5850 }
0x1925   : > { %v13838_v61 = vsel %vm5837_vm3, -4.2949673e+09, %v5858_v11  ;;  %v13841_v44 = vsel %vm5837_vm3, -4.2949673e+09, %v5851_v10 }
0x1926   : > { %6006 = vperm.xlu1 %11412, %v13841_v44   ;;  %6009 = vperm.xlu0 %11413, %v13838_v61  }
0x1928   : > { %v5865_v25 = vpop.permute.xlu1 %5864  ;;  %v5872_v57 = vpop.permute.xlu0 %5871 }
0x1929   : > { %v13846_v37 = vsel %vm5837_vm3, -4.2949673e+09, %v5865_v25  ;;  %v13849_v47 = vsel %vm5837_vm3, -4.2949673e+09, %v5872_v57 }
0x192a   : > { %6012 = vperm.xlu1 %11412, %v13846_v37   ;;  %6015 = vperm.xlu0 %11413, %v13849_v47  }
0x192c   : > { %v5879_v0 = vpop.permute.xlu0 %5878  ;;  %v5914_v53 = vpop.permute.xlu1 %5913 }
0x192d   : > { %v13854_v2 = vsel %vm5837_vm3, -4.2949673e+09, %v5879_v0  ;;  %v13857_v60 = vsel %vm5838_vm6, -4.2949673e+09, %v5914_v53 }
0x192e   : > { %6033 = vperm.xlu1 %11412, %v13857_v60   ;;  %6018 = vperm.xlu0 %11413, %v13854_v2  }
0x1930   : > { %v5886_v35 = vpop.permute.xlu0 %5885  ;;  %v5921_v7 = vpop.permute.xlu1 %5920 }
0x1931   : > { %v13862_v5 = vsel %vm5837_vm3, -4.2949673e+09, %v5886_v35  ;;  %v13865_v3 = vsel %vm5838_vm6, -4.2949673e+09, %v5921_v7 }
0x1932   : > { %6036 = vperm.xlu1 %11412, %v13865_v3   ;;  %6021 = vperm.xlu0 %11413, %v13862_v5  }
0x1934   : > { %v5893_v17 = vpop.permute.xlu0 %5892  ;;  %v5928_v49 = vpop.permute.xlu1 %5927 }
0x1935   : > { %v13870_v54 = vsel %vm5837_vm3, -4.2949673e+09, %v5893_v17  ;;  %v13873_v21 = vsel %vm5838_vm6, -4.2949673e+09, %v5928_v49 }
0x1936   : > { %6039 = vperm.xlu1 %11412, %v13873_v21   ;;  %6024 = vperm.xlu0 %11413, %v13870_v54  }
0x1938   : > { %v5935_v40 = vpop.permute.xlu1 %5934  ;;  %v5907_v18 = vpop.permute.xlu0 %5906 }
0x1939   : > { %v13878_v41 = vsel %vm5838_vm6, -4.2949673e+09, %v5935_v40  ;;  %v13881_v56 = vsel %vm5838_vm6, -4.2949673e+09, %v5907_v18 }
0x193a   : > { %6042 = vperm.xlu1 %11412, %v13878_v41   ;;  %6030 = vperm.xlu0 %11413, %v13881_v56  }
0x193c   : > { %v5942_v8 = vpop.permute.xlu1 %5941  ;;  %v5900_v45 = vpop.permute.xlu0 %5899 }
0x193d   : > { %v13886_v14 = vsel %vm5838_vm6, -4.2949673e+09, %v5942_v8  ;;  %v13889_v1 = vsel %vm5837_vm3, -4.2949673e+09, %v5900_v45  ;;  %vm15405_vm3 = vmmov %vm15400_vm4 }
0x193e   : > { %6045 = vperm.xlu1 %11412, %v13886_v14   ;;  %6027 = vperm.xlu0 %11413, %v13889_v1  }
0x1940   : > { %v5949_v9 = vpop.permute.xlu1 %5948  ;;  %v5956_v42 = vpop.permute.xlu0 %5955 }
0x1941   : > { %v13894_v26 = vsel %vm5838_vm6, -4.2949673e+09, %v5949_v9  ;;  %v13897_v4 = vsel %vm5838_vm6, -4.2949673e+09, %v5956_v42  ;;  %vm15406_vm6 = vmmov %vm15402_vm1 }
0x1942   : > { %6048 = vperm.xlu1 %11412, %v13894_v26   ;;  %6051 = vperm.xlu0 %11413, %v13897_v4  }
0x19a5   : > { %v6007_v62 = vpop.permute.xlu1 %6006  ;;  %v6010_v43 = vpop.permute.xlu0 %6009 }
0x19a6   : > { %v6056_v6 = vrot.slane %v6007_v62, %v12459_v63  ;;  %v6060_v19 = vrot.slane %v6010_v43, %v12459_v63 }
0x19a8   : > { %v6117_v48 = vsel %vm1160_vm13, %v6060_v19, %v6056_v6 }
0x19a9   : > { %v6013_v50 = vpop.permute.xlu1 %6012  ;;  %v6016_v29 = vpop.permute.xlu0 %6015 }
0x19aa   : > { %v6064_v27 = vrot.slane %v6013_v50, %v12459_v63  ;;  %v6068_v31 = vrot.slane %v6016_v29, %v12459_v63 }
0x19ac   : > { %v6118_v58 = vsel %vm15396_vm5, %v6064_v27, %v6117_v48  ;;  %vm15407_vm5 = vmmov %vm15404_vm15 }
0x19ad   : > { %v6034_v55 = vpop.permute.xlu1 %6033  ;;  %v6019_v28 = vpop.permute.xlu0 %6018  ;;  %v6119_v17 = vsel %vm15397_vm14, %v6068_v31, %v6118_v58  ;;  %vm15408_vm14 = vmmov %vm15395_vm12 }
0x19ae   : > { %v6072_v11 = vrot.slane %v6019_v28, %v12459_v63  ;;  %v6092_v57 = vrot.slane %v6034_v55, %v12459_v63 }
0x19b0   : > { %v6120_v18 = vsel %vm15398_vm0, %v6072_v11, %v6119_v17  ;;  %vm15409_vm0 = vmmov %vm15399_vm10 }
0x19b1   : > { %v6037_v33 = vpop.permute.xlu1 %6036  ;;  %v6022_v30 = vpop.permute.xlu0 %6021 }
0x19b2   : > { %v6076_v0 = vrot.slane %v6022_v30, %v12459_v63  ;;  %v6096_v35 = vrot.slane %v6037_v33, %v12459_v63 }
0x19b4   : > { %v6121_v42 = vsel %vm15400_vm4, %v6076_v0, %v6120_v18  ;;  %vm15411_vm4 = vmmov %vm15403_vm11 }
0x19b5   : > { %v6040_v51 = vpop.permute.xlu1 %6039  ;;  %v6025_v32 = vpop.permute.xlu0 %6024 }
0x19b6   : > { %v6080_v7 = vrot.slane %v6025_v32, %v12459_v63  ;;  %v6100_v49 = vrot.slane %v6040_v51, %v12459_v63 }
0x19b8   : > { %v6122_v55 = vsel %vm15402_vm1, %v6080_v7, %v6121_v42  ;;  %vm15413_vm1 = vmmov %vm15405_vm3 }
0x19b9   : > { %v6043_v10 = vpop.permute.xlu1 %6042  ;;  %v6031_v25 = vpop.permute.xlu0 %6030 }
0x19ba   : > { %v6088_v53 = vrot.slane %v6031_v25, %v12459_v63  ;;  %v6104_v62 = vrot.slane %v6043_v10, %v12459_v63 }
0x19bc   : > { %v6124_v40 = vsel %vm1160_vm13, %v6092_v57, %v6088_v53 }
0x19bd   : > { %v6125_v8 = vsel %vm15399_vm10, %v6096_v35, %v6124_v40  ;;  %v6046_v45 = vpop.permute.xlu1 %6045  ;;  %v6028_v9 = vpop.permute.xlu0 %6027  ;;  %vm15410_vm10 = vmmov %vm15401_vm8 }
0x19be   : > { %v6126_v43 = vsel %vm15401_vm8, %v6100_v49, %v6125_v8  ;;  %v6084_v50 = vrot.slane %v6028_v9, %v12459_v63  ;;  %v6108_v29 = vrot.slane %v6046_v45, %v12459_v63  ;;  %vm15412_vm8 = vmmov %vm15409_vm0 }
0x19bf   : > { %v6127_v28 = vsel %vm15403_vm11, %v6104_v62, %v6126_v43  ;;  %vm15414_vm11 = vmmov %vm15410_vm10 }
0x19c0   : > { %v6123_v33 = vsel %vm15404_vm15, %v6084_v50, %v6122_v55  ;;  %v6128_v32 = vsel %vm15405_vm3, %v6108_v29, %v6127_v28  ;;  %vm15415_vm15 = vmmov %vm15406_vm6 }
0x19c1   : > { %v6049_v30 = vpop.permute.xlu1 %6048  ;;  %v6052_v6 = vpop.permute.xlu0 %6051  ;;  %v6133_v19 = vsel %vm15395_vm12, %v6123_v33, -inf  ;;  %vm15416_vm12 = vmmov %vm15407_vm5 }
0x19c2   : > { %v6112_v27 = vrot.slane %v6049_v30, %v12459_v63  ;;  %v6116_v51 = vrot.slane %v6052_v6, %v12459_v63  ;;  %6134 = vmax.xlane.f32.xlu1 %v6133_v19  ;;  %vm15417_vm3 = vmmov %vm15411_vm4 }
0x19c4   : > { %v6129_v48 = vsel %vm15406_vm6, %v6112_v27, %v6128_v32  ;;  %vm15418_vm6 = vmmov %vm15408_vm14 }
0x19c5   : > { %v6130_v31 = vsel %vm15407_vm5, %v6116_v51, %v6129_v48  ;;  %vm15419_vm5 = vmmov %vm15413_vm1 }
0x19c6   : > { %v6136_v58 = vsel %vm15408_vm14, %v6130_v31, -inf  ;;  %vm15420_vm14 = vmmov %vm15415_vm15 }
0x19c7   : > { %6137 = vmax.xlane.f32.xlu0 %v6136_v58 }
0x1a4f   : > { %v6135_v11 = vpop.xlane.xlu1 %6134 }
0x1a50   : > { %v6144_v10 = vrot.slane %v6135_v11, %v12266_v24  ;;  %v6148_v25 = vrot.slane %v6135_v11, %v12244_v12  ;;  %v6152_v57 = vrot.slane %v6135_v11, %v12285_v34  ;;  %v6156_v0 = vrot.slane %v6135_v11, %v12289_v36 }
0x1a51   : > { %v6160_v53 = vrot.slane %v6135_v11, %v12251_v15  ;;  %v6164_v45 = vrot.slane %v6135_v11, %v12258_v20 }
0x1a52   : > { %v6221_v35 = vsub.f32 %v13841_v44, %v6144_v10  ;;  %v6222_v7 = vsub.f32 %v13838_v61, %v6148_v25  ;;  %v6224_v17 = vsub.f32 %v13849_v47, %v6156_v0  ;;  %v6223_v49 = vsub.f32 %v13846_v37, %v6152_v57 }
0x1a53   : > { %v6225_v9 = vsub.f32 %v13854_v2, %v6160_v53  ;;  %v6168_v47 = vrot.slane %v6135_v11, %v12293_v38  ;;  %v6226_v37 = vsub.f32 %v13862_v5, %v6164_v45 }
0x1a54   : > { %v6237_v40 = vmul.f32 1.442695, %v6221_v35  ;;  %v6239_v18 = vmul.f32 1.442695, %v6222_v7  ;;  %v6138_v8 = vpop.xlane.xlu0 %6137  ;;  %v6243_v42 = vmul.f32 1.442695, %v6224_v17 }
0x1a55   : > { %v6180_v62 = vrot.slane %v6138_v8, %v12244_v12  ;;  %v6241_v43 = vmul.f32 1.442695, %v6223_v49  ;;  %v6184_v44 = vrot.slane %v6138_v8, %v12285_v34  ;;  %v6245_v50 = vmul.f32 1.442695, %v6225_v9 }
0x1a56   : > { %11572 = vpow2.f32 %v6237_v40  ;;  %v6188_v29 = vrot.slane %v6138_v8, %v12289_v36  ;;  %v6227_v28 = vsub.f32 %v13870_v54, %v6168_v47  ;;  %v6247_v33 = vmul.f32 1.442695, %v6226_v37 }
0x1a57   : > { %11574 = vpow2.f32 %v6239_v18  ;;  %v6230_v61 = vsub.f32 %v13857_v60, %v6180_v62  ;;  %v6231_v2 = vsub.f32 %v13865_v3, %v6184_v44  ;;  %v6176_v30 = vrot.slane %v6138_v8, %v12266_v24 }
0x1a58   : > { %11576 = vpow2.f32 %v6243_v42  ;;  %v6192_v60 = vrot.slane %v6138_v8, %v12251_v15  ;;  %v6232_v6 = vsub.f32 %v13873_v21, %v6188_v29  ;;  %v6172_v3 = vrot.slane %v6135_v11, %v12262_v22 }
0x1a59   : > { %11578 = vpow2.f32 %v6241_v43  ;;  %v6255_v55 = vmul.f32 1.442695, %v6230_v61  ;;  %v6257_v5 = vmul.f32 1.442695, %v6231_v2  ;;  %v6249_v54 = vmul.f32 1.442695, %v6227_v28 }
0x1a5a   : > { %11580 = vpow2.f32 %v6245_v50  ;;  %v6229_v51 = vsub.f32 %v13881_v56, %v6176_v30  ;;  %v6196_v32 = vrot.slane %v6138_v8, %v12258_v20  ;;  %v6233_v21 = vsub.f32 %v13878_v41, %v6192_v60 }
0x1a5b   : > { %11582 = vpow2.f32 %v6255_v55  ;;  %v6259_v48 = vmul.f32 1.442695, %v6232_v6  ;;  %v6228_v11 = vsub.f32 %v13889_v1, %v6172_v3  ;;  %v6204_v10 = vrot.slane %v6138_v8, %v12262_v22 }
0x1a5c   : > { %11584 = vpow2.f32 %v6247_v33  ;;  %v6253_v56 = vmul.f32 1.442695, %v6229_v51  ;;  %v6200_v25 = vrot.slane %v6138_v8, %v12293_v38  ;;  %v6234_v41 = vsub.f32 %v13886_v14, %v6196_v32 }
0x1a5d   : > { %11586 = vpow2.f32 %v6257_v5  ;;  %v6261_v57 = vmul.f32 1.442695, %v6233_v21  ;;  %v6251_v35 = vmul.f32 1.442695, %v6228_v11  ;;  %v6236_v1 = vsub.f32 %v13897_v4, %v6204_v10 }
0x1a5e   : > { %11588 = vpow2.f32 %v6249_v54  ;;  %v6235_v7 = vsub.f32 %v13894_v26, %v6200_v25  ;;  %v6263_v17 = vmul.f32 1.442695, %v6234_v41 }
0x1a5f   : > { %11590 = vpow2.f32 %v6259_v48  ;;  %v6267_v40 = vmul.f32 1.442695, %v6236_v1 }
0x1a60   : > { %v13955_v19 = vpop.eup %11572  ;;  %11592 = vpow2.f32 %v6253_v56  ;;  %v6265_v18 = vmul.f32 1.442695, %v6235_v7 }
0x1a61   : > { %v13957_v27 = vpop.eup %11574  ;;  %6286 = vperm.xlu0 %11413, %v13955_v19   ;;  %11594 = vpow2.f32 %v6261_v57 }
0x1a62   : > { %6289 = vperm.xlu1 %11412, %v13957_v27   ;;  %v13965_v31 = vpop.eup %11576  ;;  %11596 = vpow2.f32 %v6251_v35 }
0x1a63   : > { %v13967_v58 = vpop.eup %11578  ;;  %11598 = vpow2.f32 %v6263_v17 }
0x1a64   : > { %v13975_v0 = vpop.eup %11580  ;;  %11600 = vpow2.f32 %v6267_v40 }
0x1a65   : > { %6295 = vperm.xlu0 %11413, %v13965_v31   ;;  %v13977_v53 = vpop.eup %11582  ;;  %11602 = vpow2.f32 %v6265_v18 }
0x1a66   : > { %6292 = vperm.xlu1 %11412, %v13967_v58   ;;  %v13983_v49 = vpop.eup %11584 }
0x1a67   : > { %v13985_v14 = vpop.eup %11586 }
0x1a68   : > { %v13989_v4 = vpop.eup %11588 }
0x1a69   : > { %6298 = vperm.xlu0 %11413, %v13975_v0   ;;  %v13991_v8 = vpop.eup %11590 }
0x1a6a   : > { %6313 = vperm.xlu1 %11412, %v13977_v53   ;;  %v13995_v26 = vpop.eup %11592 }
0x1a6b   : > { %v13997_v45 = vpop.eup %11594 }
0x1a6c   : > { %v14001_v9 = vpop.eup %11596 }
0x1a6d   : > { %6301 = vperm.xlu0 %11413, %v13983_v49   ;;  %v14003_v42 = vpop.eup %11598 }
0x1a6e   : > { %6316 = vperm.xlu1 %11412, %v13985_v14   ;;  %v14007_v62 = vpop.eup %11600 }
0x1a6f   : > { %v14009_v43 = vpop.eup %11602 }
0x1a71   : > { %6304 = vperm.xlu0 %11413, %v13989_v4  }
0x1a72   : > { %6319 = vperm.xlu1 %11412, %v13991_v8  }
0x1a75   : > { %6310 = vperm.xlu0 %11413, %v13995_v26  }
0x1a76   : > { %6322 = vperm.xlu1 %11412, %v13997_v45  }
0x1a79   : > { %6307 = vperm.xlu0 %11413, %v14001_v9  }
0x1a7a   : > { %6325 = vperm.xlu1 %11412, %v14003_v42  }
0x1a7d   : > { %6331 = vperm.xlu0 %11413, %v14007_v62  }
0x1a7e   : > { %6328 = vperm.xlu1 %11412, %v14009_v43  }
0x1ae0   : > { %v6287_v44 = vpop.permute.xlu0 %6286 }
0x1ae1   : > { %v6290_v61 = vpop.permute.xlu1 %6289  ;;  %v6336_v33 = vrot.slane %v6287_v44, %v12459_v63 }
0x1ae2   : > { %v6340_v28 = vrot.slane %v6290_v61, %v12459_v63 }
0x1ae4   : > { %v6296_v47 = vpop.permute.xlu0 %6295  ;;  %v6397_v5 = vsel %vm1160_vm13, %v6340_v28, %v6336_v33 }
0x1ae5   : > { %v6293_v37 = vpop.permute.xlu1 %6292  ;;  %v6348_v3 = vrot.slane %v6296_v47, %v12459_v63 }
0x1ae6   : > { %v6344_v30 = vrot.slane %v6293_v37, %v12459_v63 }
0x1ae8   : > { %v6299_v50 = vpop.permute.xlu0 %6298  ;;  %v6398_v54 = vsel %vm15409_vm0, %v6344_v30, %v6397_v5  ;;  %vm15421_vm0 = vmmov %vm15416_vm12 }
0x1ae9   : > { %v6314_v29 = vpop.permute.xlu1 %6313  ;;  %v6352_v51 = vrot.slane %v6299_v50, %v12459_v63  ;;  %v6399_v41 = vsel %vm15410_vm10, %v6348_v3, %v6398_v54  ;;  %vm15422_vm10 = vmmov %vm15418_vm6 }
0x1aea   : > { %v6372_v21 = vrot.slane %v6314_v29, %v12459_v63 }
0x1aeb   : > { %v6400_v1 = vsel %vm15411_vm4, %v6352_v51, %v6399_v41  ;;  %vm15423_vm4 = vmmov %vm15412_vm8 }
0x1aec   : > { %v6302_v2 = vpop.permute.xlu0 %6301 }
0x1aed   : > { %v6317_v55 = vpop.permute.xlu1 %6316  ;;  %v6356_v48 = vrot.slane %v6302_v2, %v12459_v63 }
0x1aee   : > { %v6376_v56 = vrot.slane %v6317_v55, %v12459_v63 }
0x1aef   : > { %v6401_v40 = vsel %vm15413_vm1, %v6356_v48, %v6400_v1  ;;  %vm15425_vm1 = vmmov %vm15423_vm4 }
0x1af0   : > { %v6305_v60 = vpop.permute.xlu0 %6304 }
0x1af1   : > { %v6320_v6 = vpop.permute.xlu1 %6319  ;;  %v6360_v25 = vrot.slane %v6305_v60, %v12459_v63 }
0x1af2   : > { %v6380_v57 = vrot.slane %v6320_v6, %v12459_v63 }
0x1af3   : > { %v6402_v37 = vsel %vm15415_vm15, %v6360_v25, %v6401_v40 }
0x1af4   : > { %v6311_v32 = vpop.permute.xlu0 %6310 }
0x1af5   : > { %v6323_v11 = vpop.permute.xlu1 %6322  ;;  %v6368_v10 = vrot.slane %v6311_v32, %v12459_v63 }
0x1af6   : > { %v6384_v47 = vrot.slane %v6323_v11, %v12459_v63 }
0x1af7   : > { %v6404_v35 = vsel %vm1160_vm13, %v6372_v21, %v6368_v10 }
0x1af8   : > { %v6405_v7 = vsel %vm15412_vm8, %v6376_v56, %v6404_v35  ;;  %v6308_v17 = vpop.permute.xlu0 %6307  ;;  %vm15424_vm8 = vmmov %vm15414_vm11 }
0x1af9   : > { %v6326_v18 = vpop.permute.xlu1 %6325  ;;  %v6406_v44 = vsel %vm15414_vm11, %v6380_v57, %v6405_v7  ;;  %v6364_v61 = vrot.slane %v6308_v17, %v12459_v63  ;;  %vm15426_vm11 = vmmov %vm15417_vm3 }
0x1afa   : > { %v6388_v50 = vrot.slane %v6326_v18, %v12459_v63  ;;  %v6407_v2 = vsel %vm15417_vm3, %v6384_v47, %v6406_v44  ;;  %vm15427_vm15 = vmmov %vm15424_vm8 }
0x1afb   : > { %v6403_v29 = vsel %vm15416_vm12, %v6364_v61, %v6402_v37  ;;  %vm15428_vm12 = vmmov %vm15417_vm3 }
0x1afc   : > { %v6332_v55 = vpop.permute.xlu0 %6331  ;;  %v6413_v28 = vsel %vm15418_vm6, %v6403_v29, 0.0  ;;  %v6408_v6 = vsel %vm15419_vm5, %v6388_v50, %v6407_v2  ;;  %vm15429_vm3 = vmmov %vm15419_vm5 }
0x1afd   : > { %v6329_v33 = vpop.permute.xlu1 %6328  ;;  %v6396_v30 = vrot.slane %v6332_v55, %v12459_v63  ;;  %6414 = vadd.xlane.f32.xlu1 %v6413_v28  ;;  %vm15430_vm6 = vmmov %vm15429_vm3 }
0x1afe   : > { %v6392_v60 = vrot.slane %v6329_v33, %v12459_v63  ;;  %vm15431_vm5 = vmmov %vm15420_vm14 }
0x1b00   : > { %v6409_v5 = vsel %vm15420_vm14, %v6392_v60, %v6408_v6  ;;  %vm15432_vm14 = vmmov %vm15431_vm5 }
0x1b01   : > { %v6410_v3 = vsel %vm15421_vm0, %v6396_v30, %v6409_v5 }
0x1b02   : > { %v6416_v54 = vsel %vm15422_vm10, %v6410_v3, 0.0  ;;  %vm15433_vm10 = vmmov %vm15421_vm0 }
0x1b03   : > { %6417 = vadd.xlane.f32.xlu0 %v6416_v54 }
0x1b8a   : > { %v6415_v51 = vpop.xlane.xlu1 %6414 }
0x1b8b   : > { %11604 = vrcp.f32 %v6415_v51 }
0x1b90   : > { %v6418_v32 = vpop.xlane.xlu0 %6417 }
0x1b91   : > { %11606 = vrcp.f32 %v6418_v32 }
0x1b95   : > { %v11605_v21 = vpop.eup %11604 }
0x1b96   : > { %v6430_v48 = vrot.slane %v11605_v21, %v12244_v12  ;;  %v6426_v11 = vrot.slane %v11605_v21, %v12266_v24  ;;  %v6434_v25 = vrot.slane %v11605_v21, %v12285_v34  ;;  %v6438_v41 = vrot.slane %v11605_v21, %v12289_v36 }
0x1b97   : > { %v6442_v7 = vrot.slane %v11605_v21, %v12251_v15  ;;  %v6446_v40 = vrot.slane %v11605_v21, %v12258_v20  ;;  %v6450_v44 = vrot.slane %v11605_v21, %v12293_v38  ;;  %v6454_v29 = vrot.slane %v11605_v21, %v12262_v22 }
0x1b98   : > { %v6504_v10 = vmul.f32 %v13957_v27, %v6430_v48  ;;  %v6503_v56 = vmul.f32 %v13955_v19, %v6426_v11  ;;  %v6505_v35 = vmul.f32 %v13967_v58, %v6434_v25  ;;  %v6506_v1 = vmul.f32 %v13965_v31, %v6438_v41 }
0x1b99   : > { %v6507_v27 = vmul.f32 %v13975_v0, %v6442_v7  ;;  %v6508_v58 = vmul.f32 %v13983_v49, %v6446_v40  ;;  %v6509_v0 = vmul.f32 %v13989_v4, %v6450_v44 }
0x1b9a   : > { %6531 = vperm.xlu1 %11412, %v6504_v10   ;;  %6528 = vperm.xlu0 %11413, %v6503_v56  }
0x1b9b   : > { %v11607_v57 = vpop.eup %11606 }
0x1b9c   : > { %v6462_v17 = vrot.slane %v11607_v57, %v12244_v12  ;;  %v6466_v18 = vrot.slane %v11607_v57, %v12285_v34  ;;  %v6470_v61 = vrot.slane %v11607_v57, %v12289_v36  ;;  %v6474_v47 = vrot.slane %v11607_v57, %v12251_v15 }
0x1b9d   : > { %v6458_v37 = vrot.slane %v11607_v57, %v12266_v24  ;;  %v6478_v50 = vrot.slane %v11607_v57, %v12258_v20  ;;  %v6482_v2 = vrot.slane %v11607_v57, %v12293_v38  ;;  %v6486_v55 = vrot.slane %v11607_v57, %v12262_v22 }
0x1b9e   : > { %6534 = vperm.xlu1 %11412, %v6505_v35   ;;  %6537 = vperm.xlu0 %11413, %v6506_v1   ;;  %v6512_v19 = vmul.f32 %v13977_v53, %v6462_v17  ;;  %v6513_v31 = vmul.f32 %v13985_v14, %v6466_v18  ;;  %v6514_v53 = vmul.f32 %v13991_v8, %v6470_v61 }
0x1b9f   : > { %v6515_v49 = vmul.f32 %v13997_v45, %v6474_v47  ;;  %v6511_v14 = vmul.f32 %v13995_v26, %v6458_v37  ;;  %v6516_v4 = vmul.f32 %v14003_v42, %v6478_v50  ;;  %v6510_v8 = vmul.f32 %v14001_v9, %v6454_v29 }
0x1ba0   : > { %v6517_v45 = vmul.f32 %v14009_v43, %v6482_v2  ;;  %v6518_v26 = vmul.f32 %v14007_v62, %v6486_v55 }
0x1ba2   : > { %6540 = vperm.xlu0 %11413, %v6507_v27   ;;  %6677 = vperm.xlu1 %11412, %v6512_v19  }
0x1ba6   : > { %6543 = vperm.xlu0 %11413, %v6508_v58   ;;  %6680 = vperm.xlu1 %11412, %v6513_v31  }
0x1baa   : > { %6546 = vperm.xlu0 %11413, %v6509_v0   ;;  %6683 = vperm.xlu1 %11412, %v6514_v53  }
0x1bae   : > { %6686 = vperm.xlu1 %11412, %v6515_v49   ;;  %6674 = vperm.xlu0 %11413, %v6511_v14  }
0x1bb2   : > { %6689 = vperm.xlu1 %11412, %v6516_v4   ;;  %6549 = vperm.xlu0 %11413, %v6510_v8  }
0x1bb6   : > { %6692 = vperm.xlu1 %11412, %v6517_v45   ;;  %6695 = vperm.xlu0 %11413, %v6518_v26  }
0x1bba   : > { %6590 = vrot.lane.b32.xlu1 %v13795_v46, %s11931_s12  ;;  %6736 = vrot.lane.b32.xlu0 %v13793_v59, %s11931_s12 }
0x1bbe   : > { %6813 = vrot.lane.b32.xlu1 %v13795_v46, %s11934_s17  ;;  %6891 = vrot.lane.b32.xlu0 %v13793_v59, %s11934_s17 }
0x1bc2   : > { %6811 = vrot.lane.b32.xlu1 %v13806_v39, %s11934_s17  ;;  %6889 = vrot.lane.b32.xlu0 %v13814_v52, %s11934_s17 }
0x1c19   : > { %v6532_v9 = vpop.permute.xlu1 %6531  ;;  %v6529_v42 = vpop.permute.xlu0 %6528 }
0x1c1a   : > { %v6558_v51 = vrot.slane %v6532_v9, %v12459_v63  ;;  %v6554_v32 = vrot.slane %v6529_v42, %v12459_v63 }
0x1c1c   : > { %v6583_v1 = vsel %vm1160_vm13, %v6558_v51, %v6554_v32 }
0x1c1d   : > { %v6535_v62 = vpop.permute.xlu1 %6534  ;;  %v6538_v43 = vpop.permute.xlu0 %6537 }
0x1c1e   : > { %v6562_v11 = vrot.slane %v6535_v62, %v12459_v63  ;;  %v6566_v7 = vrot.slane %v6538_v43, %v12459_v63 }
0x1c20   : > { %v6584_v19 = vsel %vm15425_vm1, %v6562_v11, %v6583_v1 }
0x1c21   : > { %v6678_v28 = vpop.permute.xlu1 %6677  ;;  %v6541_v33 = vpop.permute.xlu0 %6540  ;;  %v6585_v53 = vsel %vm15427_vm15, %v6566_v7, %v6584_v19 }
0x1c22   : > { %v6704_v21 = vrot.slane %v6678_v28, %v12459_v63  ;;  %v6570_v40 = vrot.slane %v6541_v33, %v12459_v63 }
0x1c24   : > { %v6586_v14 = vsel %vm15428_vm12, %v6570_v40, %v6585_v53 }
0x1c25   : > { %v6681_v30 = vpop.permute.xlu1 %6680  ;;  %v6544_v60 = vpop.permute.xlu0 %6543 }
0x1c26   : > { %v6708_v10 = vrot.slane %v6681_v30, %v12459_v63  ;;  %v6574_v58 = vrot.slane %v6544_v60, %v12459_v63 }
0x1c28   : > { %v6587_v29 = vsel %vm15430_vm6, %v6574_v58, %v6586_v14 }
0x1c29   : > { %v6684_v6 = vpop.permute.xlu1 %6683  ;;  %v6547_v5 = vpop.permute.xlu0 %6546 }
0x1c2a   : > { %v6712_v56 = vrot.slane %v6684_v6, %v12459_v63  ;;  %v6578_v44 = vrot.slane %v6547_v5, %v12459_v63 }
0x1c2c   : > { %v6588_v8 = vsel %vm15432_vm14, %v6578_v44, %v6587_v29 }
0x1c2d   : > { %v6687_v3 = vpop.permute.xlu1 %6686  ;;  %v6675_v54 = vpop.permute.xlu0 %6674 }
0x1c2e   : > { %v6700_v48 = vrot.slane %v6675_v54, %v12459_v63  ;;  %v6716_v17 = vrot.slane %v6687_v3, %v12459_v63 }
0x1c30   : > { %v6729_v25 = vsel %vm1160_vm13, %v6704_v21, %v6700_v48 }
0x1c31   : > { %v6730_v41 = vsel %vm15423_vm4, %v6708_v10, %v6729_v25  ;;  %v6690_v57 = vpop.permute.xlu1 %6689  ;;  %v6550_v35 = vpop.permute.xlu0 %6549  ;;  %vm15434_vm4 = vcmask 64512  }
0x1c32   : > { %v6731_v27 = vsel %vm15424_vm8, %v6712_v56, %v6730_v41  ;;  %v6720_v18 = vrot.slane %v6690_v57, %v12459_v63  ;;  %v6582_v47 = vrot.slane %v6550_v35, %v12459_v63  ;;  %vm15435_vm8 = vmmov %vm15434_vm4 }
0x1c33   : > { %v6732_v31 = vsel %vm15426_vm11, %v6716_v17, %v6731_v27  ;;  %vm15436_vm1 = vmmov %vm15434_vm4 }
0x1c34   : > { %v6733_v50 = vsel %vm15429_vm3, %v6720_v18, %v6732_v31  ;;  %v6589_v26 = vsel %vm15433_vm10, %v6582_v47, %v6588_v8  ;;  %vm15437_vm11 = vmmov %vm15436_vm1  ;;  %vm15443_vm10 = vcmask 1043459  }
0x1c35   : > { %v6693_v61 = vpop.permute.xlu1 %6692  ;;  %v6696_v0 = vpop.permute.xlu0 %6695  ;;  %vm15438_vm15 = vmmov %vm15436_vm1 }
0x1c36   : > { %v6724_v37 = vrot.slane %v6693_v61, %v12459_v63  ;;  %v6728_v49 = vrot.slane %v6696_v0, %v12459_v63  ;;  %vm15439_vm12 = vmmov %vm15436_vm1 }
0x1c37   : > { %vm15440_vm3 = vmmov %vm15436_vm1 }
0x1c38   : > { %v6734_v4 = vsel %vm15431_vm5, %v6724_v37, %v6733_v50  ;;  %vm15441_vm6 = vmmov %vm15436_vm1 }
0x1c39   : > { %v6591_v2 = vpop.permute.xlu1 %6590  ;;  %v6737_v55 = vpop.permute.xlu0 %6736  ;;  %v6735_v45 = vsel %vm15421_vm0, %v6728_v49, %v6734_v4  ;;  %vm15442_vm0 = vcmask 1042434  }
0x1c3a   : > { %11146 = vmatpush3.msra.mxu0 %v6591_v2  ;;  %11151 = vmatpush3.msra.mxu1 %v6737_v55 }
0x1c3b   : > { %11148 = vmatmul.mubr.msk.f32.vlgmr.msra.gmra.mrb[18].mxu0 %vm15434_vm4, %v6589_v26  ;;  %11153 = vmatmul.mubr.msk.f32.vlgmr.msra.gmra.mrb[26].mxu1 %vm15435_vm8, %v6735_v45  ;;  %vm15444_vm4 = vcmask 1044484   ;;  %vm15445_vm8 = vmmov %vm15442_vm0 }
0x1c3c   : > { %11155 = vmatprep.subr.mxu0 %v11929_v16  ;;  %11160 = vmatprep.subr.mxu1 %v11929_v16 }
0x1c3d   : > { %v6814_v9 = vpop.permute.xlu1 %6813  ;;  %v6892_v42 = vpop.permute.xlu0 %6891  ;;  %11157 = vmatprep.mubr.msk.f32.mxu0 %vm15290_vm2, %v11929_v16  ;;  %11162 = vmatprep.mubr.msk.f32.mxu1 %vm15290_vm2, %v11929_v16 }
0x1c3e   : > { %v6971_v62 = vsel %vm15436_vm1, %v6814_v9, 0.0  ;;  %v6974_v43 = vsel %vm15437_vm11, %v6892_v42, 0.0  ;;  %vm15446_vm1 = vcmask 1045509   ;;  %vm15447_vm11 = vmmov %vm15443_vm10 }
0x1c3f   : > { %6972 = vadd.xlane.f32.xlu1 %v6971_v62  ;;  %6975 = vadd.xlane.f32.xlu0 %v6974_v43 }
0x1c41   : > { %11156 = vmatpush3.xpose.msk.msra.mxu0 %vm15438_vm15, %v6814_v9  ;;  %11161 = vmatpush3.xpose.msk.msra.mxu1 %vm15439_vm12, %v6892_v42  ;;  %v6812_v28 = vpop.permute.xlu1 %6811  ;;  %v6890_v33 = vpop.permute.xlu0 %6889  ;;  %vm15448_vm15 = vcmask 1046534   ;;  %vm15449_vm12 = vmmov %vm15444_vm4 }
0x1c42   : > { %11165 = vmatprep.subr.mxu0 %v11929_v16  ;;  %11170 = vmatprep.subr.mxu1 %v11929_v16 }
0x1c44   : > { %11158 = vmatmul.mubr.msk.f32.vlgmr.msra.gmra.mrb[20].mxu0 %vm15440_vm3, %v6812_v28  ;;  %11163 = vmatmul.mubr.msk.f32.vlgmr.msra.gmra.mrb[28].mxu1 %vm15441_vm6, %v6890_v33  ;;  %vm15450_vm3 = vcmask 1047559  }
0x1c45   : > { %11167 = vmatprep.mubr.msk.f32.mxu0 %vm15290_vm2, %v11929_v16  ;;  %11172 = vmatprep.mubr.msk.f32.mxu1 %vm15290_vm2, %v11929_v16 }
0x1ccc   : > { %v6973_v44 = vpop.xlane.xlu1 %6972  ;;  %v6976_v61 = vpop.xlane.xlu0 %6975 }
0x1ccd   : > { %vm6977_vm5 = vcmp.eq.f32.partialorder %v6973_v44, 0.0  ;;  %vm6978_vm14 = vcmp.eq.f32.partialorder %v6976_v61, 0.0 }
0x1d0e   : > { %v14139_v30 = vpop.f32.mrb[18].mxu0  ;;  %v14141_v60 = vpop.f32.mrb[26].mxu1 }
0x1d0f   : > { %v11149_v6 = vpop.f32.mrb[19].mxu0  ;;  %v11154_v5 = vpop.f32.mrb[27].mxu1 }
0x1d17   : > { %v6885_v3 = vpop.f32.mrb[20].mxu0  ;;  %v6963_v54 = vpop.f32.mrb[28].mxu1 }
0x1d18   : > { %v6967_v51 = vmul.f32 0.35355338, %v6885_v3  ;;  %v11159_v32 = vpop.f32.mrb[21].mxu0  ;;  %v11164_v21 = vpop.f32.mrb[29].mxu1  ;;  %v6968_v10 = vmul.f32 0.35355338, %v6963_v54 }
0x1d1a   : > { %v6995_v48 = vrot.slane %v6967_v51, %v12244_v12  ;;  %v6988_v11 = vrot.slane %v6967_v51, %v12266_v24  ;;  %v7002_v56 = vrot.slane %v6967_v51, %v12285_v34  ;;  %v7009_v25 = vrot.slane %v6967_v51, %v12289_v36 }
0x1d1b   : > { %v7016_v41 = vrot.slane %v6967_v51, %v12251_v15  ;;  %v7051_v57 = vrot.slane %v6968_v10, %v12244_v12  ;;  %v7023_v35 = vrot.slane %v6967_v51, %v12258_v20  ;;  %v7058_v1 = vrot.slane %v6968_v10, %v12285_v34 }
0x1d1c   : > { %6997 = vbcast.lane.b32.xlu1 %v6995_v48, 256  ;;  %6990 = vbcast.lane.b32.xlu0 %v6988_v11, 256  ;;  %v7030_v7 = vrot.slane %v6967_v51, %v12293_v38  ;;  %v7065_v17 = vrot.slane %v6968_v10, %v12289_v36  ;;  %v7072_v27 = vrot.slane %v6968_v10, %v12251_v15 }
0x1d1d   : > { %v7044_v19 = vrot.slane %v6968_v10, %v12266_v24  ;;  %v7079_v40 = vrot.slane %v6968_v10, %v12258_v20  ;;  %v7037_v18 = vrot.slane %v6967_v51, %v12262_v22  ;;  %v7086_v58 = vrot.slane %v6968_v10, %v12293_v38 }
0x1d1e   : > { %v7093_v31 = vrot.slane %v6968_v10, %v12262_v22 }
0x1d20   : > { %7004 = vbcast.lane.b32.xlu1 %v7002_v56, 256  ;;  %7011 = vbcast.lane.b32.xlu0 %v7009_v25, 256 }
0x1d24   : > { %7018 = vbcast.lane.b32.xlu0 %v7016_v41, 256  ;;  %7053 = vbcast.lane.b32.xlu1 %v7051_v57, 256 }
0x1d28   : > { %7025 = vbcast.lane.b32.xlu0 %v7023_v35, 256  ;;  %7060 = vbcast.lane.b32.xlu1 %v7058_v1, 256 }
0x1d2c   : > { %7032 = vbcast.lane.b32.xlu0 %v7030_v7, 256  ;;  %7067 = vbcast.lane.b32.xlu1 %v7065_v17, 256 }
0x1d30   : > { %7074 = vbcast.lane.b32.xlu1 %v7072_v27, 256  ;;  %7046 = vbcast.lane.b32.xlu0 %v7044_v19, 256 }
0x1d34   : > { %7081 = vbcast.lane.b32.xlu1 %v7079_v40, 256  ;;  %7039 = vbcast.lane.b32.xlu0 %v7037_v18, 256 }
0x1d38   : > { %7088 = vbcast.lane.b32.xlu1 %v7086_v58, 256  ;;  %7095 = vbcast.lane.b32.xlu0 %v7093_v31, 256 }
0x1d8e   : > { %v6998_v0 = vpop.permute.xlu1 %6997  ;;  %v6991_v53 = vpop.permute.xlu0 %6990 }
0x1d8f   : > { %v14160_v47 = vsel %vm6977_vm5, -4.2949673e+09, %v6998_v0  ;;  %v14163_v37 = vsel %vm6977_vm5, -4.2949673e+09, %v6991_v53 }
0x1d90   : > { %7146 = vperm.xlu1 %11412, %v14163_v37   ;;  %7149 = vperm.xlu0 %11413, %v14160_v47  }
0x1d92   : > { %v7005_v49 = vpop.permute.xlu1 %7004  ;;  %v7012_v14 = vpop.permute.xlu0 %7011 }
0x1d93   : > { %v14168_v50 = vsel %vm6977_vm5, -4.2949673e+09, %v7005_v49  ;;  %v14171_v29 = vsel %vm6977_vm5, -4.2949673e+09, %v7012_v14 }
0x1d94   : > { %7152 = vperm.xlu1 %11412, %v14168_v50   ;;  %7155 = vperm.xlu0 %11413, %v14171_v29  }
0x1d96   : > { %v7019_v4 = vpop.permute.xlu0 %7018  ;;  %v7054_v8 = vpop.permute.xlu1 %7053 }
0x1d97   : > { %v14176_v2 = vsel %vm6977_vm5, -4.2949673e+09, %v7019_v4  ;;  %v14179_v55 = vsel %vm6978_vm14, -4.2949673e+09, %v7054_v8 }
0x1d98   : > { %7173 = vperm.xlu1 %11412, %v14179_v55   ;;  %7158 = vperm.xlu0 %11413, %v14176_v2  }
0x1d9a   : > { %v7026_v45 = vpop.permute.xlu0 %7025  ;;  %v7061_v26 = vpop.permute.xlu1 %7060 }
0x1d9b   : > { %v14184_v9 = vsel %vm6977_vm5, -4.2949673e+09, %v7026_v45  ;;  %v14187_v42 = vsel %vm6978_vm14, -4.2949673e+09, %v7061_v26 }
0x1d9c   : > { %7176 = vperm.xlu1 %11412, %v14187_v42   ;;  %7161 = vperm.xlu0 %11413, %v14184_v9  }
0x1d9e   : > { %v7033_v62 = vpop.permute.xlu0 %7032  ;;  %v7068_v43 = vpop.permute.xlu1 %7067 }
0x1d9f   : > { %v14192_v28 = vsel %vm6977_vm5, -4.2949673e+09, %v7033_v62  ;;  %v14195_v33 = vsel %vm6978_vm14, -4.2949673e+09, %v7068_v43 }
0x1da0   : > { %7179 = vperm.xlu1 %11412, %v14195_v33   ;;  %7164 = vperm.xlu0 %11413, %v14192_v28  }
0x1da2   : > { %v7075_v6 = vpop.permute.xlu1 %7074  ;;  %v7047_v5 = vpop.permute.xlu0 %7046 }
0x1da3   : > { %v14200_v3 = vsel %vm6978_vm14, -4.2949673e+09, %v7075_v6  ;;  %v14203_v54 = vsel %vm6978_vm14, -4.2949673e+09, %v7047_v5 }
0x1da4   : > { %7182 = vperm.xlu1 %11412, %v14200_v3   ;;  %7170 = vperm.xlu0 %11413, %v14203_v54  }
0x1da6   : > { %v7082_v51 = vpop.permute.xlu1 %7081  ;;  %v7040_v32 = vpop.permute.xlu0 %7039 }
0x1da7   : > { %v14208_v21 = vsel %vm6978_vm14, -4.2949673e+09, %v7082_v51  ;;  %v14211_v48 = vsel %vm6977_vm5, -4.2949673e+09, %v7040_v32  ;;  %vm15451_vm5 = vmmov %vm15446_vm1 }
0x1da8   : > { %7185 = vperm.xlu1 %11412, %v14208_v21   ;;  %7167 = vperm.xlu0 %11413, %v14211_v48  }
0x1daa   : > { %v7089_v11 = vpop.permute.xlu1 %7088  ;;  %v7096_v10 = vpop.permute.xlu0 %7095 }
0x1dab   : > { %v14216_v56 = vsel %vm6978_vm14, -4.2949673e+09, %v7089_v11  ;;  %v14219_v25 = vsel %vm6978_vm14, -4.2949673e+09, %v7096_v10  ;;  %vm15452_vm14 = vmmov %vm15448_vm15 }
0x1dac   : > { %7188 = vperm.xlu1 %11412, %v14216_v56   ;;  %7191 = vperm.xlu0 %11413, %v14219_v25  }
0x1e0f   : > { %v7147_v41 = vpop.permute.xlu1 %7146  ;;  %v7150_v57 = vpop.permute.xlu0 %7149 }
0x1e10   : > { %v7196_v40 = vrot.slane %v7147_v41, %v12459_v63  ;;  %v7200_v18 = vrot.slane %v7150_v57, %v12459_v63 }
0x1e12   : > { %v7257_v61 = vsel %vm1160_vm13, %v7200_v18, %v7196_v40 }
0x1e13   : > { %v7153_v35 = vpop.permute.xlu1 %7152  ;;  %v7156_v1 = vpop.permute.xlu0 %7155 }
0x1e14   : > { %v7204_v58 = vrot.slane %v7153_v35, %v12459_v63  ;;  %v7208_v0 = vrot.slane %v7156_v1, %v12459_v63 }
0x1e16   : > { %v7258_v53 = vsel %vm15442_vm0, %v7204_v58, %v7257_v61  ;;  %vm15453_vm0 = vmmov %vm15450_vm3 }
0x1e17   : > { %v7174_v7 = vpop.permute.xlu1 %7173  ;;  %v7159_v17 = vpop.permute.xlu0 %7158  ;;  %v7259_v6 = vsel %vm15443_vm10, %v7208_v0, %v7258_v53  ;;  %vm15454_vm10 = vmmov %vm15441_vm6 }
0x1e18   : > { %v7212_v49 = vrot.slane %v7159_v17, %v12459_v63  ;;  %v7232_v8 = vrot.slane %v7174_v7, %v12459_v63 }
0x1e1a   : > { %v7260_v32 = vsel %vm15444_vm4, %v7212_v49, %v7259_v6  ;;  %vm15455_vm4 = vmmov %vm15445_vm8 }
0x1e1b   : > { %v7177_v27 = vpop.permute.xlu1 %7176  ;;  %v7162_v19 = vpop.permute.xlu0 %7161 }
0x1e1c   : > { %v7216_v45 = vrot.slane %v7162_v19, %v12459_v63  ;;  %v7236_v62 = vrot.slane %v7177_v27, %v12459_v63 }
0x1e1e   : > { %v7261_v57 = vsel %vm15446_vm1, %v7216_v45, %v7260_v32  ;;  %vm15457_vm1 = vmmov %vm15449_vm12 }
0x1e1f   : > { %v7180_v31 = vpop.permute.xlu1 %7179  ;;  %v7165_v44 = vpop.permute.xlu0 %7164 }
0x1e20   : > { %v7220_v43 = vrot.slane %v7165_v44, %v12459_v63  ;;  %v7240_v5 = vrot.slane %v7180_v31, %v12459_v63 }
0x1e22   : > { %v7262_v27 = vsel %vm15448_vm15, %v7220_v43, %v7261_v57  ;;  %vm15459_vm15 = vmmov %vm15451_vm5 }
0x1e23   : > { %v7183_v14 = vpop.permute.xlu1 %7182  ;;  %v7171_v4 = vpop.permute.xlu0 %7170 }
0x1e24   : > { %v7228_v26 = vrot.slane %v7171_v4, %v12459_v63  ;;  %v7244_v35 = vrot.slane %v7183_v14, %v12459_v63 }
0x1e26   : > { %v7264_v51 = vsel %vm1160_vm13, %v7232_v8, %v7228_v26 }
0x1e27   : > { %v7265_v11 = vsel %vm15445_vm8, %v7236_v62, %v7264_v51  ;;  %v7186_v10 = vpop.permute.xlu1 %7185  ;;  %v7168_v41 = vpop.permute.xlu0 %7167  ;;  %vm15456_vm8 = vmmov %vm15447_vm11 }
0x1e28   : > { %v7266_v1 = vsel %vm15447_vm11, %v7240_v5, %v7265_v11  ;;  %v7224_v7 = vrot.slane %v7168_v41, %v12459_v63  ;;  %v7248_v17 = vrot.slane %v7186_v10, %v12459_v63  ;;  %vm15458_vm11 = vmmov %vm15455_vm4 }
0x1e29   : > { %v7267_v19 = vsel %vm15449_vm12, %v7244_v35, %v7266_v1  ;;  %vm15460_vm12 = vmmov %vm15456_vm8 }
0x1e2a   : > { %v7263_v40 = vsel %vm15450_vm3, %v7224_v7, %v7262_v27  ;;  %v7268_v0 = vsel %vm15451_vm5, %v7248_v17, %v7267_v19  ;;  %vm15461_vm3 = vmmov %vm15452_vm14 }
0x1e2b   : > { %v7189_v18 = vpop.permute.xlu1 %7188  ;;  %v7192_v58 = vpop.permute.xlu0 %7191  ;;  %v7273_v31 = vsel %vm15441_vm6, %v7263_v40, -inf  ;;  %vm15462_vm6 = vmmov %vm15453_vm0 }
0x1e2c   : > { %v7252_v44 = vrot.slane %v7189_v18, %v12459_v63  ;;  %v7256_v61 = vrot.slane %v7192_v58, %v12459_v63  ;;  %7274 = vmax.xlane.f32.xlu1 %v7273_v31  ;;  %vm15463_vm5 = vmmov %vm15457_vm1 }
0x1e2e   : > { %v7269_v53 = vsel %vm15452_vm14, %v7252_v44, %v7268_v0  ;;  %vm15464_vm14 = vmmov %vm15454_vm10 }
0x1e2f   : > { %v7270_v49 = vsel %vm15453_vm0, %v7256_v61, %v7269_v53  ;;  %vm15465_vm0 = vmmov %vm15459_vm15 }
0x1e30   : > { %v7276_v14 = vsel %vm15454_vm10, %v7270_v49, -inf  ;;  %vm15466_vm10 = vmmov %vm15461_vm3 }
0x1e31   : > { %7277 = vmax.xlane.f32.xlu0 %v7276_v14 }
0x1eb9   : > { %v7275_v4 = vpop.xlane.xlu1 %7274 }
0x1eba   : > { %v7284_v8 = vrot.slane %v7275_v4, %v12266_v24  ;;  %v7288_v45 = vrot.slane %v7275_v4, %v12244_v12  ;;  %v7292_v26 = vrot.slane %v7275_v4, %v12285_v34  ;;  %v7296_v62 = vrot.slane %v7275_v4, %v12289_v36 }
0x1ebb   : > { %v7300_v43 = vrot.slane %v7275_v4, %v12251_v15  ;;  %v7304_v57 = vrot.slane %v7275_v4, %v12258_v20 }
0x1ebc   : > { %v7361_v6 = vsub.f32 %v14163_v37, %v7284_v8  ;;  %v7362_v5 = vsub.f32 %v14160_v47, %v7288_v45  ;;  %v7364_v51 = vsub.f32 %v14171_v29, %v7296_v62  ;;  %v7363_v32 = vsub.f32 %v14168_v50, %v7292_v26 }
0x1ebd   : > { %v7365_v35 = vsub.f32 %v14176_v2, %v7300_v43  ;;  %v7308_v29 = vrot.slane %v7275_v4, %v12293_v38  ;;  %v7366_v50 = vsub.f32 %v14184_v9, %v7304_v57 }
0x1ebe   : > { %v7377_v11 = vmul.f32 1.442695, %v7361_v6  ;;  %v7379_v10 = vmul.f32 1.442695, %v7362_v5  ;;  %v7278_v41 = vpop.xlane.xlu0 %7277  ;;  %v7383_v1 = vmul.f32 1.442695, %v7364_v51 }
0x1ebf   : > { %v7320_v7 = vrot.slane %v7278_v41, %v12244_v12  ;;  %v7381_v17 = vmul.f32 1.442695, %v7363_v32  ;;  %v7324_v37 = vrot.slane %v7278_v41, %v12285_v34  ;;  %v7385_v27 = vmul.f32 1.442695, %v7365_v35 }
0x1ec0   : > { %11608 = vpow2.f32 %v7377_v11  ;;  %v7328_v19 = vrot.slane %v7278_v41, %v12289_v36  ;;  %v7367_v18 = vsub.f32 %v14192_v28, %v7308_v29  ;;  %v7387_v58 = vmul.f32 1.442695, %v7366_v50 }
0x1ec1   : > { %11610 = vpow2.f32 %v7379_v10  ;;  %v7370_v47 = vsub.f32 %v14179_v55, %v7320_v7  ;;  %v7371_v2 = vsub.f32 %v14187_v42, %v7324_v37  ;;  %v7316_v31 = vrot.slane %v7278_v41, %v12266_v24 }
0x1ec2   : > { %11612 = vpow2.f32 %v7383_v1  ;;  %v7332_v55 = vrot.slane %v7278_v41, %v12251_v15  ;;  %v7372_v44 = vsub.f32 %v14195_v33, %v7328_v19  ;;  %v7312_v42 = vrot.slane %v7275_v4, %v12262_v22 }
0x1ec3   : > { %11614 = vpow2.f32 %v7381_v17  ;;  %v7395_v40 = vmul.f32 1.442695, %v7370_v47  ;;  %v7397_v9 = vmul.f32 1.442695, %v7371_v2  ;;  %v7389_v28 = vmul.f32 1.442695, %v7367_v18 }
0x1ec4   : > { %11616 = vpow2.f32 %v7385_v27  ;;  %v7369_v53 = vsub.f32 %v14203_v54, %v7316_v31  ;;  %v7336_v49 = vrot.slane %v7278_v41, %v12258_v20  ;;  %v7373_v33 = vsub.f32 %v14200_v3, %v7332_v55 }
0x1ec5   : > { %11618 = vpow2.f32 %v7395_v40  ;;  %v7399_v14 = vmul.f32 1.442695, %v7372_v44  ;;  %v7368_v4 = vsub.f32 %v14211_v48, %v7312_v42  ;;  %v7344_v26 = vrot.slane %v7278_v41, %v12262_v22 }
0x1ec6   : > { %11620 = vpow2.f32 %v7387_v58  ;;  %v7393_v54 = vmul.f32 1.442695, %v7369_v53  ;;  %v7340_v62 = vrot.slane %v7278_v41, %v12293_v38  ;;  %v7374_v3 = vsub.f32 %v14208_v21, %v7336_v49 }
0x1ec7   : > { %11622 = vpow2.f32 %v7397_v9  ;;  %v7401_v43 = vmul.f32 1.442695, %v7373_v33  ;;  %v7391_v51 = vmul.f32 1.442695, %v7368_v4  ;;  %v7376_v48 = vsub.f32 %v14219_v25, %v7344_v26 }
0x1ec8   : > { %11624 = vpow2.f32 %v7389_v28  ;;  %v7375_v32 = vsub.f32 %v14216_v56, %v7340_v62  ;;  %v7403_v11 = vmul.f32 1.442695, %v7374_v3 }
0x1ec9   : > { %11626 = vpow2.f32 %v7399_v14  ;;  %v7407_v41 = vmul.f32 1.442695, %v7376_v48 }
0x1eca   : > { %v14277_v61 = vpop.eup %11608  ;;  %11628 = vpow2.f32 %v7393_v54  ;;  %v7405_v57 = vmul.f32 1.442695, %v7375_v32 }
0x1ecb   : > { %v14279_v0 = vpop.eup %11610  ;;  %7426 = vperm.xlu0 %11413, %v14277_v61   ;;  %11630 = vpow2.f32 %v7401_v43 }
0x1ecc   : > { %7429 = vperm.xlu1 %11412, %v14279_v0   ;;  %v14287_v8 = vpop.eup %11612  ;;  %11632 = vpow2.f32 %v7391_v51 }
0x1ecd   : > { %v14289_v45 = vpop.eup %11614  ;;  %11634 = vpow2.f32 %v7403_v11 }
0x1ece   : > { %v14297_v6 = vpop.eup %11616  ;;  %11636 = vpow2.f32 %v7407_v41 }
0x1ecf   : > { %7435 = vperm.xlu0 %11413, %v14287_v8   ;;  %v14299_v5 = vpop.eup %11618  ;;  %11638 = vpow2.f32 %v7405_v57 }
0x1ed0   : > { %7432 = vperm.xlu1 %11412, %v14289_v45   ;;  %v14305_v10 = vpop.eup %11620 }
0x1ed1   : > { %v14307_v21 = vpop.eup %11622 }
0x1ed2   : > { %v14311_v25 = vpop.eup %11624 }
0x1ed3   : > { %7438 = vperm.xlu0 %11413, %v14297_v6   ;;  %v14313_v35 = vpop.eup %11626 }
0x1ed4   : > { %7453 = vperm.xlu1 %11412, %v14299_v5   ;;  %v14317_v56 = vpop.eup %11628 }
0x1ed5   : > { %v14319_v1 = vpop.eup %11630 }
0x1ed6   : > { %v14323_v7 = vpop.eup %11632 }
0x1ed7   : > { %7441 = vperm.xlu0 %11413, %v14305_v10   ;;  %v14325_v17 = vpop.eup %11634 }
0x1ed8   : > { %7456 = vperm.xlu1 %11412, %v14307_v21   ;;  %v14329_v37 = vpop.eup %11636 }
0x1ed9   : > { %v14331_v47 = vpop.eup %11638 }
0x1edb   : > { %7444 = vperm.xlu0 %11413, %v14311_v25  }
0x1edc   : > { %7459 = vperm.xlu1 %11412, %v14313_v35  }
0x1edf   : > { %7450 = vperm.xlu0 %11413, %v14317_v56  }
0x1ee0   : > { %7462 = vperm.xlu1 %11412, %v14319_v1  }
0x1ee3   : > { %7447 = vperm.xlu0 %11413, %v14323_v7  }
0x1ee4   : > { %7465 = vperm.xlu1 %11412, %v14325_v17  }
0x1ee7   : > { %7471 = vperm.xlu0 %11413, %v14329_v37  }
0x1ee8   : > { %7468 = vperm.xlu1 %11412, %v14331_v47  }
0x1f4a   : > { %v7427_v29 = vpop.permute.xlu0 %7426 }
0x1f4b   : > { %v7430_v50 = vpop.permute.xlu1 %7429  ;;  %v7476_v55 = vrot.slane %v7427_v29, %v12459_v63 }
0x1f4c   : > { %v7480_v31 = vrot.slane %v7430_v50, %v12459_v63 }
0x1f4e   : > { %v7436_v27 = vpop.permute.xlu0 %7435  ;;  %v7537_v28 = vsel %vm1160_vm13, %v7480_v31, %v7476_v55 }
0x1f4f   : > { %v7433_v19 = vpop.permute.xlu1 %7432  ;;  %v7488_v53 = vrot.slane %v7436_v27, %v12459_v63 }
0x1f50   : > { %v7484_v44 = vrot.slane %v7433_v19, %v12459_v63 }
0x1f52   : > { %v7439_v2 = vpop.permute.xlu0 %7438  ;;  %v7538_v49 = vsel %vm15455_vm4, %v7484_v44, %v7537_v28  ;;  %vm15467_vm4 = vmmov %vm15462_vm6 }
0x1f53   : > { %v7454_v40 = vpop.permute.xlu1 %7453  ;;  %v7492_v33 = vrot.slane %v7439_v2, %v12459_v63  ;;  %v7539_v51 = vsel %vm15456_vm8, %v7488_v53, %v7538_v49  ;;  %vm15468_vm8 = vmmov %vm15464_vm14 }
0x1f54   : > { %v7512_v4 = vrot.slane %v7454_v40, %v12459_v63 }
0x1f55   : > { %v7540_v11 = vsel %vm15457_vm1, %v7492_v33, %v7539_v51  ;;  %vm15469_vm1 = vmmov %vm15458_vm11 }
0x1f56   : > { %v7442_v18 = vpop.permute.xlu0 %7441 }
0x1f57   : > { %v7457_v58 = vpop.permute.xlu1 %7456  ;;  %v7496_v26 = vrot.slane %v7442_v18, %v12459_v63 }
0x1f58   : > { %v7516_v3 = vrot.slane %v7457_v58, %v12459_v63 }
0x1f59   : > { %v7541_v29 = vsel %vm15459_vm15, %v7496_v26, %v7540_v11  ;;  %vm15471_vm15 = vmmov %vm15469_vm1 }
0x1f5a   : > { %v7445_v9 = vpop.permute.xlu0 %7444 }
0x1f5b   : > { %v7460_v42 = vpop.permute.xlu1 %7459  ;;  %v7500_v43 = vrot.slane %v7445_v9, %v12459_v63 }
0x1f5c   : > { %v7520_v48 = vrot.slane %v7460_v42, %v12459_v63 }
0x1f5d   : > { %v7542_v40 = vsel %vm15461_vm3, %v7500_v43, %v7541_v29 }
0x1f5e   : > { %v7451_v14 = vpop.permute.xlu0 %7450 }
0x1f5f   : > { %v7463_v54 = vpop.permute.xlu1 %7462  ;;  %v7508_v62 = vrot.slane %v7451_v14, %v12459_v63 }
0x1f60   : > { %v7524_v2 = vrot.slane %v7463_v54, %v12459_v63 }
0x1f61   : > { %v7544_v32 = vsel %vm1160_vm13, %v7512_v4, %v7508_v62 }
0x1f62   : > { %v7545_v41 = vsel %vm15458_vm11, %v7516_v3, %v7544_v32  ;;  %v7448_v57 = vpop.permute.xlu0 %7447  ;;  %vm15470_vm11 = vmmov %vm15460_vm12 }
0x1f63   : > { %v7466_v50 = vpop.permute.xlu1 %7465  ;;  %v7546_v27 = vsel %vm15460_vm12, %v7520_v48, %v7545_v41  ;;  %v7504_v19 = vrot.slane %v7448_v57, %v12459_v63  ;;  %vm15472_vm12 = vmmov %vm15463_vm5 }
0x1f64   : > { %v7528_v18 = vrot.slane %v7466_v50, %v12459_v63  ;;  %v7547_v31 = vsel %vm15463_vm5, %v7524_v2, %v7546_v27  ;;  %vm15473_vm3 = vmmov %vm15470_vm11 }
0x1f65   : > { %v7543_v58 = vsel %vm15462_vm6, %v7504_v19, %v7542_v40  ;;  %vm15474_vm6 = vmmov %vm15463_vm5 }
0x1f66   : > { %v7472_v55 = vpop.permute.xlu0 %7471  ;;  %v7553_v44 = vsel %vm15464_vm14, %v7543_v58, 0.0  ;;  %v7548_v53 = vsel %vm15465_vm0, %v7528_v18, %v7547_v31  ;;  %vm15475_vm5 = vmmov %vm15465_vm0 }
0x1f67   : > { %v7469_v9 = vpop.permute.xlu1 %7468  ;;  %v7536_v42 = vrot.slane %v7472_v55, %v12459_v63  ;;  %7554 = vadd.xlane.f32.xlu1 %v7553_v44  ;;  %vm15476_vm14 = vmmov %vm15465_vm0 }
0x1f68   : > { %v7532_v28 = vrot.slane %v7469_v9, %v12459_v63  ;;  %vm15477_vm0 = vmmov %vm15466_vm10 }
0x1f6a   : > { %v7549_v49 = vsel %vm15466_vm10, %v7532_v28, %v7548_v53  ;;  %vm15478_vm10 = vmmov %vm15477_vm0 }
0x1f6b   : > { %v7550_v33 = vsel %vm15467_vm4, %v7536_v42, %v7549_v49 }
0x1f6c   : > { %v7556_v14 = vsel %vm15468_vm8, %v7550_v33, 0.0  ;;  %vm15479_vm8 = vmmov %vm15467_vm4 }
0x1f6d   : > { %7557 = vadd.xlane.f32.xlu0 %v7556_v14 }
0x1ff4   : > { %v7555_v4 = vpop.xlane.xlu1 %7554 }
0x1ff5   : > { %11640 = vrcp.f32 %v7555_v4 }
0x1ffa   : > { %v7558_v26 = vpop.xlane.xlu0 %7557 }
0x1ffb   : > { %11642 = vrcp.f32 %v7558_v26 }
0x1fff   : > { %v11641_v54 = vpop.eup %11640 }
0x2000   : > { %v7570_v62 = vrot.slane %v11641_v54, %v12244_v12  ;;  %v7566_v3 = vrot.slane %v11641_v54, %v12266_v24  ;;  %v7574_v48 = vrot.slane %v11641_v54, %v12285_v34  ;;  %v7578_v32 = vrot.slane %v11641_v54, %v12289_v36 }
0x2001   : > { %v7582_v29 = vrot.slane %v11641_v54, %v12251_v15  ;;  %v7586_v27 = vrot.slane %v11641_v54, %v12258_v20  ;;  %v7590_v2 = vrot.slane %v11641_v54, %v12293_v38  ;;  %v7594_v55 = vrot.slane %v11641_v54, %v12262_v22 }
0x2002   : > { %v7644_v43 = vmul.f32 %v14279_v0, %v7570_v62  ;;  %v7643_v51 = vmul.f32 %v14277_v61, %v7566_v3  ;;  %v7645_v41 = vmul.f32 %v14289_v45, %v7574_v48  ;;  %v7646_v57 = vmul.f32 %v14287_v8, %v7578_v32 }
0x2003   : > { %v7647_v0 = vmul.f32 %v14297_v6, %v7582_v29  ;;  %v7648_v45 = vmul.f32 %v14305_v10, %v7586_v27  ;;  %v7649_v6 = vmul.f32 %v14311_v25, %v7590_v2 }
0x2004   : > { %7671 = vperm.xlu1 %11412, %v7644_v43   ;;  %7668 = vperm.xlu0 %11413, %v7643_v51  }
0x2005   : > { %v11643_v11 = vpop.eup %11642 }
0x2006   : > { %v7602_v50 = vrot.slane %v11643_v11, %v12244_v12  ;;  %v7606_v19 = vrot.slane %v11643_v11, %v12285_v34  ;;  %v7610_v40 = vrot.slane %v11643_v11, %v12289_v36  ;;  %v7614_v18 = vrot.slane %v11643_v11, %v12251_v15 }
0x2007   : > { %v7598_v58 = vrot.slane %v11643_v11, %v12266_v24  ;;  %v7618_v31 = vrot.slane %v11643_v11, %v12258_v20  ;;  %v7622_v44 = vrot.slane %v11643_v11, %v12293_v38  ;;  %v7626_v9 = vrot.slane %v11643_v11, %v12262_v22 }
0x2008   : > { %7674 = vperm.xlu1 %11412, %v7645_v41   ;;  %7677 = vperm.xlu0 %11413, %v7646_v57   ;;  %v7652_v61 = vmul.f32 %v14299_v5, %v7602_v50  ;;  %v7653_v8 = vmul.f32 %v14307_v21, %v7606_v19  ;;  %v7654_v5 = vmul.f32 %v14313_v35, %v7610_v40 }
0x2009   : > { %v7655_v10 = vmul.f32 %v14319_v1, %v7614_v18  ;;  %v7651_v21 = vmul.f32 %v14317_v56, %v7598_v58  ;;  %v7656_v25 = vmul.f32 %v14325_v17, %v7618_v31  ;;  %v7650_v35 = vmul.f32 %v14323_v7, %v7594_v55 }
0x200a   : > { %v7657_v1 = vmul.f32 %v14331_v47, %v7622_v44  ;;  %v7658_v56 = vmul.f32 %v14329_v37, %v7626_v9 }
0x200c   : > { %7680 = vperm.xlu0 %11413, %v7647_v0   ;;  %7817 = vperm.xlu1 %11412, %v7652_v61  }
0x2010   : > { %7683 = vperm.xlu0 %11413, %v7648_v45   ;;  %7820 = vperm.xlu1 %11412, %v7653_v8  }
0x2014   : > { %7686 = vperm.xlu0 %11413, %v7649_v6   ;;  %7823 = vperm.xlu1 %11412, %v7654_v5  }
0x2018   : > { %7826 = vperm.xlu1 %11412, %v7655_v10   ;;  %7814 = vperm.xlu0 %11413, %v7651_v21  }
0x201c   : > { %7829 = vperm.xlu1 %11412, %v7656_v25   ;;  %7689 = vperm.xlu0 %11413, %v7650_v35  }
0x2020   : > { %7832 = vperm.xlu1 %11412, %v7657_v1   ;;  %7835 = vperm.xlu0 %11413, %v7658_v56  }
0x2024   : > { %7730 = vrot.lane.b32.xlu1 %v13795_v46, %s11933_s21  ;;  %7876 = vrot.lane.b32.xlu0 %v13793_v59, %s11933_s21 }
0x2028   : > { %7953 = vrot.lane.b32.xlu1 %v13795_v46, %s11937_s19  ;;  %8031 = vrot.lane.b32.xlu0 %v13793_v59, %s11937_s19 }
0x202c   : > { %7951 = vrot.lane.b32.xlu1 %v13806_v39, %s11937_s19  ;;  %8029 = vrot.lane.b32.xlu0 %v13814_v52, %s11937_s19 }
0x2083   : > { %v7672_v7 = vpop.permute.xlu1 %7671  ;;  %v7669_v17 = vpop.permute.xlu0 %7668 }
0x2084   : > { %v7698_v54 = vrot.slane %v7672_v7, %v12459_v63  ;;  %v7694_v62 = vrot.slane %v7669_v17, %v12459_v63 }
0x2086   : > { %v7723_v50 = vsel %vm1160_vm13, %v7698_v54, %v7694_v62 }
0x2087   : > { %v7675_v37 = vpop.permute.xlu1 %7674  ;;  %v7678_v47 = vpop.permute.xlu0 %7677 }
0x2088   : > { %v7702_v51 = vrot.slane %v7675_v37, %v12459_v63  ;;  %v7706_v0 = vrot.slane %v7678_v47, %v12459_v63 }
0x208a   : > { %v7724_v19 = vsel %vm15471_vm15, %v7702_v51, %v7723_v50 }
0x208b   : > { %v7818_v42 = vpop.permute.xlu1 %7817  ;;  %v7681_v28 = vpop.permute.xlu0 %7680  ;;  %v7725_v58 = vsel %vm15473_vm3, %v7706_v0, %v7724_v19 }
0x208c   : > { %v7844_v3 = vrot.slane %v7818_v42, %v12459_v63  ;;  %v7710_v45 = vrot.slane %v7681_v28, %v12459_v63 }
0x208e   : > { %v7726_v55 = vsel %vm15474_vm6, %v7710_v45, %v7725_v58 }
0x208f   : > { %v7821_v53 = vpop.permute.xlu1 %7820  ;;  %v7684_v49 = vpop.permute.xlu0 %7683 }
0x2090   : > { %v7848_v48 = vrot.slane %v7821_v53, %v12459_v63  ;;  %v7714_v2 = vrot.slane %v7684_v49, %v12459_v63 }
0x2092   : > { %v7727_v35 = vsel %vm15476_vm14, %v7714_v2, %v7726_v55 }
0x2093   : > { %v7824_v33 = vpop.permute.xlu1 %7823  ;;  %v7687_v14 = vpop.permute.xlu0 %7686 }
0x2094   : > { %v7852_v32 = vrot.slane %v7824_v33, %v12459_v63  ;;  %v7718_v6 = vrot.slane %v7687_v14, %v12459_v63 }
0x2096   : > { %v7728_v9 = vsel %vm15478_vm10, %v7718_v6, %v7727_v35 }
0x2097   : > { %v7827_v4 = vpop.permute.xlu1 %7826  ;;  %v7815_v26 = vpop.permute.xlu0 %7814 }
0x2098   : > { %v7840_v43 = vrot.slane %v7815_v26, %v12459_v63  ;;  %v7856_v61 = vrot.slane %v7827_v4, %v12459_v63 }
0x209a   : > { %v7869_v11 = vsel %vm1160_vm13, %v7844_v3, %v7840_v43 }
0x209b   : > { %v7870_v41 = vsel %vm15469_vm1, %v7848_v48, %v7869_v11  ;;  %v7830_v57 = vpop.permute.xlu1 %7829  ;;  %v7690_v29 = vpop.permute.xlu0 %7689  ;;  %vm15480_vm1 = vcmask 64512  }
0x209c   : > { %v7871_v27 = vsel %vm15470_vm11, %v7852_v32, %v7870_v41  ;;  %v7860_v8 = vrot.slane %v7830_v57, %v12459_v63  ;;  %v7722_v10 = vrot.slane %v7690_v29, %v12459_v63  ;;  %vm15481_vm11 = vmmov %vm15480_vm1 }
0x209d   : > { %v7872_v40 = vsel %vm15472_vm12, %v7856_v61, %v7871_v27  ;;  %vm15482_vm15 = vmmov %vm15480_vm1 }
0x209e   : > { %v7873_v25 = vsel %vm15475_vm5, %v7860_v8, %v7872_v40  ;;  %v7729_v17 = vsel %vm15479_vm8, %v7722_v10, %v7728_v9  ;;  %vm15483_vm12 = vmmov %vm15480_vm1  ;;  %vm15489_vm8 = vcmask 1043459  }
0x209f   : > { %v7833_v5 = vpop.permute.xlu1 %7832  ;;  %v7836_v18 = vpop.permute.xlu0 %7835  ;;  %vm15484_vm3 = vmmov %vm15480_vm1 }
0x20a0   : > { %v7864_v21 = vrot.slane %v7833_v5, %v12459_v63  ;;  %v7868_v31 = vrot.slane %v7836_v18, %v12459_v63  ;;  %vm15485_vm6 = vmmov %vm15480_vm1 }
0x20a1   : > { %vm15486_vm5 = vmmov %vm15480_vm1 }
0x20a2   : > { %v7874_v44 = vsel %vm15477_vm0, %v7864_v21, %v7873_v25  ;;  %vm15487_vm14 = vmmov %vm15480_vm1 }
0x20a3   : > { %v7731_v1 = vpop.permute.xlu1 %7730  ;;  %v7877_v56 = vpop.permute.xlu0 %7876  ;;  %v7875_v7 = vsel %vm15467_vm4, %v7868_v31, %v7874_v44  ;;  %vm15488_vm4 = vcmask 1042434  }
0x20a4   : > { %11166 = vmatpush3.msra.mxu0 %v7731_v1  ;;  %11171 = vmatpush3.msra.mxu1 %v7877_v56 }
0x20a5   : > { %11168 = vmatmul.mubr.msk.f32.vlgmr.msra.gmra.mrb[22].mxu0 %vm15480_vm1, %v7729_v17  ;;  %11173 = vmatmul.mubr.msk.f32.vlgmr.msra.gmra.mrb[30].mxu1 %vm15481_vm11, %v7875_v7  ;;  %vm15490_vm1 = vcmask 1044484   ;;  %vm15491_vm11 = vmmov %vm15488_vm4 }
0x20a6   : > { %11175 = vmatprep.subr.mxu0 %v11929_v16  ;;  %11180 = vmatprep.subr.mxu1 %v11929_v16 }
0x20a7   : > { %v7954_v37 = vpop.permute.xlu1 %7953  ;;  %v8032_v47 = vpop.permute.xlu0 %8031  ;;  %11177 = vmatprep.mubr.msk.f32.mxu0 %vm15290_vm2, %v11929_v16  ;;  %11182 = vmatprep.mubr.msk.f32.mxu1 %vm15290_vm2, %v11929_v16 }
0x20a8   : > { %v8111_v42 = vsel %vm15482_vm15, %v7954_v37, 0.0  ;;  %v8114_v28 = vsel %vm15483_vm12, %v8032_v47, 0.0  ;;  %vm15492_vm15 = vcmask 1045509   ;;  %vm15493_vm12 = vmmov %vm15489_vm8 }
0x20a9   : > { %8112 = vadd.xlane.f32.xlu1 %v8111_v42  ;;  %8115 = vadd.xlane.f32.xlu0 %v8114_v28 }
0x20ab   : > { %11176 = vmatpush3.xpose.msk.msra.mxu0 %vm15484_vm3, %v7954_v37  ;;  %11181 = vmatpush3.xpose.msk.msra.mxu1 %vm15485_vm6, %v8032_v47  ;;  %v7952_v53 = vpop.permute.xlu1 %7951  ;;  %v8030_v49 = vpop.permute.xlu0 %8029  ;;  %vm15494_vm3 = vcmask 1046534   ;;  %vm15495_vm6 = vmmov %vm15490_vm1 }
0x20ac   : > { %11185 = vmatprep.subr.mxu0 %v11929_v16  ;;  %11190 = vmatprep.subr.mxu1 %v11929_v16 }
0x20ae   : > { %11178 = vmatmul.mubr.msk.f32.vlgmr.msra.gmra.mrb[24].mxu0 %vm15486_vm5, %v7952_v53  ;;  %11183 = vmatmul.mubr.msk.f32.vlgmr.msra.gmra.mrb[32].mxu1 %vm15487_vm14, %v8030_v49  ;;  %vm15496_vm5 = vcmask 1047559  }
0x20af   : > { %11187 = vmatprep.mubr.msk.f32.mxu0 %vm15290_vm2, %v11929_v16  ;;  %11192 = vmatprep.mubr.msk.f32.mxu1 %vm15290_vm2, %v11929_v16 }
0x2136   : > { %v8113_v18 = vpop.xlane.xlu1 %8112  ;;  %v8116_v58 = vpop.xlane.xlu0 %8115 }
0x2137   : > { %vm8117_vm0 = vcmp.eq.f32.partialorder %v8113_v18, 0.0  ;;  %vm8118_vm10 = vcmp.eq.f32.partialorder %v8116_v58, 0.0 }
0x2178   : > { %v14461_v33 = vpop.f32.mrb[22].mxu0  ;;  %v14463_v14 = vpop.f32.mrb[30].mxu1 }
0x2179   : > { %v11169_v4 = vpop.f32.mrb[23].mxu0  ;;  %v11174_v26 = vpop.f32.mrb[31].mxu1 }
0x2181   : > { %v8025_v54 = vpop.f32.mrb[24].mxu0  ;;  %v8103_v62 = vpop.f32.mrb[32].mxu1 }
0x2182   : > { %v8107_v3 = vmul.f32 0.35355338, %v8025_v54  ;;  %v11179_v43 = vpop.f32.mrb[25].mxu0  ;;  %v11184_v51 = vpop.f32.mrb[33].mxu1  ;;  %v8108_v11 = vmul.f32 0.35355338, %v8103_v62 }
0x2184   : > { %v8135_v48 = vrot.slane %v8107_v3, %v12244_v12  ;;  %v8128_v32 = vrot.slane %v8107_v3, %v12266_v24  ;;  %v8142_v41 = vrot.slane %v8107_v3, %v12285_v34  ;;  %v8149_v57 = vrot.slane %v8107_v3, %v12289_v36 }
0x2185   : > { %v8156_v29 = vrot.slane %v8107_v3, %v12251_v15  ;;  %v8191_v50 = vrot.slane %v8108_v11, %v12244_v12  ;;  %v8163_v0 = vrot.slane %v8107_v3, %v12258_v20  ;;  %v8198_v61 = vrot.slane %v8108_v11, %v12285_v34 }
0x2186   : > { %8137 = vbcast.lane.b32.xlu1 %v8135_v48, 256  ;;  %8130 = vbcast.lane.b32.xlu0 %v8128_v32, 256  ;;  %v8170_v27 = vrot.slane %v8107_v3, %v12293_v38  ;;  %v8205_v19 = vrot.slane %v8108_v11, %v12289_v36  ;;  %v8212_v45 = vrot.slane %v8108_v11, %v12251_v15 }
0x2187   : > { %v8184_v8 = vrot.slane %v8108_v11, %v12266_v24  ;;  %v8219_v2 = vrot.slane %v8108_v11, %v12258_v20  ;;  %v8177_v40 = vrot.slane %v8107_v3, %v12262_v22  ;;  %v8226_v6 = vrot.slane %v8108_v11, %v12293_v38 }
0x2188   : > { %v8233_v5 = vrot.slane %v8108_v11, %v12262_v22 }
0x218a   : > { %8144 = vbcast.lane.b32.xlu1 %v8142_v41, 256  ;;  %8151 = vbcast.lane.b32.xlu0 %v8149_v57, 256 }
0x218e   : > { %8158 = vbcast.lane.b32.xlu0 %v8156_v29, 256  ;;  %8193 = vbcast.lane.b32.xlu1 %v8191_v50, 256 }
0x2192   : > { %8165 = vbcast.lane.b32.xlu0 %v8163_v0, 256  ;;  %8200 = vbcast.lane.b32.xlu1 %v8198_v61, 256 }
0x2196   : > { %8172 = vbcast.lane.b32.xlu0 %v8170_v27, 256  ;;  %8207 = vbcast.lane.b32.xlu1 %v8205_v19, 256 }
0x219a   : > { %8214 = vbcast.lane.b32.xlu1 %v8212_v45, 256  ;;  %8186 = vbcast.lane.b32.xlu0 %v8184_v8, 256 }
0x219e   : > { %8221 = vbcast.lane.b32.xlu1 %v8219_v2, 256  ;;  %8179 = vbcast.lane.b32.xlu0 %v8177_v40, 256 }
0x21a2   : > { %8228 = vbcast.lane.b32.xlu1 %v8226_v6, 256  ;;  %8235 = vbcast.lane.b32.xlu0 %v8233_v5, 256 }
0x21f8   : > { %v8138_v10 = vpop.permute.xlu1 %8137  ;;  %v8131_v21 = vpop.permute.xlu0 %8130 }
0x21f9   : > { %v14482_v31 = vsel %vm8117_vm0, -4.2949673e+09, %v8138_v10  ;;  %v14485_v55 = vsel %vm8117_vm0, -4.2949673e+09, %v8131_v21 }
0x21fa   : > { %8286 = vperm.xlu1 %11412, %v14485_v55   ;;  %8289 = vperm.xlu0 %11413, %v14482_v31  }
0x21fc   : > { %v8145_v25 = vpop.permute.xlu1 %8144  ;;  %v8152_v35 = vpop.permute.xlu0 %8151 }
0x21fd   : > { %v14490_v44 = vsel %vm8117_vm0, -4.2949673e+09, %v8145_v25  ;;  %v14493_v9 = vsel %vm8117_vm0, -4.2949673e+09, %v8152_v35 }
0x21fe   : > { %8292 = vperm.xlu1 %11412, %v14490_v44   ;;  %8295 = vperm.xlu0 %11413, %v14493_v9  }
0x2200   : > { %v8159_v1 = vpop.permute.xlu0 %8158  ;;  %v8194_v56 = vpop.permute.xlu1 %8193 }
0x2201   : > { %v14498_v7 = vsel %vm8117_vm0, -4.2949673e+09, %v8159_v1  ;;  %v14501_v17 = vsel %vm8118_vm10, -4.2949673e+09, %v8194_v56 }
0x2202   : > { %8313 = vperm.xlu1 %11412, %v14501_v17   ;;  %8298 = vperm.xlu0 %11413, %v14498_v7  }
0x2204   : > { %v8166_v37 = vpop.permute.xlu0 %8165  ;;  %v8201_v47 = vpop.permute.xlu1 %8200 }
0x2205   : > { %v14506_v42 = vsel %vm8117_vm0, -4.2949673e+09, %v8166_v37  ;;  %v14509_v28 = vsel %vm8118_vm10, -4.2949673e+09, %v8201_v47 }
0x2206   : > { %8316 = vperm.xlu1 %11412, %v14509_v28   ;;  %8301 = vperm.xlu0 %11413, %v14506_v42  }
0x2208   : > { %v8173_v53 = vpop.permute.xlu0 %8172  ;;  %v8208_v49 = vpop.permute.xlu1 %8207 }
0x2209   : > { %v14514_v4 = vsel %vm8117_vm0, -4.2949673e+09, %v8173_v53  ;;  %v14517_v26 = vsel %vm8118_vm10, -4.2949673e+09, %v8208_v49 }
0x220a   : > { %8319 = vperm.xlu1 %11412, %v14517_v26   ;;  %8304 = vperm.xlu0 %11413, %v14514_v4  }
0x220c   : > { %v8215_v54 = vpop.permute.xlu1 %8214  ;;  %v8187_v62 = vpop.permute.xlu0 %8186 }
0x220d   : > { %v14522_v3 = vsel %vm8118_vm10, -4.2949673e+09, %v8215_v54  ;;  %v14525_v43 = vsel %vm8118_vm10, -4.2949673e+09, %v8187_v62 }
0x220e   : > { %8322 = vperm.xlu1 %11412, %v14522_v3   ;;  %8310 = vperm.xlu0 %11413, %v14525_v43  }
0x2210   : > { %v8222_v51 = vpop.permute.xlu1 %8221  ;;  %v8180_v48 = vpop.permute.xlu0 %8179 }
0x2211   : > { %v14530_v32 = vsel %vm8118_vm10, -4.2949673e+09, %v8222_v51  ;;  %v14533_v11 = vsel %vm8117_vm0, -4.2949673e+09, %v8180_v48  ;;  %vm15497_vm0 = vmmov %vm15492_vm15 }
0x2212   : > { %8325 = vperm.xlu1 %11412, %v14530_v32   ;;  %8307 = vperm.xlu0 %11413, %v14533_v11  }
0x2214   : > { %v8229_v41 = vpop.permute.xlu1 %8228  ;;  %v8236_v57 = vpop.permute.xlu0 %8235 }
0x2215   : > { %v14538_v29 = vsel %vm8118_vm10, -4.2949673e+09, %v8229_v41  ;;  %v14541_v50 = vsel %vm8118_vm10, -4.2949673e+09, %v8236_v57  ;;  %vm15498_vm10 = vmmov %vm15494_vm3 }
0x2216   : > { %8328 = vperm.xlu1 %11412, %v14538_v29   ;;  %8331 = vperm.xlu0 %11413, %v14541_v50  }
0x2279   : > { %v8287_v0 = vpop.permute.xlu1 %8286  ;;  %v8290_v61 = vpop.permute.xlu0 %8289 }
0x227a   : > { %v8336_v6 = vrot.slane %v8287_v0, %v12459_v63  ;;  %v8340_v5 = vrot.slane %v8290_v61, %v12459_v63 }
0x227c   : > { %v8397_v21 = vsel %vm1160_vm13, %v8340_v5, %v8336_v6 }
0x227d   : > { %v8293_v27 = vpop.permute.xlu1 %8292  ;;  %v8296_v19 = vpop.permute.xlu0 %8295 }
0x227e   : > { %v8344_v18 = vrot.slane %v8293_v27, %v12459_v63  ;;  %v8348_v25 = vrot.slane %v8296_v19, %v12459_v63 }
0x2280   : > { %v8398_v35 = vsel %vm15488_vm4, %v8344_v18, %v8397_v21  ;;  %vm15499_vm4 = vmmov %vm15496_vm5 }
0x2281   : > { %v8314_v45 = vpop.permute.xlu1 %8313  ;;  %v8299_v8 = vpop.permute.xlu0 %8298  ;;  %v8399_v51 = vsel %vm15489_vm8, %v8348_v25, %v8398_v35  ;;  %vm15500_vm8 = vmmov %vm15487_vm14 }
0x2282   : > { %v8352_v1 = vrot.slane %v8299_v8, %v12459_v63  ;;  %v8372_v47 = vrot.slane %v8314_v45, %v12459_v63 }
0x2284   : > { %v8400_v57 = vsel %vm15490_vm1, %v8352_v1, %v8399_v51  ;;  %vm15501_vm1 = vmmov %vm15491_vm11 }
0x2285   : > { %v8317_v2 = vpop.permute.xlu1 %8316  ;;  %v8302_v40 = vpop.permute.xlu0 %8301 }
0x2286   : > { %v8356_v53 = vrot.slane %v8302_v40, %v12459_v63  ;;  %v8376_v54 = vrot.slane %v8317_v2, %v12459_v63 }
0x2288   : > { %v8401_v19 = vsel %vm15492_vm15, %v8356_v53, %v8400_v57  ;;  %vm15503_vm15 = vmmov %vm15495_vm6 }
0x2289   : > { %v8320_v58 = vpop.permute.xlu1 %8319  ;;  %v8305_v10 = vpop.permute.xlu0 %8304 }
0x228a   : > { %v8360_v62 = vrot.slane %v8305_v10, %v12459_v63  ;;  %v8380_v48 = vrot.slane %v8320_v58, %v12459_v63 }
0x228c   : > { %v8402_v6 = vsel %vm15494_vm3, %v8360_v62, %v8401_v19  ;;  %vm15505_vm3 = vmmov %vm15497_vm0 }
0x228d   : > { %v8323_v56 = vpop.permute.xlu1 %8322  ;;  %v8311_v37 = vpop.permute.xlu0 %8310 }
0x228e   : > { %v8368_v49 = vrot.slane %v8311_v37, %v12459_v63  ;;  %v8384_v45 = vrot.slane %v8323_v56, %v12459_v63 }
0x2290   : > { %v8404_v41 = vsel %vm1160_vm13, %v8372_v47, %v8368_v49 }
0x2291   : > { %v8405_v0 = vsel %vm15491_vm11, %v8376_v54, %v8404_v41  ;;  %v8326_v61 = vpop.permute.xlu1 %8325  ;;  %v8308_v27 = vpop.permute.xlu0 %8307  ;;  %vm15502_vm11 = vmmov %vm15493_vm12 }
0x2292   : > { %v8406_v8 = vsel %vm15493_vm12, %v8380_v48, %v8405_v0  ;;  %v8364_v2 = vrot.slane %v8308_v27, %v12459_v63  ;;  %v8388_v40 = vrot.slane %v8326_v61, %v12459_v63  ;;  %vm15504_vm12 = vmmov %vm15501_vm1 }
0x2293   : > { %v8407_v5 = vsel %vm15495_vm6, %v8384_v45, %v8406_v8  ;;  %vm15506_vm6 = vmmov %vm15502_vm11 }
0x2294   : > { %v8403_v18 = vsel %vm15496_vm5, %v8364_v2, %v8402_v6  ;;  %v8408_v1 = vsel %vm15497_vm0, %v8388_v40, %v8407_v5  ;;  %vm15507_vm5 = vmmov %vm15498_vm10 }
0x2295   : > { %v8329_v58 = vpop.permute.xlu1 %8328  ;;  %v8332_v10 = vpop.permute.xlu0 %8331  ;;  %v8413_v21 = vsel %vm15487_vm14, %v8403_v18, -inf  ;;  %vm15508_vm14 = vmmov %vm15499_vm4 }
0x2296   : > { %v8392_v25 = vrot.slane %v8329_v58, %v12459_v63  ;;  %v8396_v35 = vrot.slane %v8332_v10, %v12459_v63  ;;  %8414 = vmax.xlane.f32.xlu1 %v8413_v21  ;;  %vm15509_vm0 = vmmov %vm15503_vm15 }
0x2298   : > { %v8409_v56 = vsel %vm15498_vm10, %v8392_v25, %v8408_v1  ;;  %vm15510_vm10 = vmmov %vm15500_vm8 }
0x2299   : > { %v8410_v37 = vsel %vm15499_vm4, %v8396_v35, %v8409_v56  ;;  %vm15511_vm4 = vmmov %vm15505_vm3 }
0x229a   : > { %v8416_v47 = vsel %vm15500_vm8, %v8410_v37, -inf  ;;  %vm15512_vm8 = vmmov %vm15507_vm5 }
0x229b   : > { %8417 = vmax.xlane.f32.xlu0 %v8416_v47 }
0x2323   : > { %v8415_v53 = vpop.xlane.xlu1 %8414 }
0x2324   : > { %v8424_v49 = vrot.slane %v8415_v53, %v12266_v24  ;;  %v8428_v54 = vrot.slane %v8415_v53, %v12244_v12  ;;  %v8432_v62 = vrot.slane %v8415_v53, %v12285_v34  ;;  %v8436_v51 = vrot.slane %v8415_v53, %v12289_v36 }
0x2325   : > { %v8440_v48 = vrot.slane %v8415_v53, %v12251_v15  ;;  %v8444_v8 = vrot.slane %v8415_v53, %v12258_v20 }
0x2326   : > { %v8501_v41 = vsub.f32 %v14485_v55, %v8424_v49  ;;  %v8502_v57 = vsub.f32 %v14482_v31, %v8428_v54  ;;  %v8504_v0 = vsub.f32 %v14493_v9, %v8436_v51  ;;  %v8503_v61 = vsub.f32 %v14490_v44, %v8432_v62 }
0x2327   : > { %v8505_v2 = vsub.f32 %v14498_v7, %v8440_v48  ;;  %v8448_v9 = vrot.slane %v8415_v53, %v12293_v38  ;;  %v8506_v44 = vsub.f32 %v14506_v42, %v8444_v8 }
0x2328   : > { %v8517_v27 = vmul.f32 1.442695, %v8501_v41  ;;  %v8519_v19 = vmul.f32 1.442695, %v8502_v57  ;;  %v8418_v45 = vpop.xlane.xlu0 %8417  ;;  %v8523_v40 = vmul.f32 1.442695, %v8504_v0 }
0x2329   : > { %v8460_v6 = vrot.slane %v8418_v45, %v12244_v12  ;;  %v8521_v5 = vmul.f32 1.442695, %v8503_v61  ;;  %v8464_v55 = vrot.slane %v8418_v45, %v12285_v34  ;;  %v8525_v18 = vmul.f32 1.442695, %v8505_v2 }
0x232a   : > { %11644 = vpow2.f32 %v8517_v27  ;;  %v8468_v58 = vrot.slane %v8418_v45, %v12289_v36  ;;  %v8507_v21 = vsub.f32 %v14514_v4, %v8448_v9  ;;  %v8527_v25 = vmul.f32 1.442695, %v8506_v44 }
0x232b   : > { %11646 = vpow2.f32 %v8519_v19  ;;  %v8510_v31 = vsub.f32 %v14501_v17, %v8460_v6  ;;  %v8511_v7 = vsub.f32 %v14509_v28, %v8464_v55  ;;  %v8456_v35 = vrot.slane %v8418_v45, %v12266_v24 }
0x232c   : > { %11648 = vpow2.f32 %v8523_v40  ;;  %v8472_v17 = vrot.slane %v8418_v45, %v12251_v15  ;;  %v8512_v1 = vsub.f32 %v14517_v26, %v8468_v58  ;;  %v8452_v28 = vrot.slane %v8415_v53, %v12262_v22 }
0x232d   : > { %11650 = vpow2.f32 %v8521_v5  ;;  %v8535_v10 = vmul.f32 1.442695, %v8510_v31  ;;  %v8537_v42 = vmul.f32 1.442695, %v8511_v7  ;;  %v8529_v4 = vmul.f32 1.442695, %v8507_v21 }
0x232e   : > { %11652 = vpow2.f32 %v8525_v18  ;;  %v8509_v47 = vsub.f32 %v14525_v43, %v8456_v35  ;;  %v8476_v49 = vrot.slane %v8418_v45, %v12258_v20  ;;  %v8513_v26 = vsub.f32 %v14522_v3, %v8472_v17 }
0x232f   : > { %11654 = vpow2.f32 %v8535_v10  ;;  %v8539_v54 = vmul.f32 1.442695, %v8512_v1  ;;  %v8508_v53 = vsub.f32 %v14533_v11, %v8452_v28  ;;  %v8484_v48 = vrot.slane %v8418_v45, %v12262_v22 }
0x2330   : > { %11656 = vpow2.f32 %v8527_v25  ;;  %v8533_v43 = vmul.f32 1.442695, %v8509_v47  ;;  %v8480_v41 = vrot.slane %v8418_v45, %v12293_v38  ;;  %v8514_v3 = vsub.f32 %v14530_v32, %v8476_v49 }
0x2331   : > { %11658 = vpow2.f32 %v8537_v42  ;;  %v8541_v57 = vmul.f32 1.442695, %v8513_v26  ;;  %v8531_v27 = vmul.f32 1.442695, %v8508_v53  ;;  %v8516_v11 = vsub.f32 %v14541_v50, %v8484_v48 }
0x2332   : > { %11660 = vpow2.f32 %v8529_v4  ;;  %v8515_v19 = vsub.f32 %v14538_v29, %v8480_v41  ;;  %v8543_v45 = vmul.f32 1.442695, %v8514_v3 }
0x2333   : > { %11662 = vpow2.f32 %v8539_v54  ;;  %v8547_v2 = vmul.f32 1.442695, %v8516_v11 }
0x2334   : > { %v14599_v56 = vpop.eup %11644  ;;  %11664 = vpow2.f32 %v8533_v43  ;;  %v8545_v40 = vmul.f32 1.442695, %v8515_v19 }
0x2335   : > { %v14601_v37 = vpop.eup %11646  ;;  %8566 = vperm.xlu0 %11413, %v14599_v56   ;;  %11666 = vpow2.f32 %v8541_v57 }
0x2336   : > { %8569 = vperm.xlu1 %11412, %v14601_v37   ;;  %v14609_v62 = vpop.eup %11648  ;;  %11668 = vpow2.f32 %v8531_v27 }
0x2337   : > { %v14611_v51 = vpop.eup %11650  ;;  %11670 = vpow2.f32 %v8543_v45 }
0x2338   : > { %v14619_v0 = vpop.eup %11652  ;;  %11672 = vpow2.f32 %v8547_v2 }
0x2339   : > { %8575 = vperm.xlu0 %11413, %v14609_v62   ;;  %v14621_v61 = vpop.eup %11654  ;;  %11674 = vpow2.f32 %v8545_v40 }
0x233a   : > { %8572 = vperm.xlu1 %11412, %v14611_v51   ;;  %v14627_v8 = vpop.eup %11656 }
0x233b   : > { %v14629_v32 = vpop.eup %11658 }
0x233c   : > { %v14633_v50 = vpop.eup %11660 }
0x233d   : > { %8578 = vperm.xlu0 %11413, %v14619_v0   ;;  %v14635_v6 = vpop.eup %11662 }
0x233e   : > { %8593 = vperm.xlu1 %11412, %v14621_v61   ;;  %v14639_v29 = vpop.eup %11664 }
0x233f   : > { %v14641_v5 = vpop.eup %11666 }
0x2340   : > { %v14645_v55 = vpop.eup %11668 }
0x2341   : > { %8581 = vperm.xlu0 %11413, %v14627_v8   ;;  %v14647_v31 = vpop.eup %11670 }
0x2342   : > { %8596 = vperm.xlu1 %11412, %v14629_v32   ;;  %v14651_v9 = vpop.eup %11672 }
0x2343   : > { %v14653_v44 = vpop.eup %11674 }
0x2345   : > { %8584 = vperm.xlu0 %11413, %v14633_v50  }
0x2346   : > { %8599 = vperm.xlu1 %11412, %v14635_v6  }
0x2349   : > { %8590 = vperm.xlu0 %11413, %v14639_v29  }
0x234a   : > { %8602 = vperm.xlu1 %11412, %v14641_v5  }
0x234d   : > { %8587 = vperm.xlu0 %11413, %v14645_v55  }
0x234e   : > { %8605 = vperm.xlu1 %11412, %v14647_v31  }
0x2351   : > { %8611 = vperm.xlu0 %11413, %v14651_v9  }
0x2352   : > { %8608 = vperm.xlu1 %11412, %v14653_v44  }
0x23b4   : > { %v8567_v18 = vpop.permute.xlu0 %8566 }
0x23b5   : > { %v8570_v58 = vpop.permute.xlu1 %8569  ;;  %v8616_v42 = vrot.slane %v8567_v18, %v12459_v63 }
0x23b6   : > { %v8620_v1 = vrot.slane %v8570_v58, %v12459_v63 }
0x23b8   : > { %v8576_v7 = vpop.permute.xlu0 %8575  ;;  %v8677_v49 = vsel %vm1160_vm13, %v8620_v1, %v8616_v42 }
0x23b9   : > { %v8573_v10 = vpop.permute.xlu1 %8572  ;;  %v8628_v26 = vrot.slane %v8576_v7, %v12459_v63 }
0x23ba   : > { %v8624_v28 = vrot.slane %v8573_v10, %v12459_v63 }
0x23bc   : > { %v8579_v21 = vpop.permute.xlu0 %8578  ;;  %v8678_v54 = vsel %vm15501_vm1, %v8624_v28, %v8677_v49  ;;  %vm15513_vm1 = vmmov %vm15508_vm14 }
0x23bd   : > { %v8594_v25 = vpop.permute.xlu1 %8593  ;;  %v8632_v53 = vrot.slane %v8579_v21, %v12459_v63  ;;  %v8679_v19 = vsel %vm15502_vm11, %v8628_v26, %v8678_v54  ;;  %vm15514_vm11 = vmmov %vm15510_vm10 }
0x23be   : > { %v8652_v43 = vrot.slane %v8594_v25, %v12459_v63 }
0x23bf   : > { %v8680_v40 = vsel %vm15503_vm15, %v8632_v53, %v8679_v19  ;;  %vm15515_vm15 = vmmov %vm15504_vm12 }
0x23c0   : > { %v8582_v35 = vpop.permute.xlu0 %8581 }
0x23c1   : > { %v8597_v17 = vpop.permute.xlu1 %8596  ;;  %v8636_v41 = vrot.slane %v8582_v35, %v12459_v63 }
0x23c2   : > { %v8656_v27 = vrot.slane %v8597_v17, %v12459_v63 }
0x23c3   : > { %v8681_v7 = vsel %vm15505_vm3, %v8636_v41, %v8680_v40  ;;  %vm15517_vm3 = vmmov %vm15515_vm15 }
0x23c4   : > { %v8585_v4 = vpop.permute.xlu0 %8584 }
0x23c5   : > { %v8600_v47 = vpop.permute.xlu1 %8599  ;;  %v8640_v11 = vrot.slane %v8585_v4, %v12459_v63 }
0x23c6   : > { %v8660_v45 = vrot.slane %v8600_v47, %v12459_v63 }
0x23c7   : > { %v8682_v17 = vsel %vm15507_vm5, %v8640_v11, %v8681_v7 }
0x23c8   : > { %v8591_v48 = vpop.permute.xlu0 %8590 }
0x23c9   : > { %v8603_v3 = vpop.permute.xlu1 %8602  ;;  %v8648_v57 = vrot.slane %v8591_v48, %v12459_v63 }
0x23ca   : > { %v8664_v35 = vrot.slane %v8603_v3, %v12459_v63 }
0x23cb   : > { %v8684_v2 = vsel %vm1160_vm13, %v8652_v43, %v8648_v57 }
0x23cc   : > { %v8685_v18 = vsel %vm15504_vm12, %v8656_v27, %v8684_v2  ;;  %v8588_v58 = vpop.permute.xlu0 %8587  ;;  %vm15516_vm12 = vmmov %vm15506_vm6 }
0x23cd   : > { %v8606_v10 = vpop.permute.xlu1 %8605  ;;  %v8686_v21 = vsel %vm15506_vm6, %v8660_v45, %v8685_v18  ;;  %v8644_v25 = vrot.slane %v8588_v58, %v12459_v63  ;;  %vm15518_vm6 = vmmov %vm15509_vm0 }
0x23ce   : > { %v8668_v1 = vrot.slane %v8606_v10, %v12459_v63  ;;  %v8687_v28 = vsel %vm15509_vm0, %v8664_v35, %v8686_v21  ;;  %vm15519_vm5 = vmmov %vm15516_vm12 }
0x23cf   : > { %v8683_v42 = vsel %vm15508_vm14, %v8644_v25, %v8682_v17  ;;  %vm15520_vm14 = vmmov %vm15509_vm0 }
0x23d0   : > { %v8612_v4 = vpop.permute.xlu0 %8611  ;;  %v8693_v47 = vsel %vm15510_vm10, %v8683_v42, 0.0  ;;  %v8688_v53 = vsel %vm15511_vm4, %v8668_v1, %v8687_v28  ;;  %vm15521_vm0 = vmmov %vm15511_vm4 }
0x23d1   : > { %v8609_v49 = vpop.permute.xlu1 %8608  ;;  %v8676_v26 = vrot.slane %v8612_v4, %v12459_v63  ;;  %8694 = vadd.xlane.f32.xlu1 %v8693_v47  ;;  %vm15522_vm10 = vmmov %vm15521_vm0 }
0x23d2   : > { %v8672_v54 = vrot.slane %v8609_v49, %v12459_v63  ;;  %vm15523_vm4 = vmmov %vm15512_vm8 }
0x23d4   : > { %v8689_v48 = vsel %vm15512_vm8, %v8672_v54, %v8688_v53  ;;  %vm15524_vm8 = vmmov %vm15523_vm4 }
0x23d5   : > { %v8690_v43 = vsel %vm15513_vm1, %v8676_v26, %v8689_v48 }
0x23d6   : > { %v8696_v41 = vsel %vm15514_vm11, %v8690_v43, 0.0  ;;  %vm15525_vm11 = vmmov %vm15513_vm1 }
0x23d7   : > { %8697 = vadd.xlane.f32.xlu0 %v8696_v41 }
0x245e   : > { %v8695_v3 = vpop.xlane.xlu1 %8694 }
0x245f   : > { %11676 = vrcp.f32 %v8695_v3 }
0x2464   : > { %v8698_v57 = vpop.xlane.xlu0 %8697 }
0x2465   : > { %11678 = vrcp.f32 %v8698_v57 }
0x2469   : > { %v11677_v27 = vpop.eup %11676 }
0x246a   : > { %v8710_v11 = vrot.slane %v11677_v27, %v12244_v12  ;;  %v8706_v19 = vrot.slane %v11677_v27, %v12266_v24  ;;  %v8714_v40 = vrot.slane %v11677_v27, %v12285_v34  ;;  %v8718_v18 = vrot.slane %v11677_v27, %v12289_v36 }
0x246b   : > { %v8722_v21 = vrot.slane %v11677_v27, %v12251_v15  ;;  %v8726_v35 = vrot.slane %v11677_v27, %v12258_v20  ;;  %v8730_v1 = vrot.slane %v11677_v27, %v12293_v38  ;;  %v8734_v49 = vrot.slane %v11677_v27, %v12262_v22 }
0x246c   : > { %v8784_v45 = vmul.f32 %v14601_v37, %v8710_v11  ;;  %v8783_v2 = vmul.f32 %v14599_v56, %v8706_v19  ;;  %v8785_v7 = vmul.f32 %v14611_v51, %v8714_v40  ;;  %v8786_v10 = vmul.f32 %v14609_v62, %v8718_v18 }
0x246d   : > { %v8787_v37 = vmul.f32 %v14619_v0, %v8722_v21  ;;  %v8788_v51 = vmul.f32 %v14627_v8, %v8726_v35  ;;  %v8789_v0 = vmul.f32 %v14633_v50, %v8730_v1 }
0x246e   : > { %8811 = vperm.xlu1 %11412, %v8784_v45   ;;  %8808 = vperm.xlu0 %11413, %v8783_v2  }
0x246f   : > { %v11679_v58 = vpop.eup %11678 }
0x2470   : > { %v8742_v25 = vrot.slane %v11679_v58, %v12244_v12  ;;  %v8746_v17 = vrot.slane %v11679_v58, %v12285_v34  ;;  %v8750_v42 = vrot.slane %v11679_v58, %v12289_v36  ;;  %v8754_v28 = vrot.slane %v11679_v58, %v12251_v15 }
0x2471   : > { %v8738_v4 = vrot.slane %v11679_v58, %v12266_v24  ;;  %v8758_v47 = vrot.slane %v11679_v58, %v12258_v20  ;;  %v8762_v26 = vrot.slane %v11679_v58, %v12293_v38  ;;  %v8766_v54 = vrot.slane %v11679_v58, %v12262_v22 }
0x2472   : > { %8814 = vperm.xlu1 %11412, %v8785_v7   ;;  %8817 = vperm.xlu0 %11413, %v8786_v10   ;;  %v8792_v56 = vmul.f32 %v14621_v61, %v8742_v25  ;;  %v8793_v62 = vmul.f32 %v14629_v32, %v8746_v17  ;;  %v8794_v61 = vmul.f32 %v14635_v6, %v8750_v42 }
0x2473   : > { %v8795_v8 = vmul.f32 %v14641_v5, %v8754_v28  ;;  %v8791_v32 = vmul.f32 %v14639_v29, %v8738_v4  ;;  %v8796_v50 = vmul.f32 %v14647_v31, %v8758_v47  ;;  %v8790_v6 = vmul.f32 %v14645_v55, %v8734_v49 }
0x2474   : > { %v8797_v5 = vmul.f32 %v14653_v44, %v8762_v26  ;;  %v8798_v29 = vmul.f32 %v14651_v9, %v8766_v54 }
0x2476   : > { %8820 = vperm.xlu0 %11413, %v8787_v37   ;;  %8957 = vperm.xlu1 %11412, %v8792_v56  }
0x247a   : > { %8823 = vperm.xlu0 %11413, %v8788_v51   ;;  %8960 = vperm.xlu1 %11412, %v8793_v62  }
0x247e   : > { %8826 = vperm.xlu0 %11413, %v8789_v0   ;;  %8963 = vperm.xlu1 %11412, %v8794_v61  }
0x2482   : > { %8966 = vperm.xlu1 %11412, %v8795_v8   ;;  %8954 = vperm.xlu0 %11413, %v8791_v32  }
0x2486   : > { %8969 = vperm.xlu1 %11412, %v8796_v50   ;;  %8829 = vperm.xlu0 %11413, %v8790_v6  }
0x248a   : > { %8972 = vperm.xlu1 %11412, %v8797_v5   ;;  %8975 = vperm.xlu0 %11413, %v8798_v29  }
0x248e   : > { %8870 = vrot.lane.b32.xlu1 %v13795_v46, %s11936_s25  ;;  %9016 = vrot.lane.b32.xlu0 %v13793_v59, %s11936_s25 }
0x2492   : > { %9093 = vrot.lane.b32.xlu1 %v13795_v46, %s11940_s15  ;;  %9171 = vrot.lane.b32.xlu0 %v13793_v59, %s11940_s15 }
0x2496   : > { %9091 = vrot.lane.b32.xlu1 %v13806_v39, %s11940_s15  ;;  %9169 = vrot.lane.b32.xlu0 %v13814_v52, %s11940_s15 }
0x24ed   : > { %v8812_v55 = vpop.permute.xlu1 %8811  ;;  %v8809_v31 = vpop.permute.xlu0 %8808 }
0x24ee   : > { %v8838_v19 = vrot.slane %v8812_v55, %v12459_v63  ;;  %v8834_v45 = vrot.slane %v8809_v31, %v12459_v63 }
0x24f0   : > { %v8863_v25 = vsel %vm1160_vm13, %v8838_v19, %v8834_v45 }
0x24f1   : > { %v8815_v9 = vpop.permute.xlu1 %8814  ;;  %v8818_v44 = vpop.permute.xlu0 %8817 }
0x24f2   : > { %v8842_v2 = vrot.slane %v8815_v9, %v12459_v63  ;;  %v8846_v37 = vrot.slane %v8818_v44, %v12459_v63 }
0x24f4   : > { %v8864_v17 = vsel %vm15517_vm3, %v8842_v2, %v8863_v25 }
0x24f5   : > { %v8958_v53 = vpop.permute.xlu1 %8957  ;;  %v8821_v48 = vpop.permute.xlu0 %8820  ;;  %v8865_v4 = vsel %vm15519_vm5, %v8846_v37, %v8864_v17 }
0x24f6   : > { %v8984_v39 = vrot.slane %v8958_v53, %v12459_v63  ;;  %v8850_v51 = vrot.slane %v8821_v48, %v12459_v63 }
0x24f8   : > { %v8866_v49 = vsel %vm15520_vm14, %v8850_v51, %v8865_v4 }
0x24f9   : > { %v8961_v43 = vpop.permute.xlu1 %8960  ;;  %v8824_v41 = vpop.permute.xlu0 %8823 }
0x24fa   : > { %v8988_v40 = vrot.slane %v8961_v43, %v12459_v63  ;;  %v8854_v1 = vrot.slane %v8824_v41, %v12459_v63 }
0x24fc   : > { %v8867_v6 = vsel %vm15522_vm10, %v8854_v1, %v8866_v49 }
0x24fd   : > { %v8964_v3 = vpop.permute.xlu1 %8963  ;;  %v8827_v57 = vpop.permute.xlu0 %8826 }
0x24fe   : > { %v8992_v18 = vrot.slane %v8964_v3, %v12459_v63  ;;  %v8858_v0 = vrot.slane %v8827_v57, %v12459_v63 }
0x2500   : > { %v8868_v54 = vsel %vm15524_vm8, %v8858_v0, %v8867_v6  ;;  %vm15534_vm8 = vcmask 1042434  }
0x2501   : > { %v8967_v27 = vpop.permute.xlu1 %8966  ;;  %v8955_v11 = vpop.permute.xlu0 %8954 }
0x2502   : > { %v8980_v52 = vrot.slane %v8955_v11, %v12459_v63  ;;  %v8996_v56 = vrot.slane %v8967_v27, %v12459_v63 }
0x2504   : > { %v9009_v58 = vsel %vm1160_vm13, %v8984_v39, %v8980_v52 }
0x2505   : > { %v9010_v7 = vsel %vm15515_vm15, %v8988_v40, %v9009_v58  ;;  %v8970_v10 = vpop.permute.xlu1 %8969  ;;  %v8830_v21 = vpop.permute.xlu0 %8829  ;;  %vm15526_vm15 = vcmask 64512  }
0x2506   : > { %v9011_v35 = vsel %vm15516_vm12, %v8992_v18, %v9010_v7  ;;  %v9000_v62 = vrot.slane %v8970_v10, %v12459_v63  ;;  %v8862_v8 = vrot.slane %v8830_v21, %v12459_v63  ;;  %vm15527_vm12 = vmmov %vm15526_vm15 }
0x2507   : > { %v9012_v42 = vsel %vm15518_vm6, %v8996_v56, %v9011_v35  ;;  %vm15528_vm3 = vmmov %vm15527_vm12 }
0x2508   : > { %v9013_v50 = vsel %vm15521_vm0, %v9000_v62, %v9012_v42  ;;  %v8869_v31 = vsel %vm15525_vm11, %v8862_v8, %v8868_v54  ;;  %vm15529_vm6 = vmmov %vm15528_vm3  ;;  %vm15536_vm11 = vcmask 1044484  }
0x2509   : > { %v8973_v61 = vpop.permute.xlu1 %8972  ;;  %v8976_v28 = vpop.permute.xlu0 %8975  ;;  %vm15530_vm5 = vmmov %vm15528_vm3 }
0x250a   : > { %v9004_v32 = vrot.slane %v8973_v61, %v12459_v63  ;;  %v9008_v47 = vrot.slane %v8976_v28, %v12459_v63  ;;  %vm15531_vm14 = vmmov %vm15528_vm3 }
0x250b   : > { %vm15532_vm0 = vmmov %vm15528_vm3 }
0x250c   : > { %v9014_v26 = vsel %vm15523_vm4, %v9004_v32, %v9013_v50  ;;  %vm15533_vm10 = vmmov %vm15532_vm0 }
0x250d   : > { %v9015_v5 = vsel %vm15513_vm1, %v9008_v47, %v9014_v26  ;;  %v8871_v29 = vpop.permute.xlu1 %8870  ;;  %v9017_v55 = vpop.permute.xlu0 %9016  ;;  %vm15535_vm1 = vcmask 1043459  }
0x250e   : > { %11186 = vmatpush3.msra.mxu0 %v8871_v29  ;;  %11191 = vmatpush3.msra.mxu1 %v9017_v55 }
0x250f   : > { %11188 = vmatmul.mubr.msk.f32.vlgmr.msra.gmra.mrb[26].mxu0 %vm15526_vm15, %v8869_v31  ;;  %11193 = vmatmul.mubr.msk.f32.vlgmr.msra.gmra.mrb[34].mxu1 %vm15527_vm12, %v9015_v5  ;;  %vm15537_vm15 = vmmov %vm15534_vm8  ;;  %vm15538_vm12 = vcmask 1045509  }
0x2510   : > { %11195 = vmatprep.subr.mxu0 %v11929_v16  ;;  %11200 = vmatprep.subr.mxu1 %v11929_v16 }
0x2511   : > { %v9094_v9 = vpop.permute.xlu1 %9093  ;;  %v9172_v44 = vpop.permute.xlu0 %9171  ;;  %11197 = vmatprep.mubr.msk.f32.mxu0 %vm15290_vm2, %v11929_v16  ;;  %11202 = vmatprep.mubr.msk.f32.mxu1 %vm15290_vm2, %v11929_v16 }
0x2512   : > { %v9251_v53 = vsel %vm15528_vm3, %v9094_v9, 0.0  ;;  %v9254_v48 = vsel %vm15529_vm6, %v9172_v44, 0.0  ;;  %vm15539_vm3 = vmmov %vm15535_vm1  ;;  %vm15540_vm6 = vcmask 1046534  }
0x2513   : > { %9252 = vadd.xlane.f32.xlu1 %v9251_v53  ;;  %9255 = vadd.xlane.f32.xlu0 %v9254_v48 }
0x2515   : > { %11196 = vmatpush3.xpose.msk.msra.mxu0 %vm15530_vm5, %v9094_v9  ;;  %11201 = vmatpush3.xpose.msk.msra.mxu1 %vm15531_vm14, %v9172_v44  ;;  %v9092_v43 = vpop.permute.xlu1 %9091  ;;  %v9170_v41 = vpop.permute.xlu0 %9169  ;;  %vm15541_vm5 = vmmov %vm15536_vm11  ;;  %vm15542_vm14 = vcmask 1047559  }
0x2516   : > { %11205 = vmatprep.subr.mxu0 %v11929_v16  ;;  %11210 = vmatprep.subr.mxu1 %v11929_v16 }
0x2518   : > { %11198 = vmatmul.mubr.msk.f32.vlgmr.msra.gmra.mrb[28].mxu0 %vm15532_vm0, %v9092_v43  ;;  %11203 = vmatmul.mubr.msk.f32.vlgmr.msra.gmra.mrb[36].mxu1 %vm15533_vm10, %v9170_v41  ;;  %vm15543_vm10 = vmmov %vm15538_vm12 }
0x2519   : > { %11207 = vmatprep.mubr.msk.f32.mxu0 %vm15290_vm2, %v11929_v16  ;;  %11212 = vmatprep.mubr.msk.f32.mxu1 %vm15290_vm2, %v11929_v16 }
0x25a0   : > { %v9253_v61 = vpop.xlane.xlu1 %9252  ;;  %v9256_v28 = vpop.xlane.xlu0 %9255 }
0x25a1   : > { %vm9257_vm2 = vcmp.eq.f32.partialorder %v9253_v61, 0.0  ;;  %vm9258_vm4 = vcmp.eq.f32.partialorder %v9256_v28, 0.0 }
0x25e2   : > { %v14783_v3 = vpop.f32.mrb[26].mxu0  ;;  %v14785_v57 = vpop.f32.mrb[34].mxu1 }
0x25e3   : > { %v11189_v27 = vpop.f32.mrb[27].mxu0  ;;  %v11194_v11 = vpop.f32.mrb[35].mxu1 }
0x25eb   : > { %v9165_v19 = vpop.f32.mrb[28].mxu0  ;;  %v9243_v45 = vpop.f32.mrb[36].mxu1 }
0x25ec   : > { %v9247_v39 = vmul.f32 0.35355338, %v9165_v19  ;;  %v11199_v52 = vpop.f32.mrb[29].mxu0  ;;  %v11204_v2 = vpop.f32.mrb[37].mxu1  ;;  %v9248_v58 = vmul.f32 0.35355338, %v9243_v45 }
0x25ee   : > { %v9275_v40 = vrot.slane %v9247_v39, %v12244_v12  ;;  %v9268_v18 = vrot.slane %v9247_v39, %v12266_v24  ;;  %v9282_v16 = vrot.slane %v9247_v39, %v12285_v34  ;;  %v9289_v7 = vrot.slane %v9247_v39, %v12289_v36 }
0x25ef   : > { %v9296_v10 = vrot.slane %v9247_v39, %v12251_v15  ;;  %v9331_v21 = vrot.slane %v9248_v58, %v12244_v12  ;;  %v9303_v25 = vrot.slane %v9247_v39, %v12258_v20  ;;  %v9338_v37 = vrot.slane %v9248_v58, %v12285_v34 }
0x25f0   : > { %9277 = vbcast.lane.b32.xlu1 %v9275_v40, 256  ;;  %9270 = vbcast.lane.b32.xlu0 %v9268_v18, 256  ;;  %v9310_v56 = vrot.slane %v9247_v39, %v12293_v38  ;;  %v9345_v35 = vrot.slane %v9248_v58, %v12289_v36  ;;  %v9352_v17 = vrot.slane %v9248_v58, %v12251_v15 }
0x25f1   : > { %v9324_v51 = vrot.slane %v9248_v58, %v12266_v24  ;;  %v9359_v62 = vrot.slane %v9248_v58, %v12258_v20  ;;  %v9317_v1 = vrot.slane %v9247_v39, %v12262_v22  ;;  %v9366_v42 = vrot.slane %v9248_v58, %v12293_v38 }
0x25f2   : > { %v9373_v0 = vrot.slane %v9248_v58, %v12262_v22 }
0x25f4   : > { %9284 = vbcast.lane.b32.xlu1 %v9282_v16, 256  ;;  %9291 = vbcast.lane.b32.xlu0 %v9289_v7, 256 }
0x25f8   : > { %9298 = vbcast.lane.b32.xlu0 %v9296_v10, 256  ;;  %9333 = vbcast.lane.b32.xlu1 %v9331_v21, 256 }
0x25fc   : > { %9305 = vbcast.lane.b32.xlu0 %v9303_v25, 256  ;;  %9340 = vbcast.lane.b32.xlu1 %v9338_v37, 256 }
0x2600   : > { %9312 = vbcast.lane.b32.xlu0 %v9310_v56, 256  ;;  %9347 = vbcast.lane.b32.xlu1 %v9345_v35, 256 }
0x2604   : > { %9354 = vbcast.lane.b32.xlu1 %v9352_v17, 256  ;;  %9326 = vbcast.lane.b32.xlu0 %v9324_v51, 256 }
0x2608   : > { %9361 = vbcast.lane.b32.xlu1 %v9359_v62, 256  ;;  %9319 = vbcast.lane.b32.xlu0 %v9317_v1, 256 }
0x260c   : > { %9368 = vbcast.lane.b32.xlu1 %v9366_v42, 256  ;;  %9375 = vbcast.lane.b32.xlu0 %v9373_v0, 256 }
0x2662   : > { %v9278_v4 = vpop.permute.xlu1 %9277  ;;  %v9271_v8 = vpop.permute.xlu0 %9270 }
0x2663   : > { %v14804_v32 = vsel %vm9257_vm2, -4.2949673e+09, %v9278_v4  ;;  %v14807_v47 = vsel %vm9257_vm2, -4.2949673e+09, %v9271_v8 }
0x2664   : > { %9426 = vperm.xlu1 %11412, %v14807_v47   ;;  %9429 = vperm.xlu0 %11413, %v14804_v32  }
0x2666   : > { %v9285_v49 = vpop.permute.xlu1 %9284  ;;  %v9292_v50 = vpop.permute.xlu0 %9291 }
0x2667   : > { %v14812_v6 = vsel %vm9257_vm2, -4.2949673e+09, %v9285_v49  ;;  %v14815_v26 = vsel %vm9257_vm2, -4.2949673e+09, %v9292_v50 }
0x2668   : > { %9432 = vperm.xlu1 %11412, %v14812_v6   ;;  %9435 = vperm.xlu0 %11413, %v14815_v26  }
0x266a   : > { %v9299_v54 = vpop.permute.xlu0 %9298  ;;  %v9334_v5 = vpop.permute.xlu1 %9333 }
0x266b   : > { %v14820_v29 = vsel %vm9257_vm2, -4.2949673e+09, %v9299_v54  ;;  %v14823_v55 = vsel %vm9258_vm4, -4.2949673e+09, %v9334_v5 }
0x266c   : > { %9453 = vperm.xlu1 %11412, %v14823_v55   ;;  %9438 = vperm.xlu0 %11413, %v14820_v29  }
0x266e   : > { %v9306_v31 = vpop.permute.xlu0 %9305  ;;  %v9341_v9 = vpop.permute.xlu1 %9340 }
0x266f   : > { %v14828_v44 = vsel %vm9257_vm2, -4.2949673e+09, %v9306_v31  ;;  %v14831_v53 = vsel %vm9258_vm4, -4.2949673e+09, %v9341_v9 }
0x2670   : > { %9456 = vperm.xlu1 %11412, %v14831_v53   ;;  %9441 = vperm.xlu0 %11413, %v14828_v44  }
0x2672   : > { %v9313_v48 = vpop.permute.xlu0 %9312  ;;  %v9348_v43 = vpop.permute.xlu1 %9347 }
0x2673   : > { %v14836_v41 = vsel %vm9257_vm2, -4.2949673e+09, %v9313_v48  ;;  %v14839_v27 = vsel %vm9258_vm4, -4.2949673e+09, %v9348_v43 }
0x2674   : > { %9459 = vperm.xlu1 %11412, %v14839_v27   ;;  %9444 = vperm.xlu0 %11413, %v14836_v41  }
0x2676   : > { %v9355_v11 = vpop.permute.xlu1 %9354  ;;  %v9327_v19 = vpop.permute.xlu0 %9326 }
0x2677   : > { %v14844_v45 = vsel %vm9258_vm4, -4.2949673e+09, %v9355_v11  ;;  %v14847_v39 = vsel %vm9258_vm4, -4.2949673e+09, %v9327_v19 }
0x2678   : > { %9462 = vperm.xlu1 %11412, %v14844_v45   ;;  %9450 = vperm.xlu0 %11413, %v14847_v39  }
0x267a   : > { %v9362_v52 = vpop.permute.xlu1 %9361  ;;  %v9320_v2 = vpop.permute.xlu0 %9319 }
0x267b   : > { %v14852_v40 = vsel %vm9258_vm4, -4.2949673e+09, %v9362_v52  ;;  %v14855_v18 = vsel %vm9257_vm2, -4.2949673e+09, %v9320_v2  ;;  %vm15544_vm2 = vmmov %vm15540_vm6 }
0x267c   : > { %9465 = vperm.xlu1 %11412, %v14852_v40   ;;  %9447 = vperm.xlu0 %11413, %v14855_v18  }
0x267e   : > { %v9369_v58 = vpop.permute.xlu1 %9368  ;;  %v9376_v16 = vpop.permute.xlu0 %9375 }
0x267f   : > { %v14860_v7 = vsel %vm9258_vm4, -4.2949673e+09, %v9369_v58  ;;  %v14863_v10 = vsel %vm9258_vm4, -4.2949673e+09, %v9376_v16  ;;  %vm15545_vm4 = vmmov %vm15542_vm14 }
0x2680   : > { %9468 = vperm.xlu1 %11412, %v14860_v7   ;;  %9471 = vperm.xlu0 %11413, %v14863_v10  }
0x26e3   : > { %v9427_v21 = vpop.permute.xlu1 %9426  ;;  %v9430_v25 = vpop.permute.xlu0 %9429 }
0x26e4   : > { %v9476_v1 = vrot.slane %v9427_v21, %v12459_v63  ;;  %v9480_v42 = vrot.slane %v9430_v25, %v12459_v63 }
0x26e6   : > { %v9537_v4 = vsel %vm1160_vm13, %v9480_v42, %v9476_v1 }
0x26e7   : > { %v9433_v37 = vpop.permute.xlu1 %9432  ;;  %v9436_v56 = vpop.permute.xlu0 %9435 }
0x26e8   : > { %v9484_v0 = vrot.slane %v9433_v37, %v12459_v63  ;;  %v9488_v8 = vrot.slane %v9436_v56, %v12459_v63 }
0x26ea   : > { %v9538_v49 = vsel %vm15534_vm8, %v9484_v0, %v9537_v4  ;;  %vm15546_vm8 = vmmov %vm15532_vm0 }
0x26eb   : > { %v9454_v35 = vpop.permute.xlu1 %9453  ;;  %v9439_v17 = vpop.permute.xlu0 %9438  ;;  %v9539_v19 = vsel %vm15535_vm1, %v9488_v8, %v9538_v49  ;;  %vm15547_vm1 = vmmov %vm15537_vm15 }
0x26ec   : > { %v9492_v50 = vrot.slane %v9439_v17, %v12459_v63  ;;  %v9512_v31 = vrot.slane %v9454_v35, %v12459_v63 }
0x26ee   : > { %v9540_v58 = vsel %vm15536_vm11, %v9492_v50, %v9539_v19  ;;  %vm15548_vm11 = vmmov %vm15539_vm3 }
0x26ef   : > { %v9457_v51 = vpop.permute.xlu1 %9456  ;;  %v9442_v62 = vpop.permute.xlu0 %9441 }
0x26f0   : > { %v9496_v9 = vrot.slane %v9442_v62, %v12459_v63  ;;  %v9516_v43 = vrot.slane %v9457_v51, %v12459_v63 }
0x26f2   : > { %v9541_v37 = vsel %vm15538_vm12, %v9496_v9, %v9540_v58  ;;  %vm15550_vm12 = vmmov %vm15547_vm1 }
0x26f3   : > { %v9460_v61 = vpop.permute.xlu1 %9459  ;;  %v9445_v28 = vpop.permute.xlu0 %9444 }
0x26f4   : > { %v9500_v11 = vrot.slane %v9445_v28, %v12459_v63  ;;  %v9520_v52 = vrot.slane %v9460_v61, %v12459_v63 }
0x26f6   : > { %v9542_v62 = vsel %vm15540_vm6, %v9500_v11, %v9541_v37  ;;  %vm15552_vm6 = vmmov %vm15548_vm11 }
0x26f7   : > { %v9463_v54 = vpop.permute.xlu1 %9462  ;;  %v9451_v5 = vpop.permute.xlu0 %9450 }
0x26f8   : > { %v9508_v48 = vrot.slane %v9451_v5, %v12459_v63  ;;  %v9524_v56 = vrot.slane %v9463_v54, %v12459_v63 }
0x26fa   : > { %v9544_v2 = vsel %vm1160_vm13, %v9512_v31, %v9508_v48 }
0x26fb   : > { %v9545_v16 = vsel %vm15537_vm15, %v9516_v43, %v9544_v2  ;;  %v9466_v21 = vpop.permute.xlu1 %9465  ;;  %v9448_v25 = vpop.permute.xlu0 %9447  ;;  %vm15549_vm15 = vmmov %vm15541_vm5 }
0x26fc   : > { %v9546_v35 = vsel %vm15539_vm3, %v9520_v52, %v9545_v16  ;;  %v9504_v17 = vrot.slane %v9448_v25, %v12459_v63  ;;  %v9528_v51 = vrot.slane %v9466_v21, %v12459_v63  ;;  %vm15551_vm3 = vmmov %vm15543_vm10 }
0x26fd   : > { %v9547_v1 = vsel %vm15541_vm5, %v9524_v56, %v9546_v35  ;;  %vm15553_vm5 = vmmov %vm15544_vm2 }
0x26fe   : > { %v9543_v42 = vsel %vm15542_vm14, %v9504_v17, %v9542_v62  ;;  %v9548_v49 = vsel %vm15543_vm10, %v9528_v51, %v9547_v1  ;;  %vm15554_vm14 = vmmov %vm15545_vm4 }
0x26ff   : > { %v9469_v0 = vpop.permute.xlu1 %9468  ;;  %v9472_v61 = vpop.permute.xlu0 %9471  ;;  %v9553_v28 = vsel %vm15532_vm0, %v9543_v42, -inf  ;;  %vm15555_vm0 = vmmov %vm15549_vm15 }
0x2700   : > { %v9532_v4 = vrot.slane %v9469_v0, %v12459_v63  ;;  %v9536_v8 = vrot.slane %v9472_v61, %v12459_v63  ;;  %9554 = vmax.xlane.f32.xlu1 %v9553_v28  ;;  %vm15556_vm10 = vmmov %vm15546_vm8 }
0x2702   : > { %v9549_v50 = vsel %vm15544_vm2, %v9532_v4, %v9548_v49  ;;  %vm15557_vm2 = vmmov %vm15551_vm3 }
0x2703   : > { %v9550_v54 = vsel %vm15545_vm4, %v9536_v8, %v9549_v50  ;;  %vm15558_vm4 = vmmov %vm15553_vm5 }
0x2704   : > { %v9556_v5 = vsel %vm15546_vm8, %v9550_v54, -inf  ;;  %vm15559_vm8 = vmmov %vm15554_vm14 }
0x2705   : > { %9557 = vmax.xlane.f32.xlu0 %v9556_v5 }
0x278d   : > { %v9555_v31 = vpop.xlane.xlu1 %9554 }
0x278e   : > { %v9564_v9 = vrot.slane %v9555_v31, %v12266_v24  ;;  %v9568_v48 = vrot.slane %v9555_v31, %v12244_v12  ;;  %v9572_v43 = vrot.slane %v9555_v31, %v12285_v34  ;;  %v9576_v11 = vrot.slane %v9555_v31, %v12289_v36 }
0x278f   : > { %v9580_v19 = vrot.slane %v9555_v31, %v12251_v15  ;;  %v9584_v56 = vrot.slane %v9555_v31, %v12258_v20 }
0x2790   : > { %v9641_v52 = vsub.f32 %v14807_v47, %v9564_v9  ;;  %v9642_v2 = vsub.f32 %v14804_v32, %v9568_v48  ;;  %v9644_v58 = vsub.f32 %v14815_v26, %v9576_v11  ;;  %v9643_v16 = vsub.f32 %v14812_v6, %v9572_v43 }
0x2791   : > { %v9645_v35 = vsub.f32 %v14820_v29, %v9580_v19  ;;  %v9588_v26 = vrot.slane %v9555_v31, %v12293_v38  ;;  %v9646_v6 = vsub.f32 %v14828_v44, %v9584_v56 }
0x2792   : > { %v9657_v21 = vmul.f32 1.442695, %v9641_v52  ;;  %v9659_v25 = vmul.f32 1.442695, %v9642_v2  ;;  %v9558_v37 = vpop.xlane.xlu0 %9557  ;;  %v9663_v17 = vmul.f32 1.442695, %v9644_v58 }
0x2793   : > { %v9600_v51 = vrot.slane %v9558_v37, %v12244_v12  ;;  %v9661_v62 = vmul.f32 1.442695, %v9643_v16  ;;  %v9604_v47 = vrot.slane %v9558_v37, %v12285_v34  ;;  %v9665_v1 = vmul.f32 1.442695, %v9645_v35 }
0x2794   : > { %11680 = vpow2.f32 %v9657_v21  ;;  %v9608_v42 = vrot.slane %v9558_v37, %v12289_v36  ;;  %v9647_v61 = vsub.f32 %v14836_v41, %v9588_v26  ;;  %v9667_v28 = vmul.f32 1.442695, %v9646_v6 }
0x2795   : > { %11682 = vpow2.f32 %v9659_v25  ;;  %v9650_v32 = vsub.f32 %v14823_v55, %v9600_v51  ;;  %v9651_v29 = vsub.f32 %v14831_v53, %v9604_v47  ;;  %v9596_v4 = vrot.slane %v9558_v37, %v12266_v24 }
0x2796   : > { %11684 = vpow2.f32 %v9663_v17  ;;  %v9612_v55 = vrot.slane %v9558_v37, %v12251_v15  ;;  %v9652_v8 = vsub.f32 %v14839_v27, %v9608_v42  ;;  %v9592_v53 = vrot.slane %v9555_v31, %v12262_v22 }
0x2797   : > { %11686 = vpow2.f32 %v9661_v62  ;;  %v9675_v0 = vmul.f32 1.442695, %v9650_v32  ;;  %v9677_v44 = vmul.f32 1.442695, %v9651_v29  ;;  %v9669_v41 = vmul.f32 1.442695, %v9647_v61 }
0x2798   : > { %11688 = vpow2.f32 %v9665_v1  ;;  %v9649_v54 = vsub.f32 %v14847_v39, %v9596_v4  ;;  %v9616_v5 = vrot.slane %v9558_v37, %v12258_v20  ;;  %v9653_v27 = vsub.f32 %v14844_v45, %v9612_v55 }
0x2799   : > { %11690 = vpow2.f32 %v9675_v0  ;;  %v9679_v9 = vmul.f32 1.442695, %v9652_v8  ;;  %v9648_v31 = vsub.f32 %v14855_v18, %v9592_v53  ;;  %v9624_v11 = vrot.slane %v9558_v37, %v12262_v22 }
0x279a   : > { %11692 = vpow2.f32 %v9667_v28  ;;  %v9673_v39 = vmul.f32 1.442695, %v9649_v54  ;;  %v9620_v19 = vrot.slane %v9558_v37, %v12293_v38  ;;  %v9654_v45 = vsub.f32 %v14852_v40, %v9616_v5 }
0x279b   : > { %11694 = vpow2.f32 %v9677_v44  ;;  %v9681_v52 = vmul.f32 1.442695, %v9653_v27  ;;  %v9671_v16 = vmul.f32 1.442695, %v9648_v31  ;;  %v9656_v18 = vsub.f32 %v14863_v10, %v9624_v11 }
0x279c   : > { %11696 = vpow2.f32 %v9669_v41  ;;  %v9655_v21 = vsub.f32 %v14860_v7, %v9620_v19  ;;  %v9683_v25 = vmul.f32 1.442695, %v9654_v45 }
0x279d   : > { %11698 = vpow2.f32 %v9679_v9  ;;  %v9687_v56 = vmul.f32 1.442695, %v9656_v18 }
0x279e   : > { %v14921_v49 = vpop.eup %11680  ;;  %11700 = vpow2.f32 %v9673_v39  ;;  %v9685_v35 = vmul.f32 1.442695, %v9655_v21 }
0x279f   : > { %v14923_v50 = vpop.eup %11682  ;;  %9706 = vperm.xlu0 %11413, %v14921_v49   ;;  %11702 = vpow2.f32 %v9681_v52 }
0x27a0   : > { %9709 = vperm.xlu1 %11412, %v14923_v50   ;;  %v14931_v48 = vpop.eup %11684  ;;  %11704 = vpow2.f32 %v9671_v16 }
0x27a1   : > { %v14933_v43 = vpop.eup %11686  ;;  %11706 = vpow2.f32 %v9683_v25 }
0x27a2   : > { %v14941_v2 = vpop.eup %11688  ;;  %11708 = vpow2.f32 %v9687_v56 }
0x27a3   : > { %9715 = vperm.xlu0 %11413, %v14931_v48   ;;  %v14943_v58 = vpop.eup %11690  ;;  %11710 = vpow2.f32 %v9685_v35 }
0x27a4   : > { %9712 = vperm.xlu1 %11412, %v14933_v43   ;;  %v14949_v37 = vpop.eup %11692 }
0x27a5   : > { %v14951_v40 = vpop.eup %11694 }
0x27a6   : > { %v14955_v10 = vpop.eup %11696 }
0x27a7   : > { %9718 = vperm.xlu0 %11413, %v14941_v2   ;;  %v14957_v17 = vpop.eup %11698 }
0x27a8   : > { %9733 = vperm.xlu1 %11412, %v14943_v58   ;;  %v14961_v7 = vpop.eup %11700 }
0x27a9   : > { %v14963_v51 = vpop.eup %11702 }
0x27aa   : > { %v14967_v62 = vpop.eup %11704 }
0x27ab   : > { %9721 = vperm.xlu0 %11413, %v14949_v37   ;;  %v14969_v47 = vpop.eup %11706 }
0x27ac   : > { %9736 = vperm.xlu1 %11412, %v14951_v40   ;;  %v14973_v32 = vpop.eup %11708 }
0x27ad   : > { %v14975_v26 = vpop.eup %11710 }
0x27af   : > { %9724 = vperm.xlu0 %11413, %v14955_v10  }
0x27b0   : > { %9739 = vperm.xlu1 %11412, %v14957_v17  }
0x27b3   : > { %9730 = vperm.xlu0 %11413, %v14961_v7  }
0x27b4   : > { %9742 = vperm.xlu1 %11412, %v14963_v51  }
0x27b7   : > { %9727 = vperm.xlu0 %11413, %v14967_v62  }
0x27b8   : > { %9745 = vperm.xlu1 %11412, %v14969_v47  }
0x27bb   : > { %9751 = vperm.xlu0 %11413, %v14973_v32  }
0x27bc   : > { %9748 = vperm.xlu1 %11412, %v14975_v26  }
0x281e   : > { %v9707_v6 = vpop.permute.xlu0 %9706 }
0x281f   : > { %v9710_v1 = vpop.permute.xlu1 %9709  ;;  %v9756_v8 = vrot.slane %v9707_v6, %v12459_v63 }
0x2820   : > { %v9760_v55 = vrot.slane %v9710_v1, %v12459_v63 }
0x2822   : > { %v9716_v42 = vpop.permute.xlu0 %9715  ;;  %v9817_v54 = vsel %vm1160_vm13, %v9760_v55, %v9756_v8 }
0x2823   : > { %v9713_v29 = vpop.permute.xlu1 %9712  ;;  %v9768_v5 = vrot.slane %v9716_v42, %v12459_v63 }
0x2824   : > { %v9764_v44 = vrot.slane %v9713_v29, %v12459_v63 }
0x2826   : > { %v9719_v0 = vpop.permute.xlu0 %9718  ;;  %v9818_v27 = vsel %vm15547_vm1, %v9764_v44, %v9817_v54  ;;  %vm15560_vm1 = vmmov %vm15556_vm10 }
0x2827   : > { %v9734_v61 = vpop.permute.xlu1 %9733  ;;  %v9772_v9 = vrot.slane %v9719_v0, %v12459_v63  ;;  %v9819_v18 = vsel %vm15548_vm11, %v9768_v5, %v9818_v27  ;;  %vm15561_vm11 = vmmov %vm15550_vm12 }
0x2828   : > { %v9792_v11 = vrot.slane %v9734_v61, %v12459_v63 }
0x2829   : > { %v9820_v56 = vsel %vm15549_vm15, %v9772_v9, %v9819_v18  ;;  %vm15562_vm15 = vmmov %vm15552_vm6 }
0x282a   : > { %v9722_v28 = vpop.permute.xlu0 %9721 }
0x282b   : > { %v9737_v4 = vpop.permute.xlu1 %9736  ;;  %v9776_v39 = vrot.slane %v9722_v28, %v12459_v63 }
0x282c   : > { %v9796_v52 = vrot.slane %v9737_v4, %v12459_v63 }
0x282d   : > { %v9821_v1 = vsel %vm15551_vm3, %v9776_v39, %v9820_v56  ;;  %vm15564_vm3 = vmmov %vm15555_vm0 }
0x282e   : > { %v9725_v53 = vpop.permute.xlu0 %9724 }
0x282f   : > { %v9740_v41 = vpop.permute.xlu1 %9739  ;;  %v9780_v16 = vrot.slane %v9725_v53, %v12459_v63 }
0x2830   : > { %v9800_v21 = vrot.slane %v9740_v41, %v12459_v63 }
0x2831   : > { %v9822_v28 = vsel %vm15553_vm5, %v9780_v16, %v9821_v1  ;;  %vm15567_vm5 = vmmov %vm15557_vm2 }
0x2832   : > { %v9731_v31 = vpop.permute.xlu0 %9730 }
0x2833   : > { %v9743_v19 = vpop.permute.xlu1 %9742  ;;  %v9788_v45 = vrot.slane %v9731_v31, %v12459_v63 }
0x2834   : > { %v9804_v61 = vrot.slane %v9743_v19, %v12459_v63 }
0x2835   : > { %v9824_v25 = vsel %vm1160_vm13, %v9792_v11, %v9788_v45 }
0x2836   : > { %v9825_v35 = vsel %vm15550_vm12, %v9796_v52, %v9824_v25  ;;  %v9728_v6 = vpop.permute.xlu0 %9727  ;;  %vm15563_vm12 = vmmov %vm15561_vm11 }
0x2837   : > { %v9746_v42 = vpop.permute.xlu1 %9745  ;;  %v9826_v29 = vsel %vm15552_vm6, %v9800_v21, %v9825_v35  ;;  %v9784_v0 = vrot.slane %v9728_v6, %v12459_v63 }
0x2838   : > { %v9808_v4 = vrot.slane %v9746_v42, %v12459_v63  ;;  %v9827_v8 = vsel %vm15555_vm0, %v9804_v61, %v9826_v29 }
0x2839   : > { %v9823_v55 = vsel %vm15554_vm14, %v9784_v0, %v9822_v28  ;;  %vm15568_vm14 = vmmov %vm15557_vm2 }
0x283a   : > { %v9752_v44 = vpop.permute.xlu0 %9751  ;;  %v9833_v53 = vsel %vm15556_vm10, %v9823_v55, 0.0  ;;  %v9828_v27 = vsel %vm15557_vm2, %v9808_v4, %v9827_v8  ;;  %vm15571_vm2 = vmmov %vm15559_vm8 }
0x283b   : > { %v9749_v41 = vpop.permute.xlu1 %9748  ;;  %v9816_v54 = vrot.slane %v9752_v44, %v12459_v63  ;;  %9834 = vadd.xlane.f32.xlu1 %v9833_v53 }
0x283c   : > { %v9812_v5 = vrot.slane %v9749_v41, %v12459_v63 }
0x283e   : > { %v9829_v9 = vsel %vm15558_vm4, %v9812_v5, %v9828_v27 }
0x283f   : > { %v9830_v31 = vsel %vm15559_vm8, %v9816_v54, %v9829_v9  ;;  %vm15573_vm8 = vmmov %vm15560_vm1 }
0x2840   : > { %v9836_v11 = vsel %vm15560_vm1, %v9830_v31, 0.0 }
0x2841   : > { %9837 = vadd.xlane.f32.xlu0 %v9836_v11 }
0x28c8   : > { %v9835_v39 = vpop.xlane.xlu1 %9834 }
0x28c9   : > { %11712 = vrcp.f32 %v9835_v39 }
0x28ce   : > { %v9838_v19 = vpop.xlane.xlu0 %9837 }
0x28cf   : > { %11714 = vrcp.f32 %v9838_v19 }
0x28d3   : > { %v11713_v45 = vpop.eup %11712 }
0x28d4   : > { %v9850_v52 = vrot.slane %v11713_v45, %v12244_v12  ;;  %v9846_v16 = vrot.slane %v11713_v45, %v12266_v24  ;;  %v9854_v25 = vrot.slane %v11713_v45, %v12285_v34  ;;  %v9858_v56 = vrot.slane %v11713_v45, %v12289_v36 }
0x28d5   : > { %v9862_v42 = vrot.slane %v11713_v45, %v12251_v15  ;;  %v9866_v0 = vrot.slane %v11713_v45, %v12258_v20  ;;  %v9870_v28 = vrot.slane %v11713_v45, %v12293_v38  ;;  %v9874_v53 = vrot.slane %v11713_v45, %v12262_v22 }
0x28d6   : > { %v9924_v18 = vmul.f32 %v14923_v50, %v9850_v52  ;;  %v9923_v21 = vmul.f32 %v14921_v49, %v9846_v16  ;;  %v9925_v6 = vmul.f32 %v14933_v43, %v9854_v25  ;;  %v9926_v1 = vmul.f32 %v14931_v48, %v9858_v56 }
0x28d7   : > { %v9927_v50 = vmul.f32 %v14941_v2, %v9862_v42  ;;  %v9928_v43 = vmul.f32 %v14949_v37, %v9866_v0  ;;  %v9929_v2 = vmul.f32 %v14955_v10, %v9870_v28 }
0x28d8   : > { %9951 = vperm.xlu1 %11412, %v9924_v18   ;;  %9948 = vperm.xlu0 %11413, %v9923_v21  }
0x28d9   : > { %v11715_v35 = vpop.eup %11714 }
0x28da   : > { %v9882_v29 = vrot.slane %v11715_v35, %v12244_v12  ;;  %v9886_v61 = vrot.slane %v11715_v35, %v12285_v34  ;;  %v9890_v4 = vrot.slane %v11715_v35, %v12289_v36  ;;  %v9894_v55 = vrot.slane %v11715_v35, %v12251_v15 }
0x28db   : > { %v9878_v8 = vrot.slane %v11715_v35, %v12266_v24  ;;  %v9898_v44 = vrot.slane %v11715_v35, %v12258_v20  ;;  %v9902_v41 = vrot.slane %v11715_v35, %v12293_v38  ;;  %v9906_v54 = vrot.slane %v11715_v35, %v12262_v22 }
0x28dc   : > { %9954 = vperm.xlu1 %11412, %v9925_v6   ;;  %9957 = vperm.xlu0 %11413, %v9926_v1   ;;  %v9932_v49 = vmul.f32 %v14943_v58, %v9882_v29  ;;  %v9933_v48 = vmul.f32 %v14951_v40, %v9886_v61  ;;  %v9934_v58 = vmul.f32 %v14957_v17, %v9890_v4 }
0x28dd   : > { %v9935_v37 = vmul.f32 %v14963_v51, %v9894_v55  ;;  %v9931_v40 = vmul.f32 %v14961_v7, %v9878_v8  ;;  %v9936_v10 = vmul.f32 %v14969_v47, %v9898_v44  ;;  %v9930_v17 = vmul.f32 %v14967_v62, %v9874_v53 }
0x28de   : > { %v9937_v51 = vmul.f32 %v14975_v26, %v9902_v41  ;;  %v9938_v7 = vmul.f32 %v14973_v32, %v9906_v54  ;;  %v522_v41 = vld [vmem:[%s12218_s16 + $0x30] sm:$0xff] }
0x28e0   : > { %9960 = vperm.xlu0 %11413, %v9927_v50   ;;  %10097 = vperm.xlu1 %11412, %v9932_v49  }
0x28e4   : > { %9963 = vperm.xlu0 %11413, %v9928_v43   ;;  %10100 = vperm.xlu1 %11412, %v9933_v48  }
0x28e8   : > { %9966 = vperm.xlu0 %11413, %v9929_v2   ;;  %10103 = vperm.xlu1 %11412, %v9934_v58  }
0x28ec   : > { %10106 = vperm.xlu1 %11412, %v9935_v37   ;;  %10094 = vperm.xlu0 %11413, %v9931_v40  }
0x28f0   : > { %10109 = vperm.xlu1 %11412, %v9936_v10   ;;  %9969 = vperm.xlu0 %11413, %v9930_v17   ;;  %v521_v17 = vld [vmem:[%s12218_s16 + $0x28] sm:$0xff] }
0x28f4   : > { %10112 = vperm.xlu1 %11412, %v9937_v51   ;;  %10115 = vperm.xlu0 %11413, %v9938_v7   ;;  %v523_v51 = vld [vmem:[%s12218_s16 + $0x38] sm:$0xff] }
0x28f5   : > { %v11292_v7 = vpack.c.bf16 %v523_v51, %v522_v41 }
0x28f8   : > { %10010 = vrot.lane.b32.xlu1 %v13795_v46, %s11939_s23  ;;  %10156 = vrot.lane.b32.xlu0 %v13793_v59, %s11939_s23 }
0x28fc   : > { %10233 = vrot.lane.b32.xlu1 %v14461_v33, %s11942_s27  ;;  %10235 = vrot.lane.b32.xlu0 %v14463_v14, %s11942_s27 }
0x2900   : > { %10241 = vrot.lane.b32.xlu1 %v14783_v3, %s11943_s14  ;;  %10243 = vrot.lane.b32.xlu0 %v14785_v57, %s11943_s14 }
0x2957   : > { %v9952_v20 = vpop.permute.xlu1 %9951  ;;  %v9949_v38 = vpop.permute.xlu0 %9948 }
0x2958   : > { %v9978_v14 = vrot.slane %v9952_v20, %v12459_v63  ;;  %v9974_v31 = vrot.slane %v9949_v38, %v12459_v63 }
0x295a   : > { %v10003_v21 = vsel %vm1160_vm13, %v9978_v14, %v9974_v31 }
0x295b   : > { %v9955_v62 = vpop.permute.xlu1 %9954  ;;  %v9958_v47 = vpop.permute.xlu0 %9957 }
0x295c   : > { %v9982_v11 = vrot.slane %v9955_v62, %v12459_v63  ;;  %v9986_v25 = vrot.slane %v9958_v47, %v12459_v63 }
0x295e   : > { %v10004_v6 = vsel %vm15563_vm12, %v9982_v11, %v10003_v21  ;;  %vm15576_vm12 = vcmask 261120   ;;  %v15104_v11 = vld [vmem:[%s12229_s30] sm:$0xff] }
0x295f   : > { %v10098_v46 = vpop.permute.xlu1 %10097  ;;  %v9961_v32 = vpop.permute.xlu0 %9960 }
0x2960   : > { %v10124_v3 = vrot.slane %v10098_v46, %v12459_v63  ;;  %v9990_v1 = vrot.slane %v9961_v32, %v12459_v63 }
0x2963   : > { %v10101_v26 = vpop.permute.xlu1 %10100  ;;  %v9964_v59 = vpop.permute.xlu0 %9963 }
0x2964   : > { %v10128_v39 = vrot.slane %v10101_v26, %v12459_v63  ;;  %v9994_v29 = vrot.slane %v9964_v59, %v12459_v63 }
0x2967   : > { %v10104_v5 = vpop.permute.xlu1 %10103  ;;  %v9967_v27 = vpop.permute.xlu0 %9966 }
0x2968   : > { %v10132_v19 = vrot.slane %v10104_v5, %v12459_v63  ;;  %v9998_v49 = vrot.slane %v9967_v27, %v12459_v63 }
0x296b   : > { %v10107_v33 = vpop.permute.xlu1 %10106  ;;  %v10095_v9 = vpop.permute.xlu0 %10094 }
0x296c   : > { %v10120_v57 = vrot.slane %v10095_v9, %v12459_v63  ;;  %v10136_v56 = vrot.slane %v10107_v33, %v12459_v63 }
0x296e   : > { %v10149_v45 = vsel %vm1160_vm13, %v10124_v3, %v10120_v57  ;;  %vm15565_vm13 = vmmov %vm15552_vm6 }
0x296f   : > { %v10150_v52 = vsel %vm15561_vm11, %v10128_v39, %v10149_v45  ;;  %v10110_v16 = vpop.permute.xlu1 %10109  ;;  %v9970_v18 = vpop.permute.xlu0 %9969  ;;  %v10005_v43 = vsel %vm15565_vm13, %v9986_v25, %v10004_v6  ;;  %vm15566_vm6 = vmmov %vm15555_vm0 }
0x2970   : > { %v10151_v35 = vsel %vm15562_vm15, %v10132_v19, %v10150_v52  ;;  %v10140_v42 = vrot.slane %v10110_v16, %v12459_v63  ;;  %v10002_v48 = vrot.slane %v9970_v18, %v12459_v63  ;;  %v10006_v2 = vsel %vm15566_vm6, %v9990_v1, %v10005_v43  ;;  %vm15569_vm0 = vmmov %vm15558_vm4 }
0x2971   : > { %v10152_v50 = vsel %vm15564_vm3, %v10136_v56, %v10151_v35  ;;  %v10007_v55 = vsel %vm15568_vm14, %v9994_v29, %v10006_v2  ;;  %vm15570_vm10 = vmmov %vm15569_vm0  ;;  %v530_v2 = vld [vmem:[%s12223_s22 + $0x8] sm:$0xff] }
0x2972   : > { %v10153_v58 = vsel %vm15567_vm5, %v10140_v42, %v10152_v50  ;;  %v10008_v37 = vsel %vm15570_vm10, %v9998_v49, %v10007_v55  ;;  %vm15572_vm4 = vmmov %vm15571_vm2  ;;  %v524_v49 = vld [vmem:[%s12231_s18] sm:$0xff] }
0x2973   : > { %v10113_v0 = vpop.permute.xlu1 %10112  ;;  %v10116_v61 = vpop.permute.xlu0 %10115  ;;  %v10009_v10 = vsel %vm15572_vm4, %v10002_v48, %v10008_v37  ;;  %vm15574_vm11 = vmmov %vm15560_vm1  ;;  %v527_v48 = vld [vmem:[%s12231_s18 + $0x18] sm:$0xff] }
0x2974   : > { %v10144_v28 = vrot.slane %v10113_v0, %v12459_v63  ;;  %v10148_v4 = vrot.slane %v10116_v61, %v12459_v63  ;;  %v520_v63 = vld [vmem:[%s12218_s16 + $0x20] sm:$0xff]  ;;  %vm15575_vm15 = vmmov %vm15560_vm1 }
0x2975   : > { %v11288_v54 = vpack.c.bf16 %v521_v17, %v520_v63  ;;  %vm15577_vm3 = vmmov %vm15576_vm12  ;;  %v525_v0 = vld [vmem:[%s12231_s18 + $0x8] sm:$0xff]  ;;  %v526_v61 = vld [vmem:[%s12231_s18 + $0x10] sm:$0xff] }
0x2976   : > { %v10154_v8 = vsel %vm15569_vm0, %v10144_v28, %v10153_v58  ;;  %vm15580_vm13 = vmmov %vm15577_vm3  ;;  %v11296_v43 = vpack.c.bf16 %v525_v0, %v524_v49  ;;  %v11300_v28 = vpack.c.bf16 %v527_v48, %v526_v61  ;;  %v531_v58 = vld [vmem:[%s12223_s22 + $0x10] sm:$0xff]  ;;  %vm10479_vm0 = vcmask 523264  }
0x2977   : > { %v10155_v40 = vsel %vm15571_vm2, %v10148_v4, %v10154_v8  ;;  %v10011_v44 = vpop.permute.xlu1 %10010  ;;  %v10157_v53 = vpop.permute.xlu0 %10156  ;;  %vm15581_vm6 = vmmov %vm15577_vm3  ;;  %v529_v4 = vld [vmem:[%s12223_s22] sm:$0xff]  ;;  %v532_v8 = vld [vmem:[%s12223_s22 + $0x18] sm:$0xff] }
0x2978   : > { %11206 = vmatpush3.msra.mxu0 %v10011_v44  ;;  %11211 = vmatpush3.msra.mxu1 %v10157_v53  ;;  %v11304_v55 = vpack.c.bf16 %v530_v2, %v529_v4  ;;  %v11308_v37 = vpack.c.bf16 %v532_v8, %v531_v58  ;;  %v534_v44 = vld [vmem:[%s12223_s22 + $0x28] sm:$0xff]  ;;  %vm15582_vm5 = vmmov %vm15577_vm3  ;;  %v10592_v58 = vrot.slane %v15104_v11, %v12289_v36 }
0x2979   : > { %11208 = vmatmul.mubr.msk.f32.vlgmr.msra.gmra.mrb[30].mxu0 %vm15573_vm8, %v10009_v10  ;;  %11213 = vmatmul.mubr.msk.f32.vlgmr.msra.gmra.mrb[38].mxu1 %vm15560_vm1, %v10155_v40  ;;  %v533_v40 = vld [vmem:[%s12223_s22 + $0x20] sm:$0xff]  ;;  %vm15583_vm14 = vmmov %vm15577_vm3 }
0x297a   : > { %11289 = vmatprep.subr.bf16.mxu0 %v11288_v54  ;;  %11297 = vmatprep.subr.bf16.mxu1 %v11296_v43  ;;  %v11312_v53 = vpack.c.bf16 %v534_v44, %v533_v40  ;;  %vm15584_vm10 = vmmov %vm15577_vm3  ;;  %v10598_v40 = vrot.slane %v15104_v11, %v12251_v15 }
0x297b   : > { %11291 = vmatpush3.bf16.msra.mxu0 %v11288_v54  ;;  %v10234_v46 = vpop.permute.xlu1 %10233  ;;  %v10236_v32 = vpop.permute.xlu0 %10235  ;;  %11299 = vmatpush3.bf16.msra.mxu1 %v11296_v43  ;;  %vm15585_vm2 = vmmov %vm15577_vm3 }
0x297c   : > { %11293 = vmatprep.subr.bf16.mxu0 %v11292_v7  ;;  %v10255_v5 = vsel %vm15574_vm11, %v14139_v30, %v10234_v46  ;;  %v10256_v27 = vsel %vm15575_vm15, %v14141_v60, %v10236_v32  ;;  %v10264_v30 = vrot.slane %v15104_v11, %v12244_v12  ;;  %11301 = vmatprep.subr.bf16.mxu1 %v11300_v28  ;;  %vm15586_vm4 = vmmov %vm15585_vm2 }
0x297d   : > { %vm15587_vm8 = vmmov %vm15585_vm2 }
0x297e   : > { %vm15588_vm1 = vmmov %vm15585_vm2 }
0x297f   : > { %11295 = vmatpush3.bf16.msra.mxu0 %v11292_v7  ;;  %v10242_v26 = vpop.permute.xlu1 %10241  ;;  %v10244_v59 = vpop.permute.xlu0 %10243  ;;  %11303 = vmatpush3.bf16.msra.mxu1 %v11300_v28  ;;  %v15125_v7 = vld [vmem:[%s12229_s30 + $0x8] sm:$0x7]  ;;  %vm15589_vm11 = vmmov %vm15588_vm1 }
0x2980   : > { %v10257_v33 = vsel %vm5355_vm7, %v10255_v5, %v10242_v26  ;;  %v10258_v9 = vsel %vm5355_vm7, %v10256_v27, %v10244_v59  ;;  %vm15578_vm7 = vmmov %vm15577_vm3  ;;  %11305 = vmatprep.subr.bf16.mxu0 %v11304_v55  ;;  %v10383_v32 = vrot.slane %v15125_v7, %v12266_v24 }
0x2981   : > { %vm15590_vm15 = vmmov %vm15588_vm1 }
0x2a4c   : > { %v10081_v20 = vpop.f32.mrb[30].mxu0  ;;  %v10227_v38 = vpop.f32.mrb[38].mxu1 }
0x2a4d   : > { %10249 = vrot.lane.b32.xlu1 %v10081_v20, %s11944_s29  ;;  %v11209_v62 = vpop.f32.mrb[31].mxu0  ;;  %10251 = vrot.lane.b32.xlu0 %v10227_v38, %s11944_s29  ;;  %v11214_v47 = vpop.f32.mrb[39].mxu1  ;;  %v10377_v20 = vrot.slane %v15104_v11, %v12262_v22  ;;  %v10886_v22 = vld [vmem:[%s483_s9] ss:$0 sm:$0xff] }
0x2abf   : > { %v10250_v14 = vpop.permute.xlu1 %10249  ;;  %v10252_v31 = vpop.permute.xlu0 %10251 }
0x2ac0   : > { %v10259_v3 = vsel %vm5358_vm9, %v10257_v33, %v10250_v14  ;;  %v10260_v57 = vsel %vm5358_vm9, %v10258_v9, %v10252_v31  ;;  %vm15579_vm9 = vmmov %vm15577_vm3  ;;  %v535_v33 = vld [vmem:[%s12223_s22 + $0x30] sm:$0xff]  ;;  %v536_v9 = vld [vmem:[%s12223_s22 + $0x38] sm:$0xff] }
0x2ac1   : > { %11223 = vmatprep.mubr.msk.f32.mxu0 %vm15576_vm12, %v10259_v3  ;;  %v11316_v14 = vpack.c.bf16 %v536_v9, %v535_v33  ;;  %vm15591_vm12 = vmmov %vm15588_vm1 }
0x2ac2   : > { %11224 = vmatmul.mubr.msk.f32.vlgmr.msra.gmra.mrb[32].mxu0 %vm15577_vm3, %v10260_v57  ;;  %vm15592_vm3 = vmmov %vm15588_vm1 }
0x2ac3   : > { %11307 = vmatpush3.bf16.msra.mxu0 %v11304_v55 }
0x2ac4   : > { %11309 = vmatprep.subr.bf16.mxu0 %v11308_v37 }
0x2ac7   : > { %11311 = vmatpush3.bf16.msra.mxu0 %v11308_v37 }
0x2ac8   : > { %11313 = vmatprep.subr.bf16.mxu0 %v11312_v53 }
0x2acb   : > { %11315 = vmatpush3.bf16.msra.mxu0 %v11312_v53 }
0x2acc   : > { %11317 = vmatprep.subr.bf16.mxu0 %v11316_v14 }
0x2acf   : > { %11319 = vmatpush3.bf16.msra.mxu0 %v11316_v14 }
0x2b95   : > { %v11225_v60 = vpop.f32.mrb[32].mxu0 }
0x2b96   : > { %v10343_v39 = vadd.f32 %v11225_v60, %v10264_v30  ;;  %v10337_v19 = vpop.f32.mrb[33].mxu0 }
0x2b97   : > { %v10338_v45 = vadd.f32 %v10337_v19, %v10264_v30 }
0x2b98   : > { %v10347_v52 = vadd.f32 %v10343_v39, %v13785_v13  ;;  %v10478_v39 = vrot.slane %v15104_v11, %v12285_v34 }
0x2b99   : > { %v10346_v16 = vadd.f32 %v10338_v45, %v13783_v23 }
0x2b9a   : > { %v10351_v18 = vsel %vm15578_vm7, %v10347_v52, 0.0  ;;  %vm15593_vm7 = vmmov %vm15588_vm1 }
0x2b9b   : > { %10352 = vadd.xlane.f32.xlu0 %v10351_v18  ;;  %v10348_v21 = vsel %vm15579_vm9, %v10346_v16, 0.0  ;;  %vm15594_vm9 = vcmask (!%p10891_p2), 261120  }
0x2b9c   : > { %10349 = vadd.xlane.f32.xlu1 %v10348_v21 }
0x2c28   : > { %v10353_v25 = vpop.xlane.xlu0 %10352 }
0x2c29   : > { %v10355_v56 = vmul.f32 0.03125, %v10353_v25  ;;  %v10350_v35 = vpop.xlane.xlu1 %10349 }
0x2c2a   : > { %v10354_v6 = vmul.f32 0.03125, %v10350_v35 }
0x2c2b   : > { %v10357_v1 = vsub.f32 %v10347_v52, %v10355_v56 }
0x2c2c   : > { %v10356_v42 = vsub.f32 %v10346_v16, %v10354_v6 }
0x2c2d   : > { %v10359_v29 = vmul.f32 %v10357_v1, %v10357_v1 }
0x2c2e   : > { %v10358_v13 = vmul.f32 %v10356_v42, %v10356_v42 }
0x2c2f   : > { %v10363_v23 = vsel %vm15580_vm13, %v10359_v29, 0.0  ;;  %vm15595_vm13 = vmmov (!%p10891_p2), %vm15594_vm9 }
0x2c30   : > { %10364 = vadd.xlane.f32.xlu1 %v10363_v23  ;;  %v10360_v50 = vsel %vm15581_vm6, %v10358_v13, 0.0 }
0x2c31   : > { %10361 = vadd.xlane.f32.xlu0 %v10360_v50 }
0x2cbd   : > { %v10365_v10 = vpop.xlane.xlu1 %10364 }
0x2cbe   : > { %v10367_v63 = vmul.f32 0.03125, %v10365_v10  ;;  %v10362_v17 = vpop.xlane.xlu0 %10361 }
0x2cbf   : > { %v10366_v41 = vmul.f32 0.03125, %v10362_v17 }
0x2cc0   : > { %v10369_v54 = vadd.f32 1e-05, %v10367_v63 }
0x2cc1   : > { %v10368_v51 = vadd.f32 1e-05, %v10366_v41 }
0x2cc2   : > { %11716 = vrsqrt.f32 %v10369_v54 }
0x2cc3   : > { %11718 = vrsqrt.f32 %v10368_v51 }
0x2ccc   : > { %v11717_v38 = vpop.eup %11716 }
0x2ccd   : > { %v11719_v62 = vpop.eup %11718  ;;  %v10373_v47 = vmul.f32 %v11717_v38, %v10357_v1 }
0x2cce   : > { %v10372_v46 = vmul.f32 %v11719_v62, %v10356_v42 }
0x2ccf   : > { %v10379_v26 = vmul.f32 %v10377_v20, %v10373_v47 }
0x2cd0   : > { %v10378_v59 = vmul.f32 %v10377_v20, %v10372_v46 }
0x2cd1   : > { %v10385_v27 = vadd.f32 %v10383_v32, %v10379_v26 }
0x2cd2   : > { %v10384_v5 = vadd.f32 %v10383_v32, %v10378_v59 }
0x2cd4   : > { %11234 = vmatprep.mubr.msk.f32.mxu1 %vm15582_vm5, %v10384_v5 }
0x2cd5   : > { %11235 = vmatmul.mubr.msk.f32.vlgmr.msra.gmra.mrb[40].mxu1 %vm15583_vm14, %v10385_v27 }
0x2da8   : > { %v11236_v31 = vpop.f32.mrb[40].mxu1 }
0x2da9   : > { %v10470_v24 = vadd.f32 %v11236_v31, %v10886_v22  ;;  %v10464_v3 = vpop.f32.mrb[41].mxu1  ;;  %v10632_v31 = vrot.slane %v15125_v7, %v12244_v12 }
0x2daa   : > { %v10465_v57 = vadd.f32 %v10886_v22, %v10464_v3 }
0x2dab   : > { %v10474_v60 = vmax.f32 %v10470_v24, 0.0 }
0x2dac   : > { %v10473_v30 = vmax.f32 %v10465_v57, 0.0  ;;  %v10638_v57 = vrot.slane %v15125_v7, %v12285_v34 }
0x2dae   : > { %11253 = vmatprep.mubr.msk.f32.mxu0 %vm10479_vm0, %v10473_v30 }
0x2daf   : > { %11254 = vmatmul.mubr.msk.f32.vlgmr.msra.gmra.mrb[34].mxu0 %vm10479_vm0, %v10474_v60 }
0x2e82   : > { %v11255_v19 = vpop.f32.mrb[34].mxu0 }
0x2e83   : > { %v10558_v45 = vadd.f32 %v11255_v19, %v10478_v39  ;;  %v10552_v52 = vpop.f32.mrb[35].mxu0 }
0x2e84   : > { %v10553_v16 = vadd.f32 %v10552_v52, %v10478_v39 }
0x2e85   : > { %v10562_v18 = vadd.f32 %v10558_v45, %v10385_v27 }
0x2e86   : > { %v10561_v21 = vadd.f32 %v10553_v16, %v10384_v5 }
0x2e87   : > { %v10566_v25 = vsel %vm15584_vm10, %v10562_v18, 0.0 }
0x2e88   : > { %10567 = vadd.xlane.f32.xlu1 %v10566_v25  ;;  %v10563_v56 = vsel %vm15585_vm2, %v10561_v21, 0.0 }
0x2e89   : > { %10564 = vadd.xlane.f32.xlu0 %v10563_v56 }
0x2f15   : > { %v10568_v35 = vpop.xlane.xlu1 %10567 }
0x2f16   : > { %v10570_v6 = vmul.f32 0.03125, %v10568_v35  ;;  %v10565_v1 = vpop.xlane.xlu0 %10564 }
0x2f17   : > { %v10569_v42 = vmul.f32 0.03125, %v10565_v1 }
0x2f18   : > { %v10572_v29 = vsub.f32 %v10562_v18, %v10570_v6 }
0x2f19   : > { %v10571_v13 = vsub.f32 %v10561_v21, %v10569_v42 }
0x2f1a   : > { %v10574_v23 = vmul.f32 %v10572_v29, %v10572_v29 }
0x2f1b   : > { %v10573_v50 = vmul.f32 %v10571_v13, %v10571_v13 }
0x2f1c   : > { %v10578_v49 = vsel %vm15586_vm4, %v10574_v23, 0.0 }
0x2f1d   : > { %10579 = vadd.xlane.f32.xlu1 %v10578_v49  ;;  %v10575_v0 = vsel %vm15587_vm8, %v10573_v50, 0.0 }
0x2f1e   : > { %10576 = vadd.xlane.f32.xlu0 %v10575_v0 }
0x2faa   : > { %v10580_v61 = vpop.xlane.xlu1 %10579 }
0x2fab   : > { %v10582_v43 = vmul.f32 0.03125, %v10580_v61  ;;  %v10577_v48 = vpop.xlane.xlu0 %10576 }
0x2fac   : > { %v10581_v28 = vmul.f32 0.03125, %v10577_v48 }
0x2fad   : > { %v10584_v4 = vadd.f32 1e-06, %v10582_v43 }
0x2fae   : > { %v10583_v2 = vadd.f32 1e-06, %v10581_v28 }
0x2faf   : > { %11720 = vrsqrt.f32 %v10584_v4 }
0x2fb0   : > { %11722 = vrsqrt.f32 %v10583_v2 }
0x2fb9   : > { %v11721_v55 = vpop.eup %11720 }
0x2fba   : > { %v11723_v8 = vpop.eup %11722  ;;  %v10588_v37 = vmul.f32 %v11721_v55, %v10572_v29 }
0x2fbb   : > { %v10587_v44 = vmul.f32 %v11723_v8, %v10571_v13 }
0x2fbc   : > { %v10594_v53 = vmul.f32 %v10592_v58, %v10588_v37 }
0x2fbd   : > { %v10593_v10 = vmul.f32 %v10592_v58, %v10587_v44 }
0x2fbe   : > { %v10600_v63 = vadd.f32 %v10598_v40, %v10594_v53 }
0x2fbf   : > { %v10599_v17 = vadd.f32 %v10598_v40, %v10593_v10 }
0x2fc0   : > { %v10602_v41 = vadd.f32 %v10600_v63, %v10385_v27 }
0x2fc1   : > { %v10601_v54 = vadd.f32 %v10599_v17, %v10384_v5 }
0x2fc2   : > { %v10606_v51 = vsel %vm15588_vm1, %v10602_v41, 0.0 }
0x2fc3   : > { %10607 = vadd.xlane.f32.xlu1 %v10606_v51  ;;  %v10603_v20 = vsel %vm15589_vm11, %v10601_v54, 0.0 }
0x2fc4   : > { %10604 = vadd.xlane.f32.xlu0 %v10603_v20 }
0x3050   : > { %v10608_v36 = vpop.xlane.xlu1 %10607 }
0x3051   : > { %v10610_v38 = vmul.f32 0.03125, %v10608_v36  ;;  %v10605_v62 = vpop.xlane.xlu0 %10604 }
0x3052   : > { %v10609_v47 = vmul.f32 0.03125, %v10605_v62 }
0x3053   : > { %v10612_v46 = vsub.f32 %v10602_v41, %v10610_v38 }
0x3054   : > { %v10611_v32 = vsub.f32 %v10601_v54, %v10609_v47 }
0x3055   : > { %v10614_v15 = vmul.f32 %v10612_v46, %v10612_v46 }
0x3056   : > { %v10613_v11 = vmul.f32 %v10611_v32, %v10611_v32 }
0x3057   : > { %v10618_v26 = vsel %vm15590_vm15, %v10614_v15, 0.0 }
0x3058   : > { %10619 = vadd.xlane.f32.xlu1 %v10618_v26  ;;  %v10615_v59 = vsel %vm15591_vm12, %v10613_v11, 0.0 }
0x3059   : > { %10616 = vadd.xlane.f32.xlu0 %v10615_v59 }
0x30e5   : > { %v10620_v5 = vpop.xlane.xlu1 %10619 }
0x30e6   : > { %v10622_v27 = vmul.f32 0.03125, %v10620_v5  ;;  %v10617_v33 = vpop.xlane.xlu0 %10616 }
0x30e7   : > { %v10621_v9 = vmul.f32 0.03125, %v10617_v33 }
0x30e8   : > { %v10624_v14 = vadd.f32 1e-05, %v10622_v27 }
0x30e9   : > { %v10623_v22 = vadd.f32 1e-05, %v10621_v9 }
0x30ea   : > { %11724 = vrsqrt.f32 %v10624_v14 }
0x30eb   : > { %11726 = vrsqrt.f32 %v10623_v22 }
0x30f4   : > { %v11725_v24 = vpop.eup %11724 }
0x30f5   : > { %v11727_v3 = vpop.eup %11726  ;;  %v10628_v30 = vmul.f32 %v11725_v24, %v10612_v46 }
0x30f6   : > { %v10627_v60 = vmul.f32 %v11727_v3, %v10611_v32  ;;  %10646 = sbr.rel (%p10891_p2) target bundleno = 12543 (0x30ff), region = 80 }
0x30f7   : > { %v10634_v39 = vmul.f32 %v10632_v31, %v10628_v30 }
0x30f8   : > { %v10633_v19 = vmul.f32 %v10632_v31, %v10627_v60 }
0x30f9   : > { %v10640_v45 = vadd.f32 %v10638_v57, %v10634_v39 }
0x30fa   : > { %v10639_v52 = vadd.f32 %v10638_v57, %v10633_v19 }
0x30fb   : > { %10642 = vst.msk [vmem:[#allocation2 + $0x8] sm:$0xff] %vm15592_vm3, %v10640_v45 }
0x30fc   : > { %10641 = vst.msk [vmem:[#allocation2] sm:$0xff] %vm15593_vm7, %v10639_v52 }
0x30fd   : > { %10647 = vst.msk [vmem:[#allocation10] sm:$0xff] %vm15594_vm9, %v10639_v52 }
0x30fe   : > { %10648 = vst.msk [vmem:[#allocation10 + $0x8] sm:$0xff] %vm15595_vm13, %v10640_v45 }
0x30ff PF: > { %p11355_p11 = scmp.eq.s32.totalorder %s12016_s13, 1  ;;  %s11945_s26 = smov [#allocation10]  }
0x3100   : > { %s10655_s9 = sshll.u32 %s11945_s26, 4  ;;  %s10656_s9 = int_to_ptr.vmem [resolvable:$true] %s10655_s9 }
0x3101   : > { %s11848_s16 = scalar_lea.vmem %s10656_s9, 256  ;;  %p11855_p6 = scmp.lt.s32.totalorder %s10656_s9, %s10656_s9 }
0x3102   : > { %p11849_p10 = scmp.ne.s32.totalorder %s10656_s9, %s11848_s16  ;;  %p11856_p5 = scmp.lt.s32.totalorder %s11848_s16, %s11848_s16 }
0x3104   : > { %p11850_p4 = pnand %p11849_p10, %p11355_p11  ;;  %p11857_p9 = por %p11856_p5, %p11855_p6 }
0x3106   : > { %p11851_p8 = pneg %p11850_p4 }
0x3108   : > { %p11858_p12 = pnand %p11857_p9, %p11851_p8 }
0x310a   : > { %11861 = shalt.err (!%p11858_p12)
}
0x310b   : > { %s15596_s18 = sld [smem:[#allocation17_spill]] }
0x3111   : > { %s11862_s12 = scalar_lea.hbm %s15596_s18, 256 }
0x3112   : > { %p11863_p0 = scmp.ne.s32.totalorder %s15596_s18, %s11862_s12  ;;  %p11868_p7 = scmp.lt.u32.totalorder %s11862_s12, %s15596_s18 }
0x3114   : > { %p11864_p3 = pnand %p11863_p0, %p11355_p11 }
0x3116   : > { %p11865_p13 = pneg %p11864_p3 }
0x3118   : > { %p11870_p1 = pnand %p11868_p7, %p11865_p13 }
0x311a   : > { %11873 = shalt.err (!%p11870_p1)
}
0x311b   : > { %s11946_s23 = smov 128  }
0x311c   : > { %11333 = dma.vmem_to_hbm [thread:$0]  (%p11355_p11), %s10656_s9, 256, %s15596_s18, [#allocation5], %s11946_s23, %s11946_s23, %s11942_s27  }
0x311d   : > { %11903 = dma.done.wait (%p11355_p11), [#allocation5], 256  }
0x311e   : > { %11905 = vsyncadd (%p11355_p11), [#allocation5], 4294967040 }
0x311f PF: > { %s15597_s12 = sld [smem:[#allocation15_spill]]  ;;  %s15598_s30 = smov %s11912_s10 }
0x3120   : > { %s15599_s10 = smov %s11916_s11  ;;  %s15600_s11 = smov %s12077_s24 }
0x3125   : > { %p19_p2 = scmp.ge.s32.totalorder %s15597_s12, 4  }
0x3127   :  { %21 = sbr.rel (!%p19_p2) target bundleno = 7 (0x7), region = 134 }
0x312e   :  { %10671 = vsyncpa [#allocation4], 1 }
0x312f   :  { %10673 = vsyncpa [#allocation4 + $0x1], 1 }
0x3130   :  { %10674 = vsyncpa [#allocation7], 1 }
0x3131   :  { %10675 = vsyncpa [#allocation5], 1 }
0x3132   :  { %10677 = vsyncpa [#allocation5 + $0x1], 1 }

</bundles_post_ra>
